<compile_context>
chip_gen: v7x
topology: tpu7x:2x2x1
jax: 0.10.0
libtpu: 0.0.40
codegen_flags: <defaults>
</compile_context>

<pallas_src>
import numpy as np
import jax
import jax.numpy as jnp
from jax.experimental import pallas as pl
from jax.experimental.pallas import tpu as pltpu

LANES = 128  # TPU vreg lane width


def _round_up(x, m):
    return ((x + m - 1) // m) * m


# ----------------------------------------------------------------------------
# Fused DownBlock kernel: conv1+BN+ReLU -> conv2+BN+ReLU -> 2x2 max-pool
# ----------------------------------------------------------------------------
def _make_downblock_kernel(KH, KW, pad):
    def kernel(x_ref, w1_ref, sc1_ref, sh1_ref, w2_ref, sc2_ref, sh2_ref,
               o_ref, xs_ref, y1_ref):
        # x_ref : (1, H, W, Cin_p)        bf16 (spatially unpadded)
        # w1_ref: (KH*KW, Cin_p, Cmid_p)  bf16 per-tap weight matrices
        # sc/sh : (1, C_p)                f32 folded BatchNorm scale/shift
        # w2_ref: (KH*KW, Cmid_p, Cout_p) bf16
        # o_ref : (1, Hh, Wh, Cout_p)     bf16 (intermediate) / f32 (last block)
        # xs_ref: (Hp1, Wp1, Cin_p)       bf16 scratch, zero border = conv1 pad
        # y1_ref: (Hp2, Wp2, Cmid_p)      bf16 scratch, zero border = conv2 pad
        _, H, W, Cin_p = x_ref.shape
        Cmid_p = sc1_ref.shape[1]
        Cout_p = sc2_ref.shape[1]
        Hp1, Wp1 = H + 2 * pad, W + 2 * pad
        H1, W1 = Hp1 - KH + 1, Wp1 - KW + 1
        Hp2, Wp2 = H1 + 2 * pad, W1 + 2 * pad
        H2, W2 = Hp2 - KH + 1, Wp2 - KW + 1
        Hh, Wh = H2 // 2, W2 // 2

        def zero_border(ref, h, w):
            # Zero only the pad frame; interior is fully overwritten below.
            Hf, Wf, C = ref.shape
            ref[0:pad, :, :] = jnp.zeros((pad, Wf, C), ref.dtype)
            ref[Hf - pad:Hf, :, :] = jnp.zeros((pad, Wf, C), ref.dtype)
            ref[pad:pad + h, 0:pad, :] = jnp.zeros((h, pad, C), ref.dtype)
            ref[pad:pad + h, Wf - pad:Wf, :] = jnp.zeros((h, pad, C), ref.dtype)

        # ---- stage input with in-kernel zero border (conv1 padding) -------
        if pad > 0:
            zero_border(xs_ref, H, W)
        xs_ref[pad:pad + H, pad:pad + W, :] = x_ref[0]

        # ---- conv1: per-tap accumulating MXU matmuls (f32 accumulator) ----
        acc1 = jnp.zeros((H1 * W1, Cmid_p), jnp.float32)
        for kh in range(KH):
            for kw in range(KW):
                tap = xs_ref[kh:kh + H1, kw:kw + W1, :].reshape(H1 * W1, Cin_p)
                acc1 = acc1 + jnp.dot(tap, w1_ref[kh * KW + kw],
                                      preferred_element_type=jnp.float32)
        y1 = jnp.maximum(acc1 * sc1_ref[...] + sh1_ref[...], 0.0)  # BN+ReLU f32

        # ---- stage conv1 activation (bf16) with zero border (conv2 pad) ---
        if pad > 0:
            zero_border(y1_ref, H1, W1)
        y1_ref[pad:pad + H1, pad:pad + W1, :] = (
            y1.reshape(H1, W1, Cmid_p).astype(y1_ref.dtype))

        # ---- conv2: per-tap accumulating MXU matmuls -----------------------
        acc2 = jnp.zeros((H2 * W2, Cout_p), jnp.float32)
        for kh in range(KH):
            for kw in range(KW):
                tap = y1_ref[kh:kh + H2, kw:kw + W2, :].reshape(H2 * W2, Cmid_p)
                acc2 = acc2 + jnp.dot(tap, w2_ref[kh * KW + kw],
                                      preferred_element_type=jnp.float32)
        y2 = jnp.maximum(acc2 * sc2_ref[...] + sh2_ref[...], 0.0)  # (H2*W2, Cout_p)

        # ---- fused 2x2 max-pool epilogue (lane-friendly reshapes) ---------
        t = y2.reshape(H2 * Wh, 2 * Cout_p)          # [:, :C]=w-even, [:, C:]=w-odd
        wpool = jnp.maximum(t[:, :Cout_p], t[:, Cout_p:])           # (H2*Wh, Cout_p)
        t2 = wpool.reshape(Hh, 2 * Wh, Cout_p)       # [:, :Wh]=h-even, [:, Wh:]=h-odd
        o_ref[0] = jnp.maximum(t2[:, :Wh, :], t2[:, Wh:, :]).astype(o_ref.dtype)

    return kernel


# ----------------------------------------------------------------------------
# Parameter preparation (hoisted out of the jitted forward): pad channels to
# 128 lanes, reshape conv weights to per-tap (KH*KW, Cin_p, Cout_p), cast bf16.
# ----------------------------------------------------------------------------
def prepare_block_params(w1_hwio, sc1, sh1, w2_hwio, sc2, sh2):
    KH, KW, Cin, Cmid = w1_hwio.shape
    Cout = w2_hwio.shape[3]
    Cin_p, Cmid_p, Cout_p = (_round_up(c, LANES) for c in (Cin, Cmid, Cout))

    w1p = jnp.pad(w1_hwio, ((0, 0), (0, 0), (0, Cin_p - Cin), (0, Cmid_p - Cmid)))
    w1p = w1p.reshape(KH * KW, Cin_p, Cmid_p).astype(jnp.bfloat16)
    w2p = jnp.pad(w2_hwio, ((0, 0), (0, 0), (0, Cmid_p - Cmid), (0, Cout_p - Cout)))
    w2p = w2p.reshape(KH * KW, Cmid_p, Cout_p).astype(jnp.bfloat16)

    sc1p = jnp.pad(sc1, (0, Cmid_p - Cmid)).reshape(1, Cmid_p).astype(jnp.float32)
    sh1p = jnp.pad(sh1, (0, Cmid_p - Cmid)).reshape(1, Cmid_p).astype(jnp.float32)
    sc2p = jnp.pad(sc2, (0, Cout_p - Cout)).reshape(1, Cout_p).astype(jnp.float32)
    sh2p = jnp.pad(sh2, (0, Cout_p - Cout)).reshape(1, Cout_p).astype(jnp.float32)
    return (w1p, sc1p, sh1p, w2p, sc2p, sh2p)


# ----------------------------------------------------------------------------
# pallas_call wrapper for one DownBlock
# ----------------------------------------------------------------------------
def downblock(x, block_params, k, pad, out_dtype):
    """x: (N, H, W, Cin_p) bf16, channels 128-padded with zeros.
       Returns (N, H2//2, W2//2, Cout_p) out_dtype; padded channels stay 0."""
    w1, sc1, sh1, w2, sc2, sh2 = block_params
    N, H, W, Cin_p = x.shape
    KH = KW = k
    Cmid_p, Cout_p = sc1.shape[1], sc2.shape[1]
    Hp1, Wp1 = H + 2 * pad, W + 2 * pad
    H1, W1 = Hp1 - KH + 1, Wp1 - KW + 1
    Hp2, Wp2 = H1 + 2 * pad, W1 + 2 * pad
    H2, W2 = Hp2 - KH + 1, Wp2 - KW + 1
    assert H2 % 2 == 0 and W2 % 2 == 0, "MaxPool2d(2) needs even spatial dims"
    Hh, Wh = H2 // 2, W2 // 2

    out_isz = jnp.dtype(out_dtype).itemsize
    est = (2 * H * W * Cin_p * 2                                     # input x2 bufs
           + 2 * Hh * Wh * Cout_p * out_isz                          # output x2 bufs
           + 2 * KH * KW * (Cin_p * Cmid_p + Cmid_p * Cout_p) * 2    # weights x2 bufs
           + (Hp1 * Wp1 * Cin_p + Hp2 * Wp2 * Cmid_p) * 2            # bf16 scratches
           + (H1 * W1 * Cmid_p + H2 * W2 * Cout_p) * 4 * 3)          # live f32 values
    vmem_limit = int(min(max(2 * est + (8 << 20), 16 << 20), 64 << 20))

    return pl.pallas_call(
        _make_downblock_kernel(KH, KW, pad),
        out_shape=jax.ShapeDtypeStruct((N, Hh, Wh, Cout_p), out_dtype),
        grid=(N,),
        in_specs=[
            pl.BlockSpec((1, H, W, Cin_p), lambda n: (n, 0, 0, 0)),
            pl.BlockSpec((KH * KW, Cin_p, Cmid_p), lambda n: (0, 0, 0)),
            pl.BlockSpec((1, Cmid_p), lambda n: (0, 0)),
            pl.BlockSpec((1, Cmid_p), lambda n: (0, 0)),
            pl.BlockSpec((KH * KW, Cmid_p, Cout_p), lambda n: (0, 0, 0)),
            pl.BlockSpec((1, Cout_p), lambda n: (0, 0)),
            pl.BlockSpec((1, Cout_p), lambda n: (0, 0)),
        ],
        out_specs=pl.BlockSpec((1, Hh, Wh, Cout_p), lambda n: (n, 0, 0, 0)),
        scratch_shapes=[pltpu.VMEM((Hp1, Wp1, Cin_p), jnp.bfloat16),
                        pltpu.VMEM((Hp2, Wp2, Cmid_p), jnp.bfloat16)],
        compiler_params=pltpu.CompilerParams(
            dimension_semantics=("parallel",),
            vmem_limit_bytes=vmem_limit),
    )(x, w1, sc1, sh1, w2, sc2, sh2)


def encoder_forward(x_nchw, prepared_params, kernel_sizes, paddings, cout_true):
    x = jnp.transpose(x_nchw, (0, 2, 3, 1))                      # NCHW -> NHWC
    cin = x.shape[-1]
    x = jnp.pad(x, ((0, 0), (0, 0), (0, 0), (0, _round_up(cin, LANES) - cin)))
    x = x.astype(jnp.bfloat16)
    nb = len(prepared_params)
    for i, (blk, k, p) in enumerate(zip(prepared_params, kernel_sizes, paddings)):
        out_dtype = jnp.float32 if i == nb - 1 else jnp.bfloat16  # bf16 between blocks
        x = downblock(x, blk, k, p, out_dtype)
    out = x[..., :cout_true]                                      # drop lane padding
    return jnp.transpose(out, (0, 3, 1, 2))                       # NHWC -> NCHW


# ----------------------------------------------------------------------------
# Deterministic parameter construction (mirrors nn.Conv2d / nn.BatchNorm2d)
# ----------------------------------------------------------------------------
def init_conv_bn(key, cin, cout, k):
    kw_, kb_, kg_, kbe_, km_, kv_ = jax.random.split(key, 6)
    bound = 1.0 / np.sqrt(cin * k * k)
    w = jax.random.uniform(kw_, (k, k, cin, cout), jnp.float32, -bound, bound)  # HWIO
    b = jax.random.uniform(kb_, (cout,), jnp.float32, -bound, bound)
    gamma = 1.0 + 0.1 * jax.random.normal(kg_, (cout,), jnp.float32)
    beta = 0.1 * jax.random.normal(kbe_, (cout,), jnp.float32)
    r_mean = 0.1 * jax.random.normal(km_, (cout,), jnp.float32)
    r_var = 1.0 + 0.1 * jax.random.uniform(kv_, (cout,), jnp.float32)
    eps = 1e-5
    scale = gamma / jnp.sqrt(r_var + eps)
    shift = beta + scale * (b - r_mean)
    return w, scale, shift


def init_encoder_params(key, in_channels, emb_sizes, out_channels, kernel_sizes):
    params = []
    cin = in_channels
    for emb, cout, k in zip(emb_sizes, out_channels, kernel_sizes):
        key, k1, k2 = jax.random.split(key, 3)
        w1, sc1, sh1 = init_conv_bn(k1, cin, emb, k)
        w2, sc2, sh2 = init_conv_bn(k2, emb, cout, k)
        params.append((w1, sc1, sh1, w2, sc2, sh2))
        cin = cout
    return params


# ----------------------------------------------------------------------------
# Pure-JAX reference (mirrors the kernel's bf16 MXU inputs: conv inputs are
# rounded to bf16, accumulation and the BN/ReLU epilogue stay in f32).
# ----------------------------------------------------------------------------
def encoder_reference(x_nchw, raw_params, paddings):
    x = jnp.transpose(x_nchw, (0, 2, 3, 1))
    for (w1, sc1, sh1, w2, sc2, sh2), p in zip(raw_params, paddings):
        for w, sc, sh in ((w1, sc1, sh1), (w2, sc2, sh2)):
            y = jax.lax.conv_general_dilated(
                x.astype(jnp.bfloat16), w.astype(jnp.bfloat16), (1, 1),
                [(p, p), (p, p)],
                dimension_numbers=("NHWC", "HWIO", "NHWC"),
                preferred_element_type=jnp.float32)
            x = jnp.maximum(y * sc + sh, 0.0)
        x = jax.lax.reduce_window(x, -jnp.inf, jax.lax.max,
                                  (1, 2, 2, 1), (1, 2, 2, 1), "VALID")
    return jnp.transpose(x, (0, 3, 1, 2))


# ----------------------------------------------------------------------------
if __name__ == "__main__":
    key = jax.random.PRNGKey(0)

    # Small Encoder config: 2 DownBlocks.
    N, in_channels, H, W = 2, 4, 16, 16
    emb_sizes = [8, 16]
    out_channels = [8, 16]
    kernel_sizes = [3, 3]
    paddings = [1, 1]

    key, kx, kp = jax.random.split(key, 3)
    x = jax.random.normal(kx, (N, in_channels, H, W), jnp.float32)  # NCHW like PyTorch
    raw_params = init_encoder_params(kp, in_channels, emb_sizes, out_channels,
                                     kernel_sizes)

    # Hoisted out of the jitted forward: pad/reshape/cast weights + folded BN once.
    prepared = [prepare_block_params(*blk) for blk in raw_params]

    fwd = jax.jit(encoder_forward, static_argnums=(2, 3, 4))
    out = jax.block_until_ready(
        fwd(x, prepared, tuple(kernel_sizes), tuple(paddings), out_channels[-1]))
    ref = jax.block_until_ready(encoder_reference(x, raw_params, paddings))

    assert out.shape == (N, out_channels[-1], H // 4, W // 4), out.shape
    # Both paths use bf16-rounded conv inputs with f32 accumulation; remaining
    # differences are accumulation order + bf16 rounding of the staged
    # intermediate activation, well inside 1e-2.
    assert np.allclose(np.asarray(out), np.asarray(ref), rtol=1e-2, atol=1e-2), (
        float(np.max(np.abs(np.asarray(out) - np.asarray(ref)))))

    print("KERNEL_OK")
</pallas_src>

<mosaic_0001>
module attributes {stable_mosaic.version = 11 : i64} {
  func.func @kernel(%arg0: i32, %arg1: memref<1x16x16x128xbf16, #tpu.memory_space<vmem>>, %arg2: memref<9x128x128xbf16, #tpu.memory_space<vmem>>, %arg3: memref<1x128xf32, #tpu.memory_space<vmem>>, %arg4: memref<1x128xf32, #tpu.memory_space<vmem>>, %arg5: memref<9x128x128xbf16, #tpu.memory_space<vmem>>, %arg6: memref<1x128xf32, #tpu.memory_space<vmem>>, %arg7: memref<1x128xf32, #tpu.memory_space<vmem>>, %arg8: memref<1x8x8x128xbf16, #tpu.memory_space<vmem>>, %arg9: memref<18x18x128xbf16, #tpu.memory_space<vmem>>, %arg10: memref<18x18x128xbf16, #tpu.memory_space<vmem>>) attributes {dimension_semantics = [#tpu.dimension_semantics<parallel>], iteration_bounds = array<i64: 2>, scalar_prefetch = 0 : i64, scratch_operands = 2 : i64, tpu.core_type = #tpu.core_type<tc>, window_params = [{transform_indices = @transform_0, window_bounds = array<i64: 1, 16, 16, 128>}, {pipeline_mode = #tpu.pipeline_mode<synchronous>, transform_indices = @transform_1, window_bounds = array<i64: 9, 128, 128>}, {pipeline_mode = #tpu.pipeline_mode<synchronous>, transform_indices = @transform_2, window_bounds = array<i64: 1, 128>}, {pipeline_mode = #tpu.pipeline_mode<synchronous>, transform_indices = @transform_3, window_bounds = array<i64: 1, 128>}, {pipeline_mode = #tpu.pipeline_mode<synchronous>, transform_indices = @transform_4, window_bounds = array<i64: 9, 128, 128>}, {pipeline_mode = #tpu.pipeline_mode<synchronous>, transform_indices = @transform_5, window_bounds = array<i64: 1, 128>}, {pipeline_mode = #tpu.pipeline_mode<synchronous>, transform_indices = @transform_6, window_bounds = array<i64: 1, 128>}, {transform_indices = @transform_7, window_bounds = array<i64: 1, 8, 8, 128>}]} {
    %cst = arith.constant 0.000000e+00 : bf16
    %0 = vector.broadcast %cst : bf16 to vector<1x18x128xbf16>
    %c0 = arith.constant 0 : index
    %c0_0 = arith.constant 0 : index
    %c0_1 = arith.constant 0 : index
    %1 = vector.load %arg9[%c0, %c0_0, %c0_1] : memref<18x18x128xbf16, #tpu.memory_space<vmem>>, vector<1x18x128xbf16>
    tpu.vector_store %arg9[%c0, %c0_0, %c0_1], %0 {strides = array<i32>} : memref<18x18x128xbf16, #tpu.memory_space<vmem>>, vector<1x18x128xbf16>,
    %cst_2 = arith.constant 0.000000e+00 : bf16
    %2 = vector.broadcast %cst_2 : bf16 to vector<1x18x128xbf16>
    %c17 = arith.constant 17 : index
    %c0_3 = arith.constant 0 : index
    %c0_4 = arith.constant 0 : index
    %3 = vector.load %arg9[%c17, %c0_3, %c0_4] : memref<18x18x128xbf16, #tpu.memory_space<vmem>>, vector<1x18x128xbf16>
    tpu.vector_store %arg9[%c17, %c0_3, %c0_4], %2 {strides = array<i32>} : memref<18x18x128xbf16, #tpu.memory_space<vmem>>, vector<1x18x128xbf16>,
    %cst_5 = arith.constant 0.000000e+00 : bf16
    %4 = vector.broadcast %cst_5 : bf16 to vector<16x1x128xbf16>
    %c1 = arith.constant 1 : index
    %c0_6 = arith.constant 0 : index
    %c0_7 = arith.constant 0 : index
    %5 = vector.load %arg9[%c1, %c0_6, %c0_7] : memref<18x18x128xbf16, #tpu.memory_space<vmem>>, vector<16x1x128xbf16>
    tpu.vector_store %arg9[%c1, %c0_6, %c0_7], %4 {strides = array<i32>} : memref<18x18x128xbf16, #tpu.memory_space<vmem>>, vector<16x1x128xbf16>,
    %cst_8 = arith.constant 0.000000e+00 : bf16
    %6 = vector.broadcast %cst_8 : bf16 to vector<16x1x128xbf16>
    %c1_9 = arith.constant 1 : index
    %c17_10 = arith.constant 17 : index
    %c0_11 = arith.constant 0 : index
    %7 = vector.load %arg9[%c1_9, %c17_10, %c0_11] : memref<18x18x128xbf16, #tpu.memory_space<vmem>>, vector<16x1x128xbf16>
    tpu.vector_store %arg9[%c1_9, %c17_10, %c0_11], %6 {strides = array<i32>} : memref<18x18x128xbf16, #tpu.memory_space<vmem>>, vector<16x1x128xbf16>,
    %c0_12 = arith.constant 0 : index
    %c0_13 = arith.constant 0 : index
    %c0_14 = arith.constant 0 : index
    %c0_15 = arith.constant 0 : index
    %8 = vector.load %arg1[%c0_12, %c0_13, %c0_14, %c0_15] : memref<1x16x16x128xbf16, #tpu.memory_space<vmem>>, vector<1x16x16x128xbf16>
    %9 = vector.shape_cast %8 : vector<1x16x16x128xbf16> to vector<16x16x128xbf16>
    %c1_16 = arith.constant 1 : index
    %c1_17 = arith.constant 1 : index
    %c0_18 = arith.constant 0 : index
    %10 = vector.load %arg9[%c1_16, %c1_17, %c0_18] : memref<18x18x128xbf16, #tpu.memory_space<vmem>>, vector<16x16x128xbf16>
    tpu.vector_store %arg9[%c1_16, %c1_17, %c0_18], %9 {strides = array<i32>} : memref<18x18x128xbf16, #tpu.memory_space<vmem>>, vector<16x16x128xbf16>,
    %cst_19 = arith.constant 0.000000e+00 : f32
    %11 = vector.broadcast %cst_19 : f32 to vector<256x128xf32>
    %c0_20 = arith.constant 0 : index
    %c0_21 = arith.constant 0 : index
    %c0_22 = arith.constant 0 : index
    %12 = vector.load %arg9[%c0_20, %c0_21, %c0_22] : memref<18x18x128xbf16, #tpu.memory_space<vmem>>, vector<16x16x128xbf16>
    %13 = vector.shape_cast %12 : vector<16x16x128xbf16> to vector<256x128xbf16>
    %c0_23 = arith.constant 0 : index
    %c0_24 = arith.constant 0 : index
    %c0_25 = arith.constant 0 : index
    %14 = vector.load %arg2[%c0_23, %c0_24, %c0_25] : memref<9x128x128xbf16, #tpu.memory_space<vmem>>, vector<1x128x128xbf16>
    %15 = vector.shape_cast %14 : vector<1x128x128xbf16> to vector<128x128xbf16>
    %cst_26 = arith.constant dense<0.000000e+00> : vector<256x128xf32>
    %16 = tpu.matmul %13, %15, %cst_26 {dimension_numbers = #tpu.dot_dimension_numbers<[1], [0], [0], [1], [0, 0, 1, 1], [], []>} : vector<256x128xbf16>, vector<128x128xbf16>, vector<256x128xf32> -> vector<256x128xf32>
    %17 = arith.addf %11, %16 : vector<256x128xf32>
    %c0_27 = arith.constant 0 : index
    %c1_28 = arith.constant 1 : index
    %c0_29 = arith.constant 0 : index
    %18 = vector.load %arg9[%c0_27, %c1_28, %c0_29] : memref<18x18x128xbf16, #tpu.memory_space<vmem>>, vector<16x16x128xbf16>
    %19 = vector.shape_cast %18 : vector<16x16x128xbf16> to vector<256x128xbf16>
    %c1_30 = arith.constant 1 : index
    %c0_31 = arith.constant 0 : index
    %c0_32 = arith.constant 0 : index
    %20 = vector.load %arg2[%c1_30, %c0_31, %c0_32] : memref<9x128x128xbf16, #tpu.memory_space<vmem>>, vector<1x128x128xbf16>
    %21 = vector.shape_cast %20 : vector<1x128x128xbf16> to vector<128x128xbf16>
    %cst_33 = arith.constant dense<0.000000e+00> : vector<256x128xf32>
    %22 = tpu.matmul %19, %21, %cst_33 {dimension_numbers = #tpu.dot_dimension_numbers<[1], [0], [0], [1], [0, 0, 1, 1], [], []>} : vector<256x128xbf16>, vector<128x128xbf16>, vector<256x128xf32> -> vector<256x128xf32>
    %23 = arith.addf %17, %22 : vector<256x128xf32>
    %c0_34 = arith.constant 0 : index
    %c2 = arith.constant 2 : index
    %c0_35 = arith.constant 0 : index
    %24 = vector.load %arg9[%c0_34, %c2, %c0_35] : memref<18x18x128xbf16, #tpu.memory_space<vmem>>, vector<16x16x128xbf16>
    %25 = vector.shape_cast %24 : vector<16x16x128xbf16> to vector<256x128xbf16>
    %c2_36 = arith.constant 2 : index
    %c0_37 = arith.constant 0 : index
    %c0_38 = arith.constant 0 : index
    %26 = vector.load %arg2[%c2_36, %c0_37, %c0_38] : memref<9x128x128xbf16, #tpu.memory_space<vmem>>, vector<1x128x128xbf16>
    %27 = vector.shape_cast %26 : vector<1x128x128xbf16> to vector<128x128xbf16>
    %cst_39 = arith.constant dense<0.000000e+00> : vector<256x128xf32>
    %28 = tpu.matmul %25, %27, %cst_39 {dimension_numbers = #tpu.dot_dimension_numbers<[1], [0], [0], [1], [0, 0, 1, 1], [], []>} : vector<256x128xbf16>, vector<128x128xbf16>, vector<256x128xf32> -> vector<256x128xf32>
    %29 = arith.addf %23, %28 : vector<256x128xf32>
    %c1_40 = arith.constant 1 : index
    %c0_41 = arith.constant 0 : index
    %c0_42 = arith.constant 0 : index
    %30 = vector.load %arg9[%c1_40, %c0_41, %c0_42] : memref<18x18x128xbf16, #tpu.memory_space<vmem>>, vector<16x16x128xbf16>
    %31 = vector.shape_cast %30 : vector<16x16x128xbf16> to vector<256x128xbf16>
    %c3 = arith.constant 3 : index
    %c0_43 = arith.constant 0 : index
    %c0_44 = arith.constant 0 : index
    %32 = vector.load %arg2[%c3, %c0_43, %c0_44] : memref<9x128x128xbf16, #tpu.memory_space<vmem>>, vector<1x128x128xbf16>
    %33 = vector.shape_cast %32 : vector<1x128x128xbf16> to vector<128x128xbf16>
    %cst_45 = arith.constant dense<0.000000e+00> : vector<256x128xf32>
    %34 = tpu.matmul %31, %33, %cst_45 {dimension_numbers = #tpu.dot_dimension_numbers<[1], [0], [0], [1], [0, 0, 1, 1], [], []>} : vector<256x128xbf16>, vector<128x128xbf16>, vector<256x128xf32> -> vector<256x128xf32>
    %35 = arith.addf %29, %34 : vector<256x128xf32>
    %c1_46 = arith.constant 1 : index
    %c1_47 = arith.constant 1 : index
    %c0_48 = arith.constant 0 : index
    %36 = vector.load %arg9[%c1_46, %c1_47, %c0_48] : memref<18x18x128xbf16, #tpu.memory_space<vmem>>, vector<16x16x128xbf16>
    %37 = vector.shape_cast %36 : vector<16x16x128xbf16> to vector<256x128xbf16>
    %c4 = arith.constant 4 : index
    %c0_49 = arith.constant 0 : index
    %c0_50 = arith.constant 0 : index
    %38 = vector.load %arg2[%c4, %c0_49, %c0_50] : memref<9x128x128xbf16, #tpu.memory_space<vmem>>, vector<1x128x128xbf16>
    %39 = vector.shape_cast %38 : vector<1x128x128xbf16> to vector<128x128xbf16>
    %cst_51 = arith.constant dense<0.000000e+00> : vector<256x128xf32>
    %40 = tpu.matmul %37, %39, %cst_51 {dimension_numbers = #tpu.dot_dimension_numbers<[1], [0], [0], [1], [0, 0, 1, 1], [], []>} : vector<256x128xbf16>, vector<128x128xbf16>, vector<256x128xf32> -> vector<256x128xf32>
    %41 = arith.addf %35, %40 : vector<256x128xf32>
    %c1_52 = arith.constant 1 : index
    %c2_53 = arith.constant 2 : index
    %c0_54 = arith.constant 0 : index
    %42 = vector.load %arg9[%c1_52, %c2_53, %c0_54] : memref<18x18x128xbf16, #tpu.memory_space<vmem>>, vector<16x16x128xbf16>
    %43 = vector.shape_cast %42 : vector<16x16x128xbf16> to vector<256x128xbf16>
    %c5 = arith.constant 5 : index
    %c0_55 = arith.constant 0 : index
    %c0_56 = arith.constant 0 : index
    %44 = vector.load %arg2[%c5, %c0_55, %c0_56] : memref<9x128x128xbf16, #tpu.memory_space<vmem>>, vector<1x128x128xbf16>
    %45 = vector.shape_cast %44 : vector<1x128x128xbf16> to vector<128x128xbf16>
    %cst_57 = arith.constant dense<0.000000e+00> : vector<256x128xf32>
    %46 = tpu.matmul %43, %45, %cst_57 {dimension_numbers = #tpu.dot_dimension_numbers<[1], [0], [0], [1], [0, 0, 1, 1], [], []>} : vector<256x128xbf16>, vector<128x128xbf16>, vector<256x128xf32> -> vector<256x128xf32>
    %47 = arith.addf %41, %46 : vector<256x128xf32>
    %c2_58 = arith.constant 2 : index
    %c0_59 = arith.constant 0 : index
    %c0_60 = arith.constant 0 : index
    %48 = vector.load %arg9[%c2_58, %c0_59, %c0_60] : memref<18x18x128xbf16, #tpu.memory_space<vmem>>, vector<16x16x128xbf16>
    %49 = vector.shape_cast %48 : vector<16x16x128xbf16> to vector<256x128xbf16>
    %c6 = arith.constant 6 : index
    %c0_61 = arith.constant 0 : index
    %c0_62 = arith.constant 0 : index
    %50 = vector.load %arg2[%c6, %c0_61, %c0_62] : memref<9x128x128xbf16, #tpu.memory_space<vmem>>, vector<1x128x128xbf16>
    %51 = vector.shape_cast %50 : vector<1x128x128xbf16> to vector<128x128xbf16>
    %cst_63 = arith.constant dense<0.000000e+00> : vector<256x128xf32>
    %52 = tpu.matmul %49, %51, %cst_63 {dimension_numbers = #tpu.dot_dimension_numbers<[1], [0], [0], [1], [0, 0, 1, 1], [], []>} : vector<256x128xbf16>, vector<128x128xbf16>, vector<256x128xf32> -> vector<256x128xf32>
    %53 = arith.addf %47, %52 : vector<256x128xf32>
    %c2_64 = arith.constant 2 : index
    %c1_65 = arith.constant 1 : index
    %c0_66 = arith.constant 0 : index
    %54 = vector.load %arg9[%c2_64, %c1_65, %c0_66] : memref<18x18x128xbf16, #tpu.memory_space<vmem>>, vector<16x16x128xbf16>
    %55 = vector.shape_cast %54 : vector<16x16x128xbf16> to vector<256x128xbf16>
    %c7 = arith.constant 7 : index
    %c0_67 = arith.constant 0 : index
    %c0_68 = arith.constant 0 : index
    %56 = vector.load %arg2[%c7, %c0_67, %c0_68] : memref<9x128x128xbf16, #tpu.memory_space<vmem>>, vector<1x128x128xbf16>
    %57 = vector.shape_cast %56 : vector<1x128x128xbf16> to vector<128x128xbf16>
    %cst_69 = arith.constant dense<0.000000e+00> : vector<256x128xf32>
    %58 = tpu.matmul %55, %57, %cst_69 {dimension_numbers = #tpu.dot_dimension_numbers<[1], [0], [0], [1], [0, 0, 1, 1], [], []>} : vector<256x128xbf16>, vector<128x128xbf16>, vector<256x128xf32> -> vector<256x128xf32>
    %59 = arith.addf %53, %58 : vector<256x128xf32>
    %c2_70 = arith.constant 2 : index
    %c2_71 = arith.constant 2 : index
    %c0_72 = arith.constant 0 : index
    %60 = vector.load %arg9[%c2_70, %c2_71, %c0_72] : memref<18x18x128xbf16, #tpu.memory_space<vmem>>, vector<16x16x128xbf16>
    %61 = vector.shape_cast %60 : vector<16x16x128xbf16> to vector<256x128xbf16>
    %c8 = arith.constant 8 : index
    %c0_73 = arith.constant 0 : index
    %c0_74 = arith.constant 0 : index
    %62 = vector.load %arg2[%c8, %c0_73, %c0_74] : memref<9x128x128xbf16, #tpu.memory_space<vmem>>, vector<1x128x128xbf16>
    %63 = vector.shape_cast %62 : vector<1x128x128xbf16> to vector<128x128xbf16>
    %cst_75 = arith.constant dense<0.000000e+00> : vector<256x128xf32>
    %64 = tpu.matmul %61, %63, %cst_75 {dimension_numbers = #tpu.dot_dimension_numbers<[1], [0], [0], [1], [0, 0, 1, 1], [], []>} : vector<256x128xbf16>, vector<128x128xbf16>, vector<256x128xf32> -> vector<256x128xf32>
    %65 = arith.addf %59, %64 : vector<256x128xf32>
    %c0_76 = arith.constant 0 : index
    %c0_77 = arith.constant 0 : index
    %66 = vector.load %arg3[%c0_76, %c0_77] : memref<1x128xf32, #tpu.memory_space<vmem>>, vector<1x128xf32>
    %67 = vector.broadcast %66 : vector<1x128xf32> to vector<256x128xf32>
    %68 = arith.mulf %65, %67 : vector<256x128xf32>
    %c0_78 = arith.constant 0 : index
    %c0_79 = arith.constant 0 : index
    %69 = vector.load %arg4[%c0_78, %c0_79] : memref<1x128xf32, #tpu.memory_space<vmem>>, vector<1x128xf32>
    %70 = vector.broadcast %69 : vector<1x128xf32> to vector<256x128xf32>
    %71 = arith.addf %68, %70 : vector<256x128xf32>
    %cst_80 = arith.constant 0.000000e+00 : f32
    %72 = vector.broadcast %cst_80 : f32 to vector<256x128xf32>
    %73 = arith.maximumf %71, %72 : vector<256x128xf32>
    %cst_81 = arith.constant 0.000000e+00 : bf16
    %74 = vector.broadcast %cst_81 : bf16 to vector<1x18x128xbf16>
    %c0_82 = arith.constant 0 : index
    %c0_83 = arith.constant 0 : index
    %c0_84 = arith.constant 0 : index
    %75 = vector.load %arg10[%c0_82, %c0_83, %c0_84] : memref<18x18x128xbf16, #tpu.memory_space<vmem>>, vector<1x18x128xbf16>
    tpu.vector_store %arg10[%c0_82, %c0_83, %c0_84], %74 {strides = array<i32>} : memref<18x18x128xbf16, #tpu.memory_space<vmem>>, vector<1x18x128xbf16>,
    %cst_85 = arith.constant 0.000000e+00 : bf16
    %76 = vector.broadcast %cst_85 : bf16 to vector<1x18x128xbf16>
    %c17_86 = arith.constant 17 : index
    %c0_87 = arith.constant 0 : index
    %c0_88 = arith.constant 0 : index
    %77 = vector.load %arg10[%c17_86, %c0_87, %c0_88] : memref<18x18x128xbf16, #tpu.memory_space<vmem>>, vector<1x18x128xbf16>
    tpu.vector_store %arg10[%c17_86, %c0_87, %c0_88], %76 {strides = array<i32>} : memref<18x18x128xbf16, #tpu.memory_space<vmem>>, vector<1x18x128xbf16>,
    %cst_89 = arith.constant 0.000000e+00 : bf16
    %78 = vector.broadcast %cst_89 : bf16 to vector<16x1x128xbf16>
    %c1_90 = arith.constant 1 : index
    %c0_91 = arith.constant 0 : index
    %c0_92 = arith.constant 0 : index
    %79 = vector.load %arg10[%c1_90, %c0_91, %c0_92] : memref<18x18x128xbf16, #tpu.memory_space<vmem>>, vector<16x1x128xbf16>
    tpu.vector_store %arg10[%c1_90, %c0_91, %c0_92], %78 {strides = array<i32>} : memref<18x18x128xbf16, #tpu.memory_space<vmem>>, vector<16x1x128xbf16>,
    %cst_93 = arith.constant 0.000000e+00 : bf16
    %80 = vector.broadcast %cst_93 : bf16 to vector<16x1x128xbf16>
    %c1_94 = arith.constant 1 : index
    %c17_95 = arith.constant 17 : index
    %c0_96 = arith.constant 0 : index
    %81 = vector.load %arg10[%c1_94, %c17_95, %c0_96] : memref<18x18x128xbf16, #tpu.memory_space<vmem>>, vector<16x1x128xbf16>
    tpu.vector_store %arg10[%c1_94, %c17_95, %c0_96], %80 {strides = array<i32>} : memref<18x18x128xbf16, #tpu.memory_space<vmem>>, vector<16x1x128xbf16>,
    %82 = vector.shape_cast %73 : vector<256x128xf32> to vector<16x16x128xf32>
    %83 = arith.truncf %82 : vector<16x16x128xf32> to vector<16x16x128xbf16>
    %c1_97 = arith.constant 1 : index
    %c1_98 = arith.constant 1 : index
    %c0_99 = arith.constant 0 : index
    %84 = vector.load %arg10[%c1_97, %c1_98, %c0_99] : memref<18x18x128xbf16, #tpu.memory_space<vmem>>, vector<16x16x128xbf16>
    tpu.vector_store %arg10[%c1_97, %c1_98, %c0_99], %83 {strides = array<i32>} : memref<18x18x128xbf16, #tpu.memory_space<vmem>>, vector<16x16x128xbf16>,
    %cst_100 = arith.constant 0.000000e+00 : f32
    %85 = vector.broadcast %cst_100 : f32 to vector<256x128xf32>
    %c0_101 = arith.constant 0 : index
    %c0_102 = arith.constant 0 : index
    %c0_103 = arith.constant 0 : index
    %86 = vector.load %arg10[%c0_101, %c0_102, %c0_103] : memref<18x18x128xbf16, #tpu.memory_space<vmem>>, vector<16x16x128xbf16>
    %87 = vector.shape_cast %86 : vector<16x16x128xbf16> to vector<256x128xbf16>
    %c0_104 = arith.constant 0 : index
    %c0_105 = arith.constant 0 : index
    %c0_106 = arith.constant 0 : index
    %88 = vector.load %arg5[%c0_104, %c0_105, %c0_106] : memref<9x128x128xbf16, #tpu.memory_space<vmem>>, vector<1x128x128xbf16>
    %89 = vector.shape_cast %88 : vector<1x128x128xbf16> to vector<128x128xbf16>
    %cst_107 = arith.constant dense<0.000000e+00> : vector<256x128xf32>
    %90 = tpu.matmul %87, %89, %cst_107 {dimension_numbers = #tpu.dot_dimension_numbers<[1], [0], [0], [1], [0, 0, 1, 1], [], []>} : vector<256x128xbf16>, vector<128x128xbf16>, vector<256x128xf32> -> vector<256x128xf32>
    %91 = arith.addf %85, %90 : vector<256x128xf32>
    %c0_108 = arith.constant 0 : index
    %c1_109 = arith.constant 1 : index
    %c0_110 = arith.constant 0 : index
    %92 = vector.load %arg10[%c0_108, %c1_109, %c0_110] : memref<18x18x128xbf16, #tpu.memory_space<vmem>>, vector<16x16x128xbf16>
    %93 = vector.shape_cast %92 : vector<16x16x128xbf16> to vector<256x128xbf16>
    %c1_111 = arith.constant 1 : index
    %c0_112 = arith.constant 0 : index
    %c0_113 = arith.constant 0 : index
    %94 = vector.load %arg5[%c1_111, %c0_112, %c0_113] : memref<9x128x128xbf16, #tpu.memory_space<vmem>>, vector<1x128x128xbf16>
    %95 = vector.shape_cast %94 : vector<1x128x128xbf16> to vector<128x128xbf16>
    %cst_114 = arith.constant dense<0.000000e+00> : vector<256x128xf32>
    %96 = tpu.matmul %93, %95, %cst_114 {dimension_numbers = #tpu.dot_dimension_numbers<[1], [0], [0], [1], [0, 0, 1, 1], [], []>} : vector<256x128xbf16>, vector<128x128xbf16>, vector<256x128xf32> -> vector<256x128xf32>
    %97 = arith.addf %91, %96 : vector<256x128xf32>
    %c0_115 = arith.constant 0 : index
    %c2_116 = arith.constant 2 : index
    %c0_117 = arith.constant 0 : index
    %98 = vector.load %arg10[%c0_115, %c2_116, %c0_117] : memref<18x18x128xbf16, #tpu.memory_space<vmem>>, vector<16x16x128xbf16>
    %99 = vector.shape_cast %98 : vector<16x16x128xbf16> to vector<256x128xbf16>
    %c2_118 = arith.constant 2 : index
    %c0_119 = arith.constant 0 : index
    %c0_120 = arith.constant 0 : index
    %100 = vector.load %arg5[%c2_118, %c0_119, %c0_120] : memref<9x128x128xbf16, #tpu.memory_space<vmem>>, vector<1x128x128xbf16>
    %101 = vector.shape_cast %100 : vector<1x128x128xbf16> to vector<128x128xbf16>
    %cst_121 = arith.constant dense<0.000000e+00> : vector<256x128xf32>
    %102 = tpu.matmul %99, %101, %cst_121 {dimension_numbers = #tpu.dot_dimension_numbers<[1], [0], [0], [1], [0, 0, 1, 1], [], []>} : vector<256x128xbf16>, vector<128x128xbf16>, vector<256x128xf32> -> vector<256x128xf32>
    %103 = arith.addf %97, %102 : vector<256x128xf32>
    %c1_122 = arith.constant 1 : index
    %c0_123 = arith.constant 0 : index
    %c0_124 = arith.constant 0 : index
    %104 = vector.load %arg10[%c1_122, %c0_123, %c0_124] : memref<18x18x128xbf16, #tpu.memory_space<vmem>>, vector<16x16x128xbf16>
    %105 = vector.shape_cast %104 : vector<16x16x128xbf16> to vector<256x128xbf16>
    %c3_125 = arith.constant 3 : index
    %c0_126 = arith.constant 0 : index
    %c0_127 = arith.constant 0 : index
    %106 = vector.load %arg5[%c3_125, %c0_126, %c0_127] : memref<9x128x128xbf16, #tpu.memory_space<vmem>>, vector<1x128x128xbf16>
    %107 = vector.shape_cast %106 : vector<1x128x128xbf16> to vector<128x128xbf16>
    %cst_128 = arith.constant dense<0.000000e+00> : vector<256x128xf32>
    %108 = tpu.matmul %105, %107, %cst_128 {dimension_numbers = #tpu.dot_dimension_numbers<[1], [0], [0], [1], [0, 0, 1, 1], [], []>} : vector<256x128xbf16>, vector<128x128xbf16>, vector<256x128xf32> -> vector<256x128xf32>
    %109 = arith.addf %103, %108 : vector<256x128xf32>
    %c1_129 = arith.constant 1 : index
    %c1_130 = arith.constant 1 : index
    %c0_131 = arith.constant 0 : index
    %110 = vector.load %arg10[%c1_129, %c1_130, %c0_131] : memref<18x18x128xbf16, #tpu.memory_space<vmem>>, vector<16x16x128xbf16>
    %111 = vector.shape_cast %110 : vector<16x16x128xbf16> to vector<256x128xbf16>
    %c4_132 = arith.constant 4 : index
    %c0_133 = arith.constant 0 : index
    %c0_134 = arith.constant 0 : index
    %112 = vector.load %arg5[%c4_132, %c0_133, %c0_134] : memref<9x128x128xbf16, #tpu.memory_space<vmem>>, vector<1x128x128xbf16>
    %113 = vector.shape_cast %112 : vector<1x128x128xbf16> to vector<128x128xbf16>
    %cst_135 = arith.constant dense<0.000000e+00> : vector<256x128xf32>
    %114 = tpu.matmul %111, %113, %cst_135 {dimension_numbers = #tpu.dot_dimension_numbers<[1], [0], [0], [1], [0, 0, 1, 1], [], []>} : vector<256x128xbf16>, vector<128x128xbf16>, vector<256x128xf32> -> vector<256x128xf32>
    %115 = arith.addf %109, %114 : vector<256x128xf32>
    %c1_136 = arith.constant 1 : index
    %c2_137 = arith.constant 2 : index
    %c0_138 = arith.constant 0 : index
    %116 = vector.load %arg10[%c1_136, %c2_137, %c0_138] : memref<18x18x128xbf16, #tpu.memory_space<vmem>>, vector<16x16x128xbf16>
    %117 = vector.shape_cast %116 : vector<16x16x128xbf16> to vector<256x128xbf16>
    %c5_139 = arith.constant 5 : index
    %c0_140 = arith.constant 0 : index
    %c0_141 = arith.constant 0 : index
    %118 = vector.load %arg5[%c5_139, %c0_140, %c0_141] : memref<9x128x128xbf16, #tpu.memory_space<vmem>>, vector<1x128x128xbf16>
    %119 = vector.shape_cast %118 : vector<1x128x128xbf16> to vector<128x128xbf16>
    %cst_142 = arith.constant dense<0.000000e+00> : vector<256x128xf32>
    %120 = tpu.matmul %117, %119, %cst_142 {dimension_numbers = #tpu.dot_dimension_numbers<[1], [0], [0], [1], [0, 0, 1, 1], [], []>} : vector<256x128xbf16>, vector<128x128xbf16>, vector<256x128xf32> -> vector<256x128xf32>
    %121 = arith.addf %115, %120 : vector<256x128xf32>
    %c2_143 = arith.constant 2 : index
    %c0_144 = arith.constant 0 : index
    %c0_145 = arith.constant 0 : index
    %122 = vector.load %arg10[%c2_143, %c0_144, %c0_145] : memref<18x18x128xbf16, #tpu.memory_space<vmem>>, vector<16x16x128xbf16>
    %123 = vector.shape_cast %122 : vector<16x16x128xbf16> to vector<256x128xbf16>
    %c6_146 = arith.constant 6 : index
    %c0_147 = arith.constant 0 : index
    %c0_148 = arith.constant 0 : index
    %124 = vector.load %arg5[%c6_146, %c0_147, %c0_148] : memref<9x128x128xbf16, #tpu.memory_space<vmem>>, vector<1x128x128xbf16>
    %125 = vector.shape_cast %124 : vector<1x128x128xbf16> to vector<128x128xbf16>
    %cst_149 = arith.constant dense<0.000000e+00> : vector<256x128xf32>
    %126 = tpu.matmul %123, %125, %cst_149 {dimension_numbers = #tpu.dot_dimension_numbers<[1], [0], [0], [1], [0, 0, 1, 1], [], []>} : vector<256x128xbf16>, vector<128x128xbf16>, vector<256x128xf32> -> vector<256x128xf32>
    %127 = arith.addf %121, %126 : vector<256x128xf32>
    %c2_150 = arith.constant 2 : index
    %c1_151 = arith.constant 1 : index
    %c0_152 = arith.constant 0 : index
    %128 = vector.load %arg10[%c2_150, %c1_151, %c0_152] : memref<18x18x128xbf16, #tpu.memory_space<vmem>>, vector<16x16x128xbf16>
    %129 = vector.shape_cast %128 : vector<16x16x128xbf16> to vector<256x128xbf16>
    %c7_153 = arith.constant 7 : index
    %c0_154 = arith.constant 0 : index
    %c0_155 = arith.constant 0 : index
    %130 = vector.load %arg5[%c7_153, %c0_154, %c0_155] : memref<9x128x128xbf16, #tpu.memory_space<vmem>>, vector<1x128x128xbf16>
    %131 = vector.shape_cast %130 : vector<1x128x128xbf16> to vector<128x128xbf16>
    %cst_156 = arith.constant dense<0.000000e+00> : vector<256x128xf32>
    %132 = tpu.matmul %129, %131, %cst_156 {dimension_numbers = #tpu.dot_dimension_numbers<[1], [0], [0], [1], [0, 0, 1, 1], [], []>} : vector<256x128xbf16>, vector<128x128xbf16>, vector<256x128xf32> -> vector<256x128xf32>
    %133 = arith.addf %127, %132 : vector<256x128xf32>
    %c2_157 = arith.constant 2 : index
    %c2_158 = arith.constant 2 : index
    %c0_159 = arith.constant 0 : index
    %134 = vector.load %arg10[%c2_157, %c2_158, %c0_159] : memref<18x18x128xbf16, #tpu.memory_space<vmem>>, vector<16x16x128xbf16>
    %135 = vector.shape_cast %134 : vector<16x16x128xbf16> to vector<256x128xbf16>
    %c8_160 = arith.constant 8 : index
    %c0_161 = arith.constant 0 : index
    %c0_162 = arith.constant 0 : index
    %136 = vector.load %arg5[%c8_160, %c0_161, %c0_162] : memref<9x128x128xbf16, #tpu.memory_space<vmem>>, vector<1x128x128xbf16>
    %137 = vector.shape_cast %136 : vector<1x128x128xbf16> to vector<128x128xbf16>
    %cst_163 = arith.constant dense<0.000000e+00> : vector<256x128xf32>
    %138 = tpu.matmul %135, %137, %cst_163 {dimension_numbers = #tpu.dot_dimension_numbers<[1], [0], [0], [1], [0, 0, 1, 1], [], []>} : vector<256x128xbf16>, vector<128x128xbf16>, vector<256x128xf32> -> vector<256x128xf32>
    %139 = arith.addf %133, %138 : vector<256x128xf32>
    %c0_164 = arith.constant 0 : index
    %c0_165 = arith.constant 0 : index
    %140 = vector.load %arg6[%c0_164, %c0_165] : memref<1x128xf32, #tpu.memory_space<vmem>>, vector<1x128xf32>
    %141 = vector.broadcast %140 : vector<1x128xf32> to vector<256x128xf32>
    %142 = arith.mulf %139, %141 : vector<256x128xf32>
    %c0_166 = arith.constant 0 : index
    %c0_167 = arith.constant 0 : index
    %143 = vector.load %arg7[%c0_166, %c0_167] : memref<1x128xf32, #tpu.memory_space<vmem>>, vector<1x128xf32>
    %144 = vector.broadcast %143 : vector<1x128xf32> to vector<256x128xf32>
    %145 = arith.addf %142, %144 : vector<256x128xf32>
    %cst_168 = arith.constant 0.000000e+00 : f32
    %146 = vector.broadcast %cst_168 : f32 to vector<256x128xf32>
    %147 = arith.maximumf %145, %146 : vector<256x128xf32>
    %148 = vector.shape_cast %147 : vector<256x128xf32> to vector<128x256xf32>
    %149 = vector.extract_strided_slice %148 {offsets = [0, 0], sizes = [128, 128], strides = [1, 1]} : vector<128x256xf32> to vector<128x128xf32>
    %150 = vector.extract_strided_slice %148 {offsets = [0, 128], sizes = [128, 128], strides = [1, 1]} : vector<128x256xf32> to vector<128x128xf32>
    %151 = arith.maximumf %149, %150 : vector<128x128xf32>
    %152 = vector.shape_cast %151 : vector<128x128xf32> to vector<8x16x128xf32>
    %153 = vector.extract_strided_slice %152 {offsets = [0, 0, 0], sizes = [8, 8, 128], strides = [1, 1, 1]} : vector<8x16x128xf32> to vector<8x8x128xf32>
    %154 = vector.extract_strided_slice %152 {offsets = [0, 8, 0], sizes = [8, 8, 128], strides = [1, 1, 1]} : vector<8x16x128xf32> to vector<8x8x128xf32>
    %155 = arith.maximumf %153, %154 : vector<8x8x128xf32>
    %156 = arith.truncf %155 : vector<8x8x128xf32> to vector<8x8x128xbf16>
    %c0_169 = arith.constant 0 : index
    %c0_170 = arith.constant 0 : index
    %c0_171 = arith.constant 0 : index
    %c0_172 = arith.constant 0 : index
    %157 = vector.load %arg8[%c0_169, %c0_170, %c0_171, %c0_172] : memref<1x8x8x128xbf16, #tpu.memory_space<vmem>>, vector<1x8x8x128xbf16>
    %158 = vector.shape_cast %157 : vector<1x8x8x128xbf16> to vector<8x8x128xbf16>
    %159 = vector.shape_cast %156 : vector<8x8x128xbf16> to vector<1x8x8x128xbf16>
    tpu.vector_store %arg8[%c0_169, %c0_170, %c0_171, %c0_172], %159 {strides = array<i32>} : memref<1x8x8x128xbf16, #tpu.memory_space<vmem>>, vector<1x8x8x128xbf16>,
    return
  }
  func.func @transform_0(%arg0: i32) -> (i32, i32, i32, i32) {
    %c0_i32 = arith.constant 0 : i32
    %c0_i32_0 = arith.constant 0 : i32
    %c0_i32_1 = arith.constant 0 : i32
    %c0_i32_2 = arith.constant 0 : i32
    return %arg0, %c0_i32, %c0_i32_0, %c0_i32_1 : i32, i32, i32, i32
  }
  func.func @transform_1(%arg0: i32) -> (i32, i32, i32) {
    %c0_i32 = arith.constant 0 : i32
    %c0_i32_0 = arith.constant 0 : i32
    %c0_i32_1 = arith.constant 0 : i32
    %c0_i32_2 = arith.constant 0 : i32
    return %c0_i32, %c0_i32_0, %c0_i32_1 : i32, i32, i32
  }
  func.func @transform_2(%arg0: i32) -> (i32, i32) {
    %c0_i32 = arith.constant 0 : i32
    %c0_i32_0 = arith.constant 0 : i32
    %c0_i32_1 = arith.constant 0 : i32
    return %c0_i32, %c0_i32_0 : i32, i32
  }
  func.func @transform_3(%arg0: i32) -> (i32, i32) {
    %c0_i32 = arith.constant 0 : i32
    %c0_i32_0 = arith.constant 0 : i32
    %c0_i32_1 = arith.constant 0 : i32
    return %c0_i32, %c0_i32_0 : i32, i32
  }
  func.func @transform_4(%arg0: i32) -> (i32, i32, i32) {
    %c0_i32 = arith.constant 0 : i32
    %c0_i32_0 = arith.constant 0 : i32
    %c0_i32_1 = arith.constant 0 : i32
    %c0_i32_2 = arith.constant 0 : i32
    return %c0_i32, %c0_i32_0, %c0_i32_1 : i32, i32, i32
  }
  func.func @transform_5(%arg0: i32) -> (i32, i32) {
    %c0_i32 = arith.constant 0 : i32
    %c0_i32_0 = arith.constant 0 : i32
    %c0_i32_1 = arith.constant 0 : i32
    return %c0_i32, %c0_i32_0 : i32, i32
  }
  func.func @transform_6(%arg0: i32) -> (i32, i32) {
    %c0_i32 = arith.constant 0 : i32
    %c0_i32_0 = arith.constant 0 : i32
    %c0_i32_1 = arith.constant 0 : i32
    return %c0_i32, %c0_i32_0 : i32, i32
  }
  func.func @transform_7(%arg0: i32) -> (i32, i32, i32, i32) {
    %c0_i32 = arith.constant 0 : i32
    %c0_i32_0 = arith.constant 0 : i32
    %c0_i32_1 = arith.constant 0 : i32
    %c0_i32_2 = arith.constant 0 : i32
    return %arg0, %c0_i32, %c0_i32_0, %c0_i32_1 : i32, i32, i32, i32
  }
}

module attributes {stable_mosaic.version = 11 : i64} {
  func.func @kernel(%arg0: i32, %arg1: memref<1x8x8x128xbf16, #tpu.memory_space<vmem>>, %arg2: memref<9x128x128xbf16, #tpu.memory_space<vmem>>, %arg3: memref<1x128xf32, #tpu.memory_space<vmem>>, %arg4: memref<1x128xf32, #tpu.memory_space<vmem>>, %arg5: memref<9x128x128xbf16, #tpu.memory_space<vmem>>, %arg6: memref<1x128xf32, #tpu.memory_space<vmem>>, %arg7: memref<1x128xf32, #tpu.memory_space<vmem>>, %arg8: memref<1x4x4x128xf32, #tpu.memory_space<vmem>>, %arg9: memref<10x10x128xbf16, #tpu.memory_space<vmem>>, %arg10: memref<10x10x128xbf16, #tpu.memory_space<vmem>>) attributes {dimension_semantics = [#tpu.dimension_semantics<parallel>], iteration_bounds = array<i64: 2>, scalar_prefetch = 0 : i64, scratch_operands = 2 : i64, tpu.core_type = #tpu.core_type<tc>, window_params = [{transform_indices = @transform_0, window_bounds = array<i64: 1, 8, 8, 128>}, {pipeline_mode = #tpu.pipeline_mode<synchronous>, transform_indices = @transform_1, window_bounds = array<i64: 9, 128, 128>}, {pipeline_mode = #tpu.pipeline_mode<synchronous>, transform_indices = @transform_2, window_bounds = array<i64: 1, 128>}, {pipeline_mode = #tpu.pipeline_mode<synchronous>, transform_indices = @transform_3, window_bounds = array<i64: 1, 128>}, {pipeline_mode = #tpu.pipeline_mode<synchronous>, transform_indices = @transform_4, window_bounds = array<i64: 9, 128, 128>}, {pipeline_mode = #tpu.pipeline_mode<synchronous>, transform_indices = @transform_5, window_bounds = array<i64: 1, 128>}, {pipeline_mode = #tpu.pipeline_mode<synchronous>, transform_indices = @transform_6, window_bounds = array<i64: 1, 128>}, {transform_indices = @transform_7, window_bounds = array<i64: 1, 4, 4, 128>}]} {
    %cst = arith.constant 0.000000e+00 : bf16
    %0 = vector.broadcast %cst : bf16 to vector<1x10x128xbf16>
    %c0 = arith.constant 0 : index
    %c0_0 = arith.constant 0 : index
    %c0_1 = arith.constant 0 : index
    %1 = vector.load %arg9[%c0, %c0_0, %c0_1] : memref<10x10x128xbf16, #tpu.memory_space<vmem>>, vector<1x10x128xbf16>
    tpu.vector_store %arg9[%c0, %c0_0, %c0_1], %0 {strides = array<i32>} : memref<10x10x128xbf16, #tpu.memory_space<vmem>>, vector<1x10x128xbf16>,
    %cst_2 = arith.constant 0.000000e+00 : bf16
    %2 = vector.broadcast %cst_2 : bf16 to vector<1x10x128xbf16>
    %c9 = arith.constant 9 : index
    %c0_3 = arith.constant 0 : index
    %c0_4 = arith.constant 0 : index
    %3 = vector.load %arg9[%c9, %c0_3, %c0_4] : memref<10x10x128xbf16, #tpu.memory_space<vmem>>, vector<1x10x128xbf16>
    tpu.vector_store %arg9[%c9, %c0_3, %c0_4], %2 {strides = array<i32>} : memref<10x10x128xbf16, #tpu.memory_space<vmem>>, vector<1x10x128xbf16>,
    %cst_5 = arith.constant 0.000000e+00 : bf16
    %4 = vector.broadcast %cst_5 : bf16 to vector<8x1x128xbf16>
    %c1 = arith.constant 1 : index
    %c0_6 = arith.constant 0 : index
    %c0_7 = arith.constant 0 : index
    %5 = vector.load %arg9[%c1, %c0_6, %c0_7] : memref<10x10x128xbf16, #tpu.memory_space<vmem>>, vector<8x1x128xbf16>
    tpu.vector_store %arg9[%c1, %c0_6, %c0_7], %4 {strides = array<i32>} : memref<10x10x128xbf16, #tpu.memory_space<vmem>>, vector<8x1x128xbf16>,
    %cst_8 = arith.constant 0.000000e+00 : bf16
    %6 = vector.broadcast %cst_8 : bf16 to vector<8x1x128xbf16>
    %c1_9 = arith.constant 1 : index
    %c9_10 = arith.constant 9 : index
    %c0_11 = arith.constant 0 : index
    %7 = vector.load %arg9[%c1_9, %c9_10, %c0_11] : memref<10x10x128xbf16, #tpu.memory_space<vmem>>, vector<8x1x128xbf16>
    tpu.vector_store %arg9[%c1_9, %c9_10, %c0_11], %6 {strides = array<i32>} : memref<10x10x128xbf16, #tpu.memory_space<vmem>>, vector<8x1x128xbf16>,
    %c0_12 = arith.constant 0 : index
    %c0_13 = arith.constant 0 : index
    %c0_14 = arith.constant 0 : index
    %c0_15 = arith.constant 0 : index
    %8 = vector.load %arg1[%c0_12, %c0_13, %c0_14, %c0_15] : memref<1x8x8x128xbf16, #tpu.memory_space<vmem>>, vector<1x8x8x128xbf16>
    %9 = vector.shape_cast %8 : vector<1x8x8x128xbf16> to vector<8x8x128xbf16>
    %c1_16 = arith.constant 1 : index
    %c1_17 = arith.constant 1 : index
    %c0_18 = arith.constant 0 : index
    %10 = vector.load %arg9[%c1_16, %c1_17, %c0_18] : memref<10x10x128xbf16, #tpu.memory_space<vmem>>, vector<8x8x128xbf16>
    tpu.vector_store %arg9[%c1_16, %c1_17, %c0_18], %9 {strides = array<i32>} : memref<10x10x128xbf16, #tpu.memory_space<vmem>>, vector<8x8x128xbf16>,
    %cst_19 = arith.constant 0.000000e+00 : f32
    %11 = vector.broadcast %cst_19 : f32 to vector<64x128xf32>
    %c0_20 = arith.constant 0 : index
    %c0_21 = arith.constant 0 : index
    %c0_22 = arith.constant 0 : index
    %12 = vector.load %arg9[%c0_20, %c0_21, %c0_22] : memref<10x10x128xbf16, #tpu.memory_space<vmem>>, vector<8x8x128xbf16>
    %13 = vector.shape_cast %12 : vector<8x8x128xbf16> to vector<64x128xbf16>
    %c0_23 = arith.constant 0 : index
    %c0_24 = arith.constant 0 : index
    %c0_25 = arith.constant 0 : index
    %14 = vector.load %arg2[%c0_23, %c0_24, %c0_25] : memref<9x128x128xbf16, #tpu.memory_space<vmem>>, vector<1x128x128xbf16>
    %15 = vector.shape_cast %14 : vector<1x128x128xbf16> to vector<128x128xbf16>
    %cst_26 = arith.constant dense<0.000000e+00> : vector<64x128xf32>
    %16 = tpu.matmul %13, %15, %cst_26 {dimension_numbers = #tpu.dot_dimension_numbers<[1], [0], [0], [1], [0, 0, 1, 1], [], []>} : vector<64x128xbf16>, vector<128x128xbf16>, vector<64x128xf32> -> vector<64x128xf32>
    %17 = arith.addf %11, %16 : vector<64x128xf32>
    %c0_27 = arith.constant 0 : index
    %c1_28 = arith.constant 1 : index
    %c0_29 = arith.constant 0 : index
    %18 = vector.load %arg9[%c0_27, %c1_28, %c0_29] : memref<10x10x128xbf16, #tpu.memory_space<vmem>>, vector<8x8x128xbf16>
    %19 = vector.shape_cast %18 : vector<8x8x128xbf16> to vector<64x128xbf16>
    %c1_30 = arith.constant 1 : index
    %c0_31 = arith.constant 0 : index
    %c0_32 = arith.constant 0 : index
    %20 = vector.load %arg2[%c1_30, %c0_31, %c0_32] : memref<9x128x128xbf16, #tpu.memory_space<vmem>>, vector<1x128x128xbf16>
    %21 = vector.shape_cast %20 : vector<1x128x128xbf16> to vector<128x128xbf16>
    %cst_33 = arith.constant dense<0.000000e+00> : vector<64x128xf32>
    %22 = tpu.matmul %19, %21, %cst_33 {dimension_numbers = #tpu.dot_dimension_numbers<[1], [0], [0], [1], [0, 0, 1, 1], [], []>} : vector<64x128xbf16>, vector<128x128xbf16>, vector<64x128xf32> -> vector<64x128xf32>
    %23 = arith.addf %17, %22 : vector<64x128xf32>
    %c0_34 = arith.constant 0 : index
    %c2 = arith.constant 2 : index
    %c0_35 = arith.constant 0 : index
    %24 = vector.load %arg9[%c0_34, %c2, %c0_35] : memref<10x10x128xbf16, #tpu.memory_space<vmem>>, vector<8x8x128xbf16>
    %25 = vector.shape_cast %24 : vector<8x8x128xbf16> to vector<64x128xbf16>
    %c2_36 = arith.constant 2 : index
    %c0_37 = arith.constant 0 : index
    %c0_38 = arith.constant 0 : index
    %26 = vector.load %arg2[%c2_36, %c0_37, %c0_38] : memref<9x128x128xbf16, #tpu.memory_space<vmem>>, vector<1x128x128xbf16>
    %27 = vector.shape_cast %26 : vector<1x128x128xbf16> to vector<128x128xbf16>
    %cst_39 = arith.constant dense<0.000000e+00> : vector<64x128xf32>
    %28 = tpu.matmul %25, %27, %cst_39 {dimension_numbers = #tpu.dot_dimension_numbers<[1], [0], [0], [1], [0, 0, 1, 1], [], []>} : vector<64x128xbf16>, vector<128x128xbf16>, vector<64x128xf32> -> vector<64x128xf32>
    %29 = arith.addf %23, %28 : vector<64x128xf32>
    %c1_40 = arith.constant 1 : index
    %c0_41 = arith.constant 0 : index
    %c0_42 = arith.constant 0 : index
    %30 = vector.load %arg9[%c1_40, %c0_41, %c0_42] : memref<10x10x128xbf16, #tpu.memory_space<vmem>>, vector<8x8x128xbf16>
    %31 = vector.shape_cast %30 : vector<8x8x128xbf16> to vector<64x128xbf16>
    %c3 = arith.constant 3 : index
    %c0_43 = arith.constant 0 : index
    %c0_44 = arith.constant 0 : index
    %32 = vector.load %arg2[%c3, %c0_43, %c0_44] : memref<9x128x128xbf16, #tpu.memory_space<vmem>>, vector<1x128x128xbf16>
    %33 = vector.shape_cast %32 : vector<1x128x128xbf16> to vector<128x128xbf16>
    %cst_45 = arith.constant dense<0.000000e+00> : vector<64x128xf32>
    %34 = tpu.matmul %31, %33, %cst_45 {dimension_numbers = #tpu.dot_dimension_numbers<[1], [0], [0], [1], [0, 0, 1, 1], [], []>} : vector<64x128xbf16>, vector<128x128xbf16>, vector<64x128xf32> -> vector<64x128xf32>
    %35 = arith.addf %29, %34 : vector<64x128xf32>
    %c1_46 = arith.constant 1 : index
    %c1_47 = arith.constant 1 : index
    %c0_48 = arith.constant 0 : index
    %36 = vector.load %arg9[%c1_46, %c1_47, %c0_48] : memref<10x10x128xbf16, #tpu.memory_space<vmem>>, vector<8x8x128xbf16>
    %37 = vector.shape_cast %36 : vector<8x8x128xbf16> to vector<64x128xbf16>
    %c4 = arith.constant 4 : index
    %c0_49 = arith.constant 0 : index
    %c0_50 = arith.constant 0 : index
    %38 = vector.load %arg2[%c4, %c0_49, %c0_50] : memref<9x128x128xbf16, #tpu.memory_space<vmem>>, vector<1x128x128xbf16>
    %39 = vector.shape_cast %38 : vector<1x128x128xbf16> to vector<128x128xbf16>
    %cst_51 = arith.constant dense<0.000000e+00> : vector<64x128xf32>
    %40 = tpu.matmul %37, %39, %cst_51 {dimension_numbers = #tpu.dot_dimension_numbers<[1], [0], [0], [1], [0, 0, 1, 1], [], []>} : vector<64x128xbf16>, vector<128x128xbf16>, vector<64x128xf32> -> vector<64x128xf32>
    %41 = arith.addf %35, %40 : vector<64x128xf32>
    %c1_52 = arith.constant 1 : index
    %c2_53 = arith.constant 2 : index
    %c0_54 = arith.constant 0 : index
    %42 = vector.load %arg9[%c1_52, %c2_53, %c0_54] : memref<10x10x128xbf16, #tpu.memory_space<vmem>>, vector<8x8x128xbf16>
    %43 = vector.shape_cast %42 : vector<8x8x128xbf16> to vector<64x128xbf16>
    %c5 = arith.constant 5 : index
    %c0_55 = arith.constant 0 : index
    %c0_56 = arith.constant 0 : index
    %44 = vector.load %arg2[%c5, %c0_55, %c0_56] : memref<9x128x128xbf16, #tpu.memory_space<vmem>>, vector<1x128x128xbf16>
    %45 = vector.shape_cast %44 : vector<1x128x128xbf16> to vector<128x128xbf16>
    %cst_57 = arith.constant dense<0.000000e+00> : vector<64x128xf32>
    %46 = tpu.matmul %43, %45, %cst_57 {dimension_numbers = #tpu.dot_dimension_numbers<[1], [0], [0], [1], [0, 0, 1, 1], [], []>} : vector<64x128xbf16>, vector<128x128xbf16>, vector<64x128xf32> -> vector<64x128xf32>
    %47 = arith.addf %41, %46 : vector<64x128xf32>
    %c2_58 = arith.constant 2 : index
    %c0_59 = arith.constant 0 : index
    %c0_60 = arith.constant 0 : index
    %48 = vector.load %arg9[%c2_58, %c0_59, %c0_60] : memref<10x10x128xbf16, #tpu.memory_space<vmem>>, vector<8x8x128xbf16>
    %49 = vector.shape_cast %48 : vector<8x8x128xbf16> to vector<64x128xbf16>
    %c6 = arith.constant 6 : index
    %c0_61 = arith.constant 0 : index
    %c0_62 = arith.constant 0 : index
    %50 = vector.load %arg2[%c6, %c0_61, %c0_62] : memref<9x128x128xbf16, #tpu.memory_space<vmem>>, vector<1x128x128xbf16>
    %51 = vector.shape_cast %50 : vector<1x128x128xbf16> to vector<128x128xbf16>
    %cst_63 = arith.constant dense<0.000000e+00> : vector<64x128xf32>
    %52 = tpu.matmul %49, %51, %cst_63 {dimension_numbers = #tpu.dot_dimension_numbers<[1], [0], [0], [1], [0, 0, 1, 1], [], []>} : vector<64x128xbf16>, vector<128x128xbf16>, vector<64x128xf32> -> vector<64x128xf32>
    %53 = arith.addf %47, %52 : vector<64x128xf32>
    %c2_64 = arith.constant 2 : index
    %c1_65 = arith.constant 1 : index
    %c0_66 = arith.constant 0 : index
    %54 = vector.load %arg9[%c2_64, %c1_65, %c0_66] : memref<10x10x128xbf16, #tpu.memory_space<vmem>>, vector<8x8x128xbf16>
    %55 = vector.shape_cast %54 : vector<8x8x128xbf16> to vector<64x128xbf16>
    %c7 = arith.constant 7 : index
    %c0_67 = arith.constant 0 : index
    %c0_68 = arith.constant 0 : index
    %56 = vector.load %arg2[%c7, %c0_67, %c0_68] : memref<9x128x128xbf16, #tpu.memory_space<vmem>>, vector<1x128x128xbf16>
    %57 = vector.shape_cast %56 : vector<1x128x128xbf16> to vector<128x128xbf16>
    %cst_69 = arith.constant dense<0.000000e+00> : vector<64x128xf32>
    %58 = tpu.matmul %55, %57, %cst_69 {dimension_numbers = #tpu.dot_dimension_numbers<[1], [0], [0], [1], [0, 0, 1, 1], [], []>} : vector<64x128xbf16>, vector<128x128xbf16>, vector<64x128xf32> -> vector<64x128xf32>
    %59 = arith.addf %53, %58 : vector<64x128xf32>
    %c2_70 = arith.constant 2 : index
    %c2_71 = arith.constant 2 : index
    %c0_72 = arith.constant 0 : index
    %60 = vector.load %arg9[%c2_70, %c2_71, %c0_72] : memref<10x10x128xbf16, #tpu.memory_space<vmem>>, vector<8x8x128xbf16>
    %61 = vector.shape_cast %60 : vector<8x8x128xbf16> to vector<64x128xbf16>
    %c8 = arith.constant 8 : index
    %c0_73 = arith.constant 0 : index
    %c0_74 = arith.constant 0 : index
    %62 = vector.load %arg2[%c8, %c0_73, %c0_74] : memref<9x128x128xbf16, #tpu.memory_space<vmem>>, vector<1x128x128xbf16>
    %63 = vector.shape_cast %62 : vector<1x128x128xbf16> to vector<128x128xbf16>
    %cst_75 = arith.constant dense<0.000000e+00> : vector<64x128xf32>
    %64 = tpu.matmul %61, %63, %cst_75 {dimension_numbers = #tpu.dot_dimension_numbers<[1], [0], [0], [1], [0, 0, 1, 1], [], []>} : vector<64x128xbf16>, vector<128x128xbf16>, vector<64x128xf32> -> vector<64x128xf32>
    %65 = arith.addf %59, %64 : vector<64x128xf32>
    %c0_76 = arith.constant 0 : index
    %c0_77 = arith.constant 0 : index
    %66 = vector.load %arg3[%c0_76, %c0_77] : memref<1x128xf32, #tpu.memory_space<vmem>>, vector<1x128xf32>
    %67 = vector.broadcast %66 : vector<1x128xf32> to vector<64x128xf32>
    %68 = arith.mulf %65, %67 : vector<64x128xf32>
    %c0_78 = arith.constant 0 : index
    %c0_79 = arith.constant 0 : index
    %69 = vector.load %arg4[%c0_78, %c0_79] : memref<1x128xf32, #tpu.memory_space<vmem>>, vector<1x128xf32>
    %70 = vector.broadcast %69 : vector<1x128xf32> to vector<64x128xf32>
    %71 = arith.addf %68, %70 : vector<64x128xf32>
    %cst_80 = arith.constant 0.000000e+00 : f32
    %72 = vector.broadcast %cst_80 : f32 to vector<64x128xf32>
    %73 = arith.maximumf %71, %72 : vector<64x128xf32>
    %cst_81 = arith.constant 0.000000e+00 : bf16
    %74 = vector.broadcast %cst_81 : bf16 to vector<1x10x128xbf16>
    %c0_82 = arith.constant 0 : index
    %c0_83 = arith.constant 0 : index
    %c0_84 = arith.constant 0 : index
    %75 = vector.load %arg10[%c0_82, %c0_83, %c0_84] : memref<10x10x128xbf16, #tpu.memory_space<vmem>>, vector<1x10x128xbf16>
    tpu.vector_store %arg10[%c0_82, %c0_83, %c0_84], %74 {strides = array<i32>} : memref<10x10x128xbf16, #tpu.memory_space<vmem>>, vector<1x10x128xbf16>,
    %cst_85 = arith.constant 0.000000e+00 : bf16
    %76 = vector.broadcast %cst_85 : bf16 to vector<1x10x128xbf16>
    %c9_86 = arith.constant 9 : index
    %c0_87 = arith.constant 0 : index
    %c0_88 = arith.constant 0 : index
    %77 = vector.load %arg10[%c9_86, %c0_87, %c0_88] : memref<10x10x128xbf16, #tpu.memory_space<vmem>>, vector<1x10x128xbf16>
    tpu.vector_store %arg10[%c9_86, %c0_87, %c0_88], %76 {strides = array<i32>} : memref<10x10x128xbf16, #tpu.memory_space<vmem>>, vector<1x10x128xbf16>,
    %cst_89 = arith.constant 0.000000e+00 : bf16
    %78 = vector.broadcast %cst_89 : bf16 to vector<8x1x128xbf16>
    %c1_90 = arith.constant 1 : index
    %c0_91 = arith.constant 0 : index
    %c0_92 = arith.constant 0 : index
    %79 = vector.load %arg10[%c1_90, %c0_91, %c0_92] : memref<10x10x128xbf16, #tpu.memory_space<vmem>>, vector<8x1x128xbf16>
    tpu.vector_store %arg10[%c1_90, %c0_91, %c0_92], %78 {strides = array<i32>} : memref<10x10x128xbf16, #tpu.memory_space<vmem>>, vector<8x1x128xbf16>,
    %cst_93 = arith.constant 0.000000e+00 : bf16
    %80 = vector.broadcast %cst_93 : bf16 to vector<8x1x128xbf16>
    %c1_94 = arith.constant 1 : index
    %c9_95 = arith.constant 9 : index
    %c0_96 = arith.constant 0 : index
    %81 = vector.load %arg10[%c1_94, %c9_95, %c0_96] : memref<10x10x128xbf16, #tpu.memory_space<vmem>>, vector<8x1x128xbf16>
    tpu.vector_store %arg10[%c1_94, %c9_95, %c0_96], %80 {strides = array<i32>} : memref<10x10x128xbf16, #tpu.memory_space<vmem>>, vector<8x1x128xbf16>,
    %82 = vector.shape_cast %73 : vector<64x128xf32> to vector<8x8x128xf32>
    %83 = arith.truncf %82 : vector<8x8x128xf32> to vector<8x8x128xbf16>
    %c1_97 = arith.constant 1 : index
    %c1_98 = arith.constant 1 : index
    %c0_99 = arith.constant 0 : index
    %84 = vector.load %arg10[%c1_97, %c1_98, %c0_99] : memref<10x10x128xbf16, #tpu.memory_space<vmem>>, vector<8x8x128xbf16>
    tpu.vector_store %arg10[%c1_97, %c1_98, %c0_99], %83 {strides = array<i32>} : memref<10x10x128xbf16, #tpu.memory_space<vmem>>, vector<8x8x128xbf16>,
    %cst_100 = arith.constant 0.000000e+00 : f32
    %85 = vector.broadcast %cst_100 : f32 to vector<64x128xf32>
    %c0_101 = arith.constant 0 : index
    %c0_102 = arith.constant 0 : index
    %c0_103 = arith.constant 0 : index
    %86 = vector.load %arg10[%c0_101, %c0_102, %c0_103] : memref<10x10x128xbf16, #tpu.memory_space<vmem>>, vector<8x8x128xbf16>
    %87 = vector.shape_cast %86 : vector<8x8x128xbf16> to vector<64x128xbf16>
    %c0_104 = arith.constant 0 : index
    %c0_105 = arith.constant 0 : index
    %c0_106 = arith.constant 0 : index
    %88 = vector.load %arg5[%c0_104, %c0_105, %c0_106] : memref<9x128x128xbf16, #tpu.memory_space<vmem>>, vector<1x128x128xbf16>
    %89 = vector.shape_cast %88 : vector<1x128x128xbf16> to vector<128x128xbf16>
    %cst_107 = arith.constant dense<0.000000e+00> : vector<64x128xf32>
    %90 = tpu.matmul %87, %89, %cst_107 {dimension_numbers = #tpu.dot_dimension_numbers<[1], [0], [0], [1], [0, 0, 1, 1], [], []>} : vector<64x128xbf16>, vector<128x128xbf16>, vector<64x128xf32> -> vector<64x128xf32>
    %91 = arith.addf %85, %90 : vector<64x128xf32>
    %c0_108 = arith.constant 0 : index
    %c1_109 = arith.constant 1 : index
    %c0_110 = arith.constant 0 : index
    %92 = vector.load %arg10[%c0_108, %c1_109, %c0_110] : memref<10x10x128xbf16, #tpu.memory_space<vmem>>, vector<8x8x128xbf16>
    %93 = vector.shape_cast %92 : vector<8x8x128xbf16> to vector<64x128xbf16>
    %c1_111 = arith.constant 1 : index
    %c0_112 = arith.constant 0 : index
    %c0_113 = arith.constant 0 : index
    %94 = vector.load %arg5[%c1_111, %c0_112, %c0_113] : memref<9x128x128xbf16, #tpu.memory_space<vmem>>, vector<1x128x128xbf16>
    %95 = vector.shape_cast %94 : vector<1x128x128xbf16> to vector<128x128xbf16>
    %cst_114 = arith.constant dense<0.000000e+00> : vector<64x128xf32>
    %96 = tpu.matmul %93, %95, %cst_114 {dimension_numbers = #tpu.dot_dimension_numbers<[1], [0], [0], [1], [0, 0, 1, 1], [], []>} : vector<64x128xbf16>, vector<128x128xbf16>, vector<64x128xf32> -> vector<64x128xf32>
    %97 = arith.addf %91, %96 : vector<64x128xf32>
    %c0_115 = arith.constant 0 : index
    %c2_116 = arith.constant 2 : index
    %c0_117 = arith.constant 0 : index
    %98 = vector.load %arg10[%c0_115, %c2_116, %c0_117] : memref<10x10x128xbf16, #tpu.memory_space<vmem>>, vector<8x8x128xbf16>
    %99 = vector.shape_cast %98 : vector<8x8x128xbf16> to vector<64x128xbf16>
    %c2_118 = arith.constant 2 : index
    %c0_119 = arith.constant 0 : index
    %c0_120 = arith.constant 0 : index
    %100 = vector.load %arg5[%c2_118, %c0_119, %c0_120] : memref<9x128x128xbf16, #tpu.memory_space<vmem>>, vector<1x128x128xbf16>
    %101 = vector.shape_cast %100 : vector<1x128x128xbf16> to vector<128x128xbf16>
    %cst_121 = arith.constant dense<0.000000e+00> : vector<64x128xf32>
    %102 = tpu.matmul %99, %101, %cst_121 {dimension_numbers = #tpu.dot_dimension_numbers<[1], [0], [0], [1], [0, 0, 1, 1], [], []>} : vector<64x128xbf16>, vector<128x128xbf16>, vector<64x128xf32> -> vector<64x128xf32>
    %103 = arith.addf %97, %102 : vector<64x128xf32>
    %c1_122 = arith.constant 1 : index
    %c0_123 = arith.constant 0 : index
    %c0_124 = arith.constant 0 : index
    %104 = vector.load %arg10[%c1_122, %c0_123, %c0_124] : memref<10x10x128xbf16, #tpu.memory_space<vmem>>, vector<8x8x128xbf16>
    %105 = vector.shape_cast %104 : vector<8x8x128xbf16> to vector<64x128xbf16>
    %c3_125 = arith.constant 3 : index
    %c0_126 = arith.constant 0 : index
    %c0_127 = arith.constant 0 : index
    %106 = vector.load %arg5[%c3_125, %c0_126, %c0_127] : memref<9x128x128xbf16, #tpu.memory_space<vmem>>, vector<1x128x128xbf16>
    %107 = vector.shape_cast %106 : vector<1x128x128xbf16> to vector<128x128xbf16>
    %cst_128 = arith.constant dense<0.000000e+00> : vector<64x128xf32>
    %108 = tpu.matmul %105, %107, %cst_128 {dimension_numbers = #tpu.dot_dimension_numbers<[1], [0], [0], [1], [0, 0, 1, 1], [], []>} : vector<64x128xbf16>, vector<128x128xbf16>, vector<64x128xf32> -> vector<64x128xf32>
    %109 = arith.addf %103, %108 : vector<64x128xf32>
    %c1_129 = arith.constant 1 : index
    %c1_130 = arith.constant 1 : index
    %c0_131 = arith.constant 0 : index
    %110 = vector.load %arg10[%c1_129, %c1_130, %c0_131] : memref<10x10x128xbf16, #tpu.memory_space<vmem>>, vector<8x8x128xbf16>
    %111 = vector.shape_cast %110 : vector<8x8x128xbf16> to vector<64x128xbf16>
    %c4_132 = arith.constant 4 : index
    %c0_133 = arith.constant 0 : index
    %c0_134 = arith.constant 0 : index
    %112 = vector.load %arg5[%c4_132, %c0_133, %c0_134] : memref<9x128x128xbf16, #tpu.memory_space<vmem>>, vector<1x128x128xbf16>
    %113 = vector.shape_cast %112 : vector<1x128x128xbf16> to vector<128x128xbf16>
    %cst_135 = arith.constant dense<0.000000e+00> : vector<64x128xf32>
    %114 = tpu.matmul %111, %113, %cst_135 {dimension_numbers = #tpu.dot_dimension_numbers<[1], [0], [0], [1], [0, 0, 1, 1], [], []>} : vector<64x128xbf16>, vector<128x128xbf16>, vector<64x128xf32> -> vector<64x128xf32>
    %115 = arith.addf %109, %114 : vector<64x128xf32>
    %c1_136 = arith.constant 1 : index
    %c2_137 = arith.constant 2 : index
    %c0_138 = arith.constant 0 : index
    %116 = vector.load %arg10[%c1_136, %c2_137, %c0_138] : memref<10x10x128xbf16, #tpu.memory_space<vmem>>, vector<8x8x128xbf16>
    %117 = vector.shape_cast %116 : vector<8x8x128xbf16> to vector<64x128xbf16>
    %c5_139 = arith.constant 5 : index
    %c0_140 = arith.constant 0 : index
    %c0_141 = arith.constant 0 : index
    %118 = vector.load %arg5[%c5_139, %c0_140, %c0_141] : memref<9x128x128xbf16, #tpu.memory_space<vmem>>, vector<1x128x128xbf16>
    %119 = vector.shape_cast %118 : vector<1x128x128xbf16> to vector<128x128xbf16>
    %cst_142 = arith.constant dense<0.000000e+00> : vector<64x128xf32>
    %120 = tpu.matmul %117, %119, %cst_142 {dimension_numbers = #tpu.dot_dimension_numbers<[1], [0], [0], [1], [0, 0, 1, 1], [], []>} : vector<64x128xbf16>, vector<128x128xbf16>, vector<64x128xf32> -> vector<64x128xf32>
    %121 = arith.addf %115, %120 : vector<64x128xf32>
    %c2_143 = arith.constant 2 : index
    %c0_144 = arith.constant 0 : index
    %c0_145 = arith.constant 0 : index
    %122 = vector.load %arg10[%c2_143, %c0_144, %c0_145] : memref<10x10x128xbf16, #tpu.memory_space<vmem>>, vector<8x8x128xbf16>
    %123 = vector.shape_cast %122 : vector<8x8x128xbf16> to vector<64x128xbf16>
    %c6_146 = arith.constant 6 : index
    %c0_147 = arith.constant 0 : index
    %c0_148 = arith.constant 0 : index
    %124 = vector.load %arg5[%c6_146, %c0_147, %c0_148] : memref<9x128x128xbf16, #tpu.memory_space<vmem>>, vector<1x128x128xbf16>
    %125 = vector.shape_cast %124 : vector<1x128x128xbf16> to vector<128x128xbf16>
    %cst_149 = arith.constant dense<0.000000e+00> : vector<64x128xf32>
    %126 = tpu.matmul %123, %125, %cst_149 {dimension_numbers = #tpu.dot_dimension_numbers<[1], [0], [0], [1], [0, 0, 1, 1], [], []>} : vector<64x128xbf16>, vector<128x128xbf16>, vector<64x128xf32> -> vector<64x128xf32>
    %127 = arith.addf %121, %126 : vector<64x128xf32>
    %c2_150 = arith.constant 2 : index
    %c1_151 = arith.constant 1 : index
    %c0_152 = arith.constant 0 : index
    %128 = vector.load %arg10[%c2_150, %c1_151, %c0_152] : memref<10x10x128xbf16, #tpu.memory_space<vmem>>, vector<8x8x128xbf16>
    %129 = vector.shape_cast %128 : vector<8x8x128xbf16> to vector<64x128xbf16>
    %c7_153 = arith.constant 7 : index
    %c0_154 = arith.constant 0 : index
    %c0_155 = arith.constant 0 : index
    %130 = vector.load %arg5[%c7_153, %c0_154, %c0_155] : memref<9x128x128xbf16, #tpu.memory_space<vmem>>, vector<1x128x128xbf16>
    %131 = vector.shape_cast %130 : vector<1x128x128xbf16> to vector<128x128xbf16>
    %cst_156 = arith.constant dense<0.000000e+00> : vector<64x128xf32>
    %132 = tpu.matmul %129, %131, %cst_156 {dimension_numbers = #tpu.dot_dimension_numbers<[1], [0], [0], [1], [0, 0, 1, 1], [], []>} : vector<64x128xbf16>, vector<128x128xbf16>, vector<64x128xf32> -> vector<64x128xf32>
    %133 = arith.addf %127, %132 : vector<64x128xf32>
    %c2_157 = arith.constant 2 : index
    %c2_158 = arith.constant 2 : index
    %c0_159 = arith.constant 0 : index
    %134 = vector.load %arg10[%c2_157, %c2_158, %c0_159] : memref<10x10x128xbf16, #tpu.memory_space<vmem>>, vector<8x8x128xbf16>
    %135 = vector.shape_cast %134 : vector<8x8x128xbf16> to vector<64x128xbf16>
    %c8_160 = arith.constant 8 : index
    %c0_161 = arith.constant 0 : index
    %c0_162 = arith.constant 0 : index
    %136 = vector.load %arg5[%c8_160, %c0_161, %c0_162] : memref<9x128x128xbf16, #tpu.memory_space<vmem>>, vector<1x128x128xbf16>
    %137 = vector.shape_cast %136 : vector<1x128x128xbf16> to vector<128x128xbf16>
    %cst_163 = arith.constant dense<0.000000e+00> : vector<64x128xf32>
    %138 = tpu.matmul %135, %137, %cst_163 {dimension_numbers = #tpu.dot_dimension_numbers<[1], [0], [0], [1], [0, 0, 1, 1], [], []>} : vector<64x128xbf16>, vector<128x128xbf16>, vector<64x128xf32> -> vector<64x128xf32>
    %139 = arith.addf %133, %138 : vector<64x128xf32>
    %c0_164 = arith.constant 0 : index
    %c0_165 = arith.constant 0 : index
    %140 = vector.load %arg6[%c0_164, %c0_165] : memref<1x128xf32, #tpu.memory_space<vmem>>, vector<1x128xf32>
    %141 = vector.broadcast %140 : vector<1x128xf32> to vector<64x128xf32>
    %142 = arith.mulf %139, %141 : vector<64x128xf32>
    %c0_166 = arith.constant 0 : index
    %c0_167 = arith.constant 0 : index
    %143 = vector.load %arg7[%c0_166, %c0_167] : memref<1x128xf32, #tpu.memory_space<vmem>>, vector<1x128xf32>
    %144 = vector.broadcast %143 : vector<1x128xf32> to vector<64x128xf32>
    %145 = arith.addf %142, %144 : vector<64x128xf32>
    %cst_168 = arith.constant 0.000000e+00 : f32
    %146 = vector.broadcast %cst_168 : f32 to vector<64x128xf32>
    %147 = arith.maximumf %145, %146 : vector<64x128xf32>
    %148 = vector.shape_cast %147 : vector<64x128xf32> to vector<32x256xf32>
    %149 = vector.extract_strided_slice %148 {offsets = [0, 0], sizes = [32, 128], strides = [1, 1]} : vector<32x256xf32> to vector<32x128xf32>
    %150 = vector.extract_strided_slice %148 {offsets = [0, 128], sizes = [32, 128], strides = [1, 1]} : vector<32x256xf32> to vector<32x128xf32>
    %151 = arith.maximumf %149, %150 : vector<32x128xf32>
    %152 = vector.shape_cast %151 : vector<32x128xf32> to vector<4x8x128xf32>
    %153 = vector.extract_strided_slice %152 {offsets = [0, 0, 0], sizes = [4, 4, 128], strides = [1, 1, 1]} : vector<4x8x128xf32> to vector<4x4x128xf32>
    %154 = vector.extract_strided_slice %152 {offsets = [0, 4, 0], sizes = [4, 4, 128], strides = [1, 1, 1]} : vector<4x8x128xf32> to vector<4x4x128xf32>
    %155 = arith.maximumf %153, %154 : vector<4x4x128xf32>
    %c0_169 = arith.constant 0 : index
    %c0_170 = arith.constant 0 : index
    %c0_171 = arith.constant 0 : index
    %c0_172 = arith.constant 0 : index
    %156 = vector.load %arg8[%c0_169, %c0_170, %c0_171, %c0_172] : memref<1x4x4x128xf32, #tpu.memory_space<vmem>>, vector<1x4x4x128xf32>
    %157 = vector.shape_cast %156 : vector<1x4x4x128xf32> to vector<4x4x128xf32>
    %158 = vector.shape_cast %155 : vector<4x4x128xf32> to vector<1x4x4x128xf32>
    tpu.vector_store %arg8[%c0_169, %c0_170, %c0_171, %c0_172], %158 {strides = array<i32>} : memref<1x4x4x128xf32, #tpu.memory_space<vmem>>, vector<1x4x4x128xf32>,
    return
  }
  func.func @transform_0(%arg0: i32) -> (i32, i32, i32, i32) {
    %c0_i32 = arith.constant 0 : i32
    %c0_i32_0 = arith.constant 0 : i32
    %c0_i32_1 = arith.constant 0 : i32
    %c0_i32_2 = arith.constant 0 : i32
    return %arg0, %c0_i32, %c0_i32_0, %c0_i32_1 : i32, i32, i32, i32
  }
  func.func @transform_1(%arg0: i32) -> (i32, i32, i32) {
    %c0_i32 = arith.constant 0 : i32
    %c0_i32_0 = arith.constant 0 : i32
    %c0_i32_1 = arith.constant 0 : i32
    %c0_i32_2 = arith.constant 0 : i32
    return %c0_i32, %c0_i32_0, %c0_i32_1 : i32, i32, i32
  }
  func.func @transform_2(%arg0: i32) -> (i32, i32) {
    %c0_i32 = arith.constant 0 : i32
    %c0_i32_0 = arith.constant 0 : i32
    %c0_i32_1 = arith.constant 0 : i32
    return %c0_i32, %c0_i32_0 : i32, i32
  }
  func.func @transform_3(%arg0: i32) -> (i32, i32) {
    %c0_i32 = arith.constant 0 : i32
    %c0_i32_0 = arith.constant 0 : i32
    %c0_i32_1 = arith.constant 0 : i32
    return %c0_i32, %c0_i32_0 : i32, i32
  }
  func.func @transform_4(%arg0: i32) -> (i32, i32, i32) {
    %c0_i32 = arith.constant 0 : i32
    %c0_i32_0 = arith.constant 0 : i32
    %c0_i32_1 = arith.constant 0 : i32
    %c0_i32_2 = arith.constant 0 : i32
    return %c0_i32, %c0_i32_0, %c0_i32_1 : i32, i32, i32
  }
  func.func @transform_5(%arg0: i32) -> (i32, i32) {
    %c0_i32 = arith.constant 0 : i32
    %c0_i32_0 = arith.constant 0 : i32
    %c0_i32_1 = arith.constant 0 : i32
    return %c0_i32, %c0_i32_0 : i32, i32
  }
  func.func @transform_6(%arg0: i32) -> (i32, i32) {
    %c0_i32 = arith.constant 0 : i32
    %c0_i32_0 = arith.constant 0 : i32
    %c0_i32_1 = arith.constant 0 : i32
    return %c0_i32, %c0_i32_0 : i32, i32
  }
  func.func @transform_7(%arg0: i32) -> (i32, i32, i32, i32) {
    %c0_i32 = arith.constant 0 : i32
    %c0_i32_0 = arith.constant 0 : i32
    %c0_i32_1 = arith.constant 0 : i32
    %c0_i32_2 = arith.constant 0 : i32
    return %arg0, %c0_i32, %c0_i32_0, %c0_i32_1 : i32, i32, i32, i32
  }
}

</mosaic_0001>

<bundles_post_ra>
// kernel: encoder_forward.3
= control target key start
LH: loop header
LB: loop body
LE: loop exit
PB: predicated region body
PF: predicated region fallthrough
CT: control target
= control target key end

     0   :  { %s6405_s24 = smov 0   ;;  %s7578_s0 = inlined_call_operand.vmem [shape: bf16[2,8,8,128], index: 0, kind: input, shape index: {}]   ;;  %s7579_s1 = inlined_call_operand.vmem [shape: bf16[9,128,128], index: 1, kind: input, shape index: {}]   ;;  %s7580_s2 = inlined_call_operand.vmem [shape: f32[1,128], index: 2, kind: input, shape index: {}]   ;;  %s7581_s3 = inlined_call_operand.vmem [shape: f32[1,128], index: 3, kind: input, shape index: {}]   ;;  %s7582_s4 = inlined_call_operand.vmem [shape: bf16[9,128,128], index: 4, kind: input, shape index: {}]   ;;  %s7583_s5 = inlined_call_operand.vmem [shape: f32[1,128], index: 5, kind: input, shape index: {}]   ;;  %s7584_s6 = inlined_call_operand.vmem [shape: f32[1,128], index: 6, kind: input, shape index: {}]   ;;  %s7585_s7 = inlined_call_operand.vmem [shape: f32[2,4,4,128], index: 7, kind: output, shape index: {}]  }
   0x1 LB: > { %s4848_s25 = sadd.s32 4294967295, %s6361_s24   ;;  %p4852_p0 = scmp.ge.s32.totalorder %s6361_s24, 1  ;;  %s6361_s24 = sphi %s6405_s24, %s17_s24  }
   0x2   : > { %p237_p1 = scmp.lt.s32.totalorder %s6361_s24, 3 }
   0x4   : > { %p238_p2 = pnand %p4852_p0, %p237_p1 }
   0x5   : > { %v6187_v0 = vld [vmem:[%s7579_s1 + $0x40] sm:$0xff] (!%p238_p2)   ;;  %p269_p3 = scmp.lt.s32.totalorder (!%p238_p2), %s4848_s25, 1  ;;  %v6188_v1 = vld [vmem:[%s7579_s1 + $0x48] sm:$0xff] (!%p238_p2)   ;;  %v6363_v2 = vmov (!%p238_p2), 0   ;;  %v6189_v3 = vld [vmem:[%s7579_s1 + $0x50] sm:$0xff] (!%p238_p2)   ;;  %vm286_vm0 = vcmask (!%p238_p2), 1040384  }
   0x6   : > { %241 = sbr.rel (%p238_p2) target bundleno = 1053 (0x41d), region = 48  ;;  %5617 = vmatprep.subr.bf16.mxu0 (!%p238_p2), %v6187_v0  ;;  %280 = vst [vmem:[#allocation2] sm:$0xf] (!%p238_p2), %v6363_v2  ;;  %281 = vst [vmem:[#allocation2 + $0x4] sm:$0x1] (!%p238_p2), %v6363_v2  ;;  %v6190_v4 = vld [vmem:[%s7579_s1 + $0x58] sm:$0xff] (!%p238_p2)  }
   0x7   : > { %283 = vst [vmem:[#allocation2 + $0x48] sm:$0xf] (!%p238_p2), %v6363_v2  ;;  %284 = vst [vmem:[#allocation2 + $0x4c] sm:$0x1] (!%p238_p2), %v6363_v2  ;;  %5618 = vmatpush3.bf16.msra.mxu0 (!%p238_p2), %v6187_v0  ;;  %vm287_vm1 = vsmask.f32 (!%p238_p2), 256 }
   0x8   : > { %2483 = vst [vmem:[#allocation3] sm:$0xf] (!%p238_p2), %v6363_v2  ;;  %2484 = vst [vmem:[#allocation3 + $0x4] sm:$0x1] (!%p238_p2), %v6363_v2  ;;  %5619 = vmatprep.subr.bf16.mxu0 (!%p238_p2), %v6188_v1  ;;  %v289_v5 = vld [vmem:[#allocation2 + $0x8] sm:$0x1] (!%p238_p2) }
   0x9   : > { %2486 = vst [vmem:[#allocation3 + $0x48] sm:$0xf] (!%p238_p2), %v6363_v2  ;;  %2487 = vst [vmem:[#allocation3 + $0x4c] sm:$0x1] (!%p238_p2), %v6363_v2  ;;  %vm313_vm2 = vsmask.f32 (!%p238_p2), 7938 }
   0xa   : > { %vm6433_vm3 = vmand (!%p238_p2), %vm286_vm0, %vm287_vm1  ;;  %v315_v7 = vld [vmem:[#allocation2 + $0xc] sm:$0x1] (!%p238_p2)  ;;  %v6191_v16 = vld [vmem:[%s7579_s1 + $0x60] sm:$0xff] (!%p238_p2)   ;;  %vm427_vm5 = vcmask (!%p238_p2), 1043456   ;;  %vm509_vm7 = vsmask.f32 (!%p238_p2), 3328 }
   0xb   : > { %5620 = vmatpush3.bf16.msra.mxu0 (!%p238_p2), %v6188_v1  ;;  %v290_v9 = vsel (!%p238_p2), %vm6433_vm3, 0, %v289_v5  ;;  %vm6441_vm4 = vmand (!%p238_p2), %vm286_vm0, %vm313_vm2  ;;  %v292_v18 = vld [vmem:[#allocation2 + $0x10] sm:$0x1] (!%p238_p2)  ;;  %v6192_v19 = vld [vmem:[%s7579_s1 + $0x68] sm:$0xff] (!%p238_p2)   ;;  %vm510_vm8 = vsmask.f32 (!%p238_p2), 7440 }
   0xc   : > { %5621 = vmatprep.subr.bf16.mxu0 (!%p238_p2), %v6189_v3  ;;  %291 = vst [vmem:[#allocation2 + $0x8] sm:$0x1] (!%p238_p2), %v290_v9  ;;  %v316_v12 = vsel (!%p238_p2), %vm6441_vm4, 0, %v315_v7  ;;  %v295_v24 = vld [vmem:[#allocation2 + $0x18] sm:$0x1] (!%p238_p2)  ;;  %v293_v26 = vsel (!%p238_p2), %vm6433_vm3, 0, %v292_v18  ;;  %vm6466_vm6 = vmand (!%p238_p2), %vm427_vm5, %vm313_vm2 }
   0xd   : > { %s7597_s25 = smov (!%p269_p3, %s4848_s25), 1  ;;  %v6447_v14 = vld [vmem:[#allocation2] sm:$0xf]  ;;  %v6449_v15 = vld [vmem:[#allocation2 + $0x4] sm:$0x1]  ;;  %v296_v27 = vsel %vm6433_vm3, 0, %v295_v24  ;;  %vm6519_vm9 = vmor %vm509_vm7, %vm510_vm8 }
   0xe   : > { %s5391_s9 = sshll.u32 %s7597_s25, 5  ;;  %317 = vst [vmem:[#allocation2 + $0xc] sm:$0x1] %v316_v12  ;;  %v513_v21 = vshrl.u32 %v6447_v14, 16  ;;  %v516_v22 = vshll.u32 %v6447_v14, 16  ;;  %v522_v23 = vshll.u32 %v6449_v15, 16 }
   0xf   : > { %s6428_s12 = scalar_lea.vmem %s7578_s0, %s5391_s9  ;;  %5622 = vmatpush3.bf16.msra.mxu0 %v6189_v3  ;;  %v318_v28 = vld [vmem:[#allocation2 + $0x14] sm:$0x1]  ;;  %v321_v29 = vld [vmem:[#allocation2 + $0x1c] sm:$0x1]  ;;  %294 = vst [vmem:[#allocation2 + $0x10] sm:$0x1] %v293_v26 }
  0x10   : > { %v339_v8 = vld [vmem:[%s6428_s12] sm:$0xf]  ;;  %5623 = vmatprep.subr.bf16.mxu0 %v6190_v4  ;;  %297 = vst [vmem:[#allocation2 + $0x18] sm:$0x1] %v296_v27  ;;  %v319_v31 = vsel %vm6441_vm4, 0, %v318_v28  ;;  %v322_v32 = vsel %vm6441_vm4, 0, %v321_v29 }
  0x11   : > { %v348_v11 = vshrl.u32 %v339_v8, 16  ;;  %v351_v13 = vshll.u32 %v339_v8, 16  ;;  %v340_v33 = vld [vmem:[%s6428_s12 + $0x4] sm:$0xf]  ;;  %v341_v34 = vld [vmem:[%s6428_s12 + $0x8] sm:$0xf] }
  0x12   : > { %320 = vst [vmem:[#allocation2 + $0x14] sm:$0x1] %v319_v31  ;;  %323 = vst [vmem:[#allocation2 + $0x1c] sm:$0x1] %v322_v32  ;;  %v356_v35 = vshrl.u32 %v340_v33, 16  ;;  %v359_v36 = vshll.u32 %v340_v33, 16 }
  0x13   : > { %v350_v17 = vrot.slane %v348_v11, 7  ;;  %5624 = vmatpush3.bf16.msra.mxu0 %v6190_v4  ;;  %v364_v37 = vshrl.u32 %v341_v34, 16  ;;  %v367_v38 = vshll.u32 %v341_v34, 16  ;;  %v6193_v39 = vld [vmem:[%s7579_s1 + $0x70] sm:$0xff]   ;;  %v429_v40 = vld [vmem:[#allocation2 + $0x8] sm:$0xf] }
  0x14   : > { %5625 = vmatprep.subr.bf16.mxu0 %v6191_v16  ;;  %v515_v41 = vrot.slane %v513_v21, 4  ;;  %v518_v42 = vrot.slane %v516_v22, 5  ;;  %v358_v45 = vrot.slane %v356_v35, 7  ;;  %v6194_v52 = vld [vmem:[%s7579_s1 + $0x78] sm:$0xff]   ;;  %v298_v60 = vld [vmem:[#allocation2 + $0x20] sm:$0x1] }
  0x15   : > { %v354_v20 = vrot.slane %v350_v17, 4  ;;  %v353_v25 = vor.u32 %v351_v13, %v350_v17  ;;  %v432_v44 = vld [vmem:[#allocation2 + $0xc] sm:$0x1]  ;;  %v366_v46 = vrot.slane %v364_v37, 7  ;;  %v6490_v61 = vrot.slane %v522_v23, 5  ;;  %v6501_v3 = vld [vmem:[%s7579_s1] sm:$0xff]  }
  0x16   : > { %v361_v48 = vor.u32 %v359_v36, %v358_v45  ;;  %v362_v49 = vrot.slane %v358_v45, 4  ;;  %v435_v53 = vld [vmem:[#allocation2 + $0x10] sm:$0xf]  ;;  %v519_v55 = vor.u32 %v518_v42, %v515_v41  ;;  %v299_v0 = vsel %vm6433_vm3, 0, %v298_v60  ;;  %v301_v1 = vld [vmem:[#allocation2 + $0x28] sm:$0x1] }
  0x17   : > { %5626 = vmatpush3.bf16.msra.mxu0 %v6191_v16  ;;  %v430_v43 = vsel %vm6466_vm6, %v353_v25, %v429_v40  ;;  %v433_v47 = vsel %vm6433_vm3, %v354_v20, %v432_v44  ;;  %v369_v50 = vor.u32 %v367_v38, %v366_v46  ;;  %v370_v51 = vrot.slane %v366_v46, 4  ;;  %v441_v54 = vld [vmem:[#allocation2 + $0x18] sm:$0xf]  ;;  %v324_v2 = vld [vmem:[#allocation2 + $0x24] sm:$0x1]  ;;  %s5392_s9 = sshll.u32 %s7597_s25, 4 }
  0x18   : > { %5627 = vmatprep.subr.bf16.mxu0 %v6192_v19  ;;  %431 = vst [vmem:[#allocation2 + $0x8] sm:$0xf] %v430_v43  ;;  %434 = vst [vmem:[#allocation2 + $0xc] sm:$0x1] %v433_v47  ;;  %v436_v56 = vsel %vm6466_vm6, %v361_v48, %v435_v53  ;;  %v302_v4 = vsel %vm6433_vm3, 0, %v301_v1  ;;  %v325_v5 = vsel %vm6441_vm4, 0, %v324_v2  ;;  %s278_s13 = scalar_lea.vmem %s7585_s7, %s5392_s9 }
  0x19   : > { %v438_v57 = vld [vmem:[#allocation2 + $0x14] sm:$0x1]  ;;  %v442_v58 = vsel %vm6466_vm6, %v369_v50, %v441_v54  ;;  %v444_v59 = vld [vmem:[#allocation2 + $0x1c] sm:$0x1]  ;;  %437 = vst [vmem:[#allocation2 + $0x10] sm:$0xf] %v436_v56 }
  0x1a   : > { %v439_v62 = vsel %vm6433_vm3, %v362_v49, %v438_v57  ;;  %443 = vst [vmem:[#allocation2 + $0x18] sm:$0xf] %v442_v58  ;;  %v445_v63 = vsel %vm6433_vm3, %v370_v51, %v444_v59  ;;  %300 = vst [vmem:[#allocation2 + $0x20] sm:$0x1] %v299_v0  ;;  %v327_v7 = vld [vmem:[#allocation2 + $0x2c] sm:$0x1] }
  0x1b   : > { %5628 = vmatpush3.bf16.msra.mxu0 %v6192_v19  ;;  %440 = vst [vmem:[#allocation2 + $0x14] sm:$0x1] %v439_v62  ;;  %446 = vst [vmem:[#allocation2 + $0x1c] sm:$0x1] %v445_v63  ;;  %v342_v8 = vld [vmem:[%s6428_s12 + $0xc] sm:$0xf] }
  0x1c   : > { %5629 = vmatprep.subr.bf16.mxu0 %v6193_v39  ;;  %303 = vst [vmem:[#allocation2 + $0x28] sm:$0x1] %v302_v4  ;;  %326 = vst [vmem:[#allocation2 + $0x24] sm:$0x1] %v325_v5  ;;  %v328_v11 = vsel %vm6441_vm4, 0, %v327_v7  ;;  %v372_v13 = vshrl.u32 %v342_v8, 16 }
  0x1d   : > { %v343_v12 = vld [vmem:[%s6428_s12 + $0x10] sm:$0xf]  ;;  %v520_v17 = vrot.slane %v519_v55, 4  ;;  %329 = vst [vmem:[#allocation2 + $0x2c] sm:$0x1] %v328_v11  ;;  %v375_v24 = vshll.u32 %v342_v8, 16 }
  0x1e   : > { %v380_v20 = vshrl.u32 %v343_v12, 16  ;;  %v374_v23 = vrot.slane %v372_v13, 7  ;;  %v383_v25 = vshll.u32 %v343_v12, 16  ;;  %v304_v31 = vld [vmem:[#allocation2 + $0x30] sm:$0x1]  ;;  %vm931_vm10 = vcmask 1042432  }
  0x1f   : > { %5630 = vmatpush3.bf16.msra.mxu0 %v6193_v39  ;;  %v6508_v9 = vld [vmem:[#allocation2 + $0x8] sm:$0xf]  ;;  %v6513_v16 = vld [vmem:[#allocation2 + $0xc] sm:$0x1]  ;;  %v525_v32 = vsel %vm6519_vm9, %v520_v17, %v6490_v61  ;;  %v305_v37 = vsel %vm6433_vm3, 0, %v304_v31  ;;  %vm932_vm11 = vcmask 1046532  }
  0x20   : > { %5631 = vmatprep.subr.bf16.mxu0 %v6194_v52  ;;  %v527_v18 = vshrl.u32 %v6508_v9, 16  ;;  %v530_v19 = vshll.u32 %v6508_v9, 16  ;;  %v536_v22 = vshll.u32 %v6513_v16, 16  ;;  %v382_v28 = vrot.slane %v380_v20, 7  ;;  %v6528_v34 = vld [vmem:[#allocation2 + $0x10] sm:$0xf]  ;;  %vm6613_vm12 = vmor %vm931_vm10, %vm932_vm11 }
  0x21   : > { %v6530_v35 = vld [vmem:[#allocation2 + $0x18] sm:$0xf]  ;;  %v378_v36 = vrot.slane %v374_v23, 4  ;;  %v541_v40 = vshrl.u32 %v6528_v34, 16  ;;  %v544_v41 = vshll.u32 %v6528_v34, 16  ;;  %v377_v42 = vor.u32 %v375_v24, %v374_v23  ;;  %v6351_v21 = vld [vmem:[%s7582_s4 + $0x220] sm:$0xff]  }
  0x22   : > { %v529_v26 = vrot.slane %v527_v18, 4  ;;  %v532_v27 = vrot.slane %v530_v19, 5  ;;  %v538_v29 = vrot.slane %v536_v22, 5  ;;  %v6534_v38 = vld [vmem:[#allocation2 + $0x14] sm:$0x1]  ;;  %v385_v43 = vor.u32 %v383_v25, %v382_v28  ;;  %v6278_v10 = vld [vmem:[%s7582_s4 + $0x78] sm:$0xff]  }
  0x23   : > { %5632 = vmatpush3.bf16.msra.mxu0 %v6194_v52  ;;  %v6536_v39 = vld [vmem:[#allocation2 + $0x1c] sm:$0x1]  ;;  %306 = vst [vmem:[#allocation2 + $0x30] sm:$0x1] %v305_v37  ;;  %v550_v45 = vshll.u32 %v6534_v38, 16  ;;  %v555_v46 = vshrl.u32 %v6530_v35, 16 }
  0x24   : > { %v533_v33 = vor.u32 %v532_v27, %v529_v26  ;;  %5641 = vmatprep.subr.bf16.mxu0 %v6501_v3  ;;  %v558_v47 = vshll.u32 %v6530_v35, 16  ;;  %v447_v48 = vld [vmem:[#allocation2 + $0x20] sm:$0xf]  ;;  %v543_v49 = vrot.slane %v541_v40, 4  ;;  %v546_v50 = vrot.slane %v544_v41, 5  ;;  %v6197_v37 = vld [vmem:[%s7579_s1 + $0x10] sm:$0xff]  }
  0x25   : > { %v564_v51 = vshll.u32 %v6536_v39, 16  ;;  %v386_v52 = vrot.slane %v382_v28, 4  ;;  %v450_v53 = vld [vmem:[#allocation2 + $0x24] sm:$0x1]  ;;  %v557_v55 = vrot.slane %v555_v46, 4  ;;  %v552_v61 = vrot.slane %v550_v45, 5 }
  0x26   : > { %v534_v44 = vrot.slane %v533_v33, 4  ;;  %v560_v56 = vrot.slane %v558_v47, 5  ;;  %v453_v57 = vld [vmem:[#allocation2 + $0x28] sm:$0xf]  ;;  %v307_v58 = vld [vmem:[#allocation2 + $0x38] sm:$0x1]  ;;  %v547_v60 = vor.u32 %v546_v50, %v543_v49  ;;  %v448_v2 = vsel %vm6466_vm6, %v377_v42, %v447_v48 }
  0x27   : > { %v566_v62 = vrot.slane %v564_v51, 5  ;;  %v456_v63 = vld [vmem:[#allocation2 + $0x2c] sm:$0x1]  ;;  %v330_v0 = vld [vmem:[#allocation2 + $0x34] sm:$0x1]  ;;  %v451_v4 = vsel %vm6433_vm3, %v378_v36, %v450_v53  ;;  %v454_v5 = vsel %vm6466_vm6, %v385_v43, %v453_v57  ;;  %v308_v17 = vsel %vm6433_vm3, 0, %v307_v58 }
  0x28   : > { %v539_v54 = vsel %vm6519_vm9, %v534_v44, %v538_v29  ;;  %v561_v1 = vor.u32 %v560_v56, %v557_v55  ;;  %v333_v7 = vld [vmem:[#allocation2 + $0x3c] sm:$0x1]  ;;  %v344_v8 = vld [vmem:[%s6428_s12 + $0x14] sm:$0xf]  ;;  %v345_v11 = vld [vmem:[%s6428_s12 + $0x18] sm:$0xf]  ;;  %v457_v13 = vsel %vm6433_vm3, %v386_v52, %v456_v63 }
  0x29   : > { %v4873_v59 = vcombine.low %v525_v32, %v539_v54  ;;  %v548_v12 = vrot.slane %v547_v60, 4  ;;  %449 = vst [vmem:[#allocation2 + $0x20] sm:$0xf] %v448_v2  ;;  %452 = vst [vmem:[#allocation2 + $0x24] sm:$0x1] %v451_v4  ;;  %v331_v18 = vsel %vm6441_vm4, 0, %v330_v0 }
  0x2a   : > { %455 = vst [vmem:[#allocation2 + $0x28] sm:$0xf] %v454_v5  ;;  %v562_v19 = vrot.slane %v561_v1, 4  ;;  %458 = vst [vmem:[#allocation2 + $0x2c] sm:$0x1] %v457_v13  ;;  %v334_v20 = vsel %vm6441_vm4, 0, %v333_v7 }
  0x2b   : > { %5633 = vmatprep.mubr.bf16.mxu0 %v4873_v59  ;;  %309 = vst [vmem:[#allocation2 + $0x38] sm:$0x1] %v308_v17  ;;  %332 = vst [vmem:[#allocation2 + $0x34] sm:$0x1] %v331_v18  ;;  %v388_v22 = vshrl.u32 %v344_v8, 16  ;;  %v391_v23 = vshll.u32 %v344_v8, 16  ;;  %v553_v24 = vsel %vm6519_vm9, %v548_v12, %v552_v61 }
  0x2c   : > { %335 = vst [vmem:[#allocation2 + $0x3c] sm:$0x1] %v334_v20  ;;  %v396_v25 = vshrl.u32 %v345_v11, 16  ;;  %v459_v26 = vld [vmem:[#allocation2 + $0x30] sm:$0xf]  ;;  %v567_v27 = vsel %vm6519_vm9, %v562_v19, %v566_v62  ;;  %v399_v29 = vshll.u32 %v345_v11, 16 }
  0x2d   : > { %v390_v28 = vrot.slane %v388_v22, 7  ;;  %v4874_v31 = vcombine.low %v553_v24, %v567_v27  ;;  %v6196_v32 = vld [vmem:[%s7579_s1 + $0x8] sm:$0xff]   ;;  %v6198_v55 = vld [vmem:[%s7579_s1 + $0x18] sm:$0xff]   ;;  %v944_v7 = vrot.slane %v6534_v38, 5  ;;  %v948_v8 = vrot.slane %v6536_v39, 5  ;;  %v6199_v11 = vld [vmem:[%s7579_s1 + $0x20] sm:$0xff]  }
  0x2e   : > { %v398_v33 = vrot.slane %v396_v25, 7  ;;  %v909_v39 = vld [vmem:[#allocation2 + $0x10] sm:$0xe]  ;;  %v910_v20 = vld [vmem:[#allocation2 + $0x18] sm:$0xe] }
  0x2f   : > { %v393_v36 = vor.u32 %v391_v23, %v390_v28  ;;  %5634 = vmatmul.mubr.bf16.vlgmr.msra.gmra.mrb[0].mxu0 %v4874_v31  ;;  %v394_v40 = vrot.slane %v390_v28, 4  ;;  %v4899_v28 = vrot.slane %v909_v39, 9  ;;  %v6200_v31 = vld [vmem:[%s7579_s1 + $0x28] sm:$0xff]   ;;  %v6209_v39 = vld [vmem:[%s7579_s1 + $0xa0] sm:$0xff]  }
  0x30   : > { %v402_v41 = vrot.slane %v398_v33, 4  ;;  %5642 = vmatpush3.bf16.msra.mxu0 %v6501_v3  ;;  %v6573_v42 = vld [vmem:[#allocation2 + $0x20] sm:$0xf]  ;;  %v6577_v44 = vld [vmem:[#allocation2 + $0x24] sm:$0x1]  ;;  %v401_v45 = vor.u32 %v399_v29, %v398_v33  ;;  %v4900_v29 = vrot.slane %v910_v20, 9 }
  0x31   : > { %v6575_v43 = vld [vmem:[#allocation2 + $0x28] sm:$0xf]  ;;  %v460_v46 = vsel %vm6466_vm6, %v393_v36, %v459_v26  ;;  %5643 = vmatprep.subr.bf16.mxu0 %v6196_v32  ;;  %v6581_v47 = vld [vmem:[#allocation2 + $0x2c] sm:$0x1]  ;;  %v569_v48 = vshrl.u32 %v6573_v42, 16  ;;  %v572_v49 = vshll.u32 %v6573_v42, 16 }
  0x32   : > { %v578_v50 = vshll.u32 %v6577_v44, 16  ;;  %v583_v3 = vshrl.u32 %v6575_v43, 16  ;;  %461 = vst [vmem:[#allocation2 + $0x30] sm:$0xf] %v460_v46  ;;  %v586_v51 = vshll.u32 %v6575_v43, 16  ;;  %v592_v52 = vshll.u32 %v6581_v47, 16 }
  0x33   : > { %v462_v53 = vld [vmem:[#allocation2 + $0x34] sm:$0x1]  ;;  %v465_v54 = vld [vmem:[#allocation2 + $0x38] sm:$0xf]  ;;  %v571_v56 = vrot.slane %v569_v48, 4  ;;  %v574_v57 = vrot.slane %v572_v49, 5  ;;  %v6636_v46 = vsel %vm6613_vm12, %v4900_v29, %v948_v8 }
  0x34   : > { %v585_v58 = vrot.slane %v583_v3, 4  ;;  %v468_v59 = vld [vmem:[#allocation2 + $0x3c] sm:$0x1]  ;;  %5644 = vmatpush3.bf16.msra.mxu0 %v6196_v32  ;;  %v580_v60 = vrot.slane %v578_v50, 5  ;;  %v588_v61 = vrot.slane %v586_v51, 5  ;;  %v463_v62 = vsel %vm6433_vm3, %v394_v40, %v462_v53  ;;  %v6201_v51 = vld [vmem:[%s7579_s1 + $0x30] sm:$0xff]  }
  0x35   : > { %v466_v63 = vsel %vm6466_vm6, %v401_v45, %v465_v54  ;;  %5645 = vmatprep.subr.bf16.mxu0 %v6197_v37  ;;  %v575_v0 = vor.u32 %v574_v57, %v571_v56  ;;  %464 = vst [vmem:[#allocation2 + $0x34] sm:$0x1] %v463_v62  ;;  %v469_v1 = vsel %vm6433_vm3, %v402_v41, %v468_v59  ;;  %v594_v4 = vrot.slane %v592_v52, 5  ;;  %v907_v62 = vld [vmem:[#allocation2] sm:$0xe]  ;;  %v6210_v20 = vld [vmem:[%s7579_s1 + $0xa8] sm:$0xff]  }
  0x36   : > { %467 = vst [vmem:[#allocation2 + $0x38] sm:$0xf] %v466_v63  ;;  %v589_v2 = vor.u32 %v588_v61, %v585_v58  ;;  %470 = vst [vmem:[#allocation2 + $0x3c] sm:$0x1] %v469_v1  ;;  %v6632_v45 = vsel %vm6613_vm12, %v4899_v28, %v944_v7  ;;  %v4885_v58 = vcombine.low %v6447_v14, %v6508_v9  ;;  %v6204_v61 = vld [vmem:[%s7579_s1 + $0x80] sm:$0xff]   ;;  %v940_v9 = vrot.slane %v6513_v16, 5 }
  0x37   : > { %v576_v5 = vrot.slane %v575_v0, 4  ;;  %v4922_v53 = vcombine.low %v6632_v45, %v6636_v46  ;;  %v908_v63 = vld [vmem:[#allocation2 + $0x8] sm:$0xe]  ;;  %v936_v0 = vrot.slane %v6449_v15, 5  ;;  %v4886_v14 = vcombine.low %v6528_v34, %v6530_v35  ;;  %v310_v7 = vld [vmem:[#allocation2 + $0x40] sm:$0x1] }
  0x38   : > { %5646 = vmatpush3.bf16.msra.mxu0 %v6197_v37  ;;  %v590_v12 = vrot.slane %v589_v2, 4  ;;  %v6206_v1 = vld [vmem:[%s7579_s1 + $0x88] sm:$0xff]   ;;  %v4887_v2 = vcombine.low %v6573_v42, %v6575_v43  ;;  %v346_v8 = vld [vmem:[%s6428_s12 + $0x1c] sm:$0xf]  ;;  %v311_v15 = vsel %vm6433_vm3, 0, %v310_v7  ;;  %v6207_v34 = vld [vmem:[%s7579_s1 + $0x90] sm:$0xff]  }
  0x39   : > { %v6603_v13 = vld [vmem:[#allocation2 + $0x30] sm:$0xf]  ;;  %5647 = vmatprep.subr.bf16.mxu0 %v6198_v55  ;;  %v581_v17 = vsel %vm6519_vm9, %v576_v5, %v580_v60  ;;  %v6202_v60 = vld [vmem:[%s7579_s1 + $0x38] sm:$0xff]   ;;  %v4898_v5 = vrot.slane %v908_v63, 9  ;;  %v404_v16 = vshrl.u32 %v346_v8, 16  ;;  %v407_v43 = vshll.u32 %v346_v8, 16 }
  0x3a   : > { %v597_v18 = vshrl.u32 %v6603_v13, 16  ;;  %v600_v19 = vshll.u32 %v6603_v13, 16  ;;  %v595_v38 = vsel %vm6519_vm9, %v590_v12, %v594_v4  ;;  %v4897_v4 = vrot.slane %v907_v62, 9  ;;  %312 = vst [vmem:[#allocation2 + $0x40] sm:$0x1] %v311_v15  ;;  %v6214_v29 = vld [vmem:[%s7579_s1 + $0xb8] sm:$0xff]  }
  0x3b   : > { %v4875_v22 = vcombine.low %v581_v17, %v595_v38  ;;  %v941_v42 = vsel %vm6613_vm12, %v4898_v5, %v940_v9  ;;  %v6218_v45 = vld [vmem:[%s7579_s1 + $0xd8] sm:$0xff]   ;;  %v6219_v46 = vld [vmem:[%s7579_s1 + $0xe0] sm:$0xff]   ;;  %v1292_v62 = vld [vmem:[#allocation2 + $0x10] sm:$0xf] }
  0x3c   : > { %v599_v23 = vrot.slane %v597_v18, 4  ;;  %v602_v24 = vrot.slane %v600_v19, 5  ;;  %5648 = vmatpush3.bf16.msra.mxu0 %v6198_v55  ;;  %v6619_v27 = vld [vmem:[#allocation2 + $0x34] sm:$0x1]  ;;  %v937_v35 = vsel %vm6613_vm12, %v4897_v4, %v936_v0  ;;  %v6208_v18 = vld [vmem:[%s7579_s1 + $0x98] sm:$0xff]   ;;  %v1321_v9 = vshrl.u32 %v1292_v62, 16 }
  0x3d   : > { %v6617_v26 = vld [vmem:[#allocation2 + $0x38] sm:$0xf]  ;;  %5649 = vmatprep.subr.bf16.mxu0 %v6199_v11  ;;  %5637 = vmatprep.mubr.bf16.mxu0 %v4875_v22  ;;  %v6624_v32 = vld [vmem:[#allocation2 + $0x3c] sm:$0x1]  ;;  %v606_v36 = vshll.u32 %v6619_v27, 16  ;;  %v4921_v17 = vcombine.low %v937_v35, %v941_v42  ;;  %v6212_v22 = vld [vmem:[%s7579_s1 + $0xb0] sm:$0xff]  }
  0x3e   : > { %v603_v33 = vor.u32 %v602_v24, %v599_v23  ;;  %v611_v37 = vshrl.u32 %v6617_v26, 16  ;;  %v614_v40 = vshll.u32 %v6617_v26, 16  ;;  %v620_v41 = vshll.u32 %v6624_v32, 16  ;;  %v911_v23 = vld [vmem:[#allocation2 + $0x20] sm:$0xe] }
  0x3f   : > { %v608_v49 = vrot.slane %v606_v36, 5  ;;  %v4888_v12 = vcombine.low %v6603_v13, %v6617_v26  ;;  %v912_v24 = vld [vmem:[#allocation2 + $0x28] sm:$0xe]  ;;  %v336_v26 = vld [vmem:[#allocation2 + $0x44] sm:$0x1]  ;;  %v1323_v8 = vrot.slane %v1321_v9, 4 }
  0x40   : > { %v604_v48 = vrot.slane %v603_v33, 4  ;;  %v613_v50 = vrot.slane %v611_v37, 4  ;;  %v616_v3 = vrot.slane %v614_v40, 5  ;;  %5650 = vmatpush3.bf16.msra.mxu0 %v6199_v11  ;;  %v622_v52 = vrot.slane %v620_v41, 5  ;;  %v913_v40 = vld [vmem:[#allocation2 + $0x30] sm:$0xe] }
  0x41   : > { %5651 = vmatprep.subr.bf16.mxu0 %v6200_v31  ;;  %v406_v11 = vrot.slane %v404_v16, 7  ;;  %v471_v38 = vld [vmem:[#allocation2 + $0x40] sm:$0xf]  ;;  %v337_v28 = vsel %vm6441_vm4, 0, %v336_v26  ;;  %v952_v33 = vrot.slane %v6577_v44, 5  ;;  %v4902_v36 = vrot.slane %v912_v24, 9 }
  0x42   : > { %v617_v54 = vor.u32 %v616_v3, %v613_v50  ;;  %v609_v55 = vsel %vm6519_vm9, %v604_v48, %v608_v49  ;;  %v956_v37 = vrot.slane %v6581_v47, 5  ;;  %338 = vst [vmem:[#allocation2 + $0x44] sm:$0x1] %v337_v28  ;;  %v6215_v41 = vld [vmem:[%s7579_s1 + $0xc0] sm:$0xff]   ;;  %v914_v50 = vld [vmem:[#allocation2 + $0x38] sm:$0xe] }
  0x43   : > { %v409_v19 = vor.u32 %v407_v43, %v406_v11  ;;  %v410_v3 = vrot.slane %v406_v11, 4  ;;  %v6216_v44 = vld [vmem:[%s7579_s1 + $0xc8] sm:$0xff]   ;;  %v4903_v47 = vrot.slane %v913_v40, 9  ;;  %v6735_v4 = vld [vmem:[#allocation2 + $0x14] sm:$0x1]  ;;  %v6222_v16 = vld [vmem:[%s7579_s1 + $0xf8] sm:$0xff]  }
  0x44   : > { %v618_v56 = vrot.slane %v617_v54, 4  ;;  %5652 = vmatpush3.bf16.msra.mxu0 %v6200_v31  ;;  %v4901_v31 = vrot.slane %v911_v23, 9  ;;  %v957_v49 = vsel %vm6613_vm12, %v4902_v36, %v956_v37  ;;  %v4904_v54 = vrot.slane %v914_v50, 9  ;;  %v1296_v43 = vld [vmem:[#allocation2 + $0x20] sm:$0xf]  ;;  %v6227_v40 = vld [vmem:[%s7579_s1 + $0x110] sm:$0xff]  }
  0x45   : > { %5653 = vmatprep.subr.bf16.mxu0 %v6201_v51  ;;  %v472_v13 = vsel %vm6466_vm6, %v409_v19, %v471_v38  ;;  %v1330_v42 = vshll.u32 %v6735_v4, 16  ;;  %v6224_v19 = vld [vmem:[%s7579_s1 + $0x100] sm:$0xff]   ;;  %v6230_v9 = vld [vmem:[%s7579_s1 + $0x128] sm:$0xff]  }
  0x46   : > { %v623_v57 = vsel %vm6519_vm9, %v618_v56, %v622_v52  ;;  %473 = vst [vmem:[#allocation2 + $0x40] sm:$0xf] %v472_v13  ;;  %v953_v48 = vsel %vm6613_vm12, %v4901_v31, %v952_v33  ;;  %v6225_v38 = vld [vmem:[#allocation2 + $0x18] ss:$8 sps:$4 sm:$0xff]   ;;  %v1352_v13 = vshll.u32 %v1296_v43, 16 }
  0x47   : > { %v4876_v59 = vcombine.low %v609_v55, %v623_v57  ;;  %v4923_v52 = vcombine.low %v953_v48, %v957_v49  ;;  %v964_v55 = vrot.slane %v6624_v32, 5  ;;  %v6217_v32 = vld [vmem:[%s7579_s1 + $0xd0] sm:$0xff]   ;;  %v1332_v24 = vrot.slane %v1330_v42, 5  ;;  %v1298_v33 = vld [vmem:[#allocation2 + $0x28] sm:$0xf] }
  0x48   : > { %5654 = vmatpush3.bf16.msra.mxu0 %v6201_v51  ;;  %v960_v51 = vrot.slane %v6619_v27, 5  ;;  %v1354_v37 = vrot.slane %v1352_v13, 5  ;;  %v1363_v48 = vshrl.u32 %v1298_v33, 16  ;;  %v1366_v49 = vshll.u32 %v1298_v33, 16  ;;  %v6232_v42 = vld [vmem:[%s7579_s1 + $0x130] sm:$0xff]  }
  0x49   : > { %5638 = vmatmul.mubr.bf16.gmra.mrb[4].mxu0 %v4876_v59  ;;  %5655 = vmatprep.subr.bf16.mxu0 %v6202_v60  ;;  %v474_v56 = vld [vmem:[#allocation2 + $0x44] sm:$0x1]  ;;  %v6787_v33 = vld [vmem:[#allocation2 + $0x18] sm:$0xe] }
  0x4a   : > { %5657 = vmatprep.mubr.bf16.mxu0 %v4885_v58  ;;  %v475_v57 = vsel %vm6433_vm3, %v410_v3, %v474_v56  ;;  %v961_v27 = vsel %vm6613_vm12, %v4903_v47, %v960_v51  ;;  %v965_v58 = vsel %vm6613_vm12, %v4904_v54, %v964_v55  ;;  %v6228_v47 = vld [vmem:[%s7579_s1 + $0x118] sm:$0xff]   ;;  %v6229_v56 = vld [vmem:[%s7579_s1 + $0x120] sm:$0xff]  }
  0x4b   : > { %476 = vst [vmem:[#allocation2 + $0x44] sm:$0x1] %v475_v57  ;;  %v4924_v59 = vcombine.low %v961_v27, %v965_v58  ;;  %v6758_v55 = vld [vmem:[#allocation2 + $0x1c] sm:$0x1]  ;;  %v6763_v57 = vld [vmem:[#allocation2 + $0x24] sm:$0x1] }
  0x4c   : > { %5656 = vmatpush3.bf16.msra.mxu0 %v6202_v60  ;;  %v6223_v60 = vld [vmem:[#allocation2 + $0x8] ss:$8 sps:$4 sm:$0xff]   ;;  %v6765_v27 = vld [vmem:[#allocation2 + $0x2c] sm:$0x1]  ;;  %v6767_v58 = vld [vmem:[#allocation2 + $0x34] sm:$0x1] }
  0x4d   : > { %5665 = vmatprep.subr.bf16.mxu0 %v6204_v61  ;;  %v6233_v50 = vld [vmem:[#allocation2 + $0x38] ss:$8 sps:$4 sm:$0xff]  }
  0x51   : > { %5658 = vmatmul.mubr.bf16.vlgmr.msra.gmra.mrb[0].mxu0 %v4886_v14  ;;  %v6221_v14 = vld [vmem:[%s7579_s1 + $0xf0] sm:$0xff]  }
  0x52   : > { %5666 = vmatpush3.bf16.msra.mxu0 %v6204_v61  ;;  %5661 = vmatprep.mubr.bf16.mxu0 %v4887_v2  ;;  %v6220_v61 = vld [vmem:[%s7579_s1 + $0xe8] sm:$0xff]  }
  0x53   : > { %5667 = vmatprep.subr.bf16.mxu0 %v6206_v1  ;;  %v6733_v2 = vld [vmem:[#allocation2 + $0xc] sm:$0x1] }
  0x54   : > { %v1316_v35 = vshll.u32 %v6733_v2, 16 }
  0x56   : > { %5668 = vmatpush3.bf16.msra.mxu0 %v6206_v1  ;;  %v1324_v1 = vshll.u32 %v1292_v62, 16  ;;  %v1318_v23 = vrot.slane %v1316_v35, 5 }
  0x57   : > { %5669 = vmatprep.subr.bf16.mxu0 %v6207_v34 }
  0x58   : > { %v1326_v15 = vrot.slane %v1324_v1, 5 }
  0x59   : > { %5662 = vmatmul.mubr.bf16.gmra.mrb[4].mxu0 %v4888_v12 }
  0x5a   : > { %5670 = vmatpush3.bf16.msra.mxu0 %v6207_v34  ;;  %5681 = vmatprep.mubr.bf16.mxu0 %v4921_v17  ;;  %v1294_v34 = vld [vmem:[#allocation2 + $0x18] sm:$0xf]  ;;  %v1327_v12 = vor.u32 %v1326_v15, %v1323_v8  ;;  %v6776_v15 = vld [vmem:[#allocation2 + $0x3c] sm:$0x1] }
  0x5b   : > { %5671 = vmatprep.subr.bf16.mxu0 %v6208_v18  ;;  %v1335_v17 = vshrl.u32 %v1294_v34, 16  ;;  %v1400_v13 = vshll.u32 %v6776_v15, 16 }
  0x5c   : > { %v1328_v28 = vrot.slane %v1327_v12, 4 }
  0x5e   : > { %5672 = vmatpush3.bf16.msra.mxu0 %v6208_v18  ;;  %v1338_v18 = vshll.u32 %v1294_v34, 16 }
  0x5f   : > { %5673 = vmatprep.subr.bf16.mxu0 %v6209_v39 }
  0x60   : > { %v1340_v31 = vrot.slane %v1338_v18, 5 }
  0x62   : > { %5674 = vmatpush3.bf16.msra.mxu0 %v6209_v39  ;;  %v1349_v39 = vshrl.u32 %v1296_v43, 16 }
  0x63   : > { %5675 = vmatprep.subr.bf16.mxu0 %v6210_v20 }
  0x64   : > { %v1351_v36 = vrot.slane %v1349_v39, 4 }
  0x66   : > { %5676 = vmatpush3.bf16.msra.mxu0 %v6210_v20  ;;  %v6226_v20 = vld [vmem:[%s7579_s1 + $0x108] sm:$0xff]  }
  0x67   : > { %5677 = vmatprep.subr.bf16.mxu0 %v6212_v22 }
  0x6a   : > { %5678 = vmatpush3.bf16.msra.mxu0 %v6212_v22  ;;  %v6231_v22 = vld [vmem:[#allocation2 + $0x28] ss:$8 sps:$4 sm:$0xff]  }
  0x6b   : > { %5679 = vmatprep.subr.bf16.mxu0 %v6214_v29 }
  0x6e   : > { %5680 = vmatpush3.bf16.msra.mxu0 %v6214_v29  ;;  %v1337_v29 = vrot.slane %v1335_v17, 4 }
  0x6f   : > { %5689 = vmatprep.subr.bf16.mxu0 %v6215_v41 }
  0x70   : > { %v1341_v62 = vor.u32 %v1340_v31, %v1337_v29  ;;  %v1572_v29 = vld [vmem:[#allocation2 + $0x8] sm:$0xe]  ;;  %v1573_v31 = vld [vmem:[#allocation2 + $0x10] sm:$0xe] }
  0x71   : > { %5682 = vmatmul.mubr.bf16.vlgmr.msra.gmra.mrb[0].mxu0 %v4922_v53  ;;  %v1290_v53 = vld [vmem:[#allocation2 + $0x8] sm:$0xf] }
  0x72   : > { %5690 = vmatpush3.bf16.msra.mxu0 %v6215_v41  ;;  %5685 = vmatprep.mubr.bf16.mxu0 %v4923_v52  ;;  %v1307_v63 = vshrl.u32 %v1290_v53, 16  ;;  %v1310_v0 = vshll.u32 %v1290_v53, 16  ;;  %v1300_v41 = vld [vmem:[#allocation2 + $0x30] sm:$0xf]  ;;  %v1344_v53 = vshll.u32 %v6758_v55, 16 }
  0x73   : > { %5691 = vmatprep.subr.bf16.mxu0 %v6216_v44  ;;  %v1377_v52 = vshrl.u32 %v1300_v41, 16  ;;  %v1380_v54 = vshll.u32 %v1300_v41, 16 }
  0x74   : > { %v1309_v5 = vrot.slane %v1307_v63, 4  ;;  %v1312_v7 = vrot.slane %v1310_v0, 5  ;;  %v1355_v63 = vor.u32 %v1354_v37, %v1351_v36  ;;  %v1358_v0 = vshll.u32 %v6763_v57, 16 }
  0x75   : > { %v1346_v43 = vrot.slane %v1344_v53, 5 }
  0x76   : > { %5692 = vmatpush3.bf16.msra.mxu0 %v6216_v44  ;;  %v1313_v11 = vor.u32 %v1312_v7, %v1309_v5  ;;  %v1333_v44 = vsel %vm6519_vm9, %v1328_v28, %v1332_v24  ;;  %v1386_v5 = vshll.u32 %v6767_v58, 16  ;;  %v1356_v12 = vrot.slane %v1355_v63, 4  ;;  %v6785_v28 = vld [vmem:[#allocation2 + $0x44] sm:$0x1]  ;;  %v1577_v63 = vld [vmem:[#allocation2 + $0x30] sm:$0xe] }
  0x77   : > { %5693 = vmatprep.subr.bf16.mxu0 %v6217_v32  ;;  %v1360_v17 = vrot.slane %v1358_v0, 5  ;;  %v1414_v37 = vshll.u32 %v6785_v28, 16  ;;  %v1578_v0 = vld [vmem:[#allocation2 + $0x38] sm:$0xe] }
  0x78   : > { %v1314_v26 = vrot.slane %v1313_v11, 4  ;;  %v1342_v11 = vrot.slane %v1341_v62, 4 }
  0x79   : > { %5686 = vmatmul.mubr.bf16.gmra.mrb[4].mxu0 %v4924_v59  ;;  %v1368_v59 = vrot.slane %v1366_v49, 5  ;;  %v1361_v49 = vsel %vm6519_vm9, %v1356_v12, %v1360_v17  ;;  %v1416_v53 = vrot.slane %v1414_v37, 5  ;;  %v6238_v12 = vld [vmem:[%s7579_s1 + $0x158] sm:$0xff]  }
  0x7a   : > { %5694 = vmatpush3.bf16.msra.mxu0 %v6217_v32  ;;  %5705 = vmatprep.mubr.bf16.mxu0 %v6223_v60  ;;  %v1319_v3 = vsel %vm6519_vm9, %v1314_v26, %v1318_v23  ;;  %v1365_v32 = vrot.slane %v1363_v48, 4  ;;  %v1379_v60 = vrot.slane %v1377_v52, 4  ;;  %v6234_v26 = vld [vmem:[%s7579_s1 + $0x138] sm:$0xff]   ;;  %v1347_v48 = vsel %vm6519_vm9, %v1342_v11, %v1346_v43 }
  0x7b   : > { %5695 = vmatprep.subr.bf16.mxu0 %v6218_v45  ;;  %v4977_v51 = vcombine.low %v1319_v3, %v1333_v44  ;;  %v1602_v3 = vrot.slane %v6735_v4, 5  ;;  %v6235_v44 = vld [vmem:[%s7579_s1 + $0x140] sm:$0xff]   ;;  %v1606_v52 = vrot.slane %v6758_v55, 5  ;;  %v1610_v4 = vrot.slane %v6763_v57, 5  ;;  %v6251_v37 = vld [vmem:[#allocation2 + $0x10] ss:$8 sps:$4 sm:$0xff]  }
  0x7c   : > { %v1369_v1 = vor.u32 %v1368_v59, %v1365_v32  ;;  %v1575_v32 = vld [vmem:[#allocation2 + $0x20] sm:$0xe]  ;;  %v4991_v59 = vrot.slane %v6787_v33, 9  ;;  %v4995_v43 = vrot.slane %v1578_v0, 9  ;;  %v6245_v33 = vld [vmem:[%s7579_s1 + $0x190] sm:$0xff]  }
  0x7d   : > { %v1579_v55 = vld [vmem:[#allocation2 + $0x40] sm:$0xe]  ;;  %v6259_v0 = vld [vmem:[#allocation2 + $0x30] ss:$8 sps:$4 sm:$0xff]  }
  0x7e   : > { %5696 = vmatpush3.bf16.msra.mxu0 %v6218_v45  ;;  %v1382_v45 = vrot.slane %v1380_v54, 5  ;;  %v4996_v11 = vrot.slane %v1579_v55, 9  ;;  %v6254_v55 = vld [vmem:[%s7579_s1 + $0x1c8] sm:$0xff]  }
  0x7f   : > { %5697 = vmatprep.subr.bf16.mxu0 %v6219_v46 }
  0x80   : > { %v1383_v8 = vor.u32 %v1382_v45, %v1379_v60  ;;  %v4978_v60 = vcombine.low %v1347_v48, %v1361_v49  ;;  %v6236_v45 = vld [vmem:[%s7579_s1 + $0x148] sm:$0xff]   ;;  %v1953_v49 = vld [vmem:[#allocation2 + $0x10] sm:$0xf] }
  0x81   : > { %v6248_v48 = vld [vmem:[%s7579_s1 + $0x1a8] sm:$0xff]  }
  0x82   : > { %5698 = vmatpush3.bf16.msra.mxu0 %v6219_v46  ;;  %v1302_v46 = vld [vmem:[#allocation2 + $0x38] sm:$0xf] }
  0x83   : > { %5699 = vmatprep.subr.bf16.mxu0 %v6220_v61  ;;  %v1391_v7 = vshrl.u32 %v1302_v46, 16 }
  0x85   : > { %v1393_v39 = vrot.slane %v1391_v7, 4  ;;  %v6237_v7 = vld [vmem:[%s7579_s1 + $0x150] sm:$0xff]  }
  0x86   : > { %5700 = vmatpush3.bf16.msra.mxu0 %v6220_v61  ;;  %v1304_v61 = vld [vmem:[#allocation2 + $0x40] sm:$0xf] }
  0x87   : > { %5701 = vmatprep.subr.bf16.mxu0 %v6221_v14  ;;  %v1405_v34 = vshrl.u32 %v1304_v61, 16  ;;  %v1408_v35 = vshll.u32 %v1304_v61, 16  ;;  %v1576_v61 = vld [vmem:[#allocation2 + $0x28] sm:$0xe] }
  0x89   : > { %v1407_v23 = vrot.slane %v1405_v34, 4  ;;  %v1410_v24 = vrot.slane %v1408_v35, 5  ;;  %v1618_v34 = vrot.slane %v6767_v58, 5  ;;  %v1622_v35 = vrot.slane %v6776_v15, 5  ;;  %v6239_v58 = vld [vmem:[%s7579_s1 + $0x160] sm:$0xff]   ;;  %v6240_v15 = vld [vmem:[%s7579_s1 + $0x168] sm:$0xff]  }
  0x8a   : > { %5702 = vmatpush3.bf16.msra.mxu0 %v6221_v14  ;;  %v1372_v14 = vshll.u32 %v6765_v27, 16 }
  0x8b   : > { %5703 = vmatprep.subr.bf16.mxu0 %v6222_v16  ;;  %v1411_v41 = vor.u32 %v1410_v24, %v1407_v23 }
  0x8c   : > { %v1374_v18 = vrot.slane %v1372_v14, 5 }
  0x8e   : > { %5704 = vmatpush3.bf16.msra.mxu0 %v6222_v16  ;;  %v1394_v16 = vshll.u32 %v1302_v46, 16  ;;  %v1412_v46 = vrot.slane %v1411_v41, 4  ;;  %v6247_v41 = vld [vmem:[%s7579_s1 + $0x1a0] sm:$0xff]  }
  0x8f   : > { %5713 = vmatprep.subr.bf16.mxu0 %v6224_v19 }
  0x91   : > { %5706 = vmatmul.mubr.bf16.vlgmr.msra.gmra.mrb[0].mxu0 %v6225_v38  ;;  %v1388_v38 = vrot.slane %v1386_v5, 5  ;;  %v1614_v5 = vrot.slane %v6765_v27, 5  ;;  %v1626_v27 = vrot.slane %v6785_v28, 5 }
  0x92   : > { %5714 = vmatpush3.bf16.msra.mxu0 %v6224_v19  ;;  %5709 = vmatprep.mubr.bf16.mxu0 %v6231_v22  ;;  %v1370_v19 = vrot.slane %v1369_v1, 4  ;;  %v1396_v22 = vrot.slane %v1394_v16, 5  ;;  %v4992_v1 = vrot.slane %v1575_v32, 9  ;;  %v4993_v16 = vrot.slane %v1576_v61, 9 }
  0x93   : > { %5715 = vmatprep.subr.bf16.mxu0 %v6226_v20 }
  0x94   : > { %v1397_v36 = vor.u32 %v1396_v22, %v1393_v39  ;;  %v6243_v39 = vld [vmem:[%s7579_s1 + $0x180] sm:$0xff]   ;;  %v1615_v22 = vsel %vm6613_vm12, %v4993_v16, %v1614_v5  ;;  %v6255_v5 = vld [vmem:[%s7579_s1 + $0x1d0] sm:$0xff]  }
  0x95   : > { %v6261_v16 = vld [vmem:[#allocation2 + $0x40] ss:$8 sps:$4 sm:$0xff]  }
  0x96   : > { %5716 = vmatpush3.bf16.msra.mxu0 %v6226_v20  ;;  %v1384_v20 = vrot.slane %v1383_v8, 4  ;;  %v1398_v54 = vrot.slane %v1397_v36, 4  ;;  %v1417_v8 = vsel %vm6519_vm9, %v1412_v46, %v1416_v53 }
  0x97   : > { %5717 = vmatprep.subr.bf16.mxu0 %v6227_v40 }
  0x99   : > { %5710 = vmatmul.mubr.bf16.gmra.mrb[4].mxu0 %v6233_v50  ;;  %v1402_v50 = vrot.slane %v1400_v13, 5  ;;  %v1607_v13 = vsel %vm6613_vm12, %v4991_v59, %v1606_v52  ;;  %v6250_v52 = vld [vmem:[%s7579_s1 + $0x1b8] sm:$0xff]  }
  0x9a   : > { %5718 = vmatpush3.bf16.msra.mxu0 %v6227_v40  ;;  %5729 = vmatprep.mubr.bf16.mxu0 %v4977_v51  ;;  %v1598_v40 = vrot.slane %v6733_v2, 5  ;;  %v1389_v2 = vsel %vm6519_vm9, %v1384_v20, %v1388_v38  ;;  %v4989_v51 = vrot.slane %v1572_v29, 9  ;;  %v6242_v38 = vld [vmem:[%s7579_s1 + $0x178] sm:$0xff]   ;;  %v1611_v20 = vsel %vm6613_vm12, %v4992_v1, %v1610_v4  ;;  %v6875_v4 = vld [vmem:[#allocation2 + $0x14] sm:$0x1] }
  0x9b   : > { %5719 = vmatprep.subr.bf16.mxu0 %v6228_v47  ;;  %v1403_v57 = vsel %vm6519_vm9, %v1398_v54, %v1402_v50  ;;  %v5014_v24 = vcombine.low %v1607_v13, %v1611_v20  ;;  %v1623_v29 = vsel %vm6613_vm12, %v4995_v43, %v1622_v35  ;;  %v1955_v50 = vld [vmem:[#allocation2 + $0x18] sm:$0xf]  ;;  %v1979_v53 = vshll.u32 %v6875_v4, 16  ;;  %v1957_v35 = vld [vmem:[#allocation2 + $0x20] sm:$0xf]  ;;  %v6258_v20 = vld [vmem:[%s7579_s1 + $0x1e8] sm:$0xff]  }
  0x9c   : > { %v1599_v14 = vsel %vm6613_vm12, %v4989_v51, %v1598_v40  ;;  %v4980_v17 = vcombine.low %v1403_v57, %v1417_v8  ;;  %v6246_v40 = vld [vmem:[%s7579_s1 + $0x198] sm:$0xff]   ;;  %v1987_v51 = vshll.u32 %v1955_v50, 16  ;;  %v1959_v43 = vld [vmem:[#allocation2 + $0x28] sm:$0xf] }
  0x9d   : > { %v1981_v57 = vrot.slane %v1979_v53, 5  ;;  %v6262_v53 = vld [vmem:[%s7579_s1 + $0x1f8] sm:$0xff]  }
  0x9e   : > { %5720 = vmatpush3.bf16.msra.mxu0 %v6228_v47  ;;  %v1375_v47 = vsel %vm6519_vm9, %v1370_v19, %v1374_v18  ;;  %v6241_v19 = vld [vmem:[%s7579_s1 + $0x170] sm:$0xff]   ;;  %v1989_v59 = vrot.slane %v1987_v51, 5 }
  0x9f   : > { %5721 = vmatprep.subr.bf16.mxu0 %v6229_v56  ;;  %v4979_v62 = vcombine.low %v1375_v47, %v1389_v2  ;;  %v1973_v47 = vshll.u32 %v1953_v49, 16  ;;  %v1984_v2 = vshrl.u32 %v1955_v50, 16 }
  0xa1   : > { %v1986_v32 = vrot.slane %v1984_v2, 4 }
  0xa2   : > { %5722 = vmatpush3.bf16.msra.mxu0 %v6229_v56  ;;  %v4990_v56 = vrot.slane %v1573_v31, 9  ;;  %v1627_v31 = vsel %vm6613_vm12, %v4996_v11, %v1626_v27  ;;  %v1961_v11 = vld [vmem:[#allocation2 + $0x30] sm:$0xf]  ;;  %v1963_v27 = vld [vmem:[#allocation2 + $0x38] sm:$0xf] }
  0xa3   : > { %5723 = vmatprep.subr.bf16.mxu0 %v6230_v9  ;;  %v5016_v36 = vcombine.low %v1623_v29, %v1627_v31  ;;  %v1990_v61 = vor.u32 %v1989_v59, %v1986_v32  ;;  %v2043_v13 = vshll.u32 %v1963_v27, 16  ;;  %v1965_v31 = vld [vmem:[#allocation2 + $0x40] sm:$0xf] }
  0xa6   : > { %5724 = vmatpush3.bf16.msra.mxu0 %v6230_v9  ;;  %v1603_v9 = vsel %vm6613_vm12, %v4990_v56, %v1602_v3  ;;  %v6249_v3 = vld [vmem:[%s7579_s1 + $0x1b0] sm:$0xff]   ;;  %v1975_v56 = vrot.slane %v1973_v47, 5  ;;  %v2057_v47 = vshll.u32 %v1965_v31, 16 }
  0xa7   : > { %5725 = vmatprep.subr.bf16.mxu0 %v6232_v42  ;;  %v5013_v18 = vcombine.low %v1599_v14, %v1603_v9  ;;  %v1991_v9 = vrot.slane %v1990_v61, 4 }
  0xaa   : > { %5726 = vmatpush3.bf16.msra.mxu0 %v6232_v42  ;;  %v4994_v42 = vrot.slane %v1577_v63, 9  ;;  %v6253_v63 = vld [vmem:[#allocation2 + $0x20] ss:$8 sps:$4 sm:$0xff]  }
  0xab   : > { %5727 = vmatprep.subr.bf16.mxu0 %v6234_v26 }
  0xac   : > { %v1619_v23 = vsel %vm6613_vm12, %v4994_v42, %v1618_v34  ;;  %v6256_v42 = vld [vmem:[%s7579_s1 + $0x1d8] sm:$0xff]  }
  0xad   : > { %v5015_v28 = vcombine.low %v1615_v22, %v1619_v23  ;;  %v6903_v22 = vld [vmem:[#allocation2 + $0x24] sm:$0x1] }
  0xae   : > { %5728 = vmatpush3.bf16.msra.mxu0 %v6234_v26  ;;  %v6244_v26 = vld [vmem:[%s7579_s1 + $0x188] sm:$0xff]  }
  0xaf   : > { %5737 = vmatprep.subr.bf16.mxu0 %v6235_v44 }
  0xb1   : > { %5730 = vmatmul.mubr.bf16.vlgmr.msra.gmra.mrb[0].mxu0 %v4978_v60  ;;  %v6877_v60 = vld [vmem:[#allocation2 + $0x1c] sm:$0x1] }
  0xb2   : > { %5738 = vmatpush3.bf16.msra.mxu0 %v6235_v44  ;;  %5733 = vmatprep.mubr.bf16.mxu0 %v4979_v62  ;;  %v1970_v44 = vshrl.u32 %v1953_v49, 16  ;;  %v1993_v62 = vshll.u32 %v6877_v60, 16  ;;  %v6909_v49 = vld [vmem:[#allocation2 + $0x3c] sm:$0x1] }
  0xb3   : > { %5739 = vmatprep.subr.bf16.mxu0 %v6236_v45 }
  0xb4   : > { %v1972_v54 = vrot.slane %v1970_v44, 4  ;;  %v1995_v1 = vrot.slane %v1993_v62, 5  ;;  %v2054_v44 = vshrl.u32 %v1965_v31, 16  ;;  %v2261_v31 = vrot.slane %v6875_v4, 5 }
  0xb6   : > { %5740 = vmatpush3.bf16.msra.mxu0 %v6236_v45  ;;  %v6252_v45 = vld [vmem:[%s7579_s1 + $0x1c0] sm:$0xff]   ;;  %v1976_v46 = vor.u32 %v1975_v56, %v1972_v54  ;;  %v1996_v8 = vsel %vm6519_vm9, %v1991_v9, %v1995_v1  ;;  %v6260_v56 = vld [vmem:[%s7579_s1 + $0x1f0] sm:$0xff]  }
  0xb7   : > { %5741 = vmatprep.subr.bf16.mxu0 %v6237_v7 }
  0xb8   : > { %v1977_v14 = vrot.slane %v1976_v46, 4  ;;  %v2049_v46 = vshll.u32 %v6909_v49, 16 }
  0xb9   : > { %5734 = vmatmul.mubr.bf16.gmra.mrb[4].mxu0 %v4980_v17  ;;  %v2001_v17 = vshll.u32 %v1957_v35, 16 }
  0xba   : > { %5742 = vmatpush3.bf16.msra.mxu0 %v6237_v7  ;;  %5753 = vmatprep.mubr.bf16.mxu0 %v5013_v18  ;;  %v1982_v7 = vsel %vm6519_vm9, %v1977_v14, %v1981_v57  ;;  %v2012_v18 = vshrl.u32 %v1959_v43, 16  ;;  %v6921_v57 = vld [vmem:[#allocation2 + $0x44] sm:$0x1] }
  0xbb   : > { %5743 = vmatprep.subr.bf16.mxu0 %v6238_v12  ;;  %v5069_v34 = vcombine.low %v1982_v7, %v1996_v8 }
  0xbe   : > { %5744 = vmatpush3.bf16.msra.mxu0 %v6238_v12  ;;  %v1998_v12 = vshrl.u32 %v1957_v35, 16 }
  0xbf   : > { %5745 = vmatprep.subr.bf16.mxu0 %v6239_v58 }
  0xc0   : > { %v2000_v23 = vrot.slane %v1998_v12, 4 }
  0xc2   : > { %5746 = vmatpush3.bf16.msra.mxu0 %v6239_v58  ;;  %v2015_v58 = vshll.u32 %v1959_v43, 16 }
  0xc3   : > { %5747 = vmatprep.subr.bf16.mxu0 %v6240_v15 }
  0xc4   : > { %v2017_v29 = vrot.slane %v2015_v58, 5 }
  0xc6   : > { %5748 = vmatpush3.bf16.msra.mxu0 %v6240_v15  ;;  %v6257_v15 = vld [vmem:[%s7579_s1 + $0x1e0] sm:$0xff]  }
  0xc7   : > { %5749 = vmatprep.subr.bf16.mxu0 %v6241_v19 }
  0xca   : > { %5750 = vmatpush3.bf16.msra.mxu0 %v6241_v19  ;;  %v2026_v19 = vshrl.u32 %v1961_v11, 16 }
  0xcb   : > { %5751 = vmatprep.subr.bf16.mxu0 %v6242_v38 }
  0xce   : > { %5752 = vmatpush3.bf16.msra.mxu0 %v6242_v38  ;;  %v2029_v38 = vshll.u32 %v1961_v11, 16  ;;  %v2063_v11 = vshll.u32 %v6921_v57, 16 }
  0xcf   : > { %5761 = vmatprep.subr.bf16.mxu0 %v6243_v39 }
  0xd1   : > { %5754 = vmatmul.mubr.bf16.vlgmr.msra.gmra.mrb[0].mxu0 %v5014_v24  ;;  %v2003_v24 = vrot.slane %v2001_v17, 5  ;;  %v6263_v17 = vld [vmem:[%s7579_s1 + $0x200] sm:$0xff]  }
  0xd2   : > { %5762 = vmatpush3.bf16.msra.mxu0 %v6243_v39  ;;  %5757 = vmatprep.mubr.bf16.mxu0 %v5015_v28  ;;  %v2040_v39 = vshrl.u32 %v1963_v27, 16  ;;  %v2014_v28 = vrot.slane %v2012_v18, 4 }
  0xd3   : > { %5763 = vmatprep.subr.bf16.mxu0 %v6244_v26  ;;  %v2004_v50 = vor.u32 %v2003_v24, %v2000_v23 }
  0xd4   : > { %v2018_v2 = vor.u32 %v2017_v29, %v2014_v28  ;;  %v6264_v28 = vld [vmem:[%s7579_s1 + $0x208] sm:$0xff]  }
  0xd5   : > { %v2005_v61 = vrot.slane %v2004_v50, 4 }
  0xd6   : > { %5764 = vmatpush3.bf16.msra.mxu0 %v6244_v26  ;;  %v6905_v26 = vld [vmem:[#allocation2 + $0x2c] sm:$0x1] }
  0xd7   : > { %5765 = vmatprep.subr.bf16.mxu0 %v6245_v33  ;;  %v2021_v51 = vshll.u32 %v6905_v26, 16 }
  0xd9   : > { %5758 = vmatmul.mubr.bf16.gmra.mrb[4].mxu0 %v5016_v36  ;;  %v2031_v36 = vrot.slane %v2029_v38, 5  ;;  %v2023_v14 = vrot.slane %v2021_v51, 5  ;;  %v6269_v51 = vld [vmem:[%s7579_s1 + $0x230] sm:$0xff]  }
  0xda   : > { %5766 = vmatpush3.bf16.msra.mxu0 %v6245_v33  ;;  %5777 = vmatprep.mubr.bf16.mxu0 %v6251_v37  ;;  %v2028_v33 = vrot.slane %v2026_v19, 4  ;;  %v2042_v37 = vrot.slane %v2040_v39, 4  ;;  %v2236_v19 = vld [vmem:[#allocation2 + $0x18] sm:$0xe] }
  0xdb   : > { %5767 = vmatprep.subr.bf16.mxu0 %v6246_v40 }
  0xdc   : > { %v2032_v32 = vor.u32 %v2031_v36, %v2028_v33  ;;  %v5082_v33 = vrot.slane %v2236_v19, 9  ;;  %v2265_v36 = vrot.slane %v6877_v60, 5 }
  0xde   : > { %5768 = vmatpush3.bf16.msra.mxu0 %v6246_v40  ;;  %v2045_v40 = vrot.slane %v2043_v13, 5  ;;  %v2266_v60 = vsel %vm6613_vm12, %v5082_v33, %v2265_v36  ;;  %v2507_v33 = vld [vmem:[#allocation3 + $0x38] sm:$0x1]  ;;  %v2531_v36 = vld [vmem:[#allocation3 + $0x3c] sm:$0x1] }
  0xdf   : > { %5769 = vmatprep.subr.bf16.mxu0 %v6247_v41 }
  0xe2   : > { %5770 = vmatpush3.bf16.msra.mxu0 %v6247_v41  ;;  %v1967_v41 = vld [vmem:[#allocation2 + $0x48] sm:$0xf] }
  0xe3   : > { %5771 = vmatprep.subr.bf16.mxu0 %v6248_v48  ;;  %v2071_v54 = vshll.u32 %v1967_v41, 16 }
  0xe5   : > { %v2073_v1 = vrot.slane %v2071_v54, 5  ;;  %v2238_v54 = vld [vmem:[#allocation2 + $0x28] sm:$0xe] }
  0xe6   : > { %5772 = vmatpush3.bf16.msra.mxu0 %v6248_v48  ;;  %v6907_v48 = vld [vmem:[#allocation2 + $0x34] sm:$0x1] }
  0xe7   : > { %5773 = vmatprep.subr.bf16.mxu0 %v6249_v3  ;;  %v2035_v59 = vshll.u32 %v6907_v48, 16 }
  0xe9   : > { %v2037_v7 = vrot.slane %v2035_v59, 5 }
  0xea   : > { %5774 = vmatpush3.bf16.msra.mxu0 %v6249_v3  ;;  %v2007_v3 = vshll.u32 %v6903_v22, 16 }
  0xeb   : > { %5775 = vmatprep.subr.bf16.mxu0 %v6250_v52 }
  0xec   : > { %v2009_v62 = vrot.slane %v2007_v3, 5 }
  0xee   : > { %5776 = vmatpush3.bf16.msra.mxu0 %v6250_v52  ;;  %v2068_v52 = vshrl.u32 %v1967_v41, 16  ;;  %v2010_v35 = vsel %vm6519_vm9, %v2005_v61, %v2009_v62  ;;  %v6265_v41 = vld [vmem:[%s7579_s1 + $0x210] sm:$0xff]   ;;  %v6270_v61 = vld [vmem:[%s7579_s1 + $0x238] sm:$0xff]  }
  0xef   : > { %5785 = vmatprep.subr.bf16.mxu0 %v6252_v45 }
  0xf0   : > { %v2070_v9 = vrot.slane %v2068_v52, 4  ;;  %v2237_v52 = vld [vmem:[#allocation2 + $0x20] sm:$0xe] }
  0xf1   : > { %5778 = vmatmul.mubr.bf16.vlgmr.msra.gmra.mrb[0].mxu0 %v6253_v63  ;;  %v2056_v63 = vrot.slane %v2054_v44, 4  ;;  %v6266_v44 = vld [vmem:[%s7579_s1 + $0x218] sm:$0xff]   ;;  %v5083_v59 = vrot.slane %v2237_v52, 9 }
  0xf2   : > { %5786 = vmatpush3.bf16.msra.mxu0 %v6252_v45  ;;  %5781 = vmatprep.mubr.bf16.mxu0 %v6259_v0  ;;  %v2046_v45 = vor.u32 %v2045_v40, %v2042_v37  ;;  %v2059_v0 = vrot.slane %v2057_v47, 5  ;;  %v2074_v27 = vor.u32 %v2073_v1, %v2070_v9  ;;  %v6267_v47 = vld [vmem:[%s7579_s1 + $0x220] sm:$0xff]  }
  0xf3   : > { %5787 = vmatprep.subr.bf16.mxu0 %v6254_v55  ;;  %v2241_v9 = vld [vmem:[#allocation2 + $0x40] sm:$0xe] }
  0xf4   : > { %v2047_v8 = vrot.slane %v2046_v45, 4  ;;  %v2075_v23 = vrot.slane %v2074_v27, 4  ;;  %v2269_v45 = vrot.slane %v6903_v22, 5  ;;  %v6271_v27 = vld [vmem:[%s7582_s4 + $0x40] sm:$0xff]  }
  0xf5   : > { %5833 = vmatprep.subr.bf16.mxu1 %v6271_v27 }
  0xf6   : > { %5788 = vmatpush3.bf16.msra.mxu0 %v6254_v55  ;;  %v2019_v55 = vrot.slane %v2018_v2, 4  ;;  %v6268_v2 = vld [vmem:[%s7579_s1 + $0x228] sm:$0xff]   ;;  %5834 = vmatpush3.bf16.msra.mxu1 %v6271_v27 }
  0xf7   : > { %5789 = vmatprep.subr.bf16.mxu0 %v6255_v5 }
  0xf8   : > { %v2024_v43 = vsel %vm6519_vm9, %v2019_v55, %v2023_v14  ;;  %v2281_v55 = vrot.slane %v6909_v49, 5  ;;  %v2270_v14 = vsel %vm6613_vm12, %v5083_v59, %v2269_v45  ;;  %v6275_v45 = vld [vmem:[%s7582_s4 + $0x60] sm:$0xff]  }
  0xf9   : > { %5782 = vmatmul.mubr.bf16.gmra.mrb[4].mxu0 %v6261_v16  ;;  %v2051_v16 = vrot.slane %v2049_v46, 5  ;;  %v5070_v38 = vcombine.low %v2010_v35, %v2024_v43  ;;  %v5084_v46 = vrot.slane %v2238_v54, 9  ;;  %v2504_v54 = vld [vmem:[#allocation3 + $0x30] sm:$0x1] }
  0xfa   : > { %5790 = vmatpush3.bf16.msra.mxu0 %v6255_v5  ;;  %5801 = vmatprep.mubr.bf16.mxu0 %v5069_v34  ;;  %v2033_v5 = vrot.slane %v2032_v32, 4  ;;  %v6923_v34 = vld [vmem:[#allocation2 + $0x4c] sm:$0x1]  ;;  %v2240_v32 = vld [vmem:[#allocation2 + $0x38] sm:$0xe] }
  0xfb   : > { %5791 = vmatprep.subr.bf16.mxu0 %v6256_v42  ;;  %v2077_v12 = vshll.u32 %v6923_v34, 16  ;;  %v2052_v58 = vsel %vm6519_vm9, %v2047_v8, %v2051_v16  ;;  %v2285_v8 = vrot.slane %v6921_v57, 5  ;;  %v2289_v35 = vrot.slane %v6923_v34, 5 }
  0xfc   : > { %v2038_v18 = vsel %vm6519_vm9, %v2033_v5, %v2037_v7  ;;  %v2242_v5 = vld [vmem:[#allocation2 + $0x48] sm:$0xe]  ;;  %v5087_v7 = vrot.slane %v2241_v9, 9 }
  0xfd   : > { %v5071_v13 = vcombine.low %v2038_v18, %v2052_v58  ;;  %v2079_v24 = vrot.slane %v2077_v12, 5  ;;  %v5088_v16 = vrot.slane %v2242_v5, 9  ;;  %v2495_v12 = vld [vmem:[#allocation3 + $0x18] sm:$0x1]  ;;  %v2489_v18 = vld [vmem:[#allocation3 + $0x8] sm:$0x1] }
  0xfe   : > { %5792 = vmatpush3.bf16.msra.mxu0 %v6256_v42  ;;  %v2060_v42 = vor.u32 %v2059_v0, %v2056_v63  ;;  %v2277_v63 = vrot.slane %v6907_v48, 5  ;;  %v5086_v0 = vrot.slane %v2240_v32, 9  ;;  %v2496_v57 = vsel %vm6433_vm3, 0, %v2495_v12  ;;  %v2513_v58 = vld [vmem:[#allocation3 + $0xc] sm:$0x1] }
  0xff   : > { %5793 = vmatprep.subr.bf16.mxu0 %v6257_v15  ;;  %v2080_v40 = vsel %vm6519_vm9, %v2075_v23, %v2079_v24  ;;  %v2290_v43 = vsel %vm6613_vm12, %v5088_v16, %v2289_v35  ;;  %2497 = vst [vmem:[#allocation3 + $0x18] sm:$0x1] %v2496_v57  ;;  %v2514_v19 = vsel %vm6441_vm4, 0, %v2513_v58  ;;  %v2492_v23 = vld [vmem:[#allocation3 + $0x10] sm:$0x1] }
 0x100   : > { %v2061_v39 = vrot.slane %v2060_v42, 4  ;;  %v2282_v1 = vsel %vm6613_vm12, %v5086_v0, %v2281_v55  ;;  %v2286_v42 = vsel %vm6613_vm12, %v5087_v7, %v2285_v8  ;;  %2515 = vst [vmem:[#allocation3 + $0xc] sm:$0x1] %v2514_v19  ;;  %v2516_v24 = vld [vmem:[#allocation3 + $0x14] sm:$0x1] }
 0x101   : > { %v2528_v32 = vld [vmem:[#allocation3 + $0x34] sm:$0x1]  ;;  %v7059_v55 = vld [vmem:[%s7581_s3] ss:$0 sm:$0xff] }
 0x102   : > { %5794 = vmatpush3.bf16.msra.mxu0 %v6257_v15  ;;  %v2235_v15 = vld [vmem:[#allocation2 + $0x10] sm:$0xe]  ;;  %v2529_v59 = vsel %vm6441_vm4, 0, %v2528_v32 }
 0x103   : > { %5795 = vmatprep.subr.bf16.mxu0 %v6258_v20  ;;  %v5081_v29 = vrot.slane %v2235_v15, 9  ;;  %v2490_v15 = vsel %vm6433_vm3, 0, %v2489_v18  ;;  %2530 = vst [vmem:[#allocation3 + $0x34] sm:$0x1] %v2529_v59 }
 0x104   : > { %2491 = vst [vmem:[#allocation3 + $0x8] sm:$0x1] %v2490_v15 }
 0x105   : > { %v2262_v4 = vsel %vm6613_vm12, %v5081_v29, %v2261_v31  ;;  %v2517_v29 = vsel %vm6441_vm4, 0, %v2516_v24  ;;  %v6272_v31 = vld [vmem:[%s7582_s4 + $0x48] sm:$0xff]  }
 0x106   : > { %5796 = vmatpush3.bf16.msra.mxu0 %v6258_v20  ;;  %v2065_v20 = vrot.slane %v2063_v11, 5  ;;  %v5105_v3 = vcombine.low %v2262_v4, %v2266_v60  ;;  %v5108_v11 = vcombine.low %v2286_v42, %v2290_v43  ;;  %2518 = vst [vmem:[#allocation3 + $0x14] sm:$0x1] %v2517_v29  ;;  %5835 = vmatprep.subr.bf16.mxu1 %v6272_v31  ;;  %v2525_v60 = vld [vmem:[#allocation3 + $0x2c] sm:$0x1] }
 0x107   : > { %5797 = vmatprep.subr.bf16.mxu0 %v6260_v56  ;;  %5836 = vmatpush3.bf16.msra.mxu1 %v6272_v31 }
 0x108   : > { %v2066_v37 = vsel %vm6519_vm9, %v2061_v39, %v2065_v20  ;;  %v2522_v39 = vld [vmem:[#allocation3 + $0x24] sm:$0x1] }
 0x109   : > { %v5072_v50 = vcombine.low %v2066_v37, %v2080_v40  ;;  %v2523_v20 = vsel %vm6441_vm4, 0, %v2522_v39  ;;  %v2508_v37 = vsel %vm6433_vm3, 0, %v2507_v33  ;;  %v2532_v40 = vsel %vm6441_vm4, 0, %v2531_v36 }
 0x10a   : > { %5798 = vmatpush3.bf16.msra.mxu0 %v6260_v56  ;;  %v2239_v56 = vld [vmem:[#allocation2 + $0x30] sm:$0xe]  ;;  %2524 = vst [vmem:[#allocation3 + $0x24] sm:$0x1] %v2523_v20  ;;  %2509 = vst [vmem:[#allocation3 + $0x38] sm:$0x1] %v2508_v37 }
 0x10b   : > { %5799 = vmatprep.subr.bf16.mxu0 %v6262_v53  ;;  %v5085_v62 = vrot.slane %v2239_v56, 9  ;;  %2533 = vst [vmem:[#allocation3 + $0x3c] sm:$0x1] %v2532_v40  ;;  %v2505_v56 = vsel %vm6433_vm3, 0, %v2504_v54 }
 0x10c   : > { %2506 = vst [vmem:[#allocation3 + $0x30] sm:$0x1] %v2505_v56 }
 0x10e   : > { %5800 = vmatpush3.bf16.msra.mxu0 %v6262_v53  ;;  %v2273_v53 = vrot.slane %v6905_v26, 5  ;;  %v2278_v26 = vsel %vm6613_vm12, %v5085_v62, %v2277_v63  ;;  %v7049_v62 = vld [vmem:[#allocation3] sm:$0xf]  ;;  %v7054_v63 = vld [vmem:[%s7580_s2] ss:$0 sm:$0xff] }
 0x10f   : > { %5809 = vmatprep.subr.bf16.mxu0 %v6263_v17  ;;  %v5107_v49 = vcombine.low %v2278_v26, %v2282_v1 }
 0x110   : > { %v2274_v22 = vsel %vm6613_vm12, %v5084_v46, %v2273_v53  ;;  %v6276_v46 = vld [vmem:[%s7582_s4 + $0x68] sm:$0xff]   ;;  %v6277_v53 = vld [vmem:[%s7582_s4 + $0x70] sm:$0xff]  }
 0x111   : > { %5802 = vmatmul.mubr.bf16.vlgmr.msra.gmra.mrb[0].mxu0 %v5070_v38  ;;  %v5106_v48 = vcombine.low %v2270_v14, %v2274_v22  ;;  %v2498_v38 = vld [vmem:[#allocation3 + $0x20] sm:$0x1]  ;;  %v2730_v14 = vshrl.u32 %v7049_v62, 16  ;;  %v2733_v22 = vshll.u32 %v7049_v62, 16 }
 0x112   : > { %5810 = vmatpush3.bf16.msra.mxu0 %v6263_v17  ;;  %5805 = vmatprep.mubr.bf16.mxu0 %v5071_v13  ;;  %v2519_v17 = vld [vmem:[#allocation3 + $0x1c] sm:$0x1]  ;;  %v2499_v13 = vsel %vm6433_vm3, 0, %v2498_v38 }
 0x113   : > { %5811 = vmatprep.subr.bf16.mxu0 %v6264_v28  ;;  %v2520_v34 = vsel %vm6441_vm4, 0, %v2519_v17  ;;  %2500 = vst [vmem:[#allocation3 + $0x20] sm:$0x1] %v2499_v13  ;;  %v7069_v35 = vrot.slane %v2730_v14, 4  ;;  %v7071_v42 = vrot.slane %v2733_v22, 5 }
 0x114   : > { %2521 = vst [vmem:[#allocation3 + $0x1c] sm:$0x1] %v2520_v34  ;;  %v7075_v34 = vld [vmem:[#allocation3 + $0x4] sm:$0x1] }
 0x115   : > { %v2736_v19 = vor.u32 %v7071_v42, %v7069_v35  ;;  %v2739_v38 = vshll.u32 %v7075_v34, 16 }
 0x116   : > { %5812 = vmatpush3.bf16.msra.mxu0 %v6264_v28  ;;  %v2493_v28 = vsel %vm6433_vm3, 0, %v2492_v23 }
 0x117   : > { %5813 = vmatprep.subr.bf16.mxu0 %v6265_v41  ;;  %2494 = vst [vmem:[#allocation3 + $0x10] sm:$0x1] %v2493_v28  ;;  %v2661_v28 = vld [vmem:[#allocation3 + $0x18] sm:$0xf] }
 0x119   : > { %5806 = vmatmul.mubr.bf16.gmra.mrb[4].mxu0 %v5072_v50  ;;  %v6273_v50 = vld [vmem:[%s7582_s4 + $0x50] sm:$0xff]  }
 0x11a   : > { %5814 = vmatpush3.bf16.msra.mxu0 %v6265_v41  ;;  %5825 = vmatprep.mubr.bf16.mxu0 %v5105_v3  ;;  %v2501_v41 = vld [vmem:[#allocation3 + $0x28] sm:$0x1]  ;;  %v2526_v3 = vsel %vm6441_vm4, 0, %v2525_v60 }
 0x11b   : > { %5815 = vmatprep.subr.bf16.mxu0 %v6266_v44  ;;  %v2502_v4 = vsel %vm6433_vm3, 0, %v2501_v41  ;;  %2527 = vst [vmem:[#allocation3 + $0x2c] sm:$0x1] %v2526_v3  ;;  %5837 = vmatprep.subr.bf16.mxu1 %v6273_v50  ;;  %v2664_v29 = vld [vmem:[#allocation3 + $0x1c] sm:$0x1] }
 0x11c   : > { %2503 = vst [vmem:[#allocation3 + $0x28] sm:$0x1] %v2502_v4  ;;  %5838 = vmatpush3.bf16.msra.mxu1 %v6273_v50  ;;  %v2649_v4 = vld [vmem:[#allocation3 + $0x8] sm:$0xf] }
 0x11e   : > { %5816 = vmatpush3.bf16.msra.mxu0 %v6266_v44  ;;  %v2510_v44 = vld [vmem:[#allocation3 + $0x40] sm:$0x1] }
 0x11f   : > { %5817 = vmatprep.subr.bf16.mxu0 %v6267_v47 }
 0x122   : > { %5818 = vmatpush3.bf16.msra.mxu0 %v6267_v47  ;;  %v2534_v47 = vld [vmem:[#allocation3 + $0x44] sm:$0x1] }
 0x123   : > { %5819 = vmatprep.subr.bf16.mxu0 %v6268_v2  ;;  %v2535_v52 = vsel %vm6441_vm4, 0, %v2534_v47 }
 0x124   : > { %2536 = vst [vmem:[#allocation3 + $0x44] sm:$0x1] %v2535_v52 }
 0x126   : > { %5820 = vmatpush3.bf16.msra.mxu0 %v6268_v2  ;;  %v6274_v2 = vld [vmem:[%s7582_s4 + $0x58] sm:$0xff]  }
 0x127   : > { %5821 = vmatprep.subr.bf16.mxu0 %v6269_v51  ;;  %5839 = vmatprep.subr.bf16.mxu1 %v6274_v2 }
 0x128   : > { %5840 = vmatpush3.bf16.msra.mxu1 %v6274_v2  ;;  %v2652_v2 = vld [vmem:[#allocation3 + $0xc] sm:$0x1] }
 0x129   : > { %5841 = vmatprep.subr.bf16.mxu1 %v6275_v45 }
 0x12a   : > { %5822 = vmatpush3.bf16.msra.mxu0 %v6269_v51  ;;  %v2511_v51 = vsel %vm6433_vm3, 0, %v2510_v44 }
 0x12b   : > { %5823 = vmatprep.subr.bf16.mxu0 %v6270_v61  ;;  %2512 = vst [vmem:[#allocation3 + $0x40] sm:$0x1] %v2511_v51 }
 0x12c   : > { %5842 = vmatpush3.bf16.msra.mxu1 %v6275_v45  ;;  %v2667_v45 = vld [vmem:[#allocation3 + $0x20] sm:$0xf] }
 0x12d   : > { %5843 = vmatprep.subr.bf16.mxu1 %v6276_v46 }
 0x12e   : > { %5824 = vmatpush3.bf16.msra.mxu0 %v6270_v61  ;;  %v7046_v61 = vld [vmem:[%s7582_s4] sm:$0xff]  }
 0x130   : > { %5844 = vmatpush3.bf16.msra.mxu1 %v6276_v46 }
 0x131   : > { %5826 = vmatmul.mubr.bf16.vlgmr.msra.gmra.mrb[0].mxu0 %v5106_v48  ;;  %5845 = vmatprep.subr.bf16.mxu1 %v6277_v53 }
 0x132   : > { %5829 = vmatprep.mubr.bf16.mxu0 %v5107_v49 }
 0x134   : > { %5846 = vmatpush3.bf16.msra.mxu1 %v6277_v53 }
 0x135   : > { %5847 = vmatprep.subr.bf16.mxu1 %v6278_v10 }
 0x138   : > { %5848 = vmatpush3.bf16.msra.mxu1 %v6278_v10 }
 0x139   : > { %5830 = vmatmul.mubr.bf16.gmra.mrb[4].mxu0 %v5108_v11  ;;  %5857 = vmatprep.subr.bf16.mxu1 %v7046_v61 }
 0x204   : > { %v5827_v0 = vpop.f32.mrb[0].mxu0 }
 0x205   : > { %v2454_v9 = vmul.f32 %v5827_v0, %v7054_v63  ;;  %v2406_v26 = vpop.f32.mrb[1].mxu0  ;;  %v2670_v0 = vld [vmem:[#allocation3 + $0x24] sm:$0x1] }
 0x206   : > { %v2452_v1 = vmul.f32 %v7054_v63, %v2406_v26  ;;  %v5828_v5 = vpop.f32.mrb[2].mxu0 }
 0x207   : > { %v2469_v48 = vadd.f32 %v7059_v55, %v2454_v9  ;;  %v2455_v7 = vmul.f32 %v5828_v5, %v7054_v63  ;;  %v2409_v49 = vpop.f32.mrb[3].mxu0 }
 0x208   : > { %v2467_v8 = vadd.f32 %v7059_v55, %v2452_v1  ;;  %v2453_v16 = vmul.f32 %v7054_v63, %v2409_v49 }
 0x209   : > { %v2477_v43 = vmax.f32 %v2469_v48, 0.0  ;;  %v2470_v11 = vadd.f32 %v7059_v55, %v2455_v7  ;;  %v2655_v48 = vld [vmem:[#allocation3 + $0x10] sm:$0xf]  ;;  %v2658_v7 = vld [vmem:[#allocation3 + $0x14] sm:$0x1] }
 0x20a   : > { %v2475_v27 = vmax.f32 %v2467_v8, 0.0  ;;  %v2468_v12 = vadd.f32 %v7059_v55, %v2453_v16 }
 0x20b   : > { %v5395_v17 = vpack.c.bf16 %v2477_v43, %v2477_v43  ;;  %v2478_v57 = vmax.f32 %v2470_v11, 0.0 }
 0x20c   : > { %v5393_v18 = vpack.c.bf16 %v2475_v27, %v2475_v27  ;;  %v2476_v58 = vmax.f32 %v2468_v12, 0.0  ;;  %v5831_v15 = vpop.f32.mrb[4].mxu0 }
 0x20d   : > { %v2586_v39 = vshrl.u32 %v5395_v17, 16  ;;  %v2589_v13 = vshll.u32 %v5395_v17, 16  ;;  %v5396_v20 = vpack.c.bf16 %v2478_v57, %v2478_v57  ;;  %v2458_v23 = vmul.f32 %v5831_v15, %v7054_v63  ;;  %v2422_v24 = vpop.f32.mrb[5].mxu0 }
 0x20e   : > { %v2570_v31 = vshrl.u32 %v5393_v18, 16  ;;  %v2573_v33 = vshll.u32 %v5393_v18, 16  ;;  %v5394_v36 = vpack.c.bf16 %v2476_v58, %v2476_v58  ;;  %v2456_v37 = vmul.f32 %v7054_v63, %v2422_v24  ;;  %v5832_v40 = vpop.f32.mrb[6].mxu0 }
 0x20f   : > { %v2588_v41 = vrot.slane %v2586_v39, 7  ;;  %v2594_v60 = vshrl.u32 %v5396_v20, 16  ;;  %v2597_v50 = vshll.u32 %v5396_v20, 16  ;;  %v2473_v3 = vadd.f32 %v7059_v55, %v2458_v23  ;;  %v2425_v44 = vpop.f32.mrb[7].mxu0  ;;  %v2685_v20 = vld [vmem:[#allocation3 + $0x38] sm:$0xf] }
 0x210   : > { %v2572_v47 = vrot.slane %v2570_v31, 7  ;;  %v2578_v51 = vshrl.u32 %v5394_v36, 16  ;;  %v2581_v52 = vshll.u32 %v5394_v36, 16  ;;  %v2471_v54 = vadd.f32 %v7059_v55, %v2456_v37 }
 0x211   : > { %v2591_v56 = vor.u32 %v2589_v13, %v2588_v41  ;;  %v2592_v32 = vrot.slane %v2588_v41, 4  ;;  %v2596_v59 = vrot.slane %v2594_v60, 7  ;;  %v2481_v46 = vmax.f32 %v2473_v3, 0.0  ;;  %v2676_v41 = vld [vmem:[#allocation3 + $0x2c] sm:$0x1] }
 0x212   : > { %v2575_v53 = vor.u32 %v2573_v33, %v2572_v47  ;;  %v2576_v10 = vrot.slane %v2572_v47, 4  ;;  %v2580_v14 = vrot.slane %v2578_v51, 7  ;;  %v2479_v22 = vmax.f32 %v2471_v54, 0.0  ;;  %v2688_v33 = vld [vmem:[#allocation3 + $0x3c] sm:$0x1] }
 0x213   : > { %v2662_v9 = vsel %vm6466_vm6, %v2591_v56, %v2661_v28  ;;  %v2665_v26 = vsel %vm6433_vm3, %v2592_v32, %v2664_v29  ;;  %v2599_v1 = vor.u32 %v2597_v50, %v2596_v59  ;;  %v2600_v5 = vrot.slane %v2596_v59, 4 }
 0x214   : > { %2663 = vst [vmem:[#allocation3 + $0x18] sm:$0xf] %v2662_v9  ;;  %2666 = vst [vmem:[#allocation3 + $0x1c] sm:$0x1] %v2665_v26  ;;  %v2650_v49 = vsel %vm6466_vm6, %v2575_v53, %v2649_v4  ;;  %v2653_v8 = vsel %vm6433_vm3, %v2576_v10, %v2652_v2  ;;  %v2583_v16 = vor.u32 %v2581_v52, %v2580_v14  ;;  %v2584_v43 = vrot.slane %v2580_v14, 4 }
 0x215   : > { %2651 = vst [vmem:[#allocation3 + $0x8] sm:$0xf] %v2650_v49  ;;  %2654 = vst [vmem:[#allocation3 + $0xc] sm:$0x1] %v2653_v8  ;;  %v2668_v11 = vsel %vm6466_vm6, %v2599_v1, %v2667_v45  ;;  %v2671_v27 = vsel %vm6433_vm3, %v2600_v5, %v2670_v0  ;;  %v5399_v12 = vpack.c.bf16 %v2481_v46, %v2481_v46  ;;  %v7107_v28 = vrot.slane %v2736_v19, 4 }
 0x216   : > { %v5397_v17 = vpack.c.bf16 %v2479_v22, %v2479_v22  ;;  %2669 = vst [vmem:[#allocation3 + $0x20] sm:$0xf] %v2668_v11  ;;  %2672 = vst [vmem:[#allocation3 + $0x24] sm:$0x1] %v2671_v27  ;;  %v2656_v57 = vsel %vm6466_vm6, %v2583_v16, %v2655_v48  ;;  %v2659_v18 = vsel %vm6433_vm3, %v2584_v43, %v2658_v7  ;;  %v7111_v29 = vrot.slane %v2739_v38, 5 }
 0x217   : > { %v2459_v58 = vmul.f32 %v5832_v40, %v7054_v63  ;;  %v2457_v15 = vmul.f32 %v7054_v63, %v2425_v44  ;;  %2657 = vst [vmem:[#allocation3 + $0x10] sm:$0xf] %v2656_v57  ;;  %2660 = vst [vmem:[#allocation3 + $0x14] sm:$0x1] %v2659_v18  ;;  %v2618_v39 = vshrl.u32 %v5399_v12, 16  ;;  %v2621_v63 = vshll.u32 %v5399_v12, 16 }
 0x218   : > { %v2602_v13 = vshrl.u32 %v5397_v17, 16  ;;  %v2605_v37 = vshll.u32 %v5397_v17, 16  ;;  %v2673_v40 = vld [vmem:[#allocation3 + $0x28] sm:$0xf]  ;;  %v2742_v2 = vsel %vm6519_vm9, %v7107_v28, %v7111_v29  ;;  %v2691_v10 = vld [vmem:[#allocation3 + $0x40] sm:$0xf] }
 0x219   : > { %v2474_v23 = vadd.f32 %v7059_v55, %v2459_v58  ;;  %v2472_v24 = vadd.f32 %v7059_v55, %v2457_v15  ;;  %v2620_v31 = vrot.slane %v2618_v39, 7  ;;  %v2694_v0 = vld [vmem:[#allocation3 + $0x44] sm:$0x1]  ;;  %v2679_v22 = vld [vmem:[#allocation3 + $0x30] sm:$0xf] }
 0x21a   : > { %v2604_v36 = vrot.slane %v2602_v13, 7  ;;  %v2682_v49 = vld [vmem:[#allocation3 + $0x34] sm:$0x1] }
 0x21b   : > { %v2482_v4 = vmax.f32 %v2474_v23, 0.0  ;;  %v2480_v60 = vmax.f32 %v2472_v24, 0.0  ;;  %v2623_v50 = vor.u32 %v2621_v63, %v2620_v31  ;;  %v2624_v55 = vrot.slane %v2620_v31, 4  ;;  %v7113_v35 = vld [vmem:[#allocation3 + $0x18] sm:$0xf] }
 0x21c   : > { %v2607_v3 = vor.u32 %v2605_v37, %v2604_v36  ;;  %v2608_v44 = vrot.slane %v2604_v36, 4  ;;  %v7115_v47 = vld [vmem:[#allocation3 + $0x8] sm:$0xf]  ;;  %v7117_v38 = vld [vmem:[#allocation3 + $0xc] sm:$0x1]  ;;  %v2772_v53 = vshrl.u32 %v7113_v35, 16 }
 0x21d   : > { %v5400_v42 = vpack.c.bf16 %v2482_v4, %v2482_v4  ;;  %v5398_v19 = vpack.c.bf16 %v2480_v60, %v2480_v60  ;;  %v2686_v51 = vsel %vm6466_vm6, %v2623_v50, %v2685_v20  ;;  %v2689_v52 = vsel %vm6433_vm3, %v2624_v55, %v2688_v33  ;;  %v7141_v27 = vld [vmem:[#allocation3 + $0x1c] sm:$0x1]  ;;  %v7145_v39 = vld [vmem:[#allocation3 + $0x20] sm:$0xf] }
 0x21e   : > { %v2674_v54 = vsel %vm6466_vm6, %v2607_v3, %v2673_v40  ;;  %v2677_v56 = vsel %vm6433_vm3, %v2608_v44, %v2676_v41  ;;  %2687 = vst [vmem:[#allocation3 + $0x38] sm:$0xf] %v2686_v51  ;;  %2690 = vst [vmem:[#allocation3 + $0x3c] sm:$0x1] %v2689_v52  ;;  %v7131_v46 = vld [vmem:[#allocation3 + $0x10] sm:$0xf] }
 0x21f   : > { %2675 = vst [vmem:[#allocation3 + $0x28] sm:$0xf] %v2674_v54  ;;  %2678 = vst [vmem:[#allocation3 + $0x2c] sm:$0x1] %v2677_v56  ;;  %v2626_v32 = vshrl.u32 %v5400_v42, 16  ;;  %v2629_v59 = vshll.u32 %v5400_v42, 16 }
 0x220   : > { %v2610_v45 = vshrl.u32 %v5398_v19, 16  ;;  %v2613_v14 = vshll.u32 %v5398_v19, 16  ;;  %v2744_v9 = vshrl.u32 %v7115_v47, 16  ;;  %v2747_v26 = vshll.u32 %v7115_v47, 16  ;;  %v7137_v5 = vld [vmem:[#allocation3 + $0x14] sm:$0x1] }
 0x221   : > { %v2753_v1 = vshll.u32 %v7117_v38, 16  ;;  %v2628_v48 = vrot.slane %v2626_v32, 7  ;;  %v2758_v8 = vshrl.u32 %v7131_v46, 16  ;;  %v2761_v16 = vshll.u32 %v7131_v46, 16  ;;  %v7161_v42 = vld [vmem:[#allocation3 + $0x24] sm:$0x1] }
 0x222   : > { %v2612_v7 = vrot.slane %v2610_v45, 7  ;;  %v2746_v43 = vrot.slane %v2744_v9, 4  ;;  %v2749_v11 = vrot.slane %v2747_v26, 5  ;;  %v2767_v12 = vshll.u32 %v7137_v5, 16 }
 0x223   : > { %v2775_v17 = vshll.u32 %v7113_v35, 16  ;;  %v2631_v57 = vor.u32 %v2629_v59, %v2628_v48  ;;  %v2632_v18 = vrot.slane %v2628_v48, 4  ;;  %v2755_v20 = vrot.slane %v2753_v1, 5 }
 0x224   : > { %v2615_v58 = vor.u32 %v2613_v14, %v2612_v7  ;;  %v2616_v15 = vrot.slane %v2612_v7, 4  ;;  %v2750_v13 = vor.u32 %v2749_v11, %v2746_v43  ;;  %v2760_v23 = vrot.slane %v2758_v8, 4 }
 0x225   : > { %v2763_v24 = vrot.slane %v2761_v16, 5  ;;  %v2692_v31 = vsel %vm6466_vm6, %v2631_v57, %v2691_v10  ;;  %v2695_v63 = vsel %vm6433_vm3, %v2632_v18, %v2694_v0  ;;  %v2774_v41 = vrot.slane %v2772_v53, 4  ;;  %v7164_v51 = vld [vmem:[#allocation3 + $0x38] sm:$0xf]  ;;  %v7181_v29 = vld [vmem:[#allocation3 + $0x3c] sm:$0x1] }
 0x226   : > { %v2680_v33 = vsel %vm6466_vm6, %v2615_v58, %v2679_v22  ;;  %v2683_v36 = vsel %vm6433_vm3, %v2616_v15, %v2682_v49  ;;  %2693 = vst [vmem:[#allocation3 + $0x40] sm:$0xf] %v2692_v31  ;;  %2696 = vst [vmem:[#allocation3 + $0x44] sm:$0x1] %v2695_v63  ;;  %v2751_v37 = vrot.slane %v2750_v13, 4  ;;  %v2777_v4 = vrot.slane %v2775_v17, 5 }
 0x227   : > { %2681 = vst [vmem:[#allocation3 + $0x30] sm:$0xf] %v2680_v33  ;;  %2684 = vst [vmem:[#allocation3 + $0x34] sm:$0x1] %v2683_v36  ;;  %v2764_v40 = vor.u32 %v2763_v24, %v2760_v23  ;;  %v2769_v60 = vrot.slane %v2767_v12, 5  ;;  %v2781_v50 = vshll.u32 %v7141_v27, 16 }
 0x228   : > { %v7156_v55 = vld [vmem:[#allocation3 + $0x28] sm:$0xf]  ;;  %v2786_v3 = vshrl.u32 %v7145_v39, 16  ;;  %v2756_v30 = vsel %vm6519_vm9, %v2751_v37, %v2755_v20  ;;  %v2778_v44 = vor.u32 %v2777_v4, %v2774_v41  ;;  %v2789_v19 = vshll.u32 %v7145_v39, 16  ;;  %v7173_v45 = vld [vmem:[#allocation3 + $0x2c] sm:$0x1] }
 0x229   : > { %v2765_v6 = vrot.slane %v2764_v40, 4  ;;  %v5143_v52 = vcombine.low %v2742_v2, %v2756_v30  ;;  %v2783_v54 = vrot.slane %v2781_v50, 5  ;;  %v2800_v10 = vshrl.u32 %v7156_v55, 16  ;;  %v6280_v0 = vld [vmem:[%s7582_s4 + $0x8] sm:$0xff]   ;;  %v3126_v57 = vld [vmem:[#allocation3 + $0x10] sm:$0xe] }
 0x22a   : > { %v2788_v56 = vrot.slane %v2786_v3, 4  ;;  %v2779_v59 = vrot.slane %v2778_v44, 4  ;;  %v2791_v53 = vrot.slane %v2789_v19, 5  ;;  %v2795_v14 = vshll.u32 %v7161_v42, 16  ;;  %v3127_v63 = vld [vmem:[#allocation3 + $0x18] sm:$0xe] }
 0x22b   : > { %v2770_v32 = vsel %vm6519_vm9, %v2765_v6, %v2769_v60  ;;  %5849 = vmatprep.mubr.bf16.mxu1 %v5143_v52  ;;  %v2803_v28 = vshll.u32 %v7156_v55, 16  ;;  %v2828_v2 = vshrl.u32 %v7164_v51, 16  ;;  %v2802_v26 = vrot.slane %v2800_v10, 4  ;;  %v6281_v37 = vld [vmem:[%s7582_s4 + $0x10] sm:$0xff]   ;;  %v6283_v52 = vld [vmem:[%s7582_s4 + $0x18] sm:$0xff]  }
 0x22c   : > { %v2784_v22 = vsel %vm6519_vm9, %v2779_v59, %v2783_v54  ;;  %v2792_v9 = vor.u32 %v2791_v53, %v2788_v56  ;;  %v2831_v1 = vshll.u32 %v7164_v51, 16  ;;  %v2809_v49 = vshll.u32 %v7173_v45, 16 }
 0x22d   : > { %v5144_v48 = vcombine.low %v2770_v32, %v2784_v22  ;;  %v2805_v7 = vrot.slane %v2803_v28, 5  ;;  %v3158_v43 = vrot.slane %v7137_v5, 5  ;;  %v2797_v18 = vrot.slane %v2795_v14, 5  ;;  %v3131_v32 = vld [vmem:[#allocation3 + $0x38] sm:$0xe] }
 0x22e   : > { %v7188_v8 = vld [vmem:[#allocation3 + $0x30] sm:$0xf]  ;;  %v2727_v16 = vld [vmem:[#allocation3 + $0x34] sm:$0x1]  ;;  %v2793_v11 = vrot.slane %v2792_v9, 4  ;;  %v2830_v15 = vrot.slane %v2828_v2, 4  ;;  %v5155_v2 = vcombine.low %v7049_v62, %v7115_v47 }
 0x22f   : > { %v2814_v12 = vshrl.u32 %v7188_v8, 16  ;;  %v2817_v17 = vshll.u32 %v7188_v8, 16  ;;  %5850 = vmatmul.mubr.bf16.vlgmr.msra.gmra.mrb[0].mxu1 %v5144_v48  ;;  %v2806_v58 = vor.u32 %v2805_v7, %v2802_v26  ;;  %v2833_v13 = vrot.slane %v2831_v1, 5  ;;  %v3130_v19 = vld [vmem:[#allocation3 + $0x30] sm:$0xe]  ;;  %v6285_v47 = vld [vmem:[%s7582_s4 + $0x28] sm:$0xff]  }
 0x230   : > { %5858 = vmatpush3.bf16.msra.mxu1 %v7046_v61  ;;  %v2823_v24 = vshll.u32 %v2727_v16, 16  ;;  %v2837_v31 = vshll.u32 %v7181_v29, 16  ;;  %v3162_v5 = vrot.slane %v7141_v27, 5  ;;  %v2811_v36 = vrot.slane %v2809_v49, 5  ;;  %v6284_v26 = vld [vmem:[%s7582_s4 + $0x20] sm:$0xff]   ;;  %v6287_v7 = vld [vmem:[%s7582_s4 + $0x38] sm:$0xff]  }
 0x231   : > { %v2816_v20 = vrot.slane %v2814_v12, 4  ;;  %v2819_v23 = vrot.slane %v2817_v17, 5  ;;  %5859 = vmatprep.subr.bf16.mxu1 %v6280_v0  ;;  %v2807_v33 = vrot.slane %v2806_v58, 4  ;;  %v2834_v40 = vor.u32 %v2833_v13, %v2830_v15  ;;  %v6289_v49 = vld [vmem:[%s7582_s4 + $0x80] sm:$0xff]   ;;  %v6291_v12 = vld [vmem:[%s7582_s4 + $0x88] sm:$0xff]  }
 0x232   : > { %v2798_v41 = vsel %vm6519_vm9, %v2793_v11, %v2797_v18  ;;  %v5169_v50 = vrot.slane %v3126_v57, 9  ;;  %v5170_v3 = vrot.slane %v3127_v63, 9  ;;  %v2825_v6 = vrot.slane %v2823_v24, 5  ;;  %v6295_v13 = vld [vmem:[%s7582_s4 + $0xa0] sm:$0xff]   ;;  %v3128_v24 = vld [vmem:[#allocation3 + $0x20] sm:$0xe] }
 0x233   : > { %v2820_v61 = vor.u32 %v2819_v23, %v2816_v20  ;;  %v2812_v4 = vsel %vm6519_vm9, %v2807_v33, %v2811_v36  ;;  %v2835_v60 = vrot.slane %v2834_v40, 4  ;;  %v2839_v44 = vrot.slane %v2837_v31, 5  ;;  %v3129_v20 = vld [vmem:[#allocation3 + $0x28] sm:$0xe] }
 0x234   : > { %5860 = vmatpush3.bf16.msra.mxu1 %v6280_v0  ;;  %v5145_v27 = vcombine.low %v2798_v41, %v2812_v4  ;;  %v7208_v54 = vsel %vm6613_vm12, %v5169_v50, %v3158_v43  ;;  %v7212_v56 = vsel %vm6613_vm12, %v5170_v3, %v3162_v5  ;;  %v5173_v14 = vrot.slane %v3130_v19, 9  ;;  %v3125_v43 = vld [vmem:[#allocation3 + $0x8] sm:$0xe]  ;;  %v6299_v5 = vld [vmem:[%s7582_s4 + $0xc0] sm:$0xff]   ;;  %v6305_v50 = vld [vmem:[%s7582_s4 + $0xe8] sm:$0xff]  }
 0x235   : > { %v2821_v30 = vrot.slane %v2820_v61, 4  ;;  %5861 = vmatprep.subr.bf16.mxu1 %v6281_v37  ;;  %v2840_v53 = vsel %vm6519_vm9, %v2835_v60, %v2839_v44  ;;  %v5192_v10 = vcombine.low %v7208_v54, %v7212_v56  ;;  %v3174_v28 = vrot.slane %v2727_v16, 5  ;;  %v3124_v16 = vld [vmem:[#allocation3] sm:$0xe]  ;;  %v6298_v23 = vld [vmem:[%s7582_s4 + $0xb8] sm:$0xff]   ;;  %v6304_v60 = vld [vmem:[%s7582_s4 + $0xe0] sm:$0xff]  }
 0x236   : > { %5853 = vmatprep.mubr.bf16.mxu1 %v5145_v27  ;;  %v5174_v22 = vrot.slane %v3131_v32, 9  ;;  %v3178_v9 = vrot.slane %v7181_v29, 5  ;;  %v6286_v29 = vld [vmem:[%s7582_s4 + $0x30] sm:$0xff]   ;;  %v5156_v11 = vcombine.low %v7131_v46, %v7113_v35  ;;  %v5157_v17 = vcombine.low %v7145_v39, %v7156_v55  ;;  %v6303_v61 = vld [vmem:[%s7582_s4 + $0xd8] sm:$0xff]   ;;  %v3506_v3 = vld [vmem:[#allocation3 + $0x10] sm:$0xf] }
 0x237   : > { %v2826_v59 = vsel %vm6519_vm9, %v2821_v30, %v2825_v6  ;;  %v7228_v1 = vsel %vm6613_vm12, %v5173_v14, %v3174_v28  ;;  %v3150_v57 = vrot.slane %v7075_v34, 5  ;;  %v3154_v18 = vrot.slane %v7117_v38, 5  ;;  %v6293_v35 = vld [vmem:[%s7582_s4 + $0x90] sm:$0xff]   ;;  %v6294_v38 = vld [vmem:[%s7582_s4 + $0x98] sm:$0xff]  }
 0x238   : > { %v5146_v0 = vcombine.low %v2826_v59, %v2840_v53  ;;  %5862 = vmatpush3.bf16.msra.mxu1 %v6281_v37  ;;  %v7232_v48 = vsel %vm6613_vm12, %v5174_v22, %v3178_v9  ;;  %v5167_v58 = vrot.slane %v3124_v16, 9  ;;  %v5168_v15 = vrot.slane %v3125_v43, 9  ;;  %v6302_v4 = vld [vmem:[#allocation3 + $0x8] ss:$8 sps:$4 sm:$0xff]   ;;  %v6306_v27 = vld [vmem:[%s7582_s4 + $0xf0] sm:$0xff]   ;;  %v6311_v22 = vld [vmem:[%s7582_s4 + $0x108] sm:$0xff]  }
 0x239   : > { %5863 = vmatprep.subr.bf16.mxu1 %v6283_v52  ;;  %v5194_v62 = vcombine.low %v7228_v1, %v7232_v48  ;;  %v5158_v34 = vcombine.low %v7188_v8, %v7164_v51  ;;  %v6296_v51 = vld [vmem:[%s7582_s4 + $0xa8] sm:$0xff]   ;;  %v6297_v8 = vld [vmem:[%s7582_s4 + $0xb0] sm:$0xff]   ;;  %v5172_v31 = vrot.slane %v3129_v20, 9  ;;  %v3170_v63 = vrot.slane %v7173_v45, 5  ;;  %v3504_v30 = vld [vmem:[#allocation3 + $0x8] sm:$0xf] }
 0x23a   : > { %5854 = vmatmul.mubr.bf16.gmra.mrb[4].mxu1 %v5146_v0  ;;  %v3151_v46 = vsel %vm6613_vm12, %v5167_v58, %v3150_v57  ;;  %v3155_v39 = vsel %vm6613_vm12, %v5168_v15, %v3154_v18  ;;  %v5171_v33 = vrot.slane %v3128_v24, 9  ;;  %v3166_v36 = vrot.slane %v7161_v42, 5  ;;  %v6300_v45 = vld [vmem:[%s7582_s4 + $0xc8] sm:$0xff]   ;;  %v6301_v42 = vld [vmem:[%s7582_s4 + $0xd0] sm:$0xff]   ;;  %v6307_v19 = vld [vmem:[%s7582_s4 + $0xf8] sm:$0xff]  }
 0x23b   : > { %5873 = vmatprep.mubr.bf16.mxu1 %v5155_v2  ;;  %v5191_v55 = vcombine.low %v3151_v46, %v3155_v39  ;;  %v3171_v37 = vsel %vm6613_vm12, %v5172_v31, %v3170_v63  ;;  %v3535_v6 = vshrl.u32 %v3506_v3, 16  ;;  %v3538_v44 = vshll.u32 %v3506_v3, 16  ;;  %v6309_v59 = vld [vmem:[%s7582_s4 + $0x100] sm:$0xff]   ;;  %v7322_v28 = vld [vmem:[#allocation3 + $0xc] sm:$0x1] }
 0x23c   : > { %5864 = vmatpush3.bf16.msra.mxu1 %v6283_v52  ;;  %v3167_v40 = vsel %vm6613_vm12, %v5171_v33, %v3166_v36  ;;  %v3521_v52 = vshrl.u32 %v3504_v30, 16  ;;  %v3524_v54 = vshll.u32 %v3504_v30, 16  ;;  %v7320_v0 = vld [vmem:[#allocation3 + $0x14] sm:$0x1]  ;;  %v6308_v2 = vld [vmem:[#allocation3 + $0x18] ss:$8 sps:$4 sm:$0xff]  }
 0x23d   : > { %5865 = vmatprep.subr.bf16.mxu1 %v6284_v26  ;;  %v5193_v41 = vcombine.low %v3167_v40, %v3171_v37  ;;  %v3537_v56 = vrot.slane %v3535_v6, 4  ;;  %v3540_v32 = vrot.slane %v3538_v44, 5  ;;  %v6310_v1 = vld [vmem:[#allocation3 + $0x28] ss:$8 sps:$4 sm:$0xff]   ;;  %v3530_v48 = vshll.u32 %v7322_v28, 16  ;;  %v6317_v33 = vld [vmem:[%s7582_s4 + $0x130] sm:$0xff]  }
 0x23e   : > { %v3523_v53 = vrot.slane %v3521_v52, 4  ;;  %v6312_v43 = vld [vmem:[#allocation3 + $0x38] ss:$8 sps:$4 sm:$0xff]   ;;  %v3514_v18 = vld [vmem:[#allocation3 + $0x30] sm:$0xf] }
 0x23f   : > { %v3541_v14 = vor.u32 %v3540_v32, %v3537_v56  ;;  %v3510_v57 = vld [vmem:[#allocation3 + $0x20] sm:$0xf]  ;;  %v6315_v58 = vld [vmem:[%s7582_s4 + $0x120] sm:$0xff]   ;;  %v3508_v15 = vld [vmem:[#allocation3 + $0x18] sm:$0xf] }
 0x240   : > { %5866 = vmatpush3.bf16.msra.mxu1 %v6284_v26  ;;  %v3544_v26 = vshll.u32 %v7320_v0, 16  ;;  %v3566_v46 = vshll.u32 %v3510_v57, 16  ;;  %v3512_v39 = vld [vmem:[#allocation3 + $0x28] sm:$0xf]  ;;  %v7348_v40 = vld [vmem:[#allocation3 + $0x24] sm:$0x1] }
 0x241   : > { %5867 = vmatprep.subr.bf16.mxu1 %v6285_v47  ;;  %v3580_v20 = vshll.u32 %v3512_v39, 16  ;;  %v7352_v3 = vld [vmem:[#allocation3 + $0x1c] sm:$0x1]  ;;  %v3572_v6 = vshll.u32 %v7348_v40, 16  ;;  %v7355_v44 = vld [vmem:[#allocation3 + $0x2c] sm:$0x1] }
 0x242   : > { %v3568_v24 = vrot.slane %v3566_v46, 5 }
 0x244   : > { %5868 = vmatpush3.bf16.msra.mxu1 %v6285_v47  ;;  %v6313_v47 = vld [vmem:[%s7582_s4 + $0x110] sm:$0xff]  }
 0x245   : > { %5869 = vmatprep.subr.bf16.mxu1 %v6286_v29 }
 0x248   : > { %5870 = vmatpush3.bf16.msra.mxu1 %v6286_v29 }
 0x249   : > { %5871 = vmatprep.subr.bf16.mxu1 %v6287_v7 }
 0x24c   : > { %5872 = vmatpush3.bf16.msra.mxu1 %v6287_v7  ;;  %v3546_v7 = vrot.slane %v3544_v26, 5  ;;  %v3574_v26 = vrot.slane %v3572_v6, 5  ;;  %v3788_v6 = vld [vmem:[#allocation3 + $0x18] sm:$0xe] }
 0x24d   : > { %5881 = vmatprep.subr.bf16.mxu1 %v6289_v49 }
 0x24f   : > { %5874 = vmatmul.mubr.bf16.vlgmr.msra.gmra.mrb[0].mxu1 %v5156_v11 }
 0x250   : > { %5877 = vmatprep.mubr.bf16.mxu1 %v5157_v17  ;;  %5882 = vmatpush3.bf16.msra.mxu1 %v6289_v49  ;;  %v3532_v49 = vrot.slane %v3530_v48, 5 }
 0x251   : > { %5883 = vmatprep.subr.bf16.mxu1 %v6291_v12 }
 0x254   : > { %5884 = vmatpush3.bf16.msra.mxu1 %v6291_v12  ;;  %v6314_v12 = vld [vmem:[%s7582_s4 + $0x118] sm:$0xff]  }
 0x255   : > { %5885 = vmatprep.subr.bf16.mxu1 %v6293_v35 }
 0x257   : > { %5878 = vmatmul.mubr.bf16.gmra.mrb[4].mxu1 %v5158_v34  ;;  %v3591_v34 = vshrl.u32 %v3514_v18, 16 }
 0x258   : > { %5886 = vmatpush3.bf16.msra.mxu1 %v6293_v35  ;;  %5897 = vmatprep.mubr.bf16.mxu1 %v5191_v55  ;;  %v3563_v35 = vshrl.u32 %v3510_v57, 16  ;;  %v3549_v55 = vshrl.u32 %v3508_v15, 16 }
 0x259   : > { %5887 = vmatprep.subr.bf16.mxu1 %v6294_v38  ;;  %v3593_v31 = vrot.slane %v3591_v34, 4 }
 0x25a   : > { %v3551_v36 = vrot.slane %v3549_v55, 4 }
 0x25c   : > { %5888 = vmatpush3.bf16.msra.mxu1 %v6294_v38  ;;  %v3594_v38 = vshll.u32 %v3514_v18, 16 }
 0x25d   : > { %5889 = vmatprep.subr.bf16.mxu1 %v6295_v13 }
 0x25e   : > { %v3596_v63 = vrot.slane %v3594_v38, 5 }
 0x260   : > { %5890 = vmatpush3.bf16.msra.mxu1 %v6295_v13  ;;  %v3552_v13 = vshll.u32 %v3508_v15, 16  ;;  %v3787_v15 = vld [vmem:[#allocation3 + $0x10] sm:$0xe] }
 0x261   : > { %5891 = vmatprep.subr.bf16.mxu1 %v6296_v51 }
 0x262   : > { %v3554_v37 = vrot.slane %v3552_v13, 5  ;;  %v3786_v13 = vld [vmem:[#allocation3 + $0x8] sm:$0xe] }
 0x264   : > { %5892 = vmatpush3.bf16.msra.mxu1 %v6296_v51  ;;  %v6316_v51 = vld [vmem:[%s7582_s4 + $0x128] sm:$0xff]   ;;  %v3555_v30 = vor.u32 %v3554_v37, %v3551_v36 }
 0x265   : > { %5893 = vmatprep.subr.bf16.mxu1 %v6297_v8 }
 0x268   : > { %5894 = vmatpush3.bf16.msra.mxu1 %v6297_v8  ;;  %v3577_v8 = vshrl.u32 %v3512_v39, 16  ;;  %v6320_v39 = vld [vmem:[%s7582_s4 + $0x148] sm:$0xff]  }
 0x269   : > { %5895 = vmatprep.subr.bf16.mxu1 %v6298_v23 }
 0x26c   : > { %5896 = vmatpush3.bf16.msra.mxu1 %v6298_v23  ;;  %v3565_v23 = vrot.slane %v3563_v35, 4 }
 0x26d   : > { %5905 = vmatprep.subr.bf16.mxu1 %v6299_v5 }
 0x26f   : > { %5898 = vmatmul.mubr.bf16.vlgmr.msra.gmra.mrb[0].mxu1 %v5192_v10  ;;  %v3526_v10 = vrot.slane %v3524_v54, 5  ;;  %v6318_v54 = vld [vmem:[%s7582_s4 + $0x138] sm:$0xff]  }
 0x270   : > { %5901 = vmatprep.mubr.bf16.mxu1 %v5193_v41  ;;  %5906 = vmatpush3.bf16.msra.mxu1 %v6299_v5  ;;  %v3518_v5 = vld [vmem:[#allocation3 + $0x40] sm:$0xf]  ;;  %v3582_v41 = vrot.slane %v3580_v20, 5 }
 0x271   : > { %5907 = vmatprep.subr.bf16.mxu1 %v6300_v45  ;;  %v3527_v9 = vor.u32 %v3526_v10, %v3523_v53 }
 0x273   : > { %v3528_v29 = vrot.slane %v3527_v9, 4  ;;  %v3556_v9 = vrot.slane %v3555_v30, 4  ;;  %v6326_v30 = vld [vmem:[%s7582_s4 + $0x178] sm:$0xff]  }
 0x274   : > { %5908 = vmatpush3.bf16.msra.mxu1 %v6300_v45  ;;  %v3579_v45 = vrot.slane %v3577_v8, 4  ;;  %v3816_v8 = vrot.slane %v7320_v0, 5 }
 0x275   : > { %5909 = vmatprep.subr.bf16.mxu1 %v6301_v42  ;;  %v3533_v11 = vsel %vm6519_vm9, %v3528_v29, %v3532_v49 }
 0x276   : > { %v3583_v56 = vor.u32 %v3582_v41, %v3579_v45 }
 0x277   : > { %5902 = vmatmul.mubr.bf16.gmra.mrb[4].mxu1 %v5194_v62  ;;  %v3542_v62 = vrot.slane %v3541_v14, 4 }
 0x278   : > { %5910 = vmatpush3.bf16.msra.mxu1 %v6301_v42  ;;  %5921 = vmatprep.mubr.bf16.mxu1 %v6302_v4  ;;  %v3516_v42 = vld [vmem:[#allocation3 + $0x38] sm:$0xf]  ;;  %v7350_v4 = vld [vmem:[#allocation3 + $0x34] sm:$0x1] }
 0x279   : > { %5911 = vmatprep.subr.bf16.mxu1 %v6303_v61  ;;  %v3547_v16 = vsel %vm6519_vm9, %v3542_v62, %v3546_v7  ;;  %v3608_v52 = vshll.u32 %v3516_v42, 16  ;;  %v3600_v32 = vshll.u32 %v7350_v4, 16  ;;  %v6319_v62 = vld [vmem:[%s7582_s4 + $0x140] sm:$0xff]   ;;  %v7366_v7 = vld [vmem:[#allocation3 + $0x44] sm:$0x1] }
 0x27a   : > { %v5247_v17 = vcombine.low %v3533_v11, %v3547_v16 }
 0x27b   : > { %v3610_v48 = vrot.slane %v3608_v52, 5  ;;  %v3602_v29 = vrot.slane %v3600_v32, 5  ;;  %v3824_v52 = vrot.slane %v7348_v40, 5  ;;  %v3832_v32 = vrot.slane %v7350_v4, 5 }
 0x27c   : > { %5912 = vmatpush3.bf16.msra.mxu1 %v6303_v61  ;;  %v3569_v61 = vor.u32 %v3568_v24, %v3565_v23  ;;  %v6321_v24 = vld [vmem:[%s7582_s4 + $0x150] sm:$0xff]  }
 0x27d   : > { %5913 = vmatprep.subr.bf16.mxu1 %v6304_v60 }
 0x27e   : > { %v3570_v53 = vrot.slane %v3569_v61, 4  ;;  %v6324_v61 = vld [vmem:[%s7582_s4 + $0x168] sm:$0xff]  }
 0x280   : > { %5914 = vmatpush3.bf16.msra.mxu1 %v6304_v60  ;;  %v3619_v60 = vshrl.u32 %v3518_v5, 16  ;;  %v3575_v16 = vsel %vm6519_vm9, %v3570_v53, %v3574_v26  ;;  %v3820_v53 = vrot.slane %v7352_v3, 5 }
 0x281   : > { %5915 = vmatprep.subr.bf16.mxu1 %v6305_v50 }
 0x282   : > { %v3621_v10 = vrot.slane %v3619_v60, 4  ;;  %v6325_v60 = vld [vmem:[%s7582_s4 + $0x170] sm:$0xff]  }
 0x284   : > { %5916 = vmatpush3.bf16.msra.mxu1 %v6305_v50  ;;  %v3622_v50 = vshll.u32 %v3518_v5, 16 }
 0x285   : > { %5917 = vmatprep.subr.bf16.mxu1 %v6306_v27 }
 0x286   : > { %v3624_v14 = vrot.slane %v3622_v50, 5  ;;  %v3789_v50 = vld [vmem:[#allocation3 + $0x20] sm:$0xe] }
 0x288   : > { %5918 = vmatpush3.bf16.msra.mxu1 %v6306_v27  ;;  %v3597_v27 = vor.u32 %v3596_v63, %v3593_v31  ;;  %v5259_v31 = vrot.slane %v3786_v13, 9  ;;  %v3812_v63 = vrot.slane %v7322_v28, 5  ;;  %v6322_v28 = vld [vmem:[%s7582_s4 + $0x158] sm:$0xff]  }
 0x289   : > { %5919 = vmatprep.subr.bf16.mxu1 %v6307_v19 }
 0x28a   : > { %v3813_v45 = vsel %vm6613_vm12, %v5259_v31, %v3812_v63  ;;  %v7458_v63 = vld [vmem:[#allocation3 + $0x1c] sm:$0x1] }
 0x28c   : > { %5920 = vmatpush3.bf16.msra.mxu1 %v6307_v19  ;;  %v3605_v19 = vshrl.u32 %v3516_v42, 16  ;;  %v6323_v42 = vld [vmem:[%s7582_s4 + $0x160] sm:$0xff]  }
 0x28d   : > { %5929 = vmatprep.subr.bf16.mxu1 %v6309_v59 }
 0x28f   : > { %5922 = vmatmul.mubr.bf16.vlgmr.msra.gmra.mrb[0].mxu1 %v6308_v2  ;;  %v3586_v2 = vshll.u32 %v7355_v44, 16 }
 0x290   : > { %5925 = vmatprep.mubr.bf16.mxu1 %v6310_v1  ;;  %5930 = vmatpush3.bf16.msra.mxu1 %v6309_v59  ;;  %v3558_v59 = vshll.u32 %v7352_v3, 16  ;;  %v3607_v1 = vrot.slane %v3605_v19, 4  ;;  %v5262_v19 = vrot.slane %v3789_v50, 9 }
 0x291   : > { %5931 = vmatprep.subr.bf16.mxu1 %v6311_v22  ;;  %v3588_v11 = vrot.slane %v3586_v2, 5  ;;  %v3828_v2 = vrot.slane %v7355_v44, 5  ;;  %v6328_v44 = vld [vmem:[%s7582_s4 + $0x188] sm:$0xff]  }
 0x292   : > { %v3560_v49 = vrot.slane %v3558_v59, 5  ;;  %v3611_v18 = vor.u32 %v3610_v48, %v3607_v1  ;;  %v5261_v59 = vrot.slane %v3788_v6, 9  ;;  %v3792_v1 = vld [vmem:[#allocation3 + $0x38] sm:$0xe]  ;;  %v6342_v6 = vld [vmem:[%s7582_s4 + $0x1d8] sm:$0xff]  }
 0x294   : > { %5932 = vmatpush3.bf16.msra.mxu1 %v6311_v22  ;;  %v3598_v22 = vrot.slane %v3597_v27, 4  ;;  %v3561_v57 = vsel %vm6519_vm9, %v3556_v9, %v3560_v49  ;;  %v3612_v20 = vrot.slane %v3611_v18, 4  ;;  %v3791_v27 = vld [vmem:[#allocation3 + $0x30] sm:$0xe]  ;;  %v3793_v9 = vld [vmem:[#allocation3 + $0x40] sm:$0xe]  ;;  %v3821_v4 = vsel %vm6613_vm12, %v5261_v59, %v3820_v53 }
 0x295   : > { %5933 = vmatprep.subr.bf16.mxu1 %v6313_v47  ;;  %v5248_v35 = vcombine.low %v3561_v57, %v3575_v16  ;;  %v6329_v16 = vld [vmem:[%s7582_s4 + $0x190] sm:$0xff]   ;;  %v6330_v57 = vld [vmem:[#allocation3 + $0x10] ss:$8 sps:$4 sm:$0xff]  }
 0x296   : > { %v6333_v18 = vld [vmem:[%s7582_s4 + $0x1a8] sm:$0xff]  }
 0x297   : > { %5926 = vmatmul.mubr.bf16.gmra.mrb[4].mxu1 %v6312_v43  ;;  %v3625_v43 = vor.u32 %v3624_v14, %v3621_v10  ;;  %v6327_v10 = vld [vmem:[%s7582_s4 + $0x180] sm:$0xff]  }
 0x298   : > { %5934 = vmatpush3.bf16.msra.mxu1 %v6313_v47  ;;  %5945 = vmatprep.mubr.bf16.mxu1 %v5247_v17  ;;  %v3584_v47 = vrot.slane %v3583_v56, 4  ;;  %v7372_v17 = vld [vmem:[#allocation3 + $0x3c] sm:$0x1]  ;;  %v5264_v56 = vrot.slane %v3791_v27, 9  ;;  %v6340_v27 = vld [vmem:[#allocation3 + $0x40] ss:$8 sps:$4 sm:$0xff]  }
 0x299   : > { %5935 = vmatprep.subr.bf16.mxu1 %v6314_v12  ;;  %v3614_v38 = vshll.u32 %v7372_v17, 16  ;;  %v3626_v55 = vrot.slane %v3625_v43, 4  ;;  %v3836_v49 = vrot.slane %v7372_v17, 5  ;;  %v6332_v17 = vld [vmem:[%s7582_s4 + $0x1a0] sm:$0xff]  }
 0x29a   : > { %v3589_v46 = vsel %vm6519_vm9, %v3584_v47, %v3588_v11  ;;  %v3833_v40 = vsel %vm6613_vm12, %v5264_v56, %v3832_v32  ;;  %v3840_v47 = vrot.slane %v7366_v7, 5  ;;  %v6343_v56 = vld [vmem:[%s7582_s4 + $0x1e0] sm:$0xff]   ;;  %v4171_v32 = vld [vmem:[#allocation3 + $0x20] sm:$0xf] }
 0x29b   : > { %v3616_v5 = vrot.slane %v3614_v38, 5 }
 0x29c   : > { %5936 = vmatpush3.bf16.msra.mxu1 %v6314_v12  ;;  %v3603_v12 = vsel %vm6519_vm9, %v3598_v22, %v3602_v29  ;;  %v3825_v22 = vsel %vm6613_vm12, %v5262_v19, %v3824_v52  ;;  %v5265_v29 = vrot.slane %v3792_v1, 9  ;;  %v4173_v52 = vld [vmem:[#allocation3 + $0x28] sm:$0xf] }
 0x29d   : > { %5937 = vmatprep.subr.bf16.mxu1 %v6315_v58  ;;  %v5249_v34 = vcombine.low %v3589_v46, %v3603_v12  ;;  %v3617_v0 = vsel %vm6519_vm9, %v3612_v20, %v3616_v5  ;;  %v5284_v3 = vcombine.low %v3821_v4, %v3825_v22  ;;  %v6336_v5 = vld [vmem:[#allocation3 + $0x20] ss:$8 sps:$4 sm:$0xff]   ;;  %v4226_v59 = vshrl.u32 %v4173_v52, 16 }
 0x29e   : > { %v3837_v11 = vsel %vm6613_vm12, %v5265_v29, %v3836_v49  ;;  %v4229_v53 = vshll.u32 %v4173_v52, 16  ;;  %v4212_v22 = vshrl.u32 %v4171_v32, 16 }
 0x2a0   : > { %5938 = vmatpush3.bf16.msra.mxu1 %v6315_v58  ;;  %v3628_v58 = vshll.u32 %v7366_v7, 16  ;;  %v6331_v7 = vld [vmem:[%s7582_s4 + $0x198] sm:$0xff]   ;;  %v4231_v1 = vrot.slane %v4229_v53, 5  ;;  %v4214_v29 = vrot.slane %v4212_v22, 4 }
 0x2a1   : > { %5939 = vmatprep.subr.bf16.mxu1 %v6316_v51 }
 0x2a2   : > { %v3630_v23 = vrot.slane %v3628_v58, 5  ;;  %v4167_v58 = vld [vmem:[#allocation3 + $0x10] sm:$0xf] }
 0x2a3   : > { %v4184_v46 = vshrl.u32 %v4167_v58, 16 }
 0x2a4   : > { %5940 = vmatpush3.bf16.msra.mxu1 %v6316_v51  ;;  %v5260_v51 = vrot.slane %v3787_v15, 9  ;;  %v6334_v15 = vld [vmem:[%s7582_s4 + $0x1b0] sm:$0xff]  }
 0x2a5   : > { %5941 = vmatprep.subr.bf16.mxu1 %v6317_v33  ;;  %v4186_v13 = vrot.slane %v4184_v46, 4 }
 0x2a6   : > { %v3817_v36 = vsel %vm6613_vm12, %v5260_v51, %v3816_v8  ;;  %v6337_v8 = vld [vmem:[%s7582_s4 + $0x1c0] sm:$0xff]  }
 0x2a7   : > { %v5283_v41 = vcombine.low %v3813_v45, %v3817_v36 }
 0x2a8   : > { %5942 = vmatpush3.bf16.msra.mxu1 %v6317_v33  ;;  %v3631_v33 = vsel %vm6519_vm9, %v3626_v55, %v3630_v23 }
 0x2a9   : > { %5943 = vmatprep.subr.bf16.mxu1 %v6318_v54  ;;  %v5250_v37 = vcombine.low %v3617_v0, %v3631_v33  ;;  %v6339_v33 = vld [vmem:[%s7582_s4 + $0x1c8] sm:$0xff]  }
 0x2ac   : > { %5944 = vmatpush3.bf16.msra.mxu1 %v6318_v54  ;;  %v3790_v54 = vld [vmem:[#allocation3 + $0x28] sm:$0xe] }
 0x2ad   : > { %5953 = vmatprep.subr.bf16.mxu1 %v6319_v62  ;;  %v5263_v14 = vrot.slane %v3790_v54, 9  ;;  %v4175_v54 = vld [vmem:[#allocation3 + $0x30] sm:$0xf] }
 0x2af   : > { %5946 = vmatmul.mubr.bf16.vlgmr.msra.gmra.mrb[0].mxu1 %v5248_v35  ;;  %v3829_v26 = vsel %vm6613_vm12, %v5263_v14, %v3828_v2  ;;  %v4169_v35 = vld [vmem:[#allocation3 + $0x18] sm:$0xf]  ;;  %v4240_v14 = vshrl.u32 %v4175_v54, 16  ;;  %v4243_v2 = vshll.u32 %v4175_v54, 16 }
 0x2b0   : > { %5949 = vmatprep.mubr.bf16.mxu1 %v5249_v34  ;;  %5954 = vmatpush3.bf16.msra.mxu1 %v6319_v62  ;;  %v5285_v48 = vcombine.low %v3829_v26, %v3833_v40  ;;  %v5266_v62 = vrot.slane %v3793_v9, 9  ;;  %v6335_v34 = vld [vmem:[%s7582_s4 + $0x1b8] sm:$0xff]   ;;  %v4198_v38 = vshrl.u32 %v4169_v35, 16  ;;  %v4201_v55 = vshll.u32 %v4169_v35, 16  ;;  %v6344_v9 = vld [vmem:[%s7582_s4 + $0x1e8] sm:$0xff]  }
 0x2b1   : > { %5955 = vmatprep.subr.bf16.mxu1 %v6320_v39  ;;  %v4215_v40 = vshll.u32 %v4171_v32, 16  ;;  %v4181_v26 = vld [vmem:[#allocation3 + $0x48] sm:$0xf]  ;;  %v7488_v35 = vld [vmem:[#allocation3 + $0x24] sm:$0x1] }
 0x2b2   : > { %v3841_v43 = vsel %vm6613_vm12, %v5266_v62, %v3840_v47  ;;  %v4200_v20 = vrot.slane %v4198_v38, 4  ;;  %v4203_v23 = vrot.slane %v4201_v55, 5  ;;  %v4245_v62 = vrot.slane %v4243_v2, 5  ;;  %v4179_v47 = vld [vmem:[#allocation3 + $0x40] sm:$0xf]  ;;  %v6346_v55 = vld [vmem:[%s7582_s4 + $0x1f8] sm:$0xff]  }
 0x2b3   : > { %v5286_v12 = vcombine.low %v3837_v11, %v3841_v43  ;;  %v4217_v49 = vrot.slane %v4215_v40, 5  ;;  %v6345_v43 = vld [vmem:[%s7582_s4 + $0x1f0] sm:$0xff]   ;;  %v7484_v11 = vld [vmem:[#allocation3 + $0x2c] sm:$0x1]  ;;  %v7491_v38 = vld [vmem:[#allocation3 + $0x3c] sm:$0x1] }
 0x2b4   : > { %5956 = vmatpush3.bf16.msra.mxu1 %v6320_v39  ;;  %v4187_v39 = vshll.u32 %v4167_v58, 16  ;;  %v4204_v0 = vor.u32 %v4203_v23, %v4200_v20  ;;  %v4268_v58 = vshrl.u32 %v4179_v47, 16  ;;  %v4221_v23 = vshll.u32 %v7488_v35, 16 }
 0x2b5   : > { %5957 = vmatprep.subr.bf16.mxu1 %v6321_v24 }
 0x2b6   : > { %v4189_v51 = vrot.slane %v4187_v39, 5  ;;  %v4218_v39 = vor.u32 %v4217_v49, %v4214_v29 }
 0x2b7   : > { %5950 = vmatmul.mubr.bf16.gmra.mrb[4].mxu1 %v5250_v37  ;;  %v6338_v37 = vld [vmem:[#allocation3 + $0x30] ss:$8 sps:$4 sm:$0xff]  }
 0x2b8   : > { %5958 = vmatpush3.bf16.msra.mxu1 %v6321_v24  ;;  %5969 = vmatprep.mubr.bf16.mxu1 %v5283_v41  ;;  %v7456_v24 = vld [vmem:[#allocation3 + $0x14] sm:$0x1]  ;;  %v4190_v31 = vor.u32 %v4189_v51, %v4186_v13  ;;  %v6341_v41 = vld [vmem:[%s7582_s4 + $0x1d0] sm:$0xff]  }
 0x2b9   : > { %5959 = vmatprep.subr.bf16.mxu1 %v6322_v28  ;;  %v4193_v36 = vshll.u32 %v7456_v24, 16 }
 0x2ba   : > { %v4191_v45 = vrot.slane %v4190_v31, 4 }
 0x2bc   : > { %5960 = vmatpush3.bf16.msra.mxu1 %v6322_v28  ;;  %v4207_v28 = vshll.u32 %v7458_v63, 16 }
 0x2bd   : > { %5961 = vmatprep.subr.bf16.mxu1 %v6323_v42 }
 0x2be   : > { %v4209_v50 = vrot.slane %v4207_v28, 5  ;;  %v7499_v28 = vld [vmem:[#allocation3 + $0x4c] sm:$0x1] }
 0x2c0   : > { %5962 = vmatpush3.bf16.msra.mxu1 %v6323_v42  ;;  %v4195_v42 = vrot.slane %v4193_v36, 5 }
 0x2c1   : > { %5963 = vmatprep.subr.bf16.mxu1 %v6324_v61 }
 0x2c4   : > { %5964 = vmatpush3.bf16.msra.mxu1 %v6324_v61  ;;  %v4205_v61 = vrot.slane %v4204_v0, 4  ;;  %v4263_v0 = vshll.u32 %v7491_v38, 16 }
 0x2c5   : > { %5965 = vmatprep.subr.bf16.mxu1 %v6325_v60 }
 0x2c6   : > { %v4265_v54 = vrot.slane %v4263_v0, 5 }
 0x2c8   : > { %5966 = vmatpush3.bf16.msra.mxu1 %v6325_v60  ;;  %v4196_v60 = vsel %vm6519_vm9, %v4191_v45, %v4195_v42 }
 0x2c9   : > { %5967 = vmatprep.subr.bf16.mxu1 %v6326_v30 }
 0x2cc   : > { %5968 = vmatpush3.bf16.msra.mxu1 %v6326_v30  ;;  %v4210_v30 = vsel %vm6519_vm9, %v4205_v61, %v4209_v50 }
 0x2cd   : > { %5977 = vmatprep.subr.bf16.mxu1 %v6327_v10  ;;  %v5339_v19 = vcombine.low %v4196_v60, %v4210_v30  ;;  %v7504_v60 = vld [vmem:[#allocation3 + $0x44] sm:$0x1] }
 0x2ce   : > { %v4277_v32 = vshll.u32 %v7504_v60, 16 }
 0x2cf   : > { %5970 = vmatmul.mubr.bf16.vlgmr.msra.gmra.mrb[0].mxu1 %v5284_v3 }
 0x2d0   : > { %5973 = vmatprep.mubr.bf16.mxu1 %v5285_v48  ;;  %5978 = vmatpush3.bf16.msra.mxu1 %v6327_v10  ;;  %v4177_v10 = vld [vmem:[#allocation3 + $0x38] sm:$0xf]  ;;  %v4242_v48 = vrot.slane %v4240_v14, 4 }
 0x2d1   : > { %5979 = vmatprep.subr.bf16.mxu1 %v6328_v44  ;;  %v4254_v4 = vshrl.u32 %v4177_v10, 16  ;;  %v4257_v3 = vshll.u32 %v4177_v10, 16  ;;  %v6348_v14 = vld [vmem:[%s7582_s4 + $0x208] sm:$0xff]  }
 0x2d2   : > { %v4246_v46 = vor.u32 %v4245_v62, %v4242_v48  ;;  %v4479_v62 = vrot.slane %v7458_v63, 5 }
 0x2d4   : > { %5980 = vmatpush3.bf16.msra.mxu1 %v6328_v44  ;;  %v4228_v44 = vrot.slane %v4226_v59, 4  ;;  %v4247_v36 = vrot.slane %v4246_v46, 4  ;;  %v4449_v59 = vld [vmem:[#allocation3 + $0x10] sm:$0xe] }
 0x2d5   : > { %5981 = vmatprep.subr.bf16.mxu1 %v6329_v16 }
 0x2d7   : > { %5974 = vmatmul.mubr.bf16.gmra.mrb[4].mxu1 %v5286_v12  ;;  %v4256_v12 = vrot.slane %v4254_v4, 4  ;;  %v4450_v4 = vld [vmem:[#allocation3 + $0x18] sm:$0xe] }
 0x2d8   : > { %5982 = vmatpush3.bf16.msra.mxu1 %v6329_v16  ;;  %5993 = vmatprep.mubr.bf16.mxu1 %v6330_v57  ;;  %v4282_v16 = vshrl.u32 %v4181_v26, 16  ;;  %v4285_v57 = vshll.u32 %v4181_v26, 16  ;;  %v4475_v26 = vrot.slane %v7456_v24, 5  ;;  %v5352_v48 = vrot.slane %v4450_v4, 9 }
 0x2d9   : > { %5983 = vmatprep.subr.bf16.mxu1 %v6331_v7 }
 0x2da   : > { %v4287_v20 = vrot.slane %v4285_v57, 5  ;;  %v4452_v57 = vld [vmem:[#allocation3 + $0x28] sm:$0xe] }
 0x2db   : > { %v5354_v46 = vrot.slane %v4452_v57, 9 }
 0x2dc   : > { %5984 = vmatpush3.bf16.msra.mxu1 %v6331_v7  ;;  %v4259_v7 = vrot.slane %v4257_v3, 5  ;;  %v5351_v3 = vrot.slane %v4449_v59, 9 }
 0x2dd   : > { %5985 = vmatprep.subr.bf16.mxu1 %v6332_v17 }
 0x2de   : > { %v4260_v51 = vor.u32 %v4259_v7, %v4256_v12  ;;  %v4476_v24 = vsel %vm6613_vm12, %v5351_v3, %v4475_v26  ;;  %v6352_v12 = vld [vmem:[%s7582_s4 + $0x228] sm:$0xff]   ;;  %v6353_v7 = vld [vmem:[%s7582_s4 + $0x230] sm:$0xff]  }
 0x2e0   : > { %5986 = vmatpush3.bf16.msra.mxu1 %v6332_v17  ;;  %v4232_v17 = vor.u32 %v4231_v1, %v4228_v44  ;;  %v4261_v61 = vrot.slane %v4260_v51, 4  ;;  %v4279_v44 = vrot.slane %v4277_v32, 5  ;;  %v6349_v1 = vld [vmem:[%s7582_s4 + $0x210] sm:$0xff]  }
 0x2e1   : > { %5987 = vmatprep.subr.bf16.mxu1 %v6333_v18 }
 0x2e2   : > { %v4233_v31 = vrot.slane %v4232_v17, 4  ;;  %v4266_v10 = vsel %vm6519_vm9, %v4261_v61, %v4265_v54  ;;  %v4453_v17 = vld [vmem:[#allocation3 + $0x30] sm:$0xe]  ;;  %v5388_v54 = vld [vmem:[%s7584_s6] ss:$0 sm:$0xff] }
 0x2e4   : > { %5988 = vmatpush3.bf16.msra.mxu1 %v6333_v18  ;;  %v7486_v18 = vld [vmem:[#allocation3 + $0x34] sm:$0x1] }
 0x2e5   : > { %5989 = vmatprep.subr.bf16.mxu1 %v6334_v15  ;;  %v4249_v13 = vshll.u32 %v7486_v18, 16 }
 0x2e7   : > { %v4251_v42 = vrot.slane %v4249_v13, 5  ;;  %v4491_v13 = vrot.slane %v7486_v18, 5 }
 0x2e8   : > { %5990 = vmatpush3.bf16.msra.mxu1 %v6334_v15  ;;  %v4271_v15 = vshll.u32 %v4179_v47, 16 }
 0x2e9   : > { %5991 = vmatprep.subr.bf16.mxu1 %v6335_v34  ;;  %v4252_v52 = vsel %vm6519_vm9, %v4247_v36, %v4251_v42 }
 0x2ea   : > { %v5341_v2 = vcombine.low %v4252_v52, %v4266_v10 }
 0x2ec   : > { %5992 = vmatpush3.bf16.msra.mxu1 %v6335_v34  ;;  %v4235_v34 = vshll.u32 %v7484_v11, 16 }
 0x2ed   : > { %6001 = vmatprep.subr.bf16.mxu1 %v6337_v8 }
 0x2ee   : > { %v4237_v45 = vrot.slane %v4235_v34, 5  ;;  %v4454_v34 = vld [vmem:[#allocation3 + $0x38] sm:$0xe] }
 0x2ef   : > { %5994 = vmatmul.mubr.bf16.vlgmr.msra.gmra.mrb[0].mxu1 %v6336_v5  ;;  %v4270_v5 = vrot.slane %v4268_v58, 4  ;;  %v6354_v58 = vld [vmem:[%s7582_s4 + $0x238] sm:$0xff]  }
 0x2f0   : > { %5997 = vmatprep.mubr.bf16.mxu1 %v6338_v37  ;;  %6002 = vmatpush3.bf16.msra.mxu1 %v6337_v8  ;;  %v4284_v8 = vrot.slane %v4282_v16, 4  ;;  %v4219_v37 = vrot.slane %v4218_v39, 4  ;;  %v4238_v30 = vsel %vm6519_vm9, %v4233_v31, %v4237_v45  ;;  %v4480_v16 = vsel %vm6613_vm12, %v5352_v48, %v4479_v62 }
 0x2f1   : > { %6003 = vmatprep.subr.bf16.mxu1 %v6339_v33  ;;  %v5375_v63 = vcombine.low %v4476_v24, %v4480_v16  ;;  %v4487_v39 = vrot.slane %v7484_v11, 5  ;;  %v4455_v11 = vld [vmem:[#allocation3 + $0x40] sm:$0xe] }
 0x2f2   : > { %v4288_v50 = vor.u32 %v4287_v20, %v4284_v8  ;;  %v4483_v8 = vrot.slane %v7488_v35, 5  ;;  %v5356_v20 = vrot.slane %v4454_v34, 9  ;;  %v5357_v45 = vrot.slane %v4455_v11, 9 }
 0x2f3   : > { %v4488_v31 = vsel %vm6613_vm12, %v5354_v46, %v4487_v39 }
 0x2f4   : > { %6004 = vmatpush3.bf16.msra.mxu1 %v6339_v33  ;;  %v4273_v33 = vrot.slane %v4271_v15, 5  ;;  %v4289_v40 = vrot.slane %v4288_v50, 4  ;;  %v4451_v15 = vld [vmem:[#allocation3 + $0x20] sm:$0xe] }
 0x2f5   : > { %6005 = vmatprep.subr.bf16.mxu1 %v6341_v41  ;;  %v5353_v51 = vrot.slane %v4451_v15, 9 }
 0x2f7   : > { %5998 = vmatmul.mubr.bf16.gmra.mrb[4].mxu1 %v6340_v27  ;;  %v4223_v27 = vrot.slane %v4221_v23, 5  ;;  %v4495_v23 = vrot.slane %v7491_v38, 5  ;;  %v4484_v18 = vsel %vm6613_vm12, %v5353_v51, %v4483_v8  ;;  %v4499_v38 = vrot.slane %v7504_v60, 5 }
 0x2f8   : > { %6006 = vmatpush3.bf16.msra.mxu1 %v6341_v41  ;;  %6017 = vmatprep.mubr.bf16.mxu1 %v5339_v19  ;;  %v6347_v41 = vld [vmem:[%s7582_s4 + $0x200] sm:$0xff]   ;;  %v4291_v19 = vshll.u32 %v7499_v28, 16  ;;  %v5376_v36 = vcombine.low %v4484_v18, %v4488_v31 }
 0x2f9   : > { %6007 = vmatprep.subr.bf16.mxu1 %v6342_v6  ;;  %v4496_v35 = vsel %vm6613_vm12, %v5356_v20, %v4495_v23  ;;  %v4500_v42 = vsel %vm6613_vm12, %v5357_v45, %v4499_v38 }
 0x2fc   : > { %6008 = vmatpush3.bf16.msra.mxu1 %v6342_v6  ;;  %v4274_v6 = vor.u32 %v4273_v33, %v4270_v5  ;;  %v4456_v5 = vld [vmem:[#allocation3 + $0x48] sm:$0xe] }
 0x2fd   : > { %6009 = vmatprep.subr.bf16.mxu1 %v6343_v56  ;;  %v5358_v0 = vrot.slane %v4456_v5, 9 }
 0x2fe   : > { %v4275_v22 = vrot.slane %v4274_v6, 4  ;;  %v4700_v6 = vlaneseq }
 0x300   : > { %6010 = vmatpush3.bf16.msra.mxu1 %v6343_v56  ;;  %v4224_v56 = vsel %vm6519_vm9, %v4219_v37, %v4223_v27  ;;  %v4280_v47 = vsel %vm6519_vm9, %v4275_v22, %v4279_v44  ;;  %v6364_v27 = vmov 1966171168   ;;  %v4701_v52 = vshrl.u32 %v4700_v6, 7 }
 0x301   : > { %6011 = vmatprep.subr.bf16.mxu1 %v6344_v9  ;;  %v5340_v53 = vcombine.low %v4224_v56, %v4238_v30  ;;  %v4698_v30 = vunpack.c.l.s4 %v6364_v27 }
 0x303   : > { %v4699_v60 = vunpack.c.0.s8 %v4698_v30 }
 0x304   : > { %6012 = vmatpush3.bf16.msra.mxu1 %v6344_v9  ;;  %v4293_v9 = vrot.slane %v4291_v19, 5  ;;  %v5387_v19 = vld [vmem:[%s7583_s5] ss:$0 sm:$0xff] }
 0x305   : > { %6013 = vmatprep.subr.bf16.mxu1 %v6345_v43  ;;  %v4702_v10 = vsub.s32 %v4699_v60, %v4701_v52 }
 0x306   : > { %v4294_v29 = vsel %vm6519_vm9, %v4289_v40, %v4293_v9 }
 0x307   : > { %v5342_v49 = vcombine.low %v4280_v47, %v4294_v29 }
 0x308   : > { %6014 = vmatpush3.bf16.msra.mxu1 %v6345_v43  ;;  %v6350_v43 = vld [vmem:[%s7582_s4 + $0x218] sm:$0xff]  }
 0x309   : > { %6015 = vmatprep.subr.bf16.mxu1 %v6346_v55 }
 0x30c   : > { %6016 = vmatpush3.bf16.msra.mxu1 %v6346_v55  ;;  %v5355_v55 = vrot.slane %v4453_v17, 9 }
 0x30d   : > { %6025 = vmatprep.subr.bf16.mxu1 %v6347_v41 }
 0x30e   : > { %v4492_v33 = vsel %vm6613_vm12, %v5355_v55, %v4491_v13 }
 0x30f   : > { %6018 = vmatmul.mubr.bf16.vlgmr.msra.gmra.mrb[0].mxu1 %v5340_v53  ;;  %v5377_v37 = vcombine.low %v4492_v33, %v4496_v35 }
 0x310   : > { %6021 = vmatprep.mubr.bf16.mxu1 %v5341_v2  ;;  %6026 = vmatpush3.bf16.msra.mxu1 %v6347_v41  ;;  %v4503_v41 = vrot.slane %v7499_v28, 5 }
 0x311   : > { %6027 = vmatprep.subr.bf16.mxu1 %v6348_v14 }
 0x312   : > { %v4504_v61 = vsel %vm6613_vm12, %v5358_v0, %v4503_v41 }
 0x313   : > { %v5378_v50 = vcombine.low %v4500_v42, %v4504_v61 }
 0x314   : > { %6028 = vmatpush3.bf16.msra.mxu1 %v6348_v14 }
 0x315   : > { %6029 = vmatprep.subr.bf16.mxu1 %v6349_v1 }
 0x317   : > { %6022 = vmatmul.mubr.bf16.gmra.mrb[4].mxu1 %v5342_v49 }
 0x318   : > { %6030 = vmatpush3.bf16.msra.mxu1 %v6349_v1  ;;  %6041 = vmatprep.mubr.bf16.mxu1 %v5375_v63 }
 0x319   : > { %6031 = vmatprep.subr.bf16.mxu1 %v6350_v43 }
 0x31c   : > { %6032 = vmatpush3.bf16.msra.mxu1 %v6350_v43 }
 0x31d   : > { %6033 = vmatprep.subr.bf16.mxu1 %v6351_v21 }
 0x320   : > { %6034 = vmatpush3.bf16.msra.mxu1 %v6351_v21 }
 0x321   : > { %6035 = vmatprep.subr.bf16.mxu1 %v6352_v12 }
 0x324   : > { %6036 = vmatpush3.bf16.msra.mxu1 %v6352_v12 }
 0x325   : > { %6037 = vmatprep.subr.bf16.mxu1 %v6353_v7 }
 0x328   : > { %6038 = vmatpush3.bf16.msra.mxu1 %v6353_v7 }
 0x329   : > { %6039 = vmatprep.subr.bf16.mxu1 %v6354_v58 }
 0x32c   : > { %6040 = vmatpush3.bf16.msra.mxu1 %v6354_v58 }
 0x32f   : > { %6042 = vmatmul.mubr.bf16.vlgmr.msra.gmra.mrb[0].mxu1 %v5376_v36 }
 0x330   : > { %6045 = vmatprep.mubr.bf16.mxu1 %v5377_v37 }
 0x337   : > { %6046 = vmatmul.mubr.bf16.gmra.mrb[4].mxu1 %v5378_v50 }
 0x402   : > { %v6043_v28 = vpop.f32.mrb[0].mxu1 }
 0x403   : > { %v4668_v56 = vmul.f32 %v6043_v28, %v5387_v19  ;;  %v4620_v32 = vpop.f32.mrb[1].mxu1 }
 0x404   : > { %v4666_v25 = vmul.f32 %v5387_v19, %v4620_v32  ;;  %v6044_v59 = vpop.f32.mrb[2].mxu1 }
 0x405   : > { %v4683_v53 = vadd.f32 %v5388_v54, %v4668_v56  ;;  %v4669_v14 = vmul.f32 %v6044_v59, %v5387_v19  ;;  %v4623_v2 = vpop.f32.mrb[3].mxu1 }
 0x406   : > { %v4681_v22 = vadd.f32 %v5388_v54, %v4666_v25  ;;  %v4667_v40 = vmul.f32 %v5387_v19, %v4623_v2 }
 0x407   : > { %v4691_v9 = vmax.f32 %v4683_v53, 0.0  ;;  %v4684_v4 = vadd.f32 %v5388_v54, %v4669_v14 }
 0x408   : > { %v4689_v3 = vmax.f32 %v4681_v22, 0.0  ;;  %v4682_v26 = vadd.f32 %v5388_v54, %v4667_v40 }
 0x409   : > { %v4717_v44 = vrot.slane %v4691_v9, %v4702_v10  ;;  %v4692_v1 = vmax.f32 %v4684_v4, 0.0 }
 0x40a   : > { %v4703_v48 = vrot.slane %v4689_v3, %v4702_v10  ;;  %v4690_v62 = vmax.f32 %v4682_v26, 0.0  ;;  %v6047_v47 = vpop.f32.mrb[4].mxu1 }
 0x40b   : > { %v4763_v29 = vrot.slane %v4717_v44, 4  ;;  %v4724_v24 = vrot.slane %v4692_v1, %v4702_v10  ;;  %v4672_v49 = vmul.f32 %v6047_v47, %v5387_v19  ;;  %v4636_v16 = vpop.f32.mrb[5].mxu1 }
 0x40c   : > { %v4761_v43 = vrot.slane %v4703_v48, 4  ;;  %v4710_v63 = vrot.slane %v4690_v62, %v4702_v10  ;;  %v4670_v21 = vmul.f32 %v5387_v19, %v4636_v16  ;;  %v6048_v12 = vpop.f32.mrb[6].mxu1 }
 0x40d   : > { %v4764_v7 = vrot.slane %v4724_v24, 4  ;;  %v4687_v57 = vadd.f32 %v5388_v54, %v4672_v49  ;;  %v4673_v17 = vmul.f32 %v6048_v12, %v5387_v19  ;;  %v4639_v58 = vpop.f32.mrb[7].mxu1  ;;  %v4779_v34 = vmax.f32 %v4717_v44, %v4763_v29 }
 0x40e   : > { %v4762_v15 = vrot.slane %v4710_v63, 4  ;;  %v4685_v46 = vadd.f32 %v5388_v54, %v4670_v21  ;;  %v4671_v39 = vmul.f32 %v5387_v19, %v4639_v58  ;;  %v4777_v8 = vmax.f32 %v4703_v48, %v4761_v43 }
 0x40f   : > { %v4780_v55 = vmax.f32 %v4724_v24, %v4764_v7  ;;  %v4695_v13 = vmax.f32 %v4687_v57, 0.0  ;;  %v4688_v51 = vadd.f32 %v5388_v54, %v4673_v17 }
 0x410   : > { %v4778_v20 = vmax.f32 %v4710_v63, %v4762_v15  ;;  %v4693_v23 = vmax.f32 %v4685_v46, 0.0  ;;  %v4686_v31 = vadd.f32 %v5388_v54, %v4671_v39 }
 0x411   : > { %v4786_v5 = vmax.f32 %v4779_v34, %v4780_v55  ;;  %v4745_v33 = vrot.slane %v4695_v13, %v4702_v10  ;;  %v4696_v11 = vmax.f32 %v4688_v51, 0.0 }
 0x412   : > { %v4785_v18 = vmax.f32 %v4777_v8, %v4778_v20  ;;  %v4731_v36 = vrot.slane %v4693_v23, %v4702_v10  ;;  %v4694_v35 = vmax.f32 %v4686_v31, 0.0 }
 0x413   : > { %4790 = vst [vmem:[%s278_s13 + $0x4] sm:$0xf] %v4786_v5  ;;  %v4767_v0 = vrot.slane %v4745_v33, 4  ;;  %v4752_v37 = vrot.slane %v4696_v11, %v4702_v10 }
 0x414   : > { %4789 = vst [vmem:[%s278_s13] sm:$0xf] %v4785_v18  ;;  %v4765_v45 = vrot.slane %v4731_v36, 4  ;;  %v4738_v38 = vrot.slane %v4694_v35, %v4702_v10 }
 0x415   : > { %v4768_v41 = vrot.slane %v4752_v37, 4  ;;  %v4783_v61 = vmax.f32 %v4745_v33, %v4767_v0 }
 0x416   : > { %v4766_v42 = vrot.slane %v4738_v38, 4  ;;  %v4781_v27 = vmax.f32 %v4731_v36, %v4765_v45 }
 0x417   : > { %v4784_v50 = vmax.f32 %v4752_v37, %v4768_v41 }
 0x418   : > { %v4782_v30 = vmax.f32 %v4738_v38, %v4766_v42 }
 0x419   : > { %v4788_v6 = vmax.f32 %v4783_v61, %v4784_v50 }
 0x41a   : > { %v4787_v19 = vmax.f32 %v4781_v27, %v4782_v30 }
 0x41b   : > { %4792 = vst [vmem:[%s278_s13 + $0xc] sm:$0xf] %v4788_v6 }
 0x41c   : > { %4791 = vst [vmem:[%s278_s13 + $0x8] sm:$0xf] %v4787_v19 }
 0x41d PF: > { %s17_s24 = sadd.s32 1, %s6361_s24  }
 0x41e   : > { %p14_p4 = scmp.ge.s32.totalorder %s17_s24, 4  }
 0x420   :  { %16 = sbr.rel (!%p14_p4) target bundleno = 1 (0x1), region = 100 }

// kernel: encoder_forward.2
= control target key start
LH: loop header
LB: loop body
LE: loop exit
PB: predicated region body
PF: predicated region fallthrough
CT: control target
= control target key end

     0   :  { %12 = vsyncpa [#allocation5], 0  ;;  %s14813_s24 = smov 0   ;;  %s18351_s0 = inlined_call_operand.vmem [shape: bf16[2,16,16,128], index: 0, kind: input, shape index: {}]   ;;  %s18352_s1 = inlined_call_operand.vmem [shape: bf16[9,128,128], index: 1, kind: input, shape index: {}]   ;;  %s18353_s2 = inlined_call_operand.vmem [shape: f32[1,128], index: 2, kind: input, shape index: {}]   ;;  %s18354_s3 = inlined_call_operand.vmem [shape: f32[1,128], index: 3, kind: input, shape index: {}]   ;;  %s18355_s4 = inlined_call_operand.hbm [shape: bf16[9,128,128], index: 4, kind: input, shape index: {}]   ;;  %s18356_s5 = inlined_call_operand.vmem [shape: f32[1,128], index: 5, kind: input, shape index: {}]   ;;  %s18357_s6 = inlined_call_operand.vmem [shape: f32[1,128], index: 6, kind: input, shape index: {}]   ;;  %s18358_s7 = inlined_call_operand.vmem [shape: bf16[2,8,8,128], index: 7, kind: output, shape index: {}]  }
   0x1 LB: > { %s14819_s25 = sadd.s32 4294967295, %s14766_s24   ;;  %p11819_p0 = scmp.ge.s32.totalorder %s14766_s24, 1  ;;  %s14766_s24 = sphi %s14813_s24, %s18_s24  }
   0x2   : > { %p201_p1 = scmp.lt.s32.totalorder %s14766_s24, 3  ;;  %s14768_s26 = smov [#allocation4]  }
   0x3   : > { %s222_s27 = sshll.u32 %s14768_s26, 4  ;;  %p18359_p3 = scmp.eq.s32.totalorder %s14819_s25, 0  ;;  %s223_s27 = int_to_ptr.vmem [resolvable:$true] %s222_s27 }
   0x4   : > { %p14823_p2 = pnand %p11819_p0, %p201_p1  ;;  %s14728_s9 = scalar_lea.hbm %s18355_s4, 9216 }
   0x5   : > { %p14729_p6 = scmp.ne.s32.totalorder %s18355_s4, %s14728_s9  ;;  %p14735_p10 = scmp.lt.u32.totalorder %s14728_s9, %s18355_s4 }
   0x6   : > { %s18464_s28 = scalar_select %p14823_p2, 1, 0 }
   0x7   : > { %p14391_p4 = pneg %p14823_p2 }
   0x9   : > { %p14832_p5 = pnand %p18359_p3, %p14391_p4 }
   0xb   : > { %p14730_p7 = pneg %p14832_p5 }
   0xd   : > { %p14731_p8 = pnand %p14730_p7, %p14729_p6 }
   0xf   : > { %p14732_p9 = pneg %p14731_p8 }
  0x11   : > { %p14737_p11 = pnand %p14735_p10, %p14732_p9 }
  0x13   : > { %14740 = shalt.err (!%p14737_p11)
}
  0x14   : > { %s14741_s14 = scalar_lea.vmem %s223_s27, 9216  ;;  %p14749_p1 = scmp.lt.s32.totalorder %s223_s27, %s223_s27 }
  0x15   : > { %p14742_p12 = scmp.ne.s32.totalorder %s223_s27, %s14741_s14  ;;  %p14750_p4 = scmp.lt.s32.totalorder %s14741_s14, %s14741_s14 }
  0x17   : > { %p14744_p13 = pnand %p14742_p12, %p14730_p7  ;;  %p14751_p3 = por %p14750_p4, %p14749_p1 }
  0x19   : > { %p14745_p0 = pneg %p14744_p13 }
  0x1b   : > { %p14752_p2 = pnand %p14751_p3, %p14745_p0 }
  0x1d   : > { %14755 = shalt.err (!%p14752_p2)
}
  0x1e   : > { %s14769_s15 = smov 64   ;;  %s14770_s16 = smov 4  }
  0x1f   : > { %14394 = dma.hbm_to_vmem [thread:$0]  (!%p14832_p5), %s18355_s4, 9216, %s223_s27, [#allocation5], %s14769_s15, %s14769_s15, %s14770_s16  }
  0x20   : > { %p18466_p6 = scmp.ne.s32.totalorder %s18464_s28, 0 }
  0x22   : > { %252 = sbr.rel (%p18466_p6) target bundleno = 1778 (0x6f2), region = 48 }
  0x29   : > { %p18467_p8 = scmp.eq.s32.totalorder %s14819_s25, 0 }
  0x2b   : > { %14761 = dma.done.wait (%p18467_p8), [#allocation5], 9216   ;;  %p18468_p7 = pmov %p18467_p8 }
  0x2c   : > { %v14771_v0 = vmov 0   ;;  %p284_p2 = scmp.lt.s32.totalorder %s14819_s25, 1  ;;  %v14410_v1 = vld [vmem:[%s18352_s1 + $0x40] sm:$0xff]   ;;  %vm303_vm0 = vcmask 1040384   ;;  %v14411_v2 = vld [vmem:[%s18352_s1 + $0x48] sm:$0xff]   ;;  %v14412_v3 = vld [vmem:[%s18352_s1 + $0x50] sm:$0xff]  }
  0x2d   : > { %14763 = vsyncadd (%p18468_p7), [#allocation5], 4294958080  ;;  %295 = vst [vmem:[#allocation2] sm:$0xf] %v14771_v0  ;;  %13011 = vmatprep.subr.bf16.mxu0 %v14410_v1  ;;  %vm304_vm1 = vsmask.f32 256 }
  0x2e   : > { %296 = vst [vmem:[#allocation2 + $0x4] sm:$0xf] %v14771_v0  ;;  %297 = vst [vmem:[#allocation2 + $0x8] sm:$0x1] %v14771_v0  ;;  %s18735_s25 = smov (!%p284_p2, %s14819_s25), 1  ;;  %13012 = vmatpush3.bf16.msra.mxu0 %v14410_v1  ;;  %v18469_v4 = vmov 0 }
  0x2f   : > { %299 = vst [vmem:[#allocation2 + $0xcc] sm:$0xf] %v14771_v0  ;;  %300 = vst [vmem:[#allocation2 + $0xd0] sm:$0xf] %v14771_v0  ;;  %vm936_vm2 = vsmask.f32 3328  ;;  %13013 = vmatprep.subr.bf16.mxu0 %v14411_v2 }
  0x30   : > { %301 = vst [vmem:[#allocation2 + $0xd4] sm:$0x1] %v14771_v0  ;;  %5790 = vst [vmem:[#allocation3] sm:$0xf] %v14771_v0  ;;  %vm937_vm3 = vsmask.f32 7440 }
  0x31   : > { %5791 = vst [vmem:[#allocation3 + $0x4] sm:$0xf] %v14771_v0  ;;  %5792 = vst [vmem:[#allocation3 + $0x8] sm:$0x1] %v14771_v0  ;;  %vm354_vm4 = vsmask.f32 7938 }
  0x32   : > { %5794 = vst [vmem:[#allocation3 + $0xcc] sm:$0xf] %v14771_v0  ;;  %5795 = vst [vmem:[#allocation3 + $0xd0] sm:$0xf] %v14771_v0  ;;  %s12522_s27 = sshll.u32 %s18735_s25, 7  ;;  %13014 = vmatpush3.bf16.msra.mxu0 %v14411_v2  ;;  %v14413_v5 = vld [vmem:[%s18352_s1 + $0x58] sm:$0xff]  }
  0x33   : > { %5796 = vst [vmem:[#allocation3 + $0xd4] sm:$0x1] %v14771_v0  ;;  %vm14874_vm5 = vmand %vm303_vm0, %vm304_vm1  ;;  %vm436_vm6 = vsmask.f32 4368  ;;  %13015 = vmatprep.subr.bf16.mxu0 %v14412_v3  ;;  %s14884_s9 = scalar_lea.vmem %s18351_s0, %s12522_s27  ;;  %v306_v13 = vld [vmem:[#allocation2 + $0xc] sm:$0x1] }
  0x34   : > { %v18470_v4 = vsel %vm14874_vm5, 4294967295, %v18469_v4  ;;  %v872_v6 = vld [vmem:[#allocation2] sm:$0xf]  ;;  %vm14888_vm7 = vmand %vm303_vm0, %vm354_vm4  ;;  %v18472_v14 = vmov 0  ;;  %v307_v17 = vsel %vm14874_vm5, 0, %v306_v13  ;;  %vm758_vm8 = vcmask 1043456  }
  0x35   : > { %18471 = vst [vmem:[#allocation7_spill] sm:$0xff] %v18470_v4  ;;  %v873_v7 = vld [vmem:[#allocation2 + $0x4] sm:$0xf]  ;;  %v920_v8 = vld [vmem:[#allocation2 + $0x8] sm:$0x1]  ;;  %v940_v9 = vshrl.u32 %v872_v6, 16  ;;  %vm14903_vm9 = vmor %vm936_vm2, %vm937_vm3 }
  0x36   : > { %v943_v10 = vshll.u32 %v872_v6, 16  ;;  %v949_v11 = vshll.u32 %v873_v7, 16  ;;  %v953_v12 = vshrl.u32 %v873_v7, 16  ;;  %v18473_v14 = vsel %vm14888_vm7, 4294967295, %v18472_v14  ;;  %v14414_v15 = vld [vmem:[%s18352_s1 + $0x60] sm:$0xff]   ;;  %13016 = vmatpush3.bf16.msra.mxu0 %v14412_v3  ;;  %vm14909_vm10 = vmor %vm304_vm1, %vm436_vm6  ;;  %v14415_v43 = vld [vmem:[%s18352_s1 + $0x68] sm:$0xff]  }
  0x37   : > { %18474 = vst [vmem:[#allocation8_spill] sm:$0xff] %v18473_v14  ;;  %v959_v16 = vshll.u32 %v920_v8, 16  ;;  %v356_v18 = vld [vmem:[#allocation2 + $0x14] sm:$0x1]  ;;  %v942_v19 = vrot.slane %v940_v9, 4  ;;  %13017 = vmatprep.subr.bf16.mxu0 %v14413_v5  ;;  %v18477_v39 = vmov 0  ;;  %vm14921_vm11 = vmand %vm758_vm8, %vm354_vm4 }
  0x38   : > { %v945_v20 = vrot.slane %v943_v10, 5  ;;  %v951_v21 = vrot.slane %v949_v11, 5  ;;  %v955_v22 = vrot.slane %v953_v12, 4  ;;  %308 = vst [vmem:[#allocation2 + $0xc] sm:$0x1] %v307_v17  ;;  %v357_v25 = vsel %vm14888_vm7, 0, %v356_v18 }
  0x39   : > { %v404_v23 = vld [vmem:[%s14884_s9] sm:$0xf]  ;;  %v961_v24 = vrot.slane %v959_v16, 5  ;;  %v405_v26 = vld [vmem:[%s14884_s9 + $0x4] sm:$0xf]  ;;  %v18478_v39 = vsel %vm14909_vm10, 4294967295, %v18477_v39 }
  0x3a   : > { %v439_v27 = vshrl.u32 %v404_v23, 16  ;;  %v442_v28 = vshll.u32 %v404_v23, 16  ;;  %v946_v29 = vor.u32 %v945_v20, %v942_v19  ;;  %v956_v30 = vor.u32 %v955_v22, %v951_v21  ;;  %358 = vst [vmem:[#allocation2 + $0x14] sm:$0x1] %v357_v25  ;;  %v309_v35 = vld [vmem:[#allocation2 + $0x18] sm:$0x1]  ;;  %13018 = vmatpush3.bf16.msra.mxu0 %v14413_v5 }
  0x3b   : > { %v447_v31 = vshrl.u32 %v405_v26, 16  ;;  %v450_v32 = vshll.u32 %v405_v26, 16  ;;  %v359_v36 = vld [vmem:[#allocation2 + $0x20] sm:$0x1]  ;;  %18479 = vst [vmem:[#allocation9_spill] sm:$0xff] %v18478_v39  ;;  %v310_v41 = vsel %vm14874_vm5, 0, %v309_v35  ;;  %13019 = vmatprep.subr.bf16.mxu0 %v14414_v15 }
  0x3c   : > { %v441_v34 = vrot.slane %v439_v27, 7  ;;  %v947_v37 = vrot.slane %v946_v29, 4  ;;  %v957_v38 = vrot.slane %v956_v30, 4  ;;  %v406_v42 = vld [vmem:[%s14884_s9 + $0x8] sm:$0xf]  ;;  %v18480_v46 = vmov 0 }
  0x3d   : > { %v449_v40 = vrot.slane %v447_v31, 7  ;;  %v18481_v46 = vsel %vm14921_vm11, 4294967295, %v18480_v46  ;;  %311 = vst [vmem:[#allocation2 + $0x18] sm:$0x1] %v310_v41  ;;  %v360_v47 = vsel %vm14888_vm7, 0, %v359_v36  ;;  %v456_v49 = vshrl.u32 %v406_v42, 16 }
  0x3e   : > { %v444_v44 = vor.u32 %v442_v28, %v441_v34  ;;  %v445_v45 = vrot.slane %v441_v34, 4  ;;  %18482 = vst [vmem:[#allocation10_spill] sm:$0xff] %v18481_v46  ;;  %v407_v48 = vld [vmem:[%s14884_s9 + $0xc] sm:$0xf]  ;;  %v952_v50 = vsel %vm14903_vm9, %v947_v37, %v951_v21  ;;  %v962_v51 = vsel %vm14903_vm9, %v957_v38, %v961_v24  ;;  %361 = vst [vmem:[#allocation2 + $0x20] sm:$0x1] %v360_v47 }
  0x3f   : > { %v452_v52 = vor.u32 %v450_v32, %v449_v40  ;;  %v454_v53 = vrot.slane %v449_v40, 4  ;;  %v312_v54 = vld [vmem:[#allocation2 + $0x24] sm:$0x1]  ;;  %v362_v55 = vld [vmem:[#allocation2 + $0x2c] sm:$0x1]  ;;  %v11844_v56 = vcombine.low %v952_v50, %v962_v51  ;;  %v458_v58 = vrot.slane %v456_v49, 7  ;;  %13020 = vmatpush3.bf16.msra.mxu0 %v14414_v15 }
  0x40   : > { %v760_v57 = vld [vmem:[#allocation2 + $0xc] sm:$0xf]  ;;  %v459_v59 = vshll.u32 %v406_v42, 16  ;;  %v464_v60 = vshrl.u32 %v407_v48, 16  ;;  %v467_v63 = vshll.u32 %v407_v48, 16  ;;  %v313_v0 = vsel %vm14874_vm5, 0, %v312_v54  ;;  %13021 = vmatprep.subr.bf16.mxu0 %v14415_v43 }
  0x41   : > { %v453_v61 = vsel %vm14909_vm10, %v445_v45, %v452_v52  ;;  %v761_v62 = vsel %vm14921_vm11, %v444_v44, %v760_v57  ;;  %v408_v1 = vld [vmem:[%s14884_s9 + $0x10] sm:$0xf]  ;;  %v409_v2 = vld [vmem:[%s14884_s9 + $0x14] sm:$0xf]  ;;  %13027 = vmatprep.mubr.bf16.mxu0 %v11844_v56  ;;  %v462_v7 = vrot.slane %v458_v58, 4  ;;  %v363_v9 = vsel %vm14888_vm7, 0, %v362_v55 }
  0x42   : > { %v14416_v3 = vld [vmem:[%s18352_s1 + $0x70] sm:$0xff]   ;;  %762 = vst [vmem:[#allocation2 + $0xc] sm:$0xf] %v761_v62  ;;  %763 = vst [vmem:[#allocation2 + $0x10] sm:$0xf] %v453_v61  ;;  %v461_v6 = vor.u32 %v459_v59, %v458_v58  ;;  %v466_v8 = vrot.slane %v464_v60, 7 }
  0x43   : > { %v764_v5 = vld [vmem:[#allocation2 + $0x14] sm:$0x1]  ;;  %314 = vst [vmem:[#allocation2 + $0x24] sm:$0x1] %v313_v0  ;;  %364 = vst [vmem:[#allocation2 + $0x2c] sm:$0x1] %v363_v9  ;;  %13022 = vmatpush3.bf16.msra.mxu0 %v14415_v43 }
  0x44   : > { %v765_v10 = vsel %vm14874_vm5, %v454_v53, %v764_v5  ;;  %v473_v11 = vshrl.u32 %v408_v1, 16  ;;  %v476_v12 = vshll.u32 %v408_v1, 16  ;;  %v481_v13 = vshrl.u32 %v409_v2, 16  ;;  %v315_v18 = vld [vmem:[#allocation2 + $0x30] sm:$0x1]  ;;  %v14417_v19 = vld [vmem:[%s18352_s1 + $0x78] sm:$0xff]   ;;  %13023 = vmatprep.subr.bf16.mxu0 %v14416_v3 }
  0x45   : > { %766 = vst [vmem:[#allocation2 + $0x14] sm:$0x1] %v765_v10  ;;  %v469_v15 = vor.u32 %v467_v63, %v466_v8  ;;  %v471_v16 = vrot.slane %v466_v8, 4  ;;  %v484_v17 = vshll.u32 %v409_v2, 16  ;;  %v767_v20 = vld [vmem:[#allocation2 + $0x18] sm:$0xf] }
  0x46   : > { %v475_v21 = vrot.slane %v473_v11, 7  ;;  %v483_v22 = vrot.slane %v481_v13, 7  ;;  %v316_v23 = vsel %vm14874_vm5, 0, %v315_v18  ;;  %v768_v25 = vsel %vm14921_vm11, %v461_v6, %v767_v20  ;;  %v771_v26 = vld [vmem:[#allocation2 + $0x20] sm:$0x1]  ;;  %v14419_v20 = vld [vmem:[%s18352_s1 + $0x8] sm:$0xff]  }
  0x47   : > { %v470_v24 = vsel %vm14909_vm10, %v462_v7, %v469_v15  ;;  %317 = vst [vmem:[#allocation2 + $0x30] sm:$0x1] %v316_v23  ;;  %v365_v27 = vld [vmem:[#allocation2 + $0x38] sm:$0x1]  ;;  %769 = vst [vmem:[#allocation2 + $0x18] sm:$0xf] %v768_v25  ;;  %v772_v29 = vsel %vm14874_vm5, %v471_v16, %v771_v26  ;;  %13024 = vmatpush3.bf16.msra.mxu0 %v14416_v3 }
  0x48   : > { %v410_v28 = vld [vmem:[%s14884_s9 + $0x18] sm:$0xf]  ;;  %770 = vst [vmem:[#allocation2 + $0x1c] sm:$0xf] %v470_v24  ;;  %v478_v30 = vor.u32 %v476_v12, %v475_v21  ;;  %v479_v31 = vrot.slane %v475_v21, 4  ;;  %v486_v32 = vor.u32 %v484_v17, %v483_v22  ;;  %v14962_v34 = vld [vmem:[%s18352_s1] sm:$0xff]   ;;  %13025 = vmatprep.subr.bf16.mxu0 %v14417_v19 }
  0x49   : > { %773 = vst [vmem:[#allocation2 + $0x20] sm:$0x1] %v772_v29  ;;  %v488_v35 = vrot.slane %v483_v22, 4  ;;  %v366_v36 = vsel %vm14888_vm7, 0, %v365_v27  ;;  %v411_v37 = vld [vmem:[%s14884_s9 + $0x1c] sm:$0xf] }
  0x4a   : > { %v490_v38 = vshrl.u32 %v410_v28, 16  ;;  %v493_v40 = vshll.u32 %v410_v28, 16  ;;  %v874_v41 = vld [vmem:[#allocation2 + $0xc] sm:$0xf]  ;;  %v875_v42 = vld [vmem:[#allocation2 + $0x10] sm:$0xf]  ;;  %v487_v43 = vsel %vm14909_vm10, %v479_v31, %v486_v32 }
  0x4b   : > { %v774_v44 = vld [vmem:[#allocation2 + $0x24] sm:$0xf]  ;;  %367 = vst [vmem:[#allocation2 + $0x38] sm:$0x1] %v366_v36  ;;  %v964_v45 = vshrl.u32 %v874_v41, 16  ;;  %v967_v47 = vshll.u32 %v874_v41, 16  ;;  %13026 = vmatpush3.bf16.msra.mxu0 %v14417_v19 }
  0x4c   : > { %v973_v48 = vshll.u32 %v875_v42, 16  ;;  %v977_v49 = vshrl.u32 %v875_v42, 16  ;;  %777 = vst [vmem:[#allocation2 + $0x28] sm:$0xf] %v487_v43  ;;  %v778_v50 = vld [vmem:[#allocation2 + $0x2c] sm:$0x1]  ;;  %v775_v52 = vsel %vm14921_vm11, %v478_v30, %v774_v44  ;;  %13059 = vmatprep.subr.bf16.mxu0 %v14962_v34 }
  0x4d   : > { %v921_v51 = vld [vmem:[#allocation2 + $0x14] sm:$0x1]  ;;  %v779_v53 = vsel %vm14874_vm5, %v488_v35, %v778_v50  ;;  %v492_v54 = vrot.slane %v490_v38, 7  ;;  %v498_v55 = vshrl.u32 %v411_v37, 16  ;;  %v966_v56 = vrot.slane %v964_v45, 4  ;;  %s12523_s12 = sshll.u32 %s18735_s25, 5 }
  0x4e   : > { %v969_v57 = vrot.slane %v967_v47, 5  ;;  %v975_v58 = vrot.slane %v973_v48, 5  ;;  %v979_v59 = vrot.slane %v977_v49, 4  ;;  %776 = vst [vmem:[#allocation2 + $0x24] sm:$0xf] %v775_v52  ;;  %v983_v60 = vshll.u32 %v921_v51, 16  ;;  %s18284_s14 = scalar_lea.vmem %s18358_s7, %s12523_s12 }
  0x4f   : > { %780 = vst [vmem:[#allocation2 + $0x2c] sm:$0x1] %v779_v53  ;;  %v14973_v61 = vor.u32 %v493_v40, %v492_v54  ;;  %v496_v62 = vrot.slane %v492_v54, 4  ;;  %v876_v1 = vld [vmem:[#allocation2 + $0x18] sm:$0xf]  ;;  %v14976_v3 = vrot.slane %v498_v55, 7 }
  0x50   : > { %v970_v63 = vor.u32 %v969_v57, %v966_v56  ;;  %v980_v0 = vor.u32 %v979_v59, %v975_v58  ;;  %v877_v2 = vld [vmem:[#allocation2 + $0x1c] sm:$0xf]  ;;  %v501_v5 = vshll.u32 %v411_v37, 16  ;;  %v985_v6 = vrot.slane %v983_v60, 5  ;;  %v922_v7 = vld [vmem:[#allocation2 + $0x20] sm:$0x1] }
  0x51   : > { %v988_v8 = vshrl.u32 %v876_v1, 16  ;;  %v991_v9 = vshll.u32 %v876_v1, 16  ;;  %v997_v10 = vshll.u32 %v877_v2, 16  ;;  %v1001_v13 = vshrl.u32 %v877_v2, 16  ;;  %v318_v32 = vld [vmem:[#allocation2 + $0x3c] sm:$0x1] }
  0x52   : > { %v971_v11 = vrot.slane %v970_v63, 4  ;;  %v981_v12 = vrot.slane %v980_v0, 4  ;;  %v1007_v15 = vshll.u32 %v922_v7, 16  ;;  %v503_v21 = vor.u32 %v501_v5, %v14976_v3  ;;  %v368_v35 = vld [vmem:[#allocation2 + $0x44] sm:$0x1] }
  0x53   : > { %v990_v16 = vrot.slane %v988_v8, 4  ;;  %v993_v17 = vrot.slane %v991_v9, 5  ;;  %v999_v18 = vrot.slane %v997_v10, 5  ;;  %v879_v19 = vld [vmem:[#allocation2 + $0x28] sm:$0xf]  ;;  %v1003_v24 = vrot.slane %v1001_v13, 4 }
  0x54   : > { %v976_v22 = vsel %vm14903_vm9, %v971_v11, %v975_v58  ;;  %v986_v23 = vsel %vm14903_vm9, %v981_v12, %v985_v6  ;;  %v1009_v25 = vrot.slane %v1007_v15, 5  ;;  %v1021_v30 = vshll.u32 %v879_v19, 16  ;;  %v781_v41 = vld [vmem:[#allocation2 + $0x30] sm:$0xf]  ;;  %v412_v47 = vld [vmem:[%s14884_s9 + $0x20] sm:$0xf] }
  0x55   : > { %v11845_v26 = vcombine.low %v976_v22, %v986_v23  ;;  %v994_v27 = vor.u32 %v993_v17, %v990_v16  ;;  %v878_v28 = vld [vmem:[#allocation2 + $0x24] sm:$0xf]  ;;  %v1025_v31 = vshrl.u32 %v879_v19, 16  ;;  %v1004_v36 = vor.u32 %v1003_v24, %v999_v18  ;;  %v785_v52 = vld [vmem:[#allocation2 + $0x38] sm:$0x1] }
  0x56   : > { %v923_v29 = vld [vmem:[#allocation2 + $0x2c] sm:$0x1]  ;;  %v1012_v37 = vshrl.u32 %v878_v28, 16  ;;  %v1015_v38 = vshll.u32 %v878_v28, 16  ;;  %v1023_v43 = vrot.slane %v1021_v30, 5  ;;  %v504_v45 = vsel %vm14909_vm10, %v496_v62, %v503_v21  ;;  %v14421_v16 = vld [vmem:[%s18352_s1 + $0x18] sm:$0xff]  }
  0x57   : > { %v1031_v40 = vshll.u32 %v923_v29, 16  ;;  %13028 = vmatmul.mubr.bf16.vlgmr.msra.gmra.mrb[0].mxu0 %v11845_v26  ;;  %v995_v42 = vrot.slane %v994_v27, 4  ;;  %v1027_v44 = vrot.slane %v1025_v31, 4  ;;  %v1005_v48 = vrot.slane %v1004_v36, 4  ;;  %784 = vst [vmem:[#allocation2 + $0x34] sm:$0xf] %v504_v45 }
  0x58   : > { %13060 = vmatpush3.bf16.msra.mxu0 %v14962_v34  ;;  %v1014_v49 = vrot.slane %v1012_v37, 4  ;;  %v1017_v50 = vrot.slane %v1015_v38, 5  ;;  %v505_v55 = vrot.slane %v14976_v3, 4  ;;  %v782_v56 = vsel %vm14921_vm11, %v14973_v61, %v781_v41  ;;  %v413_v57 = vld [vmem:[%s14884_s9 + $0x24] sm:$0xf]  ;;  %v14420_v34 = vld [vmem:[%s18352_s1 + $0x10] sm:$0xff]  }
  0x59   : > { %v1033_v51 = vrot.slane %v1031_v40, 5  ;;  %v1000_v53 = vsel %vm14903_vm9, %v995_v42, %v999_v18  ;;  %v1028_v54 = vor.u32 %v1027_v44, %v1023_v43  ;;  %13061 = vmatprep.subr.bf16.mxu0 %v14419_v20  ;;  %v321_v58 = vld [vmem:[#allocation2 + $0x48] sm:$0x1]  ;;  %v1010_v59 = vsel %vm14903_vm9, %v1005_v48, %v1009_v25  ;;  %783 = vst [vmem:[#allocation2 + $0x30] sm:$0xf] %v782_v56 }
  0x5a   : > { %v1018_v60 = vor.u32 %v1017_v50, %v1014_v49  ;;  %v319_v62 = vsel %vm14874_vm5, 0, %v318_v32  ;;  %v369_v63 = vsel %vm14888_vm7, 0, %v368_v35  ;;  %v371_v0 = vld [vmem:[#allocation2 + $0x50] sm:$0x1]  ;;  %v414_v61 = vld [vmem:[%s14884_s9 + $0x28] sm:$0xf]  ;;  %v11846_v1 = vcombine.low %v1000_v53, %v1010_v59 }
  0x5b   : > { %v1029_v2 = vrot.slane %v1028_v54, 4  ;;  %v786_v3 = vsel %vm14874_vm5, %v505_v55, %v785_v52  ;;  %320 = vst [vmem:[#allocation2 + $0x3c] sm:$0x1] %v319_v62  ;;  %370 = vst [vmem:[#allocation2 + $0x44] sm:$0x1] %v369_v63  ;;  %v507_v5 = vshrl.u32 %v412_v47, 16 }
  0x5c   : > { %v15010_v6 = vld [vmem:[%s14884_s9 + $0x2c] sm:$0xf]  ;;  %v1019_v7 = vrot.slane %v1018_v60, 4  ;;  %13062 = vmatpush3.bf16.msra.mxu0 %v14419_v20  ;;  %787 = vst [vmem:[#allocation2 + $0x38] sm:$0x1] %v786_v3  ;;  %v510_v8 = vshll.u32 %v412_v47, 16  ;;  %13031 = vmatprep.mubr.bf16.mxu0 %v11846_v1 }
  0x5d   : > { %v515_v9 = vshrl.u32 %v413_v57, 16  ;;  %v518_v10 = vshll.u32 %v413_v57, 16  ;;  %v1034_v11 = vsel %vm14903_vm9, %v1029_v2, %v1033_v51  ;;  %v509_v12 = vrot.slane %v507_v5, 7  ;;  %13063 = vmatprep.subr.bf16.mxu0 %v14420_v34  ;;  %v324_v21 = vld [vmem:[#allocation2 + $0x54] sm:$0x1]  ;;  %v14422_v32 = vld [vmem:[%s18352_s1 + $0x20] sm:$0xff]  }
  0x5e   : > { %v322_v13 = vsel %vm14874_vm5, 0, %v321_v58  ;;  %v372_v15 = vsel %vm14888_vm7, 0, %v371_v0  ;;  %v1024_v17 = vsel %vm14903_vm9, %v1019_v7, %v1023_v43  ;;  %v524_v19 = vshrl.u32 %v414_v61, 16  ;;  %v881_v23 = vld [vmem:[#allocation2 + $0x34] sm:$0xf]  ;;  %v14423_v59 = vld [vmem:[%s18352_s1 + $0x28] sm:$0xff]  }
  0x5f   : > { %v517_v18 = vrot.slane %v515_v9, 7  ;;  %323 = vst [vmem:[#allocation2 + $0x48] sm:$0x1] %v322_v13  ;;  %373 = vst [vmem:[#allocation2 + $0x50] sm:$0x1] %v372_v15  ;;  %v527_v20 = vshll.u32 %v414_v61, 16  ;;  %v11847_v22 = vcombine.low %v1024_v17, %v1034_v11  ;;  %v512_v24 = vor.u32 %v510_v8, %v509_v12 }
  0x60   : > { %v513_v25 = vrot.slane %v509_v12, 4  ;;  %v532_v26 = vshrl.u32 %v15010_v6, 16  ;;  %v1045_v27 = vshll.u32 %v881_v23, 16  ;;  %v1049_v28 = vshrl.u32 %v881_v23, 16  ;;  %13064 = vmatpush3.bf16.msra.mxu0 %v14420_v34  ;;  %v374_v31 = vld [vmem:[#allocation2 + $0x5c] sm:$0x1] }
  0x61   : > { %v520_v29 = vor.u32 %v518_v10, %v517_v18  ;;  %v522_v30 = vrot.slane %v517_v18, 4  ;;  %13032 = vmatmul.mubr.bf16.gmra.mrb[4].mxu0 %v11847_v22  ;;  %v880_v35 = vld [vmem:[#allocation2 + $0x30] sm:$0xf]  ;;  %v526_v36 = vrot.slane %v524_v19, 7  ;;  %v535_v38 = vshll.u32 %v15010_v6, 16  ;;  %13065 = vmatprep.subr.bf16.mxu0 %v14421_v16 }
  0x62   : > { %v534_v37 = vrot.slane %v532_v26, 7  ;;  %v325_v40 = vsel %vm14874_vm5, 0, %v324_v21  ;;  %v1036_v41 = vshrl.u32 %v880_v35, 16  ;;  %v1039_v42 = vshll.u32 %v880_v35, 16  ;;  %v788_v45 = vld [vmem:[#allocation2 + $0x3c] sm:$0xf] }
  0x63   : > { %v15030_v43 = vrot.slane %v1045_v27, 5  ;;  %v1051_v44 = vrot.slane %v1049_v28, 4  ;;  %326 = vst [vmem:[#allocation2 + $0x54] sm:$0x1] %v325_v40  ;;  %v416_v47 = vld [vmem:[%s14884_s9 + $0x30] sm:$0xf]  ;;  %v521_v49 = vsel %vm14909_vm10, %v513_v25, %v520_v29  ;;  %v789_v50 = vsel %vm14921_vm11, %v512_v24, %v788_v45 }
  0x64   : > { %v924_v48 = vld [vmem:[#allocation2 + $0x38] sm:$0x1]  ;;  %v792_v51 = vld [vmem:[#allocation2 + $0x44] sm:$0x1]  ;;  %v529_v52 = vor.u32 %v527_v20, %v526_v36  ;;  %v530_v53 = vrot.slane %v526_v36, 4  ;;  %v1038_v55 = vrot.slane %v1036_v41, 4  ;;  %13066 = vmatpush3.bf16.msra.mxu0 %v14421_v16  ;;  %v537_v62 = vor.u32 %v535_v38, %v534_v37 }
  0x65   : > { %v15038_v54 = vld [vmem:[%s14884_s9 + $0x34] sm:$0xf]  ;;  %v1041_v56 = vrot.slane %v1039_v42, 5  ;;  %v1052_v57 = vor.u32 %v1051_v44, %v15030_v43  ;;  %v1055_v34 = vshll.u32 %v924_v48, 16  ;;  %790 = vst [vmem:[#allocation2 + $0x3c] sm:$0xf] %v789_v50  ;;  %v793_v60 = vsel %vm14874_vm5, %v522_v30, %v792_v51  ;;  %13067 = vmatprep.subr.bf16.mxu0 %v14422_v32 }
  0x66   : > { %791 = vst [vmem:[#allocation2 + $0x40] sm:$0xf] %v521_v49  ;;  %v327_v58 = vld [vmem:[#allocation2 + $0x60] sm:$0x1]  ;;  %v539_v63 = vrot.slane %v534_v37, 4  ;;  %v375_v1 = vsel %vm14888_vm7, 0, %v374_v31  ;;  %v538_v9 = vsel %vm14909_vm10, %v530_v53, %v537_v62 }
  0x67   : > { %v795_v0 = vld [vmem:[#allocation2 + $0x48] sm:$0xf]  ;;  %v799_v61 = vld [vmem:[#allocation2 + $0x50] sm:$0x1]  ;;  %v1042_v2 = vor.u32 %v1041_v56, %v1038_v55  ;;  %v1053_v3 = vrot.slane %v1052_v57, 4  ;;  %v1057_v5 = vrot.slane %v1055_v34, 5 }
  0x68   : > { %794 = vst [vmem:[#allocation2 + $0x44] sm:$0x1] %v793_v60  ;;  %v796_v6 = vsel %vm14921_vm11, %v529_v52, %v795_v0  ;;  %376 = vst [vmem:[#allocation2 + $0x5c] sm:$0x1] %v375_v1  ;;  %v377_v7 = vld [vmem:[#allocation2 + $0x68] sm:$0x1]  ;;  %v800_v10 = vsel %vm14874_vm5, %v539_v63, %v799_v61  ;;  %13068 = vmatpush3.bf16.msra.mxu0 %v14422_v32 }
  0x69   : > { %v418_v8 = vld [vmem:[%s14884_s9 + $0x38] sm:$0xf]  ;;  %797 = vst [vmem:[#allocation2 + $0x48] sm:$0xf] %v796_v6  ;;  %v541_v11 = vshrl.u32 %v416_v47, 16  ;;  %v544_v12 = vshll.u32 %v416_v47, 16  ;;  %v1058_v16 = vsel %vm14903_vm9, %v1053_v3, %v1057_v5  ;;  %13069 = vmatprep.subr.bf16.mxu0 %v14423_v59 }
  0x6a   : > { %v15056_v13 = vld [vmem:[%s14884_s9 + $0x3c] sm:$0xf]  ;;  %v1043_v15 = vrot.slane %v1042_v2, 4  ;;  %798 = vst [vmem:[#allocation2 + $0x4c] sm:$0xf] %v538_v9  ;;  %v549_v17 = vshrl.u32 %v15038_v54, 16 }
  0x6b   : > { %801 = vst [vmem:[#allocation2 + $0x50] sm:$0x1] %v800_v10  ;;  %v552_v18 = vshll.u32 %v15038_v54, 16  ;;  %v543_v19 = vrot.slane %v541_v11, 7  ;;  %v328_v20 = vsel %vm14874_vm5, 0, %v327_v58  ;;  %v378_v21 = vsel %vm14888_vm7, 0, %v377_v7 }
  0x6c   : > { %v558_v22 = vshrl.u32 %v418_v8, 16  ;;  %v14424_v23 = vld [vmem:[%s18352_s1 + $0x30] sm:$0xff]   ;;  %v1048_v24 = vsel %vm14903_vm9, %v1043_v15, %v15030_v43  ;;  %v551_v25 = vrot.slane %v549_v17, 7  ;;  %329 = vst [vmem:[#allocation2 + $0x60] sm:$0x1] %v328_v20  ;;  %v561_v27 = vshll.u32 %v418_v8, 16  ;;  %13070 = vmatpush3.bf16.msra.mxu0 %v14423_v59 }
  0x6d   : > { %v802_v26 = vld [vmem:[#allocation2 + $0x54] sm:$0xf]  ;;  %379 = vst [vmem:[#allocation2 + $0x68] sm:$0x1] %v378_v21  ;;  %v566_v28 = vshrl.u32 %v15056_v13, 16  ;;  %v11848_v29 = vcombine.low %v1048_v24, %v1058_v16  ;;  %v546_v32 = vor.u32 %v544_v12, %v543_v19  ;;  %v547_v35 = vrot.slane %v543_v19, 4  ;;  %13071 = vmatprep.subr.bf16.mxu0 %v14424_v23 }
  0x6e   : > { %v882_v30 = vld [vmem:[#allocation2 + $0x3c] sm:$0xf]  ;;  %v883_v31 = vld [vmem:[#allocation2 + $0x40] sm:$0xf]  ;;  %v15073_v36 = vrot.slane %v558_v22, 7  ;;  %v554_v43 = vor.u32 %v552_v18, %v551_v25  ;;  %v556_v44 = vrot.slane %v551_v25, 4 }
  0x6f   : > { %v1060_v37 = vshrl.u32 %v882_v30, 16  ;;  %v1063_v38 = vshll.u32 %v882_v30, 16  ;;  %v1069_v40 = vshll.u32 %v883_v31, 16  ;;  %v1073_v41 = vshrl.u32 %v883_v31, 16  ;;  %13035 = vmatprep.mubr.bf16.mxu0 %v11848_v29  ;;  %v925_v42 = vld [vmem:[#allocation2 + $0x44] sm:$0x1] }
  0x70   : > { %v803_v45 = vsel %vm14921_vm11, %v546_v32, %v802_v26  ;;  %v806_v47 = vld [vmem:[#allocation2 + $0x5c] sm:$0x1]  ;;  %v563_v48 = vor.u32 %v561_v27, %v15073_v36  ;;  %v884_v54 = vld [vmem:[#allocation2 + $0x48] sm:$0xf]  ;;  %v1079_v55 = vshll.u32 %v925_v42, 16  ;;  %v555_v58 = vsel %vm14909_vm10, %v547_v35, %v554_v43  ;;  %13072 = vmatpush3.bf16.msra.mxu0 %v14424_v23  ;;  %v15088_v5 = vld [vmem:[%s18352_s1 + $0x80] sm:$0xff]  }
  0x71   : > { %v14425_v49 = vld [vmem:[%s18352_s1 + $0x38] sm:$0xff]   ;;  %v1062_v50 = vrot.slane %v1060_v37, 4  ;;  %v1065_v51 = vrot.slane %v1063_v38, 5  ;;  %v1071_v52 = vrot.slane %v1069_v40, 5  ;;  %v1075_v53 = vrot.slane %v1073_v41, 4 }
  0x72   : > { %804 = vst [vmem:[#allocation2 + $0x54] sm:$0xf] %v803_v45  ;;  %v885_v56 = vld [vmem:[#allocation2 + $0x4c] sm:$0xf]  ;;  %v926_v57 = vld [vmem:[#allocation2 + $0x50] sm:$0x1]  ;;  %v807_v59 = vsel %vm14874_vm5, %v556_v44, %v806_v47  ;;  %13073 = vmatprep.subr.bf16.mxu0 %v14425_v49 }
  0x73   : > { %v1084_v34 = vshrl.u32 %v884_v54, 16  ;;  %v1066_v60 = vor.u32 %v1065_v51, %v1062_v50  ;;  %v1076_v62 = vor.u32 %v1075_v53, %v1071_v52  ;;  %v1087_v63 = vshll.u32 %v884_v54, 16  ;;  %805 = vst [vmem:[#allocation2 + $0x58] sm:$0xf] %v555_v58  ;;  %808 = vst [vmem:[#allocation2 + $0x5c] sm:$0x1] %v807_v59 }
  0x74   : > { %v1093_v0 = vshll.u32 %v885_v56, 16  ;;  %v1081_v61 = vrot.slane %v1079_v55, 5  ;;  %v1097_v2 = vshrl.u32 %v885_v56, 16  ;;  %v1103_v3 = vshll.u32 %v926_v57, 16  ;;  %v809_v10 = vld [vmem:[#allocation2 + $0x60] sm:$0xf]  ;;  %13074 = vmatpush3.bf16.msra.mxu0 %v14425_v49 }
  0x75   : > { %v1086_v1 = vrot.slane %v1084_v34, 4  ;;  %v1067_v6 = vrot.slane %v1066_v60, 4  ;;  %v1077_v7 = vrot.slane %v1076_v62, 4  ;;  %v1089_v8 = vrot.slane %v1087_v63, 5  ;;  %v813_v21 = vld [vmem:[#allocation2 + $0x68] sm:$0x1]  ;;  %13107 = vmatprep.subr.bf16.mxu0 %v15088_v5 }
  0x76   : > { %v1095_v9 = vrot.slane %v1093_v0, 5  ;;  %v1099_v11 = vrot.slane %v1097_v2, 4  ;;  %v1105_v12 = vrot.slane %v1103_v3, 5  ;;  %v564_v15 = vrot.slane %v15073_v36, 4  ;;  %v330_v22 = vld [vmem:[#allocation2 + $0x6c] sm:$0x1] }
  0x77   : > { %v568_v16 = vrot.slane %v566_v28, 7  ;;  %v1072_v17 = vsel %vm14903_vm9, %v1067_v6, %v1071_v52  ;;  %v1082_v18 = vsel %vm14903_vm9, %v1077_v7, %v1081_v61  ;;  %v1090_v19 = vor.u32 %v1089_v8, %v1086_v1  ;;  %v380_v28 = vld [vmem:[#allocation2 + $0x74] sm:$0x1]  ;;  %v421_v50 = vld [vmem:[%s14884_s9 + $0x44] sm:$0xf] }
  0x78   : > { %v569_v20 = vshll.u32 %v15056_v13, 16  ;;  %v11849_v23 = vcombine.low %v1072_v17, %v1082_v18  ;;  %v1100_v24 = vor.u32 %v1099_v11, %v1095_v9  ;;  %v810_v27 = vsel %vm14921_vm11, %v563_v48, %v809_v10  ;;  %v420_v13 = vld [vmem:[%s14884_s9 + $0x40] sm:$0xf]  ;;  %v333_v51 = vld [vmem:[#allocation2 + $0x78] sm:$0x1] }
  0x79   : > { %v886_v25 = vld [vmem:[#allocation2 + $0x54] sm:$0xf]  ;;  %v573_v26 = vrot.slane %v568_v16, 4  ;;  %v1091_v29 = vrot.slane %v1090_v19, 4  ;;  %811 = vst [vmem:[#allocation2 + $0x60] sm:$0xf] %v810_v27 }
  0x7a   : > { %v1108_v30 = vshrl.u32 %v886_v25, 16  ;;  %v1111_v31 = vshll.u32 %v886_v25, 16  ;;  %v571_v32 = vor.u32 %v569_v20, %v568_v16  ;;  %13036 = vmatmul.mubr.bf16.gmra.mrb[8].mxu0 %v11849_v23  ;;  %v1101_v35 = vrot.slane %v1100_v24, 4  ;;  %v887_v36 = vld [vmem:[#allocation2 + $0x58] sm:$0xf] }
  0x7b   : > { %v927_v37 = vld [vmem:[#allocation2 + $0x5c] sm:$0x1]  ;;  %v814_v38 = vsel %vm14874_vm5, %v573_v26, %v813_v21  ;;  %v331_v40 = vsel %vm14874_vm5, 0, %v330_v22  ;;  %v1096_v41 = vsel %vm14903_vm9, %v1091_v29, %v1095_v9  ;;  %v1117_v44 = vshll.u32 %v887_v36, 16  ;;  %v383_v56 = vld [vmem:[#allocation2 + $0x80] sm:$0x1] }
  0x7c   : > { %v1110_v42 = vrot.slane %v1108_v30, 4  ;;  %v1113_v43 = vrot.slane %v1111_v31, 5  ;;  %815 = vst [vmem:[#allocation2 + $0x68] sm:$0x1] %v814_v38  ;;  %332 = vst [vmem:[#allocation2 + $0x6c] sm:$0x1] %v331_v40  ;;  %v1106_v45 = vsel %vm14903_vm9, %v1101_v35, %v1105_v12  ;;  %v572_v49 = vsel %vm14909_vm10, %v564_v15, %v571_v32 }
  0x7d   : > { %v1121_v47 = vshrl.u32 %v887_v36, 16  ;;  %v1127_v48 = vshll.u32 %v927_v37, 16  ;;  %v11850_v52 = vcombine.low %v1096_v41, %v1106_v45  ;;  %v1119_v54 = vrot.slane %v1117_v44, 5  ;;  %812 = vst [vmem:[#allocation2 + $0x64] sm:$0xf] %v572_v49 }
  0x7e   : > { %v1114_v53 = vor.u32 %v1113_v43, %v1110_v42  ;;  %v381_v55 = vsel %vm14888_vm7, 0, %v380_v28  ;;  %v422_v57 = vld [vmem:[%s14884_s9 + $0x48] sm:$0xf]  ;;  %v575_v59 = vshrl.u32 %v420_v13, 16  ;;  %v578_v60 = vshll.u32 %v420_v13, 16 }
  0x7f   : > { %v1123_v34 = vrot.slane %v1121_v47, 4  ;;  %v1129_v58 = vrot.slane %v1127_v48, 5  ;;  %382 = vst [vmem:[#allocation2 + $0x74] sm:$0x1] %v381_v55  ;;  %13039 = vmatprep.mubr.bf16.mxu0 %v11850_v52  ;;  %v583_v63 = vshrl.u32 %v421_v50, 16  ;;  %v586_v0 = vshll.u32 %v421_v50, 16 }
  0x80   : > { %v1115_v62 = vrot.slane %v1114_v53, 4  ;;  %v334_v61 = vsel %vm14874_vm5, 0, %v333_v51  ;;  %v888_v2 = vld [vmem:[#allocation2 + $0x60] sm:$0xf]  ;;  %v577_v3 = vrot.slane %v575_v59, 7  ;;  %v384_v6 = vsel %vm14888_vm7, 0, %v383_v56 }
  0x81   : > { %v1124_v1 = vor.u32 %v1123_v34, %v1119_v54  ;;  %335 = vst [vmem:[#allocation2 + $0x78] sm:$0x1] %v334_v61  ;;  %v592_v7 = vshrl.u32 %v422_v57, 16  ;;  %v1132_v8 = vshrl.u32 %v888_v2, 16  ;;  %v1135_v9 = vshll.u32 %v888_v2, 16 }
  0x82   : > { %v585_v10 = vrot.slane %v583_v63, 7  ;;  %385 = vst [vmem:[#allocation2 + $0x80] sm:$0x1] %v384_v6  ;;  %v1120_v11 = vsel %vm14903_vm9, %v1115_v62, %v1119_v54  ;;  %v580_v16 = vor.u32 %v578_v60, %v577_v3  ;;  %v581_v17 = vrot.slane %v577_v3, 4  ;;  %v423_v23 = vld [vmem:[%s14884_s9 + $0x4c] sm:$0xf] }
  0x83   : > { %v1125_v12 = vrot.slane %v1124_v1, 4  ;;  %v928_v15 = vld [vmem:[#allocation2 + $0x68] sm:$0x1]  ;;  %v816_v18 = vld [vmem:[#allocation2 + $0x6c] sm:$0xf]  ;;  %v1134_v19 = vrot.slane %v1132_v8, 4 }
  0x84   : > { %v1137_v20 = vrot.slane %v1135_v9, 5  ;;  %v1151_v21 = vshll.u32 %v928_v15, 16  ;;  %v588_v22 = vor.u32 %v586_v0, %v585_v10  ;;  %v336_v24 = vld [vmem:[#allocation2 + $0x84] sm:$0x1]  ;;  %v590_v27 = vrot.slane %v585_v10, 4 }
  0x85   : > { %v1130_v25 = vsel %vm14903_vm9, %v1125_v12, %v1129_v58  ;;  %v15123_v26 = vld [vmem:[#allocation2 + $0x64] sm:$0xf]  ;;  %v817_v28 = vsel %vm14921_vm11, %v580_v16, %v816_v18  ;;  %v594_v29 = vrot.slane %v592_v7, 7  ;;  %v386_v30 = vld [vmem:[#allocation2 + $0x8c] sm:$0x1]  ;;  %v595_v41 = vshll.u32 %v422_v57, 16 }
  0x86   : > { %v11851_v31 = vcombine.low %v1120_v11, %v1130_v25  ;;  %v1138_v32 = vor.u32 %v1137_v20, %v1134_v19  ;;  %v1141_v13 = vshll.u32 %v15123_v26, 16  ;;  %v1145_v35 = vshrl.u32 %v15123_v26, 16  ;;  %818 = vst [vmem:[#allocation2 + $0x6c] sm:$0xf] %v817_v28  ;;  %v820_v36 = vld [vmem:[#allocation2 + $0x74] sm:$0x1] }
  0x87   : > { %v1153_v37 = vrot.slane %v1151_v21, 5  ;;  %v589_v38 = vsel %vm14909_vm10, %v581_v17, %v588_v22  ;;  %v821_v40 = vsel %vm14874_vm5, %v590_v27, %v820_v36  ;;  %v424_v42 = vld [vmem:[%s14884_s9 + $0x50] sm:$0xf]  ;;  %v425_v43 = vld [vmem:[%s14884_s9 + $0x54] sm:$0xf]  ;;  %v598_v48 = vrot.slane %v594_v29, 4 }
  0x88   : > { %13040 = vmatmul.mubr.bf16.gmra.mrb[12].mxu0 %v11851_v31  ;;  %v1139_v44 = vrot.slane %v1138_v32, 4  ;;  %v1143_v45 = vrot.slane %v1141_v13, 5  ;;  %v1147_v47 = vrot.slane %v1145_v35, 4  ;;  %819 = vst [vmem:[#allocation2 + $0x70] sm:$0xf] %v589_v38  ;;  %v597_v50 = vor.u32 %v595_v41, %v594_v29 }
  0x89   : > { %822 = vst [vmem:[#allocation2 + $0x74] sm:$0x1] %v821_v40  ;;  %v823_v49 = vld [vmem:[#allocation2 + $0x78] sm:$0xf]  ;;  %v600_v51 = vshrl.u32 %v423_v23, 16  ;;  %v603_v52 = vshll.u32 %v423_v23, 16 }
  0x8a   : > { %v337_v53 = vsel %vm14874_vm5, 0, %v336_v24  ;;  %v339_v54 = vld [vmem:[#allocation2 + $0x90] sm:$0x1]  ;;  %v1144_v55 = vsel %vm14903_vm9, %v1139_v44, %v1143_v45  ;;  %v1148_v56 = vor.u32 %v1147_v47, %v1143_v45  ;;  %v387_v57 = vsel %vm14888_vm7, 0, %v386_v30  ;;  %v389_v58 = vld [vmem:[#allocation2 + $0x98] sm:$0x1] }
  0x8b   : > { %338 = vst [vmem:[#allocation2 + $0x84] sm:$0x1] %v337_v53  ;;  %v609_v34 = vshrl.u32 %v424_v42, 16  ;;  %v602_v59 = vrot.slane %v600_v51, 7  ;;  %v824_v60 = vsel %vm14921_vm11, %v597_v50, %v823_v49  ;;  %388 = vst [vmem:[#allocation2 + $0x8c] sm:$0x1] %v387_v57 }
  0x8c   : > { %v612_v62 = vshll.u32 %v424_v42, 16  ;;  %v617_v63 = vshrl.u32 %v425_v43, 16  ;;  %v1149_v0 = vrot.slane %v1148_v56, 4  ;;  %825 = vst [vmem:[#allocation2 + $0x78] sm:$0xf] %v824_v60  ;;  %v620_v2 = vshll.u32 %v425_v43, 16 }
  0x8d   : > { %v827_v61 = vld [vmem:[#allocation2 + $0x80] sm:$0x1]  ;;  %v611_v1 = vrot.slane %v609_v34, 7  ;;  %v340_v3 = vsel %vm14874_vm5, 0, %v339_v54  ;;  %v15145_v6 = vld [vmem:[#allocation2 + $0x6c] sm:$0xf]  ;;  %v605_v7 = vor.u32 %v603_v52, %v602_v59 }
  0x8e   : > { %v607_v8 = vrot.slane %v602_v59, 4  ;;  %v619_v9 = vrot.slane %v617_v63, 7  ;;  %341 = vst [vmem:[#allocation2 + $0x90] sm:$0x1] %v340_v3  ;;  %v390_v10 = vsel %vm14888_vm7, 0, %v389_v58  ;;  %v1154_v11 = vsel %vm14903_vm9, %v1149_v0, %v1153_v37 }
  0x8f   : > { %v1156_v12 = vshrl.u32 %v15145_v6, 16  ;;  %v1159_v15 = vshll.u32 %v15145_v6, 16  ;;  %v614_v16 = vor.u32 %v612_v62, %v611_v1  ;;  %391 = vst [vmem:[#allocation2 + $0x98] sm:$0x1] %v390_v10  ;;  %v426_v17 = vld [vmem:[%s14884_s9 + $0x58] sm:$0xf]  ;;  %v11852_v18 = vcombine.low %v1144_v55, %v1154_v11 }
  0x90   : > { %v15154_v19 = vld [vmem:[#allocation2 + $0x70] sm:$0xf]  ;;  %v15156_v20 = vld [vmem:[#allocation2 + $0x74] sm:$0x1]  ;;  %v606_v21 = vsel %vm14909_vm10, %v598_v48, %v605_v7  ;;  %v828_v22 = vsel %vm14874_vm5, %v607_v8, %v827_v61  ;;  %v615_v23 = vrot.slane %v611_v1, 4  ;;  %v622_v31 = vor.u32 %v620_v2, %v619_v9 }
  0x91   : > { %v1158_v24 = vrot.slane %v1156_v12, 4  ;;  %v1161_v25 = vrot.slane %v1159_v15, 5  ;;  %v1165_v27 = vshll.u32 %v15154_v19, 16  ;;  %v1169_v28 = vshrl.u32 %v15154_v19, 16  ;;  %826 = vst [vmem:[#allocation2 + $0x7c] sm:$0xf] %v606_v21  ;;  %13043 = vmatprep.mubr.bf16.mxu0 %v11852_v18 }
  0x92   : > { %829 = vst [vmem:[#allocation2 + $0x80] sm:$0x1] %v828_v22  ;;  %v427_v29 = vld [vmem:[%s14884_s9 + $0x5c] sm:$0xf]  ;;  %v1175_v30 = vshll.u32 %v15156_v20, 16  ;;  %v624_v32 = vrot.slane %v619_v9, 4  ;;  %v623_v44 = vsel %vm14909_vm10, %v615_v23, %v622_v31 }
  0x93   : > { %v830_v13 = vld [vmem:[#allocation2 + $0x84] sm:$0xf]  ;;  %v626_v35 = vshrl.u32 %v426_v17, 16  ;;  %v1162_v36 = vor.u32 %v1161_v25, %v1158_v24  ;;  %v1167_v37 = vrot.slane %v1165_v27, 5  ;;  %v1171_v38 = vrot.slane %v1169_v28, 4 }
  0x94   : > { %v831_v40 = vsel %vm14921_vm11, %v614_v16, %v830_v13  ;;  %v834_v41 = vld [vmem:[#allocation2 + $0x8c] sm:$0x1]  ;;  %v1177_v42 = vrot.slane %v1175_v30, 5  ;;  %v15168_v43 = vld [vmem:[#allocation2 + $0x78] sm:$0xf]  ;;  %v629_v53 = vshll.u32 %v426_v17, 16 }
  0x95   : > { %832 = vst [vmem:[#allocation2 + $0x84] sm:$0xf] %v831_v40  ;;  %v835_v45 = vsel %vm14874_vm5, %v624_v32, %v834_v41  ;;  %v628_v47 = vrot.slane %v626_v35, 7  ;;  %v1163_v48 = vrot.slane %v1162_v36, 4  ;;  %v1172_v49 = vor.u32 %v1171_v38, %v1167_v37  ;;  %833 = vst [vmem:[#allocation2 + $0x88] sm:$0xf] %v623_v44 }
  0x96   : > { %v1180_v50 = vshrl.u32 %v15168_v43, 16  ;;  %v1183_v51 = vshll.u32 %v15168_v43, 16  ;;  %836 = vst [vmem:[#allocation2 + $0x8c] sm:$0x1] %v835_v45  ;;  %v342_v52 = vld [vmem:[#allocation2 + $0x9c] sm:$0x1] }
  0x97   : > { %v632_v54 = vrot.slane %v628_v47, 4  ;;  %v634_v55 = vshrl.u32 %v427_v29, 16  ;;  %v637_v56 = vshll.u32 %v427_v29, 16  ;;  %v837_v57 = vld [vmem:[#allocation2 + $0x90] sm:$0xf]  ;;  %v1168_v34 = vsel %vm14903_vm9, %v1163_v48, %v1167_v37 }
  0x98   : > { %v1173_v58 = vrot.slane %v1172_v49, 4  ;;  %v1182_v59 = vrot.slane %v1180_v50, 4  ;;  %v1185_v60 = vrot.slane %v1183_v51, 5  ;;  %v841_v62 = vld [vmem:[#allocation2 + $0x98] sm:$0x1]  ;;  %v631_v61 = vor.u32 %v629_v53, %v628_v47 }
  0x99   : > { %v15178_v63 = vld [vmem:[#allocation2 + $0x7c] sm:$0xf]  ;;  %v15180_v0 = vld [vmem:[#allocation2 + $0x80] sm:$0x1]  ;;  %v636_v1 = vrot.slane %v634_v55, 7  ;;  %v343_v2 = vsel %vm14874_vm5, 0, %v342_v52 }
  0x9a   : > { %v1178_v3 = vsel %vm14903_vm9, %v1173_v58, %v1177_v42  ;;  %v1186_v7 = vor.u32 %v1185_v60, %v1182_v59  ;;  %v1189_v8 = vshll.u32 %v15178_v63, 16  ;;  %v1193_v9 = vshrl.u32 %v15178_v63, 16  ;;  %344 = vst [vmem:[#allocation2 + $0x9c] sm:$0x1] %v343_v2  ;;  %v392_v10 = vld [vmem:[#allocation2 + $0xa4] sm:$0x1] }
  0x9b   : > { %v11853_v11 = vcombine.low %v1168_v34, %v1178_v3  ;;  %v1199_v12 = vshll.u32 %v15180_v0, 16  ;;  %v639_v15 = vor.u32 %v637_v56, %v636_v1  ;;  %v641_v16 = vrot.slane %v636_v1, 4  ;;  %v428_v17 = vld [vmem:[%s14884_s9 + $0x60] sm:$0xf]  ;;  %v429_v25 = vld [vmem:[%s14884_s9 + $0x64] sm:$0xf] }
  0x9c   : > { %v1187_v18 = vrot.slane %v1186_v7, 4  ;;  %v1191_v21 = vrot.slane %v1189_v8, 5  ;;  %v1195_v22 = vrot.slane %v1193_v9, 4  ;;  %v15190_v23 = vld [vmem:[#allocation2 + $0x84] sm:$0xf]  ;;  %v838_v24 = vsel %vm14921_vm11, %v631_v61, %v837_v57 }
  0x9d   : > { %13044 = vmatmul.mubr.bf16.gmra.mrb[16].mxu0 %v11853_v11  ;;  %v1201_v27 = vrot.slane %v1199_v12, 5  ;;  %v15195_v28 = vld [vmem:[#allocation2 + $0x88] sm:$0xf]  ;;  %v15197_v29 = vld [vmem:[#allocation2 + $0x8c] sm:$0x1]  ;;  %v1204_v30 = vshrl.u32 %v15190_v23, 16  ;;  %v640_v31 = vsel %vm14909_vm10, %v632_v54, %v639_v15  ;;  %v842_v32 = vsel %vm14874_vm5, %v641_v16, %v841_v62 }
  0x9e   : > { %839 = vst [vmem:[#allocation2 + $0x90] sm:$0xf] %v838_v24  ;;  %v1192_v13 = vsel %vm14903_vm9, %v1187_v18, %v1191_v21  ;;  %v1196_v35 = vor.u32 %v1195_v22, %v1191_v21  ;;  %v1207_v36 = vshll.u32 %v15190_v23, 16  ;;  %v1213_v37 = vshll.u32 %v15195_v28, 16  ;;  %840 = vst [vmem:[#allocation2 + $0x94] sm:$0xf] %v640_v31 }
  0x9f   : > { %843 = vst [vmem:[#allocation2 + $0x98] sm:$0x1] %v842_v32  ;;  %v345_v38 = vld [vmem:[#allocation2 + $0xa8] sm:$0x1]  ;;  %v1206_v40 = vrot.slane %v1204_v30, 4  ;;  %v1217_v41 = vshrl.u32 %v15195_v28, 16 }
  0xa0   : > { %v1223_v42 = vshll.u32 %v15197_v29, 16  ;;  %v393_v44 = vsel %vm14888_vm7, 0, %v392_v10  ;;  %v1197_v45 = vrot.slane %v1196_v35, 4  ;;  %v1209_v47 = vrot.slane %v1207_v36, 5  ;;  %v395_v54 = vld [vmem:[#allocation2 + $0xb0] sm:$0x1] }
  0xa1   : > { %v1215_v48 = vrot.slane %v1213_v37, 5  ;;  %394 = vst [vmem:[#allocation2 + $0xa4] sm:$0x1] %v393_v44  ;;  %v643_v49 = vshrl.u32 %v428_v17, 16  ;;  %v1219_v50 = vrot.slane %v1217_v41, 4  ;;  %v646_v52 = vshll.u32 %v428_v17, 16 }
  0xa2   : > { %v1225_v51 = vrot.slane %v1223_v42, 5  ;;  %v651_v53 = vshrl.u32 %v429_v25, 16  ;;  %v1202_v55 = vsel %vm14903_vm9, %v1197_v45, %v1201_v27  ;;  %v1210_v56 = vor.u32 %v1209_v47, %v1206_v40  ;;  %v844_v3 = vld [vmem:[#allocation2 + $0x9c] sm:$0xf]  ;;  %v430_v8 = vld [vmem:[%s14884_s9 + $0x68] sm:$0xf] }
  0xa3   : > { %v645_v57 = vrot.slane %v643_v49, 7  ;;  %v654_v34 = vshll.u32 %v429_v25, 16  ;;  %v11854_v58 = vcombine.low %v1192_v13, %v1202_v55  ;;  %v1220_v59 = vor.u32 %v1219_v50, %v1215_v48  ;;  %v431_v17 = vld [vmem:[%s14884_s9 + $0x6c] sm:$0xf]  ;;  %v348_v25 = vld [vmem:[#allocation2 + $0xb4] sm:$0x1] }
  0xa4   : > { %v653_v60 = vrot.slane %v651_v53, 7  ;;  %v346_v62 = vsel %vm14874_vm5, 0, %v345_v38  ;;  %v1211_v61 = vrot.slane %v1210_v56, 4  ;;  %v396_v7 = vsel %vm14888_vm7, 0, %v395_v54  ;;  %v398_v13 = vld [vmem:[#allocation2 + $0xbc] sm:$0x1] }
  0xa5   : > { %v15216_v1 = vld [vmem:[#allocation2 + $0x90] sm:$0xf]  ;;  %v649_v2 = vrot.slane %v645_v57, 4  ;;  %347 = vst [vmem:[#allocation2 + $0xa8] sm:$0x1] %v346_v62  ;;  %13047 = vmatprep.mubr.bf16.mxu0 %v11854_v58  ;;  %v1221_v9 = vrot.slane %v1220_v59, 4  ;;  %v648_v15 = vor.u32 %v646_v52, %v645_v57 }
  0xa6   : > { %v15221_v10 = vld [vmem:[#allocation2 + $0x94] sm:$0xf]  ;;  %v15223_v11 = vld [vmem:[#allocation2 + $0x98] sm:$0x1]  ;;  %v1228_v12 = vshrl.u32 %v15216_v1, 16  ;;  %v656_v16 = vor.u32 %v654_v34, %v653_v60  ;;  %v1216_v18 = vsel %vm14903_vm9, %v1211_v61, %v1215_v48  ;;  %v1231_v21 = vshll.u32 %v15216_v1, 16 }
  0xa7   : > { %397 = vst [vmem:[#allocation2 + $0xb0] sm:$0x1] %v396_v7  ;;  %v1237_v22 = vshll.u32 %v15221_v10, 16  ;;  %v1241_v24 = vshrl.u32 %v15221_v10, 16  ;;  %v1226_v27 = vsel %vm14903_vm9, %v1221_v9, %v1225_v51  ;;  %v1247_v31 = vshll.u32 %v15223_v11, 16 }
  0xa8   : > { %v1230_v30 = vrot.slane %v1228_v12, 4  ;;  %v657_v32 = vsel %vm14909_vm10, %v649_v2, %v656_v16  ;;  %v11855_v35 = vcombine.low %v1216_v18, %v1226_v27  ;;  %v1233_v36 = vrot.slane %v1231_v21, 5  ;;  %v848_v40 = vld [vmem:[#allocation2 + $0xa4] sm:$0x1]  ;;  %v432_v47 = vld [vmem:[%s14884_s9 + $0x70] sm:$0xf] }
  0xa9   : > { %v1239_v37 = vrot.slane %v1237_v22, 5  ;;  %v1243_v38 = vrot.slane %v1241_v24, 4  ;;  %847 = vst [vmem:[#allocation2 + $0xa0] sm:$0xf] %v657_v32  ;;  %v1249_v41 = vrot.slane %v1247_v31, 5  ;;  %v658_v42 = vrot.slane %v653_v60, 4 }
  0xaa   : > { %v845_v44 = vsel %vm14921_vm11, %v648_v15, %v844_v3  ;;  %v660_v45 = vshrl.u32 %v430_v8, 16  ;;  %13048 = vmatmul.mubr.bf16.gmra.mrb[20].mxu0 %v11855_v35  ;;  %v1234_v48 = vor.u32 %v1233_v36, %v1230_v30  ;;  %v663_v50 = vshll.u32 %v430_v8, 16  ;;  %v433_v56 = vld [vmem:[%s14884_s9 + $0x74] sm:$0xf] }
  0xab   : > { %v1244_v49 = vor.u32 %v1243_v38, %v1239_v37  ;;  %846 = vst [vmem:[#allocation2 + $0x9c] sm:$0xf] %v845_v44  ;;  %v668_v51 = vshrl.u32 %v431_v17, 16  ;;  %v849_v52 = vsel %vm14874_vm5, %v658_v42, %v848_v40  ;;  %v671_v54 = vshll.u32 %v431_v17, 16 }
  0xac   : > { %v662_v53 = vrot.slane %v660_v45, 7  ;;  %v349_v55 = vsel %vm14874_vm5, 0, %v348_v25  ;;  %v1235_v57 = vrot.slane %v1234_v48, 4  ;;  %850 = vst [vmem:[#allocation2 + $0xa4] sm:$0x1] %v849_v52  ;;  %v399_v60 = vsel %vm14888_vm7, 0, %v398_v13 }
  0xad   : > { %v1245_v34 = vrot.slane %v1244_v49, 4  ;;  %v670_v58 = vrot.slane %v668_v51, 7  ;;  %v851_v59 = vld [vmem:[#allocation2 + $0xa8] sm:$0xf]  ;;  %350 = vst [vmem:[#allocation2 + $0xb4] sm:$0x1] %v349_v55 }
  0xae   : > { %v665_v62 = vor.u32 %v663_v50, %v662_v53  ;;  %v666_v61 = vrot.slane %v662_v53, 4  ;;  %v855_v2 = vld [vmem:[#allocation2 + $0xb0] sm:$0x1]  ;;  %400 = vst [vmem:[#allocation2 + $0xbc] sm:$0x1] %v399_v60  ;;  %v677_v3 = vshrl.u32 %v432_v47, 16  ;;  %v1240_v8 = vsel %vm14903_vm9, %v1235_v57, %v1239_v37 }
  0xaf   : > { %v680_v7 = vshll.u32 %v432_v47, 16  ;;  %v1250_v9 = vsel %vm14903_vm9, %v1245_v34, %v1249_v41  ;;  %v673_v12 = vor.u32 %v671_v54, %v670_v58  ;;  %v675_v15 = vrot.slane %v670_v58, 4 }
  0xb0   : > { %v11856_v16 = vcombine.low %v1240_v8, %v1250_v9  ;;  %v15251_v17 = vld [vmem:[#allocation2 + $0xa0] sm:$0xf]  ;;  %v852_v18 = vsel %vm14921_vm11, %v665_v62, %v851_v59  ;;  %v679_v21 = vrot.slane %v677_v3, 7  ;;  %v685_v22 = vshrl.u32 %v433_v56, 16 }
  0xb1   : > { %v1261_v24 = vshll.u32 %v15251_v17, 16  ;;  %v1265_v25 = vshrl.u32 %v15251_v17, 16  ;;  %v674_v27 = vsel %vm14909_vm10, %v666_v61, %v673_v12  ;;  %853 = vst [vmem:[#allocation2 + $0xa8] sm:$0xf] %v852_v18  ;;  %v856_v30 = vsel %vm14874_vm5, %v675_v15, %v855_v2 }
  0xb2   : > { %13051 = vmatprep.mubr.bf16.mxu0 %v11856_v16  ;;  %v15261_v31 = vld [vmem:[#allocation2 + $0x9c] sm:$0xf]  ;;  %854 = vst [vmem:[#allocation2 + $0xac] sm:$0xf] %v674_v27  ;;  %857 = vst [vmem:[#allocation2 + $0xb0] sm:$0x1] %v856_v30  ;;  %v682_v32 = vor.u32 %v680_v7, %v679_v21  ;;  %v11877_v59 = vcombine.low %v15145_v6, %v15154_v19  ;;  %v11878_v60 = vcombine.low %v15168_v43, %v15178_v63 }
  0xb3   : > { %v683_v13 = vrot.slane %v679_v21, 4  ;;  %v687_v35 = vrot.slane %v685_v22, 7  ;;  %v688_v36 = vshll.u32 %v433_v56, 16  ;;  %v1252_v37 = vshrl.u32 %v15261_v31, 16  ;;  %v15265_v42 = vld [vmem:[#allocation2 + $0xa4] sm:$0x1] }
  0xb4   : > { %v1255_v38 = vshll.u32 %v15261_v31, 16  ;;  %v1263_v40 = vrot.slane %v1261_v24, 5  ;;  %v1267_v41 = vrot.slane %v1265_v25, 4  ;;  %v858_v47 = vld [vmem:[#allocation2 + $0xb4] sm:$0xf]  ;;  %v1271_v51 = vshll.u32 %v15265_v42, 16 }
  0xb5   : > { %v690_v44 = vor.u32 %v688_v36, %v687_v35  ;;  %v692_v45 = vrot.slane %v687_v35, 4  ;;  %v1254_v48 = vrot.slane %v1252_v37, 4  ;;  %v862_v52 = vld [vmem:[#allocation2 + $0xbc] sm:$0x1]  ;;  %v859_v54 = vsel %vm14921_vm11, %v682_v32, %v858_v47 }
  0xb6   : > { %v1257_v49 = vrot.slane %v1255_v38, 5  ;;  %v1268_v50 = vor.u32 %v1267_v41, %v1263_v40  ;;  %v1273_v34 = vrot.slane %v1271_v51, 5  ;;  %860 = vst [vmem:[#allocation2 + $0xb4] sm:$0xf] %v859_v54  ;;  %v11879_v62 = vcombine.low %v15190_v23, %v15195_v28 }
  0xb7   : > { %v691_v53 = vsel %vm14909_vm10, %v683_v13, %v690_v44  ;;  %v863_v55 = vsel %vm14874_vm5, %v692_v45, %v862_v52  ;;  %v11880_v61 = vcombine.low %v15216_v1, %v15221_v10  ;;  %v11881_v12 = vcombine.low %v15261_v31, %v15251_v17  ;;  %v1919_v1 = vld [vmem:[#allocation2 + $0xc] sm:$0xe] }
  0xb8   : > { %v1258_v56 = vor.u32 %v1257_v49, %v1254_v48  ;;  %v1269_v57 = vrot.slane %v1268_v50, 4  ;;  %861 = vst [vmem:[#allocation2 + $0xb8] sm:$0xf] %v691_v53  ;;  %864 = vst [vmem:[#allocation2 + $0xbc] sm:$0x1] %v863_v55  ;;  %vm1966_vm12 = vcmask 1042432  }
  0xb9   : > { %v15274_v58 = vld [vmem:[#allocation2 + $0xa8] sm:$0xf]  ;;  %v15286_v7 = vld [vmem:[#allocation2 + $0xac] sm:$0xf]  ;;  %v15288_v8 = vld [vmem:[#allocation2 + $0xb0] sm:$0x1] }
  0xba   : > { %v1259_v2 = vrot.slane %v1258_v56, 4  ;;  %v1274_v3 = vsel %vm14903_vm9, %v1269_v57, %v1273_v34  ;;  %v1276_v9 = vshrl.u32 %v15274_v58, 16  ;;  %v1279_v15 = vshll.u32 %v15274_v58, 16 }
  0xbb   : > { %v1285_v16 = vshll.u32 %v15286_v7, 16  ;;  %v1289_v18 = vshrl.u32 %v15286_v7, 16  ;;  %v1295_v21 = vshll.u32 %v15288_v8, 16  ;;  %v11882_v25 = vcombine.low %v15274_v58, %v15286_v7 }
  0xbc   : > { %v1264_v22 = vsel %vm14903_vm9, %v1259_v2, %v1263_v40  ;;  %v1278_v24 = vrot.slane %v1276_v9, 4  ;;  %v1281_v30 = vrot.slane %v1279_v15, 5  ;;  %vm1967_vm13 = vcmask 1046532  }
  0xbd   : > { %v11857_v27 = vcombine.low %v1264_v22, %v1274_v3  ;;  %v1287_v32 = vrot.slane %v1285_v16, 5  ;;  %v1291_v13 = vrot.slane %v1289_v18, 4  ;;  %v1297_v35 = vrot.slane %v1295_v21, 5  ;;  %v15301_v38 = vld [vmem:[#allocation2 + $0xb4] sm:$0xf]  ;;  %vm15336_vm14 = vmor %vm1966_vm12, %vm1967_vm13 }
  0xbe   : > { %v1282_v36 = vor.u32 %v1281_v30, %v1278_v24  ;;  %v1300_v40 = vshrl.u32 %v15301_v38, 16  ;;  %v1303_v45 = vshll.u32 %v15301_v38, 16  ;;  %v14650_v24 = vld [vmem:[#allocation2] sm:$0xf]  ;;  %v11893_v31 = vrot.slane %v1919_v1, 9 }
  0xbf   : > { %13052 = vmatmul.mubr.bf16.gmra.mrb[24].mxu0 %v11857_v27  ;;  %v1292_v37 = vor.u32 %v1291_v13, %v1287_v32  ;;  %v15303_v41 = vld [vmem:[#allocation2 + $0xb8] sm:$0xf]  ;;  %v15305_v44 = vld [vmem:[#allocation2 + $0xbc] sm:$0x1]  ;;  %v15322_v27 = vld [vmem:[#allocation2 + $0x4] sm:$0xf] }
  0xc0   : > { %v1309_v47 = vshll.u32 %v15303_v41, 16  ;;  %v1313_v48 = vshrl.u32 %v15303_v41, 16  ;;  %v1283_v49 = vrot.slane %v1282_v36, 4  ;;  %v1319_v51 = vshll.u32 %v15305_v44, 16  ;;  %v14652_v13 = vld [vmem:[#allocation2 + $0xc] sm:$0xf] }
  0xc1   : > { %v1293_v50 = vrot.slane %v1292_v37, 4  ;;  %v11883_v52 = vcombine.low %v15301_v38, %v15303_v41  ;;  %v1302_v53 = vrot.slane %v1300_v40, 4  ;;  %v1305_v54 = vrot.slane %v1303_v45, 5  ;;  %v14431_v37 = vld [vmem:[%s18352_s1 + $0x88] sm:$0xff]   ;;  %v14654_v40 = vld [vmem:[#allocation2 + $0x18] sm:$0xf] }
  0xc2   : > { %v1311_v55 = vrot.slane %v1309_v47, 5  ;;  %v1315_v56 = vrot.slane %v1313_v48, 4  ;;  %v1288_v57 = vsel %vm14903_vm9, %v1283_v49, %v1287_v32  ;;  %v1321_v15 = vrot.slane %v1319_v51, 5  ;;  %v15331_v45 = vld [vmem:[#allocation2 + $0x1c] sm:$0xf] }
  0xc3   : > { %v1298_v34 = vsel %vm14903_vm9, %v1293_v50, %v1297_v35  ;;  %v1306_v3 = vor.u32 %v1305_v54, %v1302_v53  ;;  %v11868_v30 = vcombine.low %v14650_v24, %v15322_v27  ;;  %v15325_v35 = vld [vmem:[#allocation2 + $0x10] sm:$0xf]  ;;  %v11870_v47 = vcombine.low %v14654_v40, %v15331_v45  ;;  %v1927_v48 = vld [vmem:[#allocation2 + $0x6c] sm:$0xe]  ;;  %v1928_v49 = vld [vmem:[#allocation2 + $0x78] sm:$0xe] }
  0xc4   : > { %v11858_v2 = vcombine.low %v1288_v57, %v1298_v34  ;;  %v1316_v9 = vor.u32 %v1315_v56, %v1311_v55  ;;  %v11869_v36 = vcombine.low %v14652_v13, %v15325_v35  ;;  %v11901_v50 = vrot.slane %v1927_v48, 9  ;;  %v1929_v53 = vld [vmem:[#allocation2 + $0x84] sm:$0xe]  ;;  %v1930_v34 = vld [vmem:[#allocation2 + $0x90] sm:$0xe] }
  0xc5   : > { %v1307_v16 = vrot.slane %v1306_v3, 4  ;;  %v2034_v51 = vrot.slane %v15154_v19, 5  ;;  %v11902_v56 = vrot.slane %v1928_v49, 9  ;;  %v2041_v57 = vrot.slane %v15178_v63, 5  ;;  %v14657_v3 = vld [vmem:[#allocation2 + $0x24] sm:$0xf] }
  0xc6   : > { %13055 = vmatprep.mubr.bf16.mxu0 %v11858_v2  ;;  %v1317_v18 = vrot.slane %v1316_v9, 4  ;;  %v15342_v2 = vld [vmem:[#allocation2 + $0x28] sm:$0xf]  ;;  %v2048_v48 = vrot.slane %v15195_v28, 5  ;;  %v2051_v49 = vrot.slane %v15197_v29, 5 }
  0xc7   : > { %v1312_v21 = vsel %vm14903_vm9, %v1307_v16, %v1311_v55  ;;  %v2037_v55 = vrot.slane %v15156_v20, 5  ;;  %v11871_v9 = vcombine.low %v14657_v3, %v15342_v2  ;;  %v2036_v16 = vrot.slane %v2034_v51, 4  ;;  %v1931_v20 = vld [vmem:[#allocation2 + $0x9c] sm:$0xe]  ;;  %v1932_v13 = vld [vmem:[#allocation2 + $0xa8] sm:$0xe] }
  0xc8   : > { %v1322_v22 = vsel %vm14903_vm9, %v1317_v18, %v1321_v15  ;;  %v15350_v15 = vsel %vm15336_vm14, %v11901_v50, %v2034_v51  ;;  %v15352_v18 = vld [vmem:[#allocation2 + $0x34] sm:$0xf]  ;;  %v15357_v24 = vsel %vm15336_vm14, %v11902_v56, %v2041_v57  ;;  %v11904_v51 = vrot.slane %v1930_v34, 9 }
  0xc9   : > { %v11859_v32 = vcombine.low %v1312_v21, %v1322_v22  ;;  %v14659_v21 = vld [vmem:[#allocation2 + $0x30] sm:$0xf]  ;;  %v15365_v40 = vsel %vm15336_vm14, %v2036_v16, %v2037_v55  ;;  %v2055_v56 = vrot.slane %v15221_v10, 5  ;;  %v2050_v29 = vrot.slane %v2048_v48, 4  ;;  %v1920_v10 = vld [vmem:[#allocation2 + $0x18] sm:$0xe] }
  0xca   : > { %v11872_v22 = vcombine.low %v14659_v21, %v15352_v18  ;;  %v11933_v50 = vcombine.low %v15350_v15, %v15365_v40  ;;  %v11905_v16 = vrot.slane %v1931_v20, 9  ;;  %v2062_v34 = vrot.slane %v15251_v17, 5  ;;  %v2790_v15 = vld [vmem:[#allocation2 + $0x10] sm:$0xf]  ;;  %v2792_v40 = vld [vmem:[#allocation2 + $0x18] sm:$0xf] }
  0xcb   : > { %13056 = vmatmul.mubr.bf16.gmra.mrb[28].mxu0 %v11859_v32  ;;  %v2044_v32 = vrot.slane %v15180_v0, 5  ;;  %v2057_v3 = vrot.slane %v2055_v56, 4  ;;  %v15390_v21 = vsel %vm15336_vm14, %v2050_v29, %v2051_v49  ;;  %v1999_v38 = vrot.slane %v15352_v18, 5 }
  0xcc   : > { %13075 = vmatprep.mubr.bf16.mxu0 %v11868_v30  ;;  %v2043_v30 = vrot.slane %v2041_v57, 4  ;;  %v15385_v57 = vsel %vm15336_vm14, %v11904_v51, %v2055_v56  ;;  %v2072_v51 = vrot.slane %v15288_v8, 5 }
  0xce   : > { %v15373_v0 = vsel %vm15336_vm14, %v2043_v30, %v2044_v32  ;;  %v2065_v30 = vrot.slane %v15265_v42, 5  ;;  %v11906_v32 = vrot.slane %v1932_v13, 9  ;;  %v15405_v42 = vsel %vm15336_vm14, %v11905_v16, %v2062_v34  ;;  %v14660_v16 = vld [vmem:[#allocation2 + $0x3c] sm:$0xf] }
  0xcf   : > { %v11934_v55 = vcombine.low %v15357_v24, %v15373_v0  ;;  %v2064_v13 = vrot.slane %v2062_v34, 4  ;;  %v15420_v34 = vld [vmem:[#allocation2 + $0x40] sm:$0xf]  ;;  %v14458_v0 = vld [vmem:[#allocation2 + $0xc] sm:$0xff]  }
  0xd1   : > { %v15416_v56 = vsel %vm15336_vm14, %v2064_v13, %v2065_v30  ;;  %v15429_v30 = vld [vmem:[#allocation2 + $0x4c] sm:$0xf] }
  0xd3   : > { %13076 = vmatmul.mubr.bf16.vlgmr.msra.gmra.mrb[0].mxu0 %v11869_v36  ;;  %v14437_v36 = vld [vmem:[%s18352_s1 + $0x98] sm:$0xff]  }
  0xd4   : > { %13108 = vmatpush3.bf16.msra.mxu0 %v15088_v5  ;;  %13079 = vmatprep.mubr.bf16.mxu0 %v11870_v47  ;;  %v14434_v5 = vld [vmem:[%s18352_s1 + $0x90] sm:$0xff]   ;;  %v11903_v47 = vrot.slane %v1929_v53, 9 }
  0xd5   : > { %13109 = vmatprep.subr.bf16.mxu0 %v14431_v37 }
  0xd6   : > { %v15380_v53 = vsel %vm15336_vm14, %v11903_v47, %v2048_v48  ;;  %v2069_v47 = vrot.slane %v15286_v7, 5  ;;  %v1933_v48 = vld [vmem:[#allocation2 + $0xb4] sm:$0xe]  ;;  %v1921_v7 = vld [vmem:[#allocation2 + $0x24] sm:$0xe] }
  0xd7   : > { %v11935_v20 = vcombine.low %v15380_v53, %v15390_v21  ;;  %v11907_v29 = vrot.slane %v1933_v48, 9  ;;  %v2851_v21 = vshrl.u32 %v2790_v15, 16 }
  0xd8   : > { %13110 = vmatpush3.bf16.msra.mxu0 %v14431_v37  ;;  %v2058_v37 = vrot.slane %v15223_v11, 5  ;;  %v14440_v11 = vld [vmem:[%s18352_s1 + $0xa0] sm:$0xff]   ;;  %v2071_v49 = vrot.slane %v2069_v47, 4 }
  0xd9   : > { %13111 = vmatprep.subr.bf16.mxu0 %v14434_v5 }
  0xda   : > { %v15427_v8 = vsel %vm15336_vm14, %v2071_v49, %v2072_v51  ;;  %v14446_v51 = vld [vmem:[%s18352_s1 + $0xb0] sm:$0xff]  }
  0xdb   : > { %13080 = vmatmul.mubr.bf16.gmra.mrb[4].mxu0 %v11871_v9  ;;  %v15401_v9 = vsel %vm15336_vm14, %v2057_v3, %v2058_v37  ;;  %v2076_v37 = vrot.slane %v15303_v41, 5  ;;  %v2079_v3 = vrot.slane %v15305_v44, 5  ;;  %v14443_v44 = vld [vmem:[%s18352_s1 + $0xa8] sm:$0xff]  }
  0xdc   : > { %13083 = vmatprep.mubr.bf16.mxu0 %v11872_v22  ;;  %13112 = vmatpush3.bf16.msra.mxu0 %v14434_v5  ;;  %v15411_v22 = vsel %vm15336_vm14, %v11906_v32, %v2069_v47  ;;  %v11873_v5 = vcombine.low %v14660_v16, %v15420_v34  ;;  %v14662_v47 = vld [vmem:[#allocation2 + $0x48] sm:$0xf] }
  0xdd   : > { %13113 = vmatprep.subr.bf16.mxu0 %v14437_v36  ;;  %v11874_v48 = vcombine.low %v14662_v47, %v15429_v30  ;;  %v11938_v13 = vcombine.low %v15411_v22, %v15427_v8  ;;  %v15439_v16 = vsel %vm15336_vm14, %v11907_v29, %v2076_v37  ;;  %v2078_v32 = vrot.slane %v2076_v37, 4  ;;  %v14664_v47 = vld [vmem:[#allocation2 + $0x54] sm:$0xf]  ;;  %v15450_v29 = vld [vmem:[#allocation2 + $0x58] sm:$0xf] }
  0xde   : > { %v11875_v37 = vcombine.low %v14664_v47, %v15450_v29  ;;  %v435_v47 = vld [vmem:[%s14884_s9 + $0x7c] sm:$0xf] }
  0xdf   : > { %v15443_v49 = vsel %vm15336_vm14, %v2078_v32, %v2079_v3  ;;  %v14449_v3 = vld [vmem:[%s18352_s1 + $0xb8] sm:$0xff]   ;;  %v702_v19 = vshrl.u32 %v435_v47, 16 }
  0xe0   : > { %13114 = vmatpush3.bf16.msra.mxu0 %v14437_v36  ;;  %v11939_v36 = vcombine.low %v15439_v16, %v15443_v49  ;;  %v14463_v49 = vld [vmem:[%s18352_s1 + $0x108] sm:$0xff]  }
  0xe1   : > { %13115 = vmatprep.subr.bf16.mxu0 %v14440_v11 }
  0xe3   : > { %13084 = vmatmul.mubr.bf16.gmra.mrb[8].mxu0 %v11873_v5  ;;  %v14666_v5 = vld [vmem:[#allocation2 + $0x60] sm:$0xf] }
  0xe4   : > { %13087 = vmatprep.mubr.bf16.mxu0 %v11874_v48  ;;  %13116 = vmatpush3.bf16.msra.mxu0 %v14440_v11  ;;  %v11876_v32 = vcombine.low %v14666_v5, %v15123_v26  ;;  %v15460_v11 = vld [vmem:[%s18352_s1 + $0xc0] sm:$0xff]   ;;  %v15480_v5 = vrot.slane %v702_v19, 7 }
  0xe5   : > { %13117 = vmatprep.subr.bf16.mxu0 %v14443_v44  ;;  %v1918_v26 = vld [vmem:[#allocation2] sm:$0xe]  ;;  %v351_v48 = vld [vmem:[#allocation2 + $0xc0] sm:$0x1] }
  0xe6   : > { %v11892_v43 = vrot.slane %v1918_v26, 9  ;;  %v1985_v26 = vrot.slane %v15331_v45, 5  ;;  %v709_v24 = vrot.slane %v15480_v5, 4 }
  0xe8   : > { %13118 = vmatpush3.bf16.msra.mxu0 %v14443_v44  ;;  %v352_v44 = vsel %vm14874_vm5, 0, %v351_v48 }
  0xe9   : > { %13119 = vmatprep.subr.bf16.mxu0 %v14446_v51  ;;  %353 = vst [vmem:[#allocation2 + $0xc0] sm:$0x1] %v352_v44 }
  0xeb   : > { %13088 = vmatmul.mubr.bf16.gmra.mrb[12].mxu0 %v11875_v37  ;;  %v1971_v37 = vrot.slane %v15322_v27, 5 }
  0xec   : > { %13091 = vmatprep.mubr.bf16.mxu0 %v11876_v32  ;;  %13120 = vmatpush3.bf16.msra.mxu0 %v14446_v51  ;;  %v434_v51 = vld [vmem:[%s14884_s9 + $0x78] sm:$0xf]  ;;  %v705_v32 = vshll.u32 %v435_v47, 16 }
  0xed   : > { %13121 = vmatprep.subr.bf16.mxu0 %v14449_v3  ;;  %v694_v6 = vshrl.u32 %v434_v51, 16  ;;  %v1973_v48 = vrot.slane %v1971_v37, 4 }
  0xee   : > { %v707_v28 = vor.u32 %v705_v32, %v15480_v5  ;;  %v14669_v32 = vld [vmem:[#allocation2 + $0x20] sm:$0x1] }
  0xef   : > { %v696_v63 = vrot.slane %v694_v6, 7  ;;  %v14668_v6 = vld [vmem:[#allocation2 + $0x14] sm:$0x1]  ;;  %v1988_v58 = vrot.slane %v14669_v32, 5 }
  0xf0   : > { %13122 = vmatpush3.bf16.msra.mxu0 %v14449_v3  ;;  %v1981_v19 = vrot.slane %v14668_v6, 5  ;;  %v2013_v6 = vrot.slane %v15429_v30, 5 }
  0xf1   : > { %13155 = vmatprep.subr.bf16.mxu0 %v15460_v11  ;;  %v700_v23 = vrot.slane %v696_v63, 4 }
  0xf3   : > { %13092 = vmatmul.mubr.bf16.gmra.mrb[16].mxu0 %v11877_v59  ;;  %v14667_v59 = vld [vmem:[#allocation2 + $0x8] sm:$0x1]  ;;  %v708_v27 = vsel %vm14909_vm10, %v700_v23, %v707_v28  ;;  %v14670_v23 = vld [vmem:[#allocation2 + $0x2c] sm:$0x1] }
  0xf4   : > { %13095 = vmatprep.mubr.bf16.mxu0 %v11878_v60  ;;  %v1974_v3 = vrot.slane %v14667_v59, 5  ;;  %v697_v60 = vshll.u32 %v434_v51, 16  ;;  %868 = vst [vmem:[#allocation2 + $0xc4] sm:$0xf] %v708_v27  ;;  %v1972_v51 = vsel %vm15336_vm14, %v11892_v43, %v1971_v37  ;;  %v1992_v37 = vrot.slane %v15342_v2, 5 }
  0xf5   : > { %v1995_v28 = vrot.slane %v14670_v23, 5  ;;  %v2001_v2 = vrot.slane %v1999_v38, 4 }
  0xf6   : > { %v699_v44 = vor.u32 %v697_v60, %v696_v63  ;;  %v1975_v47 = vsel %vm15336_vm14, %v1973_v48, %v1974_v3  ;;  %v11894_v63 = vrot.slane %v1920_v10, 9  ;;  %v1987_v60 = vrot.slane %v1985_v26, 4 }
  0xf7   : > { %v11924_v17 = vcombine.low %v1972_v51, %v1975_v47  ;;  %v1923_v47 = vld [vmem:[#allocation2 + $0x3c] sm:$0xe] }
  0xf8   : > { %v1986_v3 = vsel %vm15336_vm14, %v11894_v63, %v1985_v26  ;;  %v1989_v43 = vsel %vm15336_vm14, %v1987_v60, %v1988_v58  ;;  %v14672_v63 = vld [vmem:[#allocation2 + $0x44] sm:$0x1]  ;;  %v2015_v58 = vrot.slane %v2013_v6, 4 }
  0xf9   : > { %v11926_v48 = vcombine.low %v1986_v3, %v1989_v43  ;;  %v2009_v60 = vrot.slane %v14672_v63, 5  ;;  %v2020_v3 = vrot.slane %v15450_v29, 5  ;;  %v401_v63 = vld [vmem:[#allocation2 + $0xc8] sm:$0x1] }
  0xfb   : > { %13096 = vmatmul.mubr.bf16.gmra.mrb[20].mxu0 %v11879_v62  ;;  %v865_v62 = vld [vmem:[#allocation2 + $0xc0] sm:$0xf] }
  0xfc   : > { %13099 = vmatprep.mubr.bf16.mxu0 %v11880_v61  ;;  %v866_v59 = vsel %vm14921_vm11, %v699_v44, %v865_v62  ;;  %v1978_v61 = vrot.slane %v15325_v35, 5  ;;  %v1994_v44 = vrot.slane %v1992_v37, 4  ;;  %v14451_v62 = vld [vmem:[%s18352_s1 + $0xc8] sm:$0xff]  }
  0xfd   : > { %867 = vst [vmem:[#allocation2 + $0xc0] sm:$0xf] %v866_v59  ;;  %v14671_v59 = vld [vmem:[#allocation2 + $0x38] sm:$0x1] }
  0xfe   : > { %v1979_v35 = vsel %vm15336_vm14, %v11893_v31, %v1978_v61  ;;  %v2002_v1 = vrot.slane %v14671_v59, 5  ;;  %v1996_v10 = vsel %vm15336_vm14, %v1994_v44, %v1995_v28  ;;  %v1926_v44 = vld [vmem:[#allocation2 + $0x60] sm:$0xe] }
  0xff   : > { %v11900_v59 = vrot.slane %v1926_v44, 9 }
 0x100   : > { %v2003_v51 = vsel %vm15336_vm14, %v2001_v2, %v2002_v1  ;;  %v14675_v2 = vld [vmem:[#allocation2 + $0x5c] sm:$0x1] }
 0x101   : > { %v2023_v29 = vrot.slane %v14675_v2, 5 }
 0x103   : > { %13100 = vmatmul.mubr.bf16.gmra.mrb[24].mxu0 %v11881_v12  ;;  %v1980_v12 = vrot.slane %v1978_v61, 4  ;;  %v2006_v61 = vrot.slane %v15420_v34, 5 }
 0x104   : > { %13103 = vmatprep.mubr.bf16.mxu0 %v11882_v25  ;;  %v1922_v25 = vld [vmem:[#allocation2 + $0x30] sm:$0xe] }
 0x105   : > { %v1982_v45 = vsel %vm15336_vm14, %v1980_v12, %v1981_v19  ;;  %v11896_v27 = vrot.slane %v1922_v25, 9  ;;  %v1924_v19 = vld [vmem:[#allocation2 + $0x48] sm:$0xe]  ;;  %v11897_v12 = vrot.slane %v1923_v47, 9  ;;  %v2008_v34 = vrot.slane %v2006_v61, 4 }
 0x106   : > { %v11925_v41 = vcombine.low %v1979_v35, %v1982_v45  ;;  %v11898_v32 = vrot.slane %v1924_v19, 9  ;;  %v14453_v35 = vld [vmem:[%s18352_s1 + $0xd8] sm:$0xff]  }
 0x107   : > { %v2000_v26 = vsel %vm15336_vm14, %v11896_v27, %v1999_v38  ;;  %v2007_v30 = vsel %vm15336_vm14, %v11897_v12, %v2006_v61  ;;  %v2010_v45 = vsel %vm15336_vm14, %v2008_v34, %v2009_v60  ;;  %v2022_v27 = vrot.slane %v2020_v3, 4  ;;  %v14455_v61 = vld [vmem:[%s18352_s1 + $0xe8] sm:$0xff]   ;;  %v14460_v12 = vld [vmem:[%s18352_s1 + $0x100] sm:$0xff]  }
 0x108   : > { %v11928_v31 = vcombine.low %v2000_v26, %v2003_v51  ;;  %v2014_v43 = vsel %vm15336_vm14, %v11898_v32, %v2013_v6  ;;  %v11929_v23 = vcombine.low %v2007_v30, %v2010_v45  ;;  %v14456_v6 = vld [vmem:[%s18352_s1 + $0xf0] sm:$0xff]   ;;  %v18485_v34 = vcombine.low %v15385_v57, %v15401_v9  ;;  %v2789_v32 = vld [vmem:[#allocation2 + $0xc] sm:$0xf]  ;;  %v14459_v30 = vld [vmem:[#allocation2 + $0x18] sm:$0xff]  }
 0x109   : > { %v2024_v51 = vsel %vm15336_vm14, %v2022_v27, %v2023_v29  ;;  %v18486_v60 = vcombine.low %v15405_v42, %v15416_v56  ;;  %v2841_v53 = vshll.u32 %v2789_v32, 16  ;;  %v2847_v57 = vshll.u32 %v2790_v15, 16  ;;  %v2791_v9 = vld [vmem:[#allocation2 + $0x14] sm:$0x1] }
 0x10a   : > { %v2862_v42 = vshrl.u32 %v2792_v40, 16  ;;  %v2865_v56 = vshll.u32 %v2792_v40, 16  ;;  %v2857_v45 = vshll.u32 %v2791_v9, 16  ;;  %v14466_v29 = vld [vmem:[%s18352_s1 + $0x110] sm:$0xff]   ;;  %v15622_v40 = vld [vmem:[#allocation2 + $0x4c] sm:$0xf] }
 0x10b   : > { %13104 = vmatmul.mubr.bf16.gmra.mrb[28].mxu0 %v11883_v52  ;;  %v11895_v52 = vrot.slane %v1921_v7, 9  ;;  %v14673_v7 = vld [vmem:[#allocation2 + $0x50] sm:$0x1]  ;;  %v2843_v5 = vrot.slane %v2841_v53, 5  ;;  %v3548_v53 = vld [vmem:[#allocation2 + $0x48] sm:$0xe] }
 0x10c   : > { %13123 = vmatprep.mubr.bf16.mxu0 %v11924_v17  ;;  %v2016_v25 = vrot.slane %v14673_v7, 5  ;;  %v15588_v7 = vrot.slane %v2847_v57, 5  ;;  %v3644_v57 = vrot.slane %v15622_v40, 5 }
 0x10d   : > { %v1993_v18 = vsel %vm15336_vm14, %v11895_v52, %v1992_v37  ;;  %v1925_v37 = vld [vmem:[#allocation2 + $0x54] sm:$0xe] }
 0x10e   : > { %v11927_v17 = vcombine.low %v1993_v18, %v1996_v10  ;;  %v2017_v38 = vsel %vm15336_vm14, %v2015_v58, %v2016_v25  ;;  %v14676_v18 = vld [vmem:[#allocation2 + $0x68] sm:$0x1]  ;;  %v2794_v58 = vld [vmem:[#allocation2 + $0x20] sm:$0x1]  ;;  %v2853_v25 = vrot.slane %v2851_v21, 4 }
 0x10f   : > { %v11930_v28 = vcombine.low %v2014_v43, %v2017_v38  ;;  %v2030_v10 = vrot.slane %v14676_v18, 5  ;;  %v2881_v43 = vshll.u32 %v2794_v58, 16 }
 0x113   : > { %13124 = vmatmul.mubr.bf16.vlgmr.msra.gmra.mrb[0].mxu0 %v11925_v41  ;;  %v14674_v41 = vld [vmem:[#allocation2 + $0x64] sm:$0xf] }
 0x114   : > { %13156 = vmatpush3.bf16.msra.mxu0 %v15460_v11  ;;  %13127 = vmatprep.mubr.bf16.mxu0 %v11926_v48  ;;  %v14452_v11 = vld [vmem:[%s18352_s1 + $0xd0] sm:$0xff]   ;;  %v2027_v52 = vrot.slane %v14674_v41, 5  ;;  %v14454_v48 = vld [vmem:[%s18352_s1 + $0xe0] sm:$0xff]  }
 0x115   : > { %13157 = vmatprep.subr.bf16.mxu0 %v14451_v62  ;;  %v14461_v41 = vld [vmem:[#allocation2 + $0x24] sm:$0xff]  }
 0x116   : > { %v2029_v1 = vrot.slane %v2027_v52, 4  ;;  %v2028_v47 = vsel %vm15336_vm14, %v11900_v59, %v2027_v52  ;;  %v15602_v59 = vrot.slane %v2857_v45, 5 }
 0x118   : > { %13158 = vmatpush3.bf16.msra.mxu0 %v14451_v62  ;;  %v11899_v62 = vrot.slane %v1925_v37, 9  ;;  %v2864_v37 = vrot.slane %v2862_v42, 4  ;;  %v12033_v42 = vrot.slane %v3548_v53, 9 }
 0x119   : > { %13159 = vmatprep.subr.bf16.mxu0 %v14452_v11 }
 0x11a   : > { %v2021_v26 = vsel %vm15336_vm14, %v11899_v62, %v2020_v3  ;;  %v2867_v3 = vrot.slane %v2865_v56, 5  ;;  %v2854_v62 = vor.u32 %v2853_v25, %v15588_v7  ;;  %v14467_v56 = vld [vmem:[#allocation2 + $0x54] sm:$0xff]  }
 0x11b   : > { %13128 = vmatmul.mubr.bf16.gmra.mrb[4].mxu0 %v11927_v17  ;;  %v11931_v19 = vcombine.low %v2021_v26, %v2024_v51  ;;  %v14464_v51 = vld [vmem:[#allocation2 + $0x3c] sm:$0xff]  }
 0x11c   : > { %13131 = vmatprep.mubr.bf16.mxu0 %v11928_v31  ;;  %13160 = vmatpush3.bf16.msra.mxu0 %v14452_v11  ;;  %v2031_v11 = vsel %vm15336_vm14, %v2029_v1, %v2030_v10  ;;  %v14457_v31 = vld [vmem:[%s18352_s1 + $0xf8] sm:$0xff]   ;;  %v2868_v27 = vor.u32 %v2867_v3, %v2864_v37  ;;  %v14462_v1 = vld [vmem:[#allocation2 + $0x30] sm:$0xff]   ;;  %v15606_v10 = vrot.slane %v2854_v62, 4  ;;  %v15648_v3 = vld [vmem:[#allocation2 + $0x64] sm:$0xf] }
 0x11d   : > { %13161 = vmatprep.subr.bf16.mxu0 %v14453_v35  ;;  %v11932_v17 = vcombine.low %v2028_v47, %v2031_v11  ;;  %v15660_v62 = vld [vmem:[#allocation2 + $0x38] sm:$0x1] }
 0x11e   : > { %v15610_v47 = vrot.slane %v2868_v27, 4 }
 0x120   : > { %13162 = vmatpush3.bf16.msra.mxu0 %v14453_v35  ;;  %v2795_v35 = vld [vmem:[#allocation2 + $0x24] sm:$0xf] }
 0x121   : > { %13163 = vmatprep.subr.bf16.mxu0 %v14454_v48  ;;  %v2889_v44 = vshll.u32 %v2795_v35, 16 }
 0x123   : > { %13132 = vmatmul.mubr.bf16.gmra.mrb[8].mxu0 %v11929_v23  ;;  %v2796_v23 = vld [vmem:[#allocation2 + $0x28] sm:$0xf] }
 0x124   : > { %13135 = vmatprep.mubr.bf16.mxu0 %v11930_v28  ;;  %13164 = vmatpush3.bf16.msra.mxu0 %v14454_v48  ;;  %v2895_v26 = vshll.u32 %v2796_v23, 16 }
 0x125   : > { %13165 = vmatprep.subr.bf16.mxu0 %v14455_v61 }
 0x128   : > { %13166 = vmatpush3.bf16.msra.mxu0 %v14455_v61  ;;  %v15608_v61 = vrot.slane %v2881_v43, 5  ;;  %v15650_v43 = vld [vmem:[#allocation2 + $0x68] sm:$0x1] }
 0x129   : > { %13167 = vmatprep.subr.bf16.mxu0 %v14456_v6 }
 0x12b   : > { %13136 = vmatmul.mubr.bf16.gmra.mrb[12].mxu0 %v11931_v19  ;;  %v2891_v19 = vrot.slane %v2889_v44, 5 }
 0x12c   : > { %13139 = vmatprep.mubr.bf16.mxu0 %v11932_v17  ;;  %13168 = vmatpush3.bf16.msra.mxu0 %v14456_v6  ;;  %v2798_v17 = vld [vmem:[#allocation2 + $0x30] sm:$0xf] }
 0x12d   : > { %13169 = vmatprep.subr.bf16.mxu0 %v14457_v31 }
 0x130   : > { %13170 = vmatpush3.bf16.msra.mxu0 %v14457_v31  ;;  %v14469_v31 = vld [vmem:[%s18352_s1 + $0x118] sm:$0xff]  }
 0x131   : > { %13203 = vmatprep.subr.bf16.mxu0 %v14460_v12 }
 0x133   : > { %13140 = vmatmul.mubr.bf16.gmra.mrb[16].mxu0 %v11933_v50  ;;  %v402_v50 = vsel %vm14888_vm7, 0, %v401_v63  ;;  %v15617_v63 = vrot.slane %v2895_v26, 5 }
 0x134   : > { %13143 = vmatprep.mubr.bf16.mxu0 %v11934_v55  ;;  %v2838_v55 = vshrl.u32 %v2789_v32, 16  ;;  %403 = vst [vmem:[#allocation2 + $0xc8] sm:$0x1] %v402_v50  ;;  %v14472_v32 = vld [vmem:[%s18352_s1 + $0x120] sm:$0xff]   ;;  %v15624_v50 = vld [vmem:[#allocation2 + $0x50] sm:$0x1] }
 0x135   : > { %v3647_v21 = vrot.slane %v15624_v50, 5 }
 0x13b   : > { %13144 = vmatmul.mubr.bf16.gmra.mrb[20].mxu0 %v11935_v20  ;;  %v2793_v20 = vld [vmem:[#allocation2 + $0x1c] sm:$0xf]  ;;  %v869_v38 = vld [vmem:[#allocation2 + $0xc8] sm:$0x1] }
 0x13c   : > { %13147 = vmatprep.mubr.bf16.mxu0 %v18485_v34  ;;  %v2871_v22 = vshll.u32 %v2793_v20, 16  ;;  %v2875_v8 = vshrl.u32 %v2793_v20, 16  ;;  %v870_v16 = vsel %vm14874_vm5, %v709_v24, %v869_v38  ;;  %v2799_v34 = vld [vmem:[#allocation2 + $0x34] sm:$0xf]  ;;  %v2910_v24 = vshrl.u32 %v2798_v17, 16  ;;  %v14465_v20 = vld [vmem:[#allocation2 + $0x48] sm:$0xff]  }
 0x13d   : > { %871 = vst [vmem:[#allocation2 + $0xc8] sm:$0x1] %v870_v16  ;;  %v2923_v58 = vshrl.u32 %v2799_v34, 16  ;;  %v3658_v16 = vrot.slane %v15648_v3, 5 }
 0x13e   : > { %v15590_v52 = vrot.slane %v2871_v22, 5  ;;  %v2877_v48 = vrot.slane %v2875_v8, 4  ;;  %v3646_v22 = vrot.slane %v3644_v57, 4  ;;  %v14475_v8 = vld [vmem:[%s18352_s1 + $0x128] sm:$0xff]   ;;  %v15646_v37 = vrot.slane %v2910_v24, 4 }
 0x13f   : > { %v15662_v27 = vrot.slane %v2923_v58, 4 }
 0x140   : > { %v2878_v2 = vor.u32 %v2877_v48, %v15590_v52  ;;  %v15637_v25 = vsel %vm15336_vm14, %v3646_v22, %v3647_v21  ;;  %v3550_v48 = vld [vmem:[#allocation2 + $0x60] sm:$0xe]  ;;  %v15700_v22 = vld [vmem:[#allocation2 + $0x48] sm:$0xf] }
 0x141   : > { %v2961_v46 = vshll.u32 %v15700_v22, 16 }
 0x142   : > { %v15612_v11 = vrot.slane %v2878_v2, 4  ;;  %v2801_v2 = vld [vmem:[#allocation2 + $0x3c] sm:$0xf] }
 0x143   : > { %13148 = vmatmul.mubr.bf16.gmra.mrb[24].mxu0 %v18486_v60  ;;  %v2899_v60 = vshrl.u32 %v2796_v23, 16  ;;  %v12035_v23 = vrot.slane %v3550_v48, 9  ;;  %v2937_v24 = vshll.u32 %v2801_v2, 16 }
 0x144   : > { %13151 = vmatprep.mubr.bf16.mxu0 %v11938_v13  ;;  %v2840_v13 = vrot.slane %v2838_v55, 4  ;;  %v2919_v55 = vshll.u32 %v2799_v34, 16  ;;  %v2934_v34 = vshrl.u32 %v2801_v2, 16 }
 0x145   : > { %v2901_v9 = vrot.slane %v2899_v60, 4  ;;  %v15669_v26 = vsel %vm15336_vm14, %v12035_v23, %v3658_v16  ;;  %v15686_v60 = vld [vmem:[#allocation2 + $0x7c] sm:$0xf] }
 0x146   : > { %v2844_v28 = vor.u32 %v2843_v5, %v2840_v13  ;;  %v15633_v5 = vsel %vm15336_vm14, %v12033_v42, %v3644_v57  ;;  %v15658_v44 = vrot.slane %v2919_v55, 5  ;;  %v3672_v55 = vrot.slane %v15686_v60, 5  ;;  %v14471_v57 = vld [vmem:[#allocation2 + $0x78] sm:$0xff]  }
 0x147   : > { %v15711_v48 = vrot.slane %v2934_v34, 4  ;;  %v14476_v34 = vld [vmem:[#allocation2 + $0x9c] sm:$0xff]  }
 0x148   : > { %v15604_v18 = vrot.slane %v2844_v28, 4  ;;  %v14470_v28 = vld [vmem:[#allocation2 + $0x6c] sm:$0xff]  }
 0x14b   : > { %13152 = vmatmul.mubr.bf16.gmra.mrb[28].mxu0 %v11939_v36  ;;  %v2886_v36 = vshrl.u32 %v2795_v35, 16  ;;  %v3556_v35 = vld [vmem:[#allocation2 + $0xa8] sm:$0xe] }
 0x14c   : > { %13171 = vmatprep.mubr.bf16.mxu0 %v14458_v0  ;;  %v2913_v0 = vshll.u32 %v2798_v17, 16 }
 0x14d   : > { %v2888_v6 = vrot.slane %v2886_v36, 4  ;;  %v14468_v36 = vld [vmem:[#allocation2 + $0x60] sm:$0xff]  }
 0x14f   : > { %v2892_v13 = vor.u32 %v2891_v19, %v2888_v6  ;;  %v15672_v6 = vld [vmem:[#allocation2 + $0x40] sm:$0xf] }
 0x150   : > { %v2943_v21 = vshll.u32 %v15672_v6, 16  ;;  %v2947_v42 = vshrl.u32 %v15672_v6, 16 }
 0x151   : > { %v15644_v45 = vrot.slane %v2892_v13, 4 }
 0x152   : > { %v15719_v23 = vrot.slane %v2943_v21, 5  ;;  %v15734_v21 = vld [vmem:[#allocation2 + $0xa4] sm:$0x1] }
 0x153   : > { %13172 = vmatmul.mubr.bf16.vlgmr.msra.gmra.mrb[0].mxu0 %v14459_v30  ;;  %v14478_v30 = vld [vmem:[%s18352_s1 + $0x130] sm:$0xff]  }
 0x154   : > { %13204 = vmatpush3.bf16.msra.mxu0 %v14460_v12  ;;  %13175 = vmatprep.mubr.bf16.mxu0 %v14461_v41  ;;  %v2797_v12 = vld [vmem:[#allocation2 + $0x2c] sm:$0x1]  ;;  %v15654_v41 = vrot.slane %v2913_v0, 5  ;;  %v3552_v0 = vld [vmem:[#allocation2 + $0x78] sm:$0xe] }
 0x155   : > { %13205 = vmatprep.subr.bf16.mxu0 %v14463_v49  ;;  %v2905_v15 = vshll.u32 %v2797_v12, 16  ;;  %v2929_v12 = vshll.u32 %v15660_v62, 16 }
 0x157   : > { %v15652_v38 = vrot.slane %v2905_v15, 5 }
 0x158   : > { %13206 = vmatpush3.bf16.msra.mxu0 %v14463_v49  ;;  %v3661_v49 = vrot.slane %v15650_v43, 5 }
 0x159   : > { %13207 = vmatprep.subr.bf16.mxu0 %v14466_v29 }
 0x15b   : > { %13176 = vmatmul.mubr.bf16.gmra.mrb[4].mxu0 %v14462_v1  ;;  %v14481_v1 = vld [vmem:[%s18352_s1 + $0x138] sm:$0xff]  }
 0x15c   : > { %13179 = vmatprep.mubr.bf16.mxu0 %v14464_v51  ;;  %13208 = vmatpush3.bf16.msra.mxu0 %v14466_v29  ;;  %v3660_v29 = vrot.slane %v3658_v16, 4  ;;  %v2902_v51 = vor.u32 %v2901_v9, %v15617_v63  ;;  %v14473_v9 = vld [vmem:[#allocation2 + $0x84] sm:$0xff]   ;;  %v15713_v16 = vld [vmem:[#allocation2 + $0x94] sm:$0xf] }
 0x15d   : > { %13209 = vmatprep.subr.bf16.mxu0 %v14469_v31  ;;  %v3686_v2 = vrot.slane %v15713_v16, 5 }
 0x15e   : > { %v15676_v19 = vsel %vm15336_vm14, %v3660_v29, %v3661_v49  ;;  %v15690_v15 = vrot.slane %v2902_v51, 4  ;;  %v15715_v49 = vld [vmem:[#allocation2 + $0x98] sm:$0x1]  ;;  %v14477_v51 = vld [vmem:[#allocation2 + $0xa8] sm:$0xff]  }
 0x15f   : > { %v3689_v29 = vrot.slane %v15715_v49, 5 }
 0x160   : > { %13210 = vmatpush3.bf16.msra.mxu0 %v14469_v31  ;;  %v15683_v31 = vld [vmem:[%s18352_s1 + $0x140] sm:$0xff]  }
 0x161   : > { %13211 = vmatprep.subr.bf16.mxu0 %v14472_v32 }
 0x163   : > { %13180 = vmatmul.mubr.bf16.gmra.mrb[8].mxu0 %v14465_v20  ;;  %v12037_v20 = vrot.slane %v3552_v0, 9  ;;  %v15724_v0 = vrot.slane %v2947_v42, 4  ;;  %v12041_v42 = vrot.slane %v3556_v35, 9 }
 0x164   : > { %13183 = vmatprep.mubr.bf16.mxu0 %v14467_v56  ;;  %13212 = vmatpush3.bf16.msra.mxu0 %v14472_v32  ;;  %v15688_v32 = vld [vmem:[#allocation2 + $0x80] sm:$0x1]  ;;  %v3674_v56 = vrot.slane %v3672_v55, 4 }
 0x165   : > { %13213 = vmatprep.subr.bf16.mxu0 %v14475_v8  ;;  %v3675_v53 = vrot.slane %v15688_v32, 5  ;;  %v15698_v58 = vsel %vm15336_vm14, %v12037_v20, %v3672_v55  ;;  %v3688_v55 = vrot.slane %v3686_v2, 4 }
 0x167   : > { %v15738_v20 = vsel %vm15336_vm14, %v3688_v55, %v3689_v29 }
 0x168   : > { %13214 = vmatpush3.bf16.msra.mxu0 %v14475_v8  ;;  %v15704_v8 = vsel %vm15336_vm14, %v3674_v56, %v3675_v53  ;;  %v15726_v53 = vld [vmem:[#allocation2 + $0x44] sm:$0x1]  ;;  %18488 = vst [vmem:[#allocation12_spill] sm:$0xff] %v15738_v20  ;;  %v15744_v56 = vld [vmem:[#allocation2 + $0xb0] sm:$0x1]  ;;  %v2971_v20 = vshrl.u32 %v15622_v40, 16 }
 0x169   : > { %13215 = vmatprep.subr.bf16.mxu0 %v14478_v30  ;;  %v3703_v55 = vrot.slane %v15744_v56, 5 }
 0x16b   : > { %13184 = vmatmul.mubr.bf16.gmra.mrb[12].mxu0 %v14468_v36  ;;  %v15717_v36 = vrot.slane %v2937_v24, 5 }
 0x16c   : > { %13187 = vmatprep.mubr.bf16.mxu0 %v14470_v28  ;;  %13216 = vmatpush3.bf16.msra.mxu0 %v14478_v30  ;;  %v15709_v30 = vrot.slane %v2929_v12, 5  ;;  %v3554_v28 = vld [vmem:[#allocation2 + $0x90] sm:$0xe] }
 0x16d   : > { %13217 = vmatprep.subr.bf16.mxu0 %v14481_v1  ;;  %v12039_v12 = vrot.slane %v3554_v28, 9  ;;  %v3555_v28 = vld [vmem:[#allocation2 + $0x9c] sm:$0xe] }
 0x16e   : > { %v12040_v17 = vrot.slane %v3555_v28, 9  ;;  %v2860_v28 = vsel %vm14903_vm9, %v15606_v10, %v15602_v59  ;;  %v15782_v59 = vld [vmem:[#allocation2 + $0xc4] sm:$0xf] }
 0x16f   : > { %v15730_v24 = vsel %vm15336_vm14, %v12039_v12, %v3686_v2  ;;  %v3696_v12 = vrot.slane %v15734_v21, 5 }
 0x170   : > { %13218 = vmatpush3.bf16.msra.mxu0 %v14481_v1  ;;  %v14474_v1 = vld [vmem:[#allocation2 + $0x90] sm:$0xff]   ;;  %18487 = vst [vmem:[#allocation11_spill] sm:$0xff] %v15730_v24 }
 0x171   : > { %13251 = vmatprep.subr.bf16.mxu0 %v15683_v31 }
 0x173   : > { %13188 = vmatmul.mubr.bf16.gmra.mrb[16].mxu0 %v14471_v57  ;;  %v15732_v57 = vld [vmem:[#allocation2 + $0xa0] sm:$0xf] }
 0x174   : > { %13191 = vmatprep.mubr.bf16.mxu0 %v14473_v9  ;;  %v15740_v9 = vld [vmem:[#allocation2 + $0xac] sm:$0xf]  ;;  %v3693_v2 = vrot.slane %v15732_v57, 5 }
 0x175   : > { %v3700_v29 = vrot.slane %v15740_v9, 5 }
 0x176   : > { %v3695_v39 = vrot.slane %v3693_v2, 4  ;;  %v15754_v14 = vsel %vm15336_vm14, %v12040_v17, %v3693_v2  ;;  %v15772_v17 = vld [vmem:[#allocation2 + $0xb8] sm:$0xf]  ;;  %v15774_v2 = vld [vmem:[#allocation2 + $0xbc] sm:$0x1] }
 0x177   : > { %18489 = vst [vmem:[#allocation13_spill] sm:$0xff] %v15754_v14  ;;  %v3702_v4 = vrot.slane %v3700_v29, 4  ;;  %v15770_v13 = vsel %vm15336_vm14, %v12041_v42, %v3700_v29  ;;  %v2874_v42 = vsel %vm14903_vm9, %v15610_v47, %v15590_v52  ;;  %v2807_v29 = vld [vmem:[#allocation2 + $0x54] sm:$0xf]  ;;  %v3558_v52 = vld [vmem:[#allocation2 + $0xc0] sm:$0xe] }
 0x178   : > { %v15766_v35 = vsel %vm15336_vm14, %v3695_v39, %v3696_v12  ;;  %18491 = vst [vmem:[#allocation15_spill] sm:$0xff] %v15770_v13  ;;  %v2884_v12 = vsel %vm14903_vm9, %v15612_v11, %v15608_v61  ;;  %v3710_v39 = vrot.slane %v15774_v2, 5  ;;  %v3714_v47 = vrot.slane %v15782_v59, 5  ;;  %v14480_v61 = vld [vmem:[#allocation2 + $0xc0] sm:$0xff]  }
 0x179   : > { %18490 = vst [vmem:[#allocation14_spill] sm:$0xff] %v15766_v35  ;;  %v2916_v11 = vor.u32 %v15654_v41, %v15646_v37  ;;  %v2926_v13 = vor.u32 %v15662_v27, %v15658_v44  ;;  %v12043_v14 = vrot.slane %v3558_v52, 9  ;;  %v2898_v37 = vsel %vm14903_vm9, %v15644_v45, %v15617_v63 }
 0x17a   : > { %v3716_v24 = vrot.slane %v3714_v47, 4  ;;  %v2950_v41 = vor.u32 %v15724_v0, %v15719_v23  ;;  %v18498_v52 = vshll.u32 %v15726_v53, 16 }
 0x17b   : > { %13192 = vmatmul.mubr.bf16.gmra.mrb[20].mxu0 %v14474_v1  ;;  %v14479_v1 = vld [vmem:[#allocation2 + $0xb4] sm:$0xff]   ;;  %v15834_v63 = vrot.slane %v2916_v11, 4  ;;  %v2963_v11 = vrot.slane %v2961_v46, 5 }
 0x17c   : > { %13195 = vmatprep.mubr.bf16.mxu0 %v14476_v34  ;;  %v2850_v34 = vsel %vm14903_vm9, %v15604_v18, %v15588_v7  ;;  %v15780_v18 = vsel %vm15336_vm14, %v3702_v4, %v3703_v55  ;;  %v15794_v4 = vld [vmem:[#allocation2 + $0xc8] sm:$0x1]  ;;  %v3557_v55 = vld [vmem:[#allocation2 + $0xb4] sm:$0xe]  ;;  %v3707_v7 = vrot.slane %v15772_v17, 5 }
 0x17d   : > { %18492 = vst [vmem:[#allocation16_spill] sm:$0xff] %v15780_v18  ;;  %v12004_v10 = vcombine.low %v2850_v34, %v2860_v28  ;;  %v15799_v34 = vld [vmem:[#allocation2 + $0x58] sm:$0xf]  ;;  %v12042_v28 = vrot.slane %v3557_v55, 9  ;;  %v3717_v18 = vrot.slane %v15794_v4, 5 }
 0x17e   : > { %v3709_v35 = vrot.slane %v3707_v7, 4  ;;  %v2991_v45 = vshll.u32 %v15799_v34, 16  ;;  %v2995_v0 = vshrl.u32 %v15799_v34, 16 }
 0x17f   : > { %v15812_v55 = vsel %vm15336_vm14, %v12042_v28, %v3707_v7  ;;  %v15832_v28 = vsel %vm15336_vm14, %v3716_v24, %v3717_v18  ;;  %v18497_v24 = vshrl.u32 %v15700_v22, 16 }
 0x180   : > { %18493 = vst [vmem:[#allocation17_spill] sm:$0xff] %v15812_v55  ;;  %v15822_v27 = vsel %vm15336_vm14, %v3709_v35, %v3710_v39  ;;  %18496 = vst [vmem:[#allocation20_spill] sm:$0xff] %v15832_v28  ;;  %v15844_v39 = vrot.slane %v2926_v13, 4  ;;  %v2973_v35 = vrot.slane %v2971_v20, 4  ;;  %v2810_v28 = vld [vmem:[#allocation2 + $0x60] sm:$0xf] }
 0x181   : > { %18494 = vst [vmem:[#allocation18_spill] sm:$0xff] %v15822_v27  ;;  %v2960_v18 = vrot.slane %v18497_v24, 4  ;;  %v15855_v55 = vld [vmem:[#allocation2 + $0x5c] sm:$0x1]  ;;  %v15857_v22 = vrot.slane %v2991_v45, 5  ;;  %v3009_v46 = vshll.u32 %v2810_v28, 16 }
 0x182   : > { %v2813_v24 = vld [vmem:[#allocation2 + $0x6c] sm:$0xf]  ;;  %v3019_v20 = vshrl.u32 %v15648_v3, 16 }
 0x183   : > { %13196 = vmatmul.mubr.bf16.gmra.mrb[24].mxu0 %v14477_v51  ;;  %v2967_v51 = vshll.u32 %v15622_v40, 16  ;;  %v15826_v40 = vsel %vm15336_vm14, %v12043_v14, %v3714_v47  ;;  %v2908_v14 = vsel %vm14903_vm9, %v15690_v15, %v15652_v38  ;;  %v2955_v47 = vrot.slane %v18498_v52, 5 }
 0x184   : > { %13199 = vmatprep.mubr.bf16.mxu0 %v14479_v1  ;;  %v2940_v1 = vor.u32 %v15717_v36, %v15711_v48  ;;  %18495 = vst [vmem:[#allocation19_spill] sm:$0xff] %v15826_v40  ;;  %v2982_v48 = vshrl.u32 %v2807_v29, 16  ;;  %v2985_v36 = vshll.u32 %v2807_v29, 16  ;;  %v2951_v40 = vrot.slane %v2950_v41, 4 }
 0x185   : > { %v15852_v7 = vrot.slane %v2967_v51, 5  ;;  %v2977_v38 = vshll.u32 %v15624_v50, 16  ;;  %v12006_v27 = vcombine.low %v2898_v37, %v2908_v14  ;;  %v3006_v52 = vshrl.u32 %v2810_v28, 16  ;;  %v14483_v28 = vld [vmem:[%s18352_s1 + $0x148] sm:$0xff]  }
 0x186   : > { %v15846_v29 = vrot.slane %v2940_v1, 4  ;;  %v2984_v15 = vrot.slane %v2982_v48, 4  ;;  %v2987_v13 = vrot.slane %v2985_v36, 5  ;;  %v12005_v1 = vcombine.low %v2874_v42, %v2884_v12  ;;  %v15871_v48 = vld [vmem:[#allocation2 + $0x70] sm:$0xf] }
 0x187   : > { %v3015_v51 = vshll.u32 %v15648_v3, 16  ;;  %v2922_v50 = vsel %vm14903_vm9, %v15834_v63, %v15658_v44  ;;  %v2964_v42 = vor.u32 %v2963_v11, %v2960_v18  ;;  %v2974_v12 = vor.u32 %v2973_v35, %v15852_v7  ;;  %v2816_v18 = vld [vmem:[#allocation2 + $0x78] sm:$0xf] }
 0x188   : > { %v2988_v37 = vor.u32 %v2987_v13, %v2984_v15  ;;  %v3001_v41 = vshll.u32 %v15855_v55, 16  ;;  %v3030_v36 = vshrl.u32 %v2813_v24, 16  ;;  %v3033_v3 = vshll.u32 %v2813_v24, 16 }
 0x189   : > { %v2946_v44 = vsel %vm14903_vm9, %v15846_v29, %v15719_v23  ;;  %v15882_v63 = vrot.slane %v2977_v38, 5  ;;  %v3011_v35 = vrot.slane %v3009_v46, 5  ;;  %v15885_v14 = vrot.slane %v3015_v51, 5 }
 0x18a   : > { %v2965_v11 = vrot.slane %v2964_v42, 4  ;;  %v2975_v15 = vrot.slane %v2974_v12, 4  ;;  %v3039_v13 = vshll.u32 %v15871_v48, 16  ;;  %v3043_v23 = vshrl.u32 %v15871_v48, 16 }
 0x18b   : > { %13200 = vmatmul.mubr.bf16.gmra.mrb[28].mxu0 %v14480_v61  ;;  %v2997_v61 = vrot.slane %v2995_v0, 4  ;;  %v3008_v0 = vrot.slane %v3006_v52, 4  ;;  %v3003_v29 = vrot.slane %v3001_v41, 5  ;;  %v3035_v38 = vrot.slane %v3033_v3, 5 }
 0x18c   : > { %13219 = vmatprep.mubr.bf16.mxu0 %v12004_v10  ;;  %v2932_v10 = vsel %vm14903_vm9, %v15844_v39, %v15709_v30  ;;  %v2956_v30 = vsel %vm14903_vm9, %v2951_v40, %v2955_v47  ;;  %v3021_v39 = vrot.slane %v3019_v20, 4  ;;  %v2989_v40 = vrot.slane %v2988_v37, 4 }
 0x18d   : > { %v2998_v45 = vor.u32 %v2997_v61, %v15857_v22  ;;  %v3032_v47 = vrot.slane %v3030_v36, 4  ;;  %v14484_v61 = vld [vmem:[%s18352_s1 + $0x150] sm:$0xff]   ;;  %v3054_v24 = vshrl.u32 %v2816_v18, 16  ;;  %v3063_v52 = vshll.u32 %v15686_v60, 16 }
 0x18e   : > { %v3067_v46 = vshrl.u32 %v15686_v60, 16  ;;  %v3012_v20 = vor.u32 %v3011_v35, %v3008_v0  ;;  %v12007_v42 = vcombine.low %v2922_v50, %v2932_v10  ;;  %v12008_v12 = vcombine.low %v2946_v44, %v2956_v30  ;;  %v15911_v50 = vld [vmem:[#allocation2 + $0x74] sm:$0x1]  ;;  %v15915_v0 = vld [vmem:[#allocation2 + $0x88] sm:$0xf] }
 0x18f   : > { %v2999_v51 = vrot.slane %v2998_v45, 4  ;;  %v15897_v37 = vrot.slane %v3039_v13, 5  ;;  %v3045_v41 = vrot.slane %v3043_v23, 4  ;;  %v2970_v36 = vsel %vm14903_vm9, %v2965_v11, %v15852_v7 }
 0x190   : > { %v2980_v60 = vsel %vm14903_vm9, %v2975_v15, %v15882_v63  ;;  %v2994_v3 = vsel %vm14903_vm9, %v2989_v40, %v15857_v22  ;;  %v3036_v10 = vor.u32 %v3035_v38, %v3032_v47  ;;  %v3056_v44 = vrot.slane %v3054_v24, 4 }
 0x191   : > { %v15913_v7 = vrot.slane %v3063_v52, 5  ;;  %v3069_v45 = vrot.slane %v3067_v46, 4  ;;  %v3004_v63 = vsel %vm14903_vm9, %v2999_v51, %v3003_v29  ;;  %v3013_v22 = vrot.slane %v3012_v20, 4  ;;  %v2822_v52 = vld [vmem:[#allocation2 + $0x90] sm:$0xf] }
 0x192   : > { %v3049_v11 = vshll.u32 %v15911_v50, 16  ;;  %v3087_v23 = vshll.u32 %v15915_v0, 16  ;;  %v3091_v40 = vshrl.u32 %v15915_v0, 16  ;;  %v3037_v47 = vrot.slane %v3036_v10, 4 }
 0x193   : > { %13220 = vmatmul.mubr.bf16.vlgmr.msra.gmra.mrb[0].mxu0 %v12005_v1  ;;  %v3057_v1 = vshll.u32 %v2816_v18, 16  ;;  %v3046_v18 = vor.u32 %v3045_v41, %v15897_v37  ;;  %v3070_v29 = vor.u32 %v3069_v45, %v15913_v7  ;;  %v3073_v24 = vshll.u32 %v15688_v32, 16  ;;  %v2825_v41 = vld [vmem:[#allocation2 + $0x9c] sm:$0xf]  ;;  %v15933_v32 = vld [vmem:[#allocation2 + $0x8c] sm:$0x1] }
 0x194   : > { %13252 = vmatpush3.bf16.msra.mxu0 %v15683_v31  ;;  %13223 = vmatprep.mubr.bf16.mxu0 %v12006_v27  ;;  %v3022_v31 = vor.u32 %v3021_v39, %v15885_v14  ;;  %v3025_v27 = vshll.u32 %v15650_v43, 16  ;;  %v14485_v43 = vld [vmem:[%s18352_s1 + $0x158] sm:$0xff]   ;;  %v12009_v46 = vcombine.low %v2970_v36, %v2980_v60  ;;  %v12010_v51 = vcombine.low %v2994_v3, %v3004_v63  ;;  %v14487_v45 = vld [vmem:[%s18352_s1 + $0x168] sm:$0xff]  }
 0x195   : > { %13253 = vmatprep.subr.bf16.mxu0 %v14483_v28  ;;  %v3059_v30 = vrot.slane %v3057_v1, 5  ;;  %v14486_v1 = vld [vmem:[%s18352_s1 + $0x160] sm:$0xff]   ;;  %v15935_v10 = vrot.slane %v3087_v23, 5  ;;  %v3102_v36 = vshrl.u32 %v2822_v52, 16  ;;  %v3105_v60 = vshll.u32 %v2822_v52, 16 }
 0x196   : > { %v3023_v35 = vrot.slane %v3022_v31, 4  ;;  %v3027_v39 = vrot.slane %v3025_v27, 5  ;;  %v3047_v31 = vrot.slane %v3046_v18, 4  ;;  %v3051_v27 = vrot.slane %v3049_v11, 5 }
 0x197   : > { %v3060_v38 = vor.u32 %v3059_v30, %v3056_v44  ;;  %v3071_v44 = vrot.slane %v3070_v29, 4  ;;  %v3075_v30 = vrot.slane %v3073_v24, 5  ;;  %v3115_v63 = vshrl.u32 %v15713_v16, 16 }
 0x198   : > { %13254 = vmatpush3.bf16.msra.mxu0 %v14483_v28  ;;  %v2819_v28 = vld [vmem:[#allocation2 + $0x84] sm:$0xf]  ;;  %v3028_v20 = vsel %vm14903_vm9, %v3023_v35, %v3027_v39  ;;  %v3129_v35 = vshll.u32 %v2825_v41, 16  ;;  %v3052_v39 = vsel %vm14903_vm9, %v3047_v31, %v3051_v27  ;;  %v3135_v18 = vshll.u32 %v15732_v57, 16  ;;  %v2828_v31 = vld [vmem:[#allocation2 + $0xa8] sm:$0xf] }
 0x199   : > { %13255 = vmatprep.subr.bf16.mxu0 %v14484_v61  ;;  %v3078_v15 = vshrl.u32 %v2819_v28, 16  ;;  %v3081_v13 = vshll.u32 %v2819_v28, 16  ;;  %v3093_v28 = vrot.slane %v3091_v40, 4  ;;  %v3061_v3 = vrot.slane %v3060_v38, 4 }
 0x19a   : > { %v3139_v11 = vshrl.u32 %v15732_v57, 16  ;;  %v3104_v23 = vrot.slane %v3102_v36, 4  ;;  %v3107_v40 = vrot.slane %v3105_v60, 5  ;;  %v3076_v38 = vsel %vm14903_vm9, %v3071_v44, %v3075_v30  ;;  %v14488_v57 = vld [vmem:[%s18352_s1 + $0x170] sm:$0xff]  }
 0x19b   : > { %13224 = vmatmul.mubr.bf16.gmra.mrb[4].mxu0 %v12007_v42  ;;  %v3080_v42 = vrot.slane %v3078_v15, 4  ;;  %v3117_v24 = vrot.slane %v3115_v63, 4  ;;  %v3131_v52 = vrot.slane %v3129_v35, 5  ;;  %v2831_v44 = vld [vmem:[#allocation2 + $0xb4] sm:$0xf] }
 0x19c   : > { %13227 = vmatprep.mubr.bf16.mxu0 %v12008_v12  ;;  %13256 = vmatpush3.bf16.msra.mxu0 %v14484_v61  ;;  %v3018_v61 = vsel %vm14903_vm9, %v3013_v22, %v15885_v14  ;;  %v3083_v12 = vrot.slane %v3081_v13, 5  ;;  %v3042_v14 = vsel %vm14903_vm9, %v3037_v47, %v15897_v37  ;;  %v3126_v22 = vshrl.u32 %v2825_v41, 16 }
 0x19d   : > { %13257 = vmatprep.subr.bf16.mxu0 %v14485_v43  ;;  %v3097_v37 = vshll.u32 %v15933_v32, 16  ;;  %v3094_v13 = vor.u32 %v3093_v28, %v15935_v10  ;;  %v3066_v47 = vsel %vm14903_vm9, %v3061_v3, %v15913_v7  ;;  %v14489_v28 = vld [vmem:[%s18352_s1 + $0x178] sm:$0xff]   ;;  %v3150_v3 = vshrl.u32 %v2828_v31, 16 }
 0x19e   : > { %v3084_v15 = vor.u32 %v3083_v12, %v3080_v42  ;;  %v3108_v42 = vor.u32 %v3107_v40, %v3104_v23  ;;  %v3121_v12 = vshll.u32 %v15715_v49, 16  ;;  %v12013_v41 = vcombine.low %v3066_v47, %v3076_v38 }
 0x19f   : > { %v3095_v27 = vrot.slane %v3094_v13, 4  ;;  %v3159_v49 = vshll.u32 %v15740_v9, 16  ;;  %v3152_v23 = vrot.slane %v3150_v3, 4 }
 0x1a0   : > { %13258 = vmatpush3.bf16.msra.mxu0 %v14485_v43  ;;  %v3111_v43 = vshll.u32 %v15713_v16, 16  ;;  %v12011_v16 = vcombine.low %v3018_v61, %v3028_v20  ;;  %v15961_v61 = vrot.slane %v3135_v18, 5  ;;  %v3141_v20 = vrot.slane %v3139_v11, 4 }
 0x1a1   : > { %13259 = vmatprep.subr.bf16.mxu0 %v14486_v1  ;;  %v3085_v7 = vrot.slane %v3084_v15, 4  ;;  %v3109_v35 = vrot.slane %v3108_v42, 4  ;;  %v3183_v18 = vshll.u32 %v15772_v17, 16  ;;  %v3187_v11 = vshrl.u32 %v15772_v17, 16 }
 0x1a2   : > { %v15959_v29 = vrot.slane %v3111_v43, 5  ;;  %v3142_v30 = vor.u32 %v3141_v20, %v15961_v61  ;;  %v3153_v43 = vshll.u32 %v2828_v31, 16  ;;  %v3161_v47 = vrot.slane %v3159_v49, 5 }
 0x1a3   : > { %13228 = vmatmul.mubr.bf16.gmra.mrb[8].mxu0 %v12009_v46  ;;  %v12012_v46 = vcombine.low %v3042_v14, %v3052_v39  ;;  %v3145_v14 = vshll.u32 %v15734_v21, 16  ;;  %v3090_v63 = vsel %vm14903_vm9, %v3085_v7, %v15935_v10  ;;  %v3123_v21 = vrot.slane %v3121_v12, 5 }
 0x1a4   : > { %13231 = vmatprep.mubr.bf16.mxu0 %v12010_v51  ;;  %13260 = vmatpush3.bf16.msra.mxu0 %v14486_v1  ;;  %v3128_v1 = vrot.slane %v3126_v22, 4  ;;  %v3099_v51 = vrot.slane %v3097_v37, 5  ;;  %v3118_v36 = vor.u32 %v3117_v24, %v15959_v29  ;;  %v3174_v39 = vshrl.u32 %v2831_v44, 16 }
 0x1a5   : > { %13261 = vmatprep.subr.bf16.mxu0 %v14487_v45  ;;  %v3177_v37 = vshll.u32 %v2831_v44, 16  ;;  %v3147_v13 = vrot.slane %v3145_v14, 5  ;;  %v3143_v40 = vrot.slane %v3142_v30, 4  ;;  %v3189_v17 = vrot.slane %v3187_v11, 4 }
 0x1a6   : > { %v3132_v60 = vor.u32 %v3131_v52, %v3128_v1  ;;  %v3100_v22 = vsel %vm14903_vm9, %v3095_v27, %v3099_v51  ;;  %v3119_v15 = vrot.slane %v3118_v36, 4  ;;  %v3176_v24 = vrot.slane %v3174_v39, 4 }
 0x1a7   : > { %v3179_v1 = vrot.slane %v3177_v37, 5  ;;  %v3185_v52 = vrot.slane %v3183_v18, 5  ;;  %v3114_v51 = vsel %vm14903_vm9, %v3109_v35, %v15959_v29  ;;  %v3169_v31 = vshll.u32 %v15744_v56, 16 }
 0x1a8   : > { %13262 = vmatpush3.bf16.msra.mxu0 %v14487_v45  ;;  %v3163_v45 = vshrl.u32 %v15740_v9, 16  ;;  %v15982_v9 = vld [vmem:[%s18352_s1 + $0x180] sm:$0xff]   ;;  %v3133_v10 = vrot.slane %v3132_v60, 4  ;;  %v3124_v20 = vsel %vm14903_vm9, %v3119_v15, %v3123_v21  ;;  %v3148_v27 = vsel %vm14903_vm9, %v3143_v40, %v3147_v13  ;;  %v14677_v13 = vld [vmem:[#allocation2 + $0x10] sm:$0xf] }
 0x1a9   : > { %13263 = vmatprep.subr.bf16.mxu0 %v14488_v57  ;;  %v3207_v29 = vshll.u32 %v15782_v59, 16  ;;  %v3211_v60 = vshrl.u32 %v15782_v59, 16  ;;  %v3180_v14 = vor.u32 %v3179_v1, %v3176_v24  ;;  %v3190_v3 = vor.u32 %v3189_v17, %v3185_v52  ;;  %v3543_v40 = vld [vmem:[#allocation2 + $0xc] sm:$0xe] }
 0x1aa   : > { %v3165_v38 = vrot.slane %v3163_v45, 4  ;;  %v3138_v7 = vsel %vm14903_vm9, %v3133_v10, %v15961_v61  ;;  %v3193_v56 = vshll.u32 %v15774_v2, 16  ;;  %v3217_v11 = vshll.u32 %v15794_v4, 16 }
 0x1ab   : > { %13232 = vmatmul.mubr.bf16.gmra.mrb[12].mxu0 %v12011_v16  ;;  %v3155_v16 = vrot.slane %v3153_v43, 5  ;;  %v12016_v44 = vcombine.low %v3138_v7, %v3148_v27  ;;  %v3171_v43 = vrot.slane %v3169_v31, 5  ;;  %v3181_v35 = vrot.slane %v3180_v14, 4 }
 0x1ac   : > { %13235 = vmatprep.mubr.bf16.mxu0 %v12012_v46  ;;  %13264 = vmatpush3.bf16.msra.mxu0 %v14488_v57  ;;  %v12014_v57 = vcombine.low %v3090_v63, %v3100_v22  ;;  %v2834_v46 = vld [vmem:[#allocation2 + $0xc0] sm:$0xf]  ;;  %v3166_v12 = vor.u32 %v3165_v38, %v3161_v47  ;;  %v3209_v63 = vrot.slane %v3207_v29, 5  ;;  %v3213_v22 = vrot.slane %v3211_v60, 4 }
 0x1ad   : > { %13265 = vmatprep.subr.bf16.mxu0 %v14489_v28  ;;  %v3156_v42 = vor.u32 %v3155_v16, %v3152_v23  ;;  %v3201_v36 = vshll.u32 %v2834_v46, 16  ;;  %v3191_v21 = vrot.slane %v3190_v3, 4  ;;  %v3195_v39 = vrot.slane %v3193_v56, 5  ;;  %v14681_v56 = vld [vmem:[#allocation2 + $0x20] sm:$0x1] }
 0x1ae   : > { %v3167_v61 = vrot.slane %v3166_v12, 4  ;;  %v3214_v18 = vor.u32 %v3213_v22, %v3209_v63  ;;  %v3186_v15 = vsel %vm14903_vm9, %v3181_v35, %v3185_v52  ;;  %v3609_v23 = vrot.slane %v14677_v13, 5  ;;  %v14680_v12 = vld [vmem:[#allocation2 + $0x28] sm:$0xf] }
 0x1af   : > { %v3157_v30 = vrot.slane %v3156_v42, 4  ;;  %v3203_v45 = vrot.slane %v3201_v36, 5  ;;  %v3196_v10 = vsel %vm14903_vm9, %v3191_v21, %v3195_v39  ;;  %v3219_v24 = vrot.slane %v3217_v11, 5  ;;  %v3544_v42 = vld [vmem:[#allocation2 + $0x18] sm:$0xe]  ;;  %v14491_v13 = vld [vmem:[%s18352_s1 + $0x188] sm:$0xff]  }
 0x1b0   : > { %13266 = vmatpush3.bf16.msra.mxu0 %v14489_v28  ;;  %v3198_v28 = vshrl.u32 %v2834_v46, 16  ;;  %v3172_v2 = vsel %vm14903_vm9, %v3167_v61, %v3171_v43  ;;  %v12018_v38 = vcombine.low %v3186_v15, %v3196_v10  ;;  %v12028_v1 = vrot.slane %v3543_v40, 9  ;;  %v14678_v46 = vld [vmem:[#allocation2 + $0x14] sm:$0x1]  ;;  %v3545_v36 = vld [vmem:[#allocation2 + $0x24] sm:$0xe] }
 0x1b1   : > { %13299 = vmatprep.subr.bf16.mxu0 %v15982_v9  ;;  %v3162_v59 = vsel %vm14903_vm9, %v3157_v30, %v3161_v47  ;;  %v3611_v17 = vrot.slane %v3609_v23, 4  ;;  %v12029_v14 = vrot.slane %v3544_v42, 9  ;;  %v14682_v61 = vld [vmem:[#allocation2 + $0x2c] sm:$0x1]  ;;  %v3546_v39 = vld [vmem:[#allocation2 + $0x30] sm:$0xe] }
 0x1b2   : > { %v3200_v49 = vrot.slane %v3198_v28, 4  ;;  %v12017_v16 = vcombine.low %v3162_v59, %v3172_v2  ;;  %v3610_v7 = vsel %vm15336_vm14, %v12028_v1, %v3609_v23  ;;  %v3623_v28 = vrot.slane %v14680_v12, 5  ;;  %v3547_v2 = vld [vmem:[#allocation2 + $0x3c] sm:$0xe] }
 0x1b3   : > { %13236 = vmatmul.mubr.bf16.gmra.mrb[16].mxu0 %v12013_v41  ;;  %v12015_v41 = vcombine.low %v3114_v51, %v3124_v20  ;;  %v3612_v51 = vrot.slane %v14678_v46, 5  ;;  %v14679_v20 = vld [vmem:[#allocation2 + $0x1c] sm:$0xf]  ;;  %v3626_v43 = vrot.slane %v14682_v61, 5  ;;  %v3637_v59 = vrot.slane %v15672_v6, 5 }
 0x1b4   : > { %13239 = vmatprep.mubr.bf16.mxu0 %v12014_v57  ;;  %v3204_v37 = vor.u32 %v3203_v45, %v3200_v49  ;;  %v3215_v57 = vrot.slane %v3214_v18, 4  ;;  %v3616_v31 = vrot.slane %v14679_v20, 5  ;;  %v3625_v30 = vrot.slane %v3623_v28, 4 }
 0x1b5   : > { %v3613_v27 = vsel %vm15336_vm14, %v3611_v17, %v3612_v51  ;;  %v12031_v11 = vrot.slane %v3546_v39, 9  ;;  %v3633_v10 = vrot.slane %v15660_v62, 5  ;;  %v12032_v23 = vrot.slane %v3547_v2, 9  ;;  %v18512_v2 = vld [vmem:[#allocation18_spill] sm:$0xff] }
 0x1b6   : > { %v3205_v47 = vrot.slane %v3204_v37, 4  ;;  %v3220_v52 = vsel %vm14903_vm9, %v3215_v57, %v3219_v24  ;;  %v12060_v60 = vcombine.low %v3610_v7, %v3613_v27  ;;  %v3618_v3 = vrot.slane %v3616_v31, 4  ;;  %v3549_v57 = vld [vmem:[#allocation2 + $0x54] sm:$0xe] }
 0x1b7   : > { %v3617_v49 = vsel %vm15336_vm14, %v12029_v14, %v3616_v31  ;;  %v3627_v21 = vsel %vm15336_vm14, %v3625_v30, %v3626_v43  ;;  %v3639_v40 = vrot.slane %v3637_v59, 4  ;;  %v3638_v62 = vsel %vm15336_vm14, %v12032_v23, %v3637_v59  ;;  %v3551_v31 = vld [vmem:[#allocation2 + $0x6c] sm:$0xe]  ;;  %v3553_v14 = vld [vmem:[#allocation2 + $0x84] sm:$0xe]  ;;  %v18503_v43 = vld [vmem:[#allocation12_spill] sm:$0xff] }
 0x1b8   : > { %v3210_v4 = vsel %vm14903_vm9, %v3205_v47, %v3209_v63  ;;  %v14683_v63 = vld [vmem:[#allocation2 + $0x34] sm:$0xf]  ;;  %v12034_v17 = vrot.slane %v3549_v57, 9  ;;  %v3654_v51 = vrot.slane %v15855_v55, 5  ;;  %v3665_v20 = vrot.slane %v15871_v48, 5  ;;  %v14494_v55 = vld [vmem:[%s18352_s1 + $0x1a0] sm:$0xff]  }
 0x1b9   : > { %v12019_v29 = vcombine.low %v3210_v4, %v3220_v52  ;;  %v3630_v22 = vrot.slane %v14683_v63, 5  ;;  %v14493_v4 = vld [vmem:[%s18352_s1 + $0x198] sm:$0xff]   ;;  %v12036_v27 = vrot.slane %v3551_v31, 9  ;;  %v3668_v12 = vrot.slane %v15911_v50, 5  ;;  %v14496_v50 = vld [vmem:[%s18352_s1 + $0x1b0] sm:$0xff]   ;;  %v18506_v63 = vld [vmem:[#allocation14_spill] sm:$0xff] }
 0x1ba   : > { %v3667_v42 = vrot.slane %v3665_v20, 4  ;;  %v18511_v59 = vld [vmem:[#allocation17_spill] sm:$0xff]  ;;  %v14506_v23 = vld [vmem:[%s18352_s1 + $0x1d0] sm:$0xff]  }
 0x1bb   : > { %13240 = vmatmul.mubr.bf16.gmra.mrb[20].mxu0 %v12015_v41  ;;  %v3619_v41 = vrot.slane %v14681_v56, 5  ;;  %v3632_v15 = vrot.slane %v3630_v22, 4  ;;  %v3631_v6 = vsel %vm15336_vm14, %v12031_v11, %v3630_v22  ;;  %v3666_v48 = vsel %vm15336_vm14, %v12036_v27, %v3665_v20  ;;  %v14512_v57 = vld [vmem:[%s18352_s1 + $0x1e0] sm:$0xff]   ;;  %v5195_v27 = vld [vmem:[#allocation2 + $0xb4] sm:$0xe] }
 0x1bc   : > { %13243 = vmatprep.mubr.bf16.mxu0 %v12016_v44  ;;  %v12030_v44 = vrot.slane %v3545_v36, 9  ;;  %v18499_v36 = vcombine.low %v15633_v5, %v15637_v25  ;;  %v12038_v5 = vrot.slane %v3553_v14, 9  ;;  %v3682_v56 = vrot.slane %v15933_v32, 5  ;;  %v14500_v32 = vld [vmem:[%s18352_s1 + $0x1c0] sm:$0xff]  }
 0x1bd   : > { %v3620_v45 = vsel %vm15336_vm14, %v3618_v3, %v3619_v41  ;;  %v14497_v41 = vld [vmem:[%s18352_s1 + $0x1b8] sm:$0xff]  }
 0x1be   : > { %v3624_v35 = vsel %vm15336_vm14, %v12030_v44, %v3623_v28  ;;  %v12061_v37 = vcombine.low %v3617_v49, %v3620_v45  ;;  %v14495_v28 = vld [vmem:[%s18352_s1 + $0x1a8] sm:$0xff]   ;;  %v18505_v45 = vld [vmem:[#allocation13_spill] sm:$0xff] }
 0x1bf   : > { %v12062_v18 = vcombine.low %v3624_v35, %v3627_v21  ;;  %v18507_v22 = vcombine.low %v18505_v45, %v18506_v63  ;;  %v18508_v35 = vld [vmem:[#allocation15_spill] sm:$0xff]  ;;  %v18509_v21 = vld [vmem:[#allocation16_spill] sm:$0xff] }
 0x1c0   : > { %v18510_v39 = vcombine.low %v18508_v35, %v18509_v21  ;;  %v14510_v63 = vld [vmem:[#allocation2 + $0x78] sm:$0xff]  }
 0x1c3   : > { %13244 = vmatmul.mubr.bf16.gmra.mrb[24].mxu0 %v12017_v16  ;;  %v3640_v16 = vrot.slane %v15726_v53, 5  ;;  %v14492_v53 = vld [vmem:[%s18352_s1 + $0x190] sm:$0xff]  }
 0x1c4   : > { %13247 = vmatprep.mubr.bf16.mxu0 %v12018_v38  ;;  %v3634_v38 = vsel %vm15336_vm14, %v3632_v15, %v3633_v10  ;;  %v14499_v15 = vld [vmem:[#allocation2 + $0x24] sm:$0xff]   ;;  %v14501_v10 = vld [vmem:[#allocation2 + $0x30] sm:$0xff]  }
 0x1c5   : > { %v3641_v47 = vsel %vm15336_vm14, %v3639_v40, %v3640_v16  ;;  %v12063_v24 = vcombine.low %v3631_v6, %v3634_v38  ;;  %v14502_v40 = vld [vmem:[#allocation2 + $0x3c] sm:$0xff]   ;;  %v14504_v16 = vld [vmem:[#allocation2 + $0x48] sm:$0xff]   ;;  %v16111_v38 = vld [vmem:[#allocation2 + $0x58] sm:$0xf] }
 0x1c6   : > { %v12064_v1 = vcombine.low %v3638_v62, %v3641_v47  ;;  %v14509_v6 = vld [vmem:[%s18352_s1 + $0x1d8] sm:$0xff]   ;;  %v5187_v47 = vld [vmem:[#allocation2 + $0x54] sm:$0xe] }
 0x1c7   : > { %v16113_v62 = vld [vmem:[#allocation2 + $0x5c] sm:$0x1] }
 0x1cb   : > { %13248 = vmatmul.mubr.bf16.gmra.mrb[28].mxu0 %v12019_v29  ;;  %v3669_v29 = vsel %vm15336_vm14, %v3667_v42, %v3668_v12 }
 0x1cc   : > { %13267 = vmatprep.mubr.bf16.mxu0 %v12060_v60  ;;  %v3679_v60 = vrot.slane %v15915_v0, 5  ;;  %v12068_v3 = vcombine.low %v3666_v48, %v3669_v29  ;;  %v18500_v0 = vcombine.low %v15669_v26, %v15676_v19  ;;  %v18501_v26 = vcombine.low %v15698_v58, %v15704_v8  ;;  %v18502_v19 = vld [vmem:[#allocation11_spill] sm:$0xff]  ;;  %v18515_v8 = vld [vmem:[#allocation20_spill] sm:$0xff] }
 0x1cd   : > { %v18504_v49 = vcombine.low %v18502_v19, %v18503_v43  ;;  %v18514_v58 = vld [vmem:[#allocation19_spill] sm:$0xff]  ;;  %v16152_v19 = vld [vmem:[#allocation2 + $0x20] sm:$0x1] }
 0x1ce   : > { %v3681_v25 = vrot.slane %v3679_v60, 4  ;;  %v3680_v44 = vsel %vm15336_vm14, %v12038_v5, %v3679_v60  ;;  %v18516_v11 = vcombine.low %v18514_v58, %v18515_v8  ;;  %v16139_v29 = vld [vmem:[#allocation2 + $0x70] sm:$0xf]  ;;  %v16141_v60 = vld [vmem:[#allocation2 + $0x74] sm:$0x1]  ;;  %v4496_v8 = vshll.u32 %v16152_v19, 16 }
 0x1cf   : > { %v5297_v5 = vrot.slane %v16139_v29, 5 }
 0x1d0   : > { %v3683_v30 = vsel %vm15336_vm14, %v3681_v25, %v3682_v56  ;;  %v5300_v25 = vrot.slane %v16141_v60, 5  ;;  %v14518_v56 = vld [vmem:[%s18352_s1 + $0x1f0] sm:$0xff]  }
 0x1d1   : > { %v12070_v61 = vcombine.low %v3680_v44, %v3683_v30 }
 0x1d3   : > { %13268 = vmatmul.mubr.bf16.vlgmr.msra.gmra.mrb[0].mxu0 %v12061_v37  ;;  %v18513_v37 = vcombine.low %v18511_v59, %v18512_v2  ;;  %v14521_v59 = vld [vmem:[%s18352_s1 + $0x1f8] sm:$0xff]   ;;  %v4434_v2 = vld [vmem:[#allocation2 + $0x30] sm:$0xf] }
 0x1d4   : > { %13300 = vmatpush3.bf16.msra.mxu0 %v15982_v9  ;;  %13271 = vmatprep.mubr.bf16.mxu0 %v12062_v18  ;;  %v3651_v9 = vrot.slane %v15799_v34, 5  ;;  %v14498_v18 = vld [vmem:[#allocation2 + $0x18] sm:$0xff]  }
 0x1d5   : > { %13301 = vmatprep.subr.bf16.mxu0 %v14491_v13 }
 0x1d6   : > { %v3653_v46 = vrot.slane %v3651_v9, 4  ;;  %v3652_v52 = vsel %vm15336_vm14, %v12034_v17, %v3651_v9  ;;  %v5286_v9 = vrot.slane %v16113_v62, 5 }
 0x1d8   : > { %13302 = vmatpush3.bf16.msra.mxu0 %v14491_v13  ;;  %v3655_v34 = vsel %vm15336_vm14, %v3653_v46, %v3654_v51  ;;  %v14503_v13 = vld [vmem:[%s18352_s1 + $0x1c8] sm:$0xff]   ;;  %v14505_v46 = vld [vmem:[#allocation2 + $0x54] sm:$0xff]   ;;  %v16120_v51 = vld [vmem:[#allocation2 + $0x1c] sm:$0xf] }
 0x1d9   : > { %13303 = vmatprep.subr.bf16.mxu0 %v14492_v53  ;;  %v12066_v7 = vcombine.low %v3652_v52, %v3655_v34  ;;  %v14507_v52 = vld [vmem:[#allocation2 + $0x60] sm:$0xff]   ;;  %v4486_v12 = vshll.u32 %v16120_v51, 16 }
 0x1da   : > { %v4431_v34 = vld [vmem:[#allocation2 + $0x24] sm:$0xf] }
 0x1db   : > { %13272 = vmatmul.mubr.bf16.gmra.mrb[4].mxu0 %v12063_v24  ;;  %v12169_v24 = vrot.slane %v5187_v47, 9  ;;  %v4504_v48 = vshll.u32 %v4431_v34, 16  ;;  %v16150_v30 = vrot.slane %v4486_v12, 5 }
 0x1dc   : > { %13275 = vmatprep.mubr.bf16.mxu0 %v12064_v1  ;;  %13304 = vmatpush3.bf16.msra.mxu0 %v14492_v53  ;;  %v5283_v53 = vrot.slane %v16111_v38, 5  ;;  %v4428_v1 = vld [vmem:[#allocation2 + $0x18] sm:$0xf] }
 0x1dd   : > { %13305 = vmatprep.subr.bf16.mxu0 %v14493_v4  ;;  %v4477_v31 = vshrl.u32 %v4428_v1, 16  ;;  %v4480_v42 = vshll.u32 %v4428_v1, 16 }
 0x1de   : > { %v5285_v17 = vrot.slane %v5283_v53, 4 }
 0x1df   : > { %v4482_v44 = vrot.slane %v4480_v42, 5  ;;  %v4528_v42 = vshll.u32 %v4434_v2, 16 }
 0x1e0   : > { %13306 = vmatpush3.bf16.msra.mxu0 %v14493_v4  ;;  %v16124_v4 = vsel %vm15336_vm14, %v12169_v24, %v5283_v53  ;;  %v16128_v20 = vsel %vm15336_vm14, %v5285_v17, %v5286_v9  ;;  %v16184_v53 = vld [vmem:[%s18352_s1 + $0x200] sm:$0xff]   ;;  %v16186_v9 = vld [vmem:[#allocation2 + $0x34] sm:$0xf]  ;;  %v16192_v17 = vrot.slane %v4496_v8, 5 }
 0x1e1   : > { %13307 = vmatprep.subr.bf16.mxu0 %v14494_v55  ;;  %18517 = vst [vmem:[#allocation11_spill] sm:$0xff] %v16124_v4  ;;  %18518 = vst [vmem:[#allocation12_spill] sm:$0xff] %v16128_v20  ;;  %v4530_v8 = vrot.slane %v4528_v42, 5  ;;  %v4443_v20 = vld [vmem:[#allocation2 + $0x54] sm:$0xf]  ;;  %v14520_v4 = vld [vmem:[#allocation2 + $0xcc] sm:$0xff]  }
 0x1e3   : > { %13276 = vmatmul.mubr.bf16.gmra.mrb[8].mxu0 %v18499_v36  ;;  %v4501_v36 = vshrl.u32 %v4431_v34, 16  ;;  %v14511_v34 = vld [vmem:[#allocation2 + $0x84] sm:$0xff]  }
 0x1e4   : > { %13279 = vmatprep.mubr.bf16.mxu0 %v12066_v7  ;;  %13308 = vmatpush3.bf16.msra.mxu0 %v14494_v55  ;;  %v14515_v55 = vld [vmem:[%s18352_s1 + $0x1e8] sm:$0xff]  }
 0x1e5   : > { %13309 = vmatprep.subr.bf16.mxu0 %v14495_v28  ;;  %v16133_v7 = vld [vmem:[#allocation2 + $0x28] sm:$0xf]  ;;  %v4503_v43 = vrot.slane %v4501_v36, 4 }
 0x1e6   : > { %v4514_v14 = vshrl.u32 %v16133_v7, 16 }
 0x1e8   : > { %13310 = vmatpush3.bf16.msra.mxu0 %v14495_v28  ;;  %v4490_v28 = vshrl.u32 %v16120_v51, 16  ;;  %v4516_v21 = vrot.slane %v4514_v14, 4 }
 0x1e9   : > { %13311 = vmatprep.subr.bf16.mxu0 %v14496_v50 }
 0x1eb   : > { %13280 = vmatmul.mubr.bf16.gmra.mrb[12].mxu0 %v18500_v0 }
 0x1ec   : > { %13283 = vmatprep.mubr.bf16.mxu0 %v12068_v3  ;;  %13312 = vmatpush3.bf16.msra.mxu0 %v14496_v50  ;;  %v4510_v50 = vshll.u32 %v16133_v7, 16  ;;  %v5189_v3 = vld [vmem:[#allocation2 + $0x6c] sm:$0xe] }
 0x1ed   : > { %13313 = vmatprep.subr.bf16.mxu0 %v14497_v41  ;;  %v12171_v0 = vrot.slane %v5189_v3, 9  ;;  %v4538_v3 = vshrl.u32 %v16186_v9, 16 }
 0x1ee   : > { %v16160_v35 = vrot.slane %v4510_v50, 5  ;;  %v4534_v50 = vshll.u32 %v16186_v9, 16 }
 0x1ef   : > { %v16156_v45 = vsel %vm15336_vm14, %v12171_v0, %v5297_v5  ;;  %v16217_v0 = vld [vmem:[#allocation2 + $0x38] sm:$0x1] }
 0x1f0   : > { %13314 = vmatpush3.bf16.msra.mxu0 %v14497_v41  ;;  %v4479_v41 = vrot.slane %v4477_v31, 4  ;;  %18519 = vst [vmem:[#allocation13_spill] sm:$0xff] %v16156_v45 }
 0x1f1   : > { %13347 = vmatprep.subr.bf16.mxu0 %v14500_v32 }
 0x1f3   : > { %13284 = vmatmul.mubr.bf16.gmra.mrb[16].mxu0 %v18501_v26  ;;  %v14508_v26 = vld [vmem:[#allocation2 + $0x6c] sm:$0xff]  }
 0x1f4   : > { %13287 = vmatprep.mubr.bf16.mxu0 %v12070_v61  ;;  %v5299_v61 = vrot.slane %v5297_v5, 4  ;;  %v16213_v5 = vld [vmem:[#allocation2 + $0x40] sm:$0xf] }
 0x1fb   : > { %13288 = vmatmul.mubr.bf16.gmra.mrb[20].mxu0 %v18504_v49  ;;  %v4506_v49 = vrot.slane %v4504_v48, 5 }
 0x1fc   : > { %13291 = vmatprep.mubr.bf16.mxu0 %v18507_v22  ;;  %v16158_v22 = vld [vmem:[#allocation2 + $0x2c] sm:$0x1] }
 0x203   : > { %13292 = vmatmul.mubr.bf16.gmra.mrb[24].mxu0 %v18510_v39  ;;  %v16164_v39 = vsel %vm15336_vm14, %v5299_v61, %v5300_v25  ;;  %v16223_v61 = vld [vmem:[#allocation2 + $0xa0] sm:$0xf] }
 0x204   : > { %13295 = vmatprep.mubr.bf16.mxu0 %v18513_v37  ;;  %18520 = vst [vmem:[#allocation14_spill] sm:$0xff] %v16164_v39  ;;  %v5194_v37 = vld [vmem:[#allocation2 + $0xa8] sm:$0xe] }
 0x20b   : > { %13296 = vmatmul.mubr.bf16.gmra.mrb[28].mxu0 %v18516_v11  ;;  %v4507_v11 = vor.u32 %v4506_v49, %v4503_v43  ;;  %v5192_v43 = vld [vmem:[#allocation2 + $0x90] sm:$0xe] }
 0x20c   : > { %13315 = vmatprep.mubr.bf16.mxu0 %v14498_v18  ;;  %v4483_v18 = vor.u32 %v4482_v44, %v4479_v41  ;;  %v16219_v44 = vld [vmem:[#allocation2 + $0x94] sm:$0xf]  ;;  %v16283_v41 = vld [vmem:[#allocation2 + $0xbc] sm:$0x1] }
 0x20d   : > { %v5318_v49 = vrot.slane %v16219_v44, 5 }
 0x20e   : > { %v16188_v24 = vrot.slane %v4483_v18, 4  ;;  %v5325_v18 = vrot.slane %v16223_v61, 5 }
 0x213   : > { %13316 = vmatmul.mubr.bf16.vlgmr.msra.gmra.mrb[0].mxu0 %v14499_v15  ;;  %v4520_v15 = vshll.u32 %v16158_v22, 16 }
 0x214   : > { %13348 = vmatpush3.bf16.msra.mxu0 %v14500_v32  ;;  %13319 = vmatprep.mubr.bf16.mxu0 %v14501_v10  ;;  %v4492_v32 = vrot.slane %v4490_v28, 4  ;;  %v16174_v10 = vld [vmem:[#allocation2 + $0x88] sm:$0xf]  ;;  %v14513_v28 = vld [vmem:[#allocation2 + $0x90] sm:$0xff]  }
 0x215   : > { %13349 = vmatprep.subr.bf16.mxu0 %v14503_v13  ;;  %v16196_v31 = vrot.slane %v4520_v15, 5  ;;  %v5320_v15 = vrot.slane %v5318_v49, 4 }
 0x216   : > { %v4493_v58 = vor.u32 %v4492_v32, %v16150_v30  ;;  %v16221_v32 = vld [vmem:[#allocation2 + $0x98] sm:$0x1] }
 0x218   : > { %13350 = vmatpush3.bf16.msra.mxu0 %v14503_v13  ;;  %v16176_v13 = vld [vmem:[#allocation2 + $0x8c] sm:$0x1]  ;;  %v16190_v1 = vrot.slane %v4493_v58, 4 }
 0x219   : > { %13351 = vmatprep.subr.bf16.mxu0 %v14506_v23  ;;  %v5314_v47 = vrot.slane %v16176_v13, 5 }
 0x21b   : > { %13320 = vmatmul.mubr.bf16.gmra.mrb[4].mxu0 %v14502_v40  ;;  %v4525_v40 = vshrl.u32 %v4434_v2, 16  ;;  %v5193_v2 = vld [vmem:[#allocation2 + $0x9c] sm:$0xe] }
 0x21c   : > { %13323 = vmatprep.mubr.bf16.mxu0 %v14504_v16  ;;  %13352 = vmatpush3.bf16.msra.mxu0 %v14506_v23  ;;  %v4517_v23 = vor.u32 %v4516_v21, %v16160_v35  ;;  %v5191_v16 = vld [vmem:[#allocation2 + $0x84] sm:$0xe]  ;;  %v4558_v21 = vshll.u32 %v16213_v5, 16 }
 0x21d   : > { %13353 = vmatprep.subr.bf16.mxu0 %v14509_v6  ;;  %v16204_v48 = vrot.slane %v4525_v40, 4  ;;  %v4540_v40 = vrot.slane %v4538_v3, 4 }
 0x21e   : > { %v16202_v36 = vrot.slane %v4517_v23, 4  ;;  %v12175_v23 = vrot.slane %v5193_v2, 9  ;;  %v16263_v2 = vld [vmem:[#allocation2 + $0x4c] sm:$0xf] }
 0x21f   : > { %18528 = vst [vmem:[#allocation22_spill] sm:$0xff] %v16263_v2 }
 0x220   : > { %13354 = vmatpush3.bf16.msra.mxu0 %v14509_v6  ;;  %v5311_v6 = vrot.slane %v16174_v10, 5 }
 0x221   : > { %13355 = vmatprep.subr.bf16.mxu0 %v14512_v57 }
 0x223   : > { %13324 = vmatmul.mubr.bf16.gmra.mrb[8].mxu0 %v14505_v46  ;;  %v4437_v46 = vld [vmem:[#allocation2 + $0x3c] sm:$0xf] }
 0x224   : > { %13327 = vmatprep.mubr.bf16.mxu0 %v14507_v52  ;;  %13356 = vmatpush3.bf16.msra.mxu0 %v14512_v57  ;;  %v12173_v57 = vrot.slane %v5191_v16, 9  ;;  %v5313_v52 = vrot.slane %v5311_v6, 4  ;;  %v4549_v25 = vshrl.u32 %v4437_v46, 16  ;;  %v16234_v16 = vld [vmem:[#allocation2 + $0x44] sm:$0x1] }
 0x225   : > { %13357 = vmatprep.subr.bf16.mxu0 %v14515_v55  ;;  %18523 = vst [vmem:[#allocation17_spill] sm:$0xff] %v16234_v16 }
 0x226   : > { %v16200_v12 = vsel %vm15336_vm14, %v12173_v57, %v5311_v6  ;;  %v16209_v14 = vsel %vm15336_vm14, %v5313_v52, %v5314_v47  ;;  %v4440_v6 = vld [vmem:[#allocation2 + $0x48] sm:$0xf]  ;;  %v5327_v57 = vrot.slane %v5325_v18, 4  ;;  %v4544_v52 = vshll.u32 %v16217_v0, 16 }
 0x227   : > { %18521 = vst [vmem:[#allocation15_spill] sm:$0xff] %v16200_v12  ;;  %18522 = vst [vmem:[#allocation16_spill] sm:$0xff] %v16209_v14 }
 0x228   : > { %13358 = vmatpush3.bf16.msra.mxu0 %v14515_v55  ;;  %v16194_v55 = vrot.slane %v4507_v11, 4  ;;  %v16232_v11 = vrot.slane %v4534_v50, 5  ;;  %v14516_v50 = vld [vmem:[#allocation2 + $0xa8] sm:$0xff]  }
 0x229   : > { %13359 = vmatprep.subr.bf16.mxu0 %v14518_v56 }
 0x22b   : > { %13328 = vmatmul.mubr.bf16.gmra.mrb[12].mxu0 %v14508_v26  ;;  %v16225_v26 = vld [vmem:[#allocation2 + $0xa4] sm:$0x1] }
 0x22c   : > { %13331 = vmatprep.mubr.bf16.mxu0 %v14510_v63  ;;  %13360 = vmatpush3.bf16.msra.mxu0 %v14518_v56  ;;  %v4552_v56 = vshll.u32 %v4437_v46, 16  ;;  %v5321_v63 = vrot.slane %v16221_v32, 5  ;;  %v5328_v58 = vrot.slane %v16225_v26, 5  ;;  %v14514_v46 = vld [vmem:[#allocation2 + $0x9c] sm:$0xff]  }
 0x22d   : > { %13361 = vmatprep.subr.bf16.mxu0 %v14521_v59 }
 0x22e   : > { %v16245_v42 = vsel %vm15336_vm14, %v5320_v15, %v5321_v63  ;;  %v16251_v3 = vrot.slane %v4552_v56, 5  ;;  %v4568_v63 = vshll.u32 %v16234_v16, 16  ;;  %v4531_v15 = vor.u32 %v4530_v8, %v16204_v48 }
 0x22f   : > { %18525 = vst [vmem:[#allocation19_spill] sm:$0xff] %v16245_v42  ;;  %v4541_v56 = vor.u32 %v4540_v40, %v16232_v11  ;;  %v4576_v48 = vshll.u32 %v4440_v6, 16  ;;  %v12176_v8 = vrot.slane %v5194_v37, 9  ;;  %v12177_v40 = vrot.slane %v5195_v27, 9 }
 0x230   : > { %13362 = vmatpush3.bf16.msra.mxu0 %v14521_v59  ;;  %v12174_v59 = vrot.slane %v5192_v43, 9  ;;  %v16253_v43 = vrot.slane %v4558_v21, 5  ;;  %v4489_v21 = vsel %vm14903_vm9, %v16188_v24, %v16150_v30  ;;  %v16291_v42 = vrot.slane %v4531_v15, 4  ;;  %v14519_v15 = vld [vmem:[#allocation2 + $0xc0] sm:$0xff]  }
 0x231   : > { %13395 = vmatprep.subr.bf16.mxu0 %v16184_v53  ;;  %v16299_v14 = vrot.slane %v4541_v56, 4  ;;  %v4606_v16 = vshll.u32 %v16111_v38, 16 }
 0x232   : > { %v16238_v47 = vsel %vm15336_vm14, %v12174_v59, %v5318_v49  ;;  %v4562_v59 = vshrl.u32 %v16213_v5, 16  ;;  %v4499_v49 = vsel %vm14903_vm9, %v16190_v1, %v16192_v17  ;;  %v4586_v1 = vshrl.u32 %v16263_v2, 16 }
 0x233   : > { %13332 = vmatmul.mubr.bf16.gmra.mrb[16].mxu0 %v14511_v34  ;;  %18524 = vst [vmem:[#allocation18_spill] sm:$0xff] %v16238_v47  ;;  %v16241_v34 = vrot.slane %v4549_v25, 4  ;;  %v16259_v25 = vsel %vm15336_vm14, %v5327_v57, %v5328_v58  ;;  %v16274_v58 = vld [vmem:[#allocation2 + $0xb0] sm:$0x1]  ;;  %v16276_v57 = vld [vmem:[#allocation2 + $0xb8] sm:$0xf] }
 0x234   : > { %13335 = vmatprep.mubr.bf16.mxu0 %v14513_v28  ;;  %v16249_v28 = vsel %vm15336_vm14, %v12175_v23, %v5325_v18  ;;  %18527 = vst [vmem:[#allocation21_spill] sm:$0xff] %v16259_v25  ;;  %v4573_v18 = vshrl.u32 %v4440_v6, 16  ;;  %v16272_v23 = vld [vmem:[#allocation2 + $0xac] sm:$0xf]  ;;  %v5335_v24 = vrot.slane %v16274_v58, 5  ;;  %v5342_v25 = vrot.slane %v16283_v41, 5 }
 0x235   : > { %18526 = vst [vmem:[#allocation20_spill] sm:$0xff] %v16249_v28  ;;  %v5332_v30 = vrot.slane %v16272_v23, 5  ;;  %v4582_v28 = vshll.u32 %v16263_v2, 16  ;;  %v16293_v47 = vrot.slane %v4544_v52, 5  ;;  %v14517_v6 = vld [vmem:[#allocation2 + $0xb4] sm:$0xff]   ;;  %v4564_v12 = vrot.slane %v4562_v59, 4 }
 0x236   : > { %v16309_v52 = vrot.slane %v4568_v63, 5  ;;  %v4575_v45 = vrot.slane %v4573_v18, 4  ;;  %v16317_v59 = vld [vmem:[#allocation2 + $0x50] sm:$0x1]  ;;  %v12140_v63 = vcombine.low %v4489_v21, %v4499_v49  ;;  %v4513_v18 = vsel %vm14903_vm9, %v16194_v55, %v16160_v35  ;;  %v16344_v49 = vld [vmem:[#allocation2 + $0xd4] sm:$0x1] }
 0x237   : > { %v5334_v17 = vrot.slane %v5332_v30, 4  ;;  %18533 = vst [vmem:[#allocation27_spill] sm:$0xff] %v16317_v59  ;;  %v4537_v35 = vsel %vm14903_vm9, %v16291_v42, %v16232_v11  ;;  %v4565_v55 = vor.u32 %v4564_v12, %v16253_v43  ;;  %v4592_v11 = vshll.u32 %v16317_v59, 16  ;;  %v4446_v42 = vld [vmem:[#allocation2 + $0x60] sm:$0xf] }
 0x238   : > { %v16388_v59 = vrot.slane %v4606_v16, 5  ;;  %v4658_v16 = vshrl.u32 %v16139_v29, 16 }
 0x239   : > { %v16303_v39 = vsel %vm15336_vm14, %v5334_v17, %v5335_v24  ;;  %v4578_v24 = vrot.slane %v4576_v48, 5  ;;  %v4588_v17 = vrot.slane %v4586_v1, 4  ;;  %v4555_v48 = vor.u32 %v16251_v3, %v16241_v34  ;;  %v16335_v1 = vld [vmem:[#allocation2 + $0xc8] sm:$0x1] }
 0x23a   : > { %18530 = vst [vmem:[#allocation24_spill] sm:$0xff] %v16303_v39  ;;  %v5349_v34 = vrot.slane %v16335_v1, 5  ;;  %v4597_v3 = vshrl.u32 %v4443_v20, 16  ;;  %v4600_v39 = vshll.u32 %v4443_v20, 16  ;;  %v4621_v20 = vshrl.u32 %v4446_v42, 16 }
 0x23b   : > { %13336 = vmatmul.mubr.bf16.gmra.mrb[20].mxu0 %v14514_v46  ;;  %v5339_v46 = vrot.slane %v16276_v57, 5 }
 0x23c   : > { %13339 = vmatprep.mubr.bf16.mxu0 %v14516_v50  ;;  %v16297_v50 = vsel %vm15336_vm14, %v12176_v8, %v5332_v30  ;;  %v16319_v8 = vrot.slane %v4582_v28, 5  ;;  %v16333_v28 = vld [vmem:[#allocation2 + $0xc4] sm:$0xf]  ;;  %v4579_v30 = vor.u32 %v4578_v24, %v4575_v45  ;;  %v4610_v45 = vshrl.u32 %v16111_v38, 16 }
 0x23d   : > { %18529 = vst [vmem:[#allocation23_spill] sm:$0xff] %v16297_v50  ;;  %v5341_v37 = vrot.slane %v5339_v46, 4  ;;  %v16307_v27 = vsel %vm15336_vm14, %v12177_v40, %v5339_v46  ;;  %v16337_v40 = vld [vmem:[#allocation2 + $0xd0] sm:$0xf]  ;;  %v5356_v46 = vrot.slane %v16344_v49, 5  ;;  %v4547_v38 = vsel %vm14903_vm9, %v16299_v14, %v16293_v47 }
 0x23e   : > { %18531 = vst [vmem:[#allocation25_spill] sm:$0xff] %v16307_v27  ;;  %v4589_v27 = vor.u32 %v4588_v17, %v16319_v8  ;;  %v16352_v50 = vld [vmem:[#allocation2 + $0x64] sm:$0xf]  ;;  %v4612_v14 = vrot.slane %v4610_v45, 4  ;;  %v4623_v2 = vrot.slane %v4621_v20, 4 }
 0x23f   : > { %v16315_v56 = vsel %vm15336_vm14, %v5341_v37, %v5342_v25  ;;  %v4523_v25 = vsel %vm14903_vm9, %v16202_v36, %v16196_v31  ;;  %v5196_v31 = vld [vmem:[#allocation2 + $0xc0] sm:$0xe]  ;;  %v5346_v36 = vrot.slane %v16333_v28, 5  ;;  %v5197_v37 = vld [vmem:[#allocation2 + $0xcc] sm:$0xe]  ;;  %18534 = vst [vmem:[#allocation28_spill] sm:$0xff] %v16352_v50 }
 0x240   : > { %18532 = vst [vmem:[#allocation26_spill] sm:$0xff] %v16315_v56  ;;  %v12178_v21 = vrot.slane %v5196_v31, 9  ;;  %v12179_v56 = vrot.slane %v5197_v37, 9  ;;  %v4624_v37 = vshll.u32 %v4446_v42, 16  ;;  %v16385_v42 = vrot.slane %v4592_v11, 5 }
 0x241   : > { %v5348_v12 = vrot.slane %v5346_v36, 4  ;;  %v4590_v47 = vrot.slane %v4589_v27, 4  ;;  %v16391_v11 = vld [vmem:[#allocation2 + $0x68] sm:$0x1]  ;;  %v16407_v45 = vld [vmem:[#allocation2 + $0x7c] sm:$0xf] }
 0x243   : > { %13340 = vmatmul.mubr.bf16.gmra.mrb[24].mxu0 %v14517_v6  ;;  %v5353_v6 = vrot.slane %v16337_v40, 5  ;;  %v16362_v24 = vsel %vm15336_vm14, %v5348_v12, %v5349_v34  ;;  %v16378_v34 = vrot.slane %v4555_v48, 4  ;;  %v4630_v12 = vshll.u32 %v16352_v50, 16 }
 0x244   : > { %13343 = vmatprep.mubr.bf16.mxu0 %v14519_v15  ;;  %v16356_v15 = vsel %vm15336_vm14, %v12178_v21, %v5346_v36  ;;  %18536 = vst [vmem:[#allocation30_spill] sm:$0xff] %v16362_v24  ;;  %v4599_v36 = vrot.slane %v4597_v3, 4  ;;  %v4580_v24 = vrot.slane %v4579_v30, 4  ;;  %v4616_v48 = vshll.u32 %v16113_v62, 16 }
 0x245   : > { %18535 = vst [vmem:[#allocation29_spill] sm:$0xff] %v16356_v15  ;;  %v5355_v31 = vrot.slane %v5353_v6, 4  ;;  %v16366_v17 = vsel %vm15336_vm14, %v12179_v56, %v5353_v6  ;;  %v16383_v6 = vrot.slane %v4565_v55, 4  ;;  %v4602_v15 = vrot.slane %v4600_v39, 5 }
 0x246   : > { %18537 = vst [vmem:[#allocation31_spill] sm:$0xff] %v16366_v17  ;;  %v4626_v56 = vrot.slane %v4624_v37, 5  ;;  %v12141_v55 = vcombine.low %v4513_v18, %v4523_v25  ;;  %v16393_v3 = vrot.slane %v4630_v12, 5  ;;  %v4654_v39 = vshll.u32 %v16139_v29, 16  ;;  %v14523_v37 = vld [vmem:[%s18352_s1 + $0x208] sm:$0xff]  }
 0x247   : > { %v16372_v21 = vsel %vm15336_vm14, %v5355_v31, %v5356_v46  ;;  %v4634_v46 = vshrl.u32 %v16352_v50, 16  ;;  %v4449_v31 = vld [vmem:[#allocation2 + $0x6c] sm:$0xf]  ;;  %v4452_v50 = vld [vmem:[#allocation2 + $0x78] sm:$0xf]  ;;  %v4561_v62 = vsel %vm14903_vm9, %v16378_v34, %v16253_v43  ;;  %v4571_v27 = vsel %vm14903_vm9, %v16383_v6, %v16309_v52 }
 0x248   : > { %18538 = vst [vmem:[#allocation32_spill] sm:$0xff] %v16372_v21  ;;  %v12142_v21 = vcombine.low %v4537_v35, %v4547_v38  ;;  %v4645_v17 = vshrl.u32 %v4449_v31, 16  ;;  %v4648_v30 = vshll.u32 %v4449_v31, 16  ;;  %v4613_v18 = vor.u32 %v4612_v14, %v16388_v59  ;;  %v4455_v12 = vld [vmem:[#allocation2 + $0x84] sm:$0xf]  ;;  %v14524_v14 = vld [vmem:[%s18352_s1 + $0x210] sm:$0xff]  }
 0x249   : > { %v4627_v25 = vor.u32 %v4626_v56, %v4623_v2  ;;  %v4640_v35 = vshll.u32 %v16391_v11, 16  ;;  %v4669_v20 = vshrl.u32 %v4452_v50, 16  ;;  %v4672_v29 = vshll.u32 %v4452_v50, 16 }
 0x24a   : > { %v4585_v43 = vsel %vm14903_vm9, %v4580_v24, %v16319_v8  ;;  %v4595_v52 = vsel %vm14903_vm9, %v4590_v47, %v16385_v42  ;;  %v4647_v2 = vrot.slane %v4645_v17, 4  ;;  %v4650_v38 = vrot.slane %v4648_v30, 5 }
 0x24b   : > { %13344 = vmatmul.mubr.bf16.gmra.mrb[28].mxu0 %v14520_v4  ;;  %v4636_v4 = vrot.slane %v4634_v46, 4  ;;  %v16421_v34 = vrot.slane %v4654_v39, 5  ;;  %v4660_v50 = vrot.slane %v4658_v16, 4  ;;  %v4614_v6 = vrot.slane %v4613_v18, 4 }
 0x24c   : > { %13363 = vmatprep.mubr.bf16.mxu0 %v12140_v63  ;;  %v4603_v63 = vor.u32 %v4602_v15, %v4599_v36  ;;  %v16418_v15 = vrot.slane %v4616_v48, 5  ;;  %v4678_v46 = vshll.u32 %v16407_v45, 16  ;;  %v4682_v8 = vshrl.u32 %v16407_v45, 16 }
 0x24d   : > { %v4637_v36 = vor.u32 %v4636_v4, %v16393_v3  ;;  %v4628_v24 = vrot.slane %v4627_v25, 4  ;;  %v4642_v42 = vrot.slane %v4640_v35, 5  ;;  %v4671_v17 = vrot.slane %v4669_v20, 4 }
 0x24e   : > { %v4604_v56 = vrot.slane %v4603_v63, 4  ;;  %v4674_v31 = vrot.slane %v4672_v29, 5  ;;  %v4693_v47 = vshrl.u32 %v4455_v12, 16  ;;  %v4696_v48 = vshll.u32 %v4455_v12, 16  ;;  %v16444_v29 = vld [vmem:[#allocation2 + $0x80] sm:$0x1] }
 0x24f   : > { %v4706_v4 = vshrl.u32 %v16174_v10, 16  ;;  %v4638_v30 = vrot.slane %v4637_v36, 4  ;;  %v4651_v39 = vor.u32 %v4650_v38, %v4647_v2  ;;  %v12143_v16 = vcombine.low %v4561_v62, %v4571_v27  ;;  %v4458_v62 = vld [vmem:[#allocation2 + $0x90] sm:$0xf]  ;;  %v14525_v27 = vld [vmem:[%s18352_s1 + $0x218] sm:$0xff]  }
 0x250   : > { %v12144_v63 = vcombine.low %v4585_v43, %v4595_v52  ;;  %v16433_v18 = vrot.slane %v4678_v46, 5  ;;  %v4684_v25 = vrot.slane %v4682_v8, 4  ;;  %v4609_v35 = vsel %vm14903_vm9, %v4604_v56, %v16388_v59 }
 0x251   : > { %v4633_v20 = vsel %vm14903_vm9, %v4628_v24, %v16393_v3  ;;  %v4698_v43 = vrot.slane %v4696_v48, 5  ;;  %v4708_v52 = vrot.slane %v4706_v4, 4  ;;  %v4652_v2 = vrot.slane %v4651_v39, 4 }
 0x252   : > { %v4685_v38 = vor.u32 %v4684_v25, %v16433_v18  ;;  %v4717_v12 = vshrl.u32 %v4458_v62, 16  ;;  %v4720_v56 = vshll.u32 %v4458_v62, 16  ;;  %v4730_v46 = vshrl.u32 %v16219_v44, 16 }
 0x253   : > { %13364 = vmatmul.mubr.bf16.vlgmr.msra.gmra.mrb[0].mxu0 %v12141_v55  ;;  %v4702_v55 = vshll.u32 %v16174_v10, 16  ;;  %v4619_v10 = vsel %vm14903_vm9, %v4614_v6, %v16418_v15  ;;  %v4643_v15 = vsel %vm14903_vm9, %v4638_v30, %v4642_v42  ;;  %v4726_v6 = vshll.u32 %v16219_v44, 16 }
 0x254   : > { %13396 = vmatpush3.bf16.msra.mxu0 %v16184_v53  ;;  %13367 = vmatprep.mubr.bf16.mxu0 %v12142_v21  ;;  %v4661_v53 = vor.u32 %v4660_v50, %v16421_v34  ;;  %v4664_v21 = vshll.u32 %v16141_v60, 16  ;;  %v4675_v60 = vor.u32 %v4674_v31, %v4671_v17  ;;  %v4688_v50 = vshll.u32 %v16444_v29, 16  ;;  %v14526_v31 = vld [vmem:[%s18352_s1 + $0x220] sm:$0xff]  }
 0x255   : > { %13397 = vmatprep.subr.bf16.mxu0 %v14523_v37  ;;  %v16449_v59 = vrot.slane %v4702_v55, 5  ;;  %v4712_v17 = vshll.u32 %v16176_v13, 16  ;;  %v12145_v48 = vcombine.low %v4609_v35, %v4619_v10  ;;  %v12146_v55 = vcombine.low %v4633_v20, %v4643_v15 }
 0x256   : > { %v4662_v36 = vrot.slane %v4661_v53, 4  ;;  %v4666_v3 = vrot.slane %v4664_v21, 5  ;;  %v4676_v8 = vrot.slane %v4675_v60, 4  ;;  %v4686_v4 = vrot.slane %v4685_v38, 4  ;;  %v4464_v21 = vld [vmem:[#allocation2 + $0xa8] sm:$0xf] }
 0x257   : > { %v4709_v42 = vor.u32 %v4708_v52, %v16449_v59  ;;  %v4690_v30 = vrot.slane %v4688_v50, 5  ;;  %v4719_v39 = vrot.slane %v4717_v12, 4  ;;  %v4722_v53 = vrot.slane %v4720_v56, 5  ;;  %v14527_v60 = vld [vmem:[%s18352_s1 + $0x228] sm:$0xff]  }
 0x258   : > { %13398 = vmatpush3.bf16.msra.mxu0 %v14523_v37  ;;  %v4695_v37 = vrot.slane %v4693_v47, 4  ;;  %v4461_v47 = vld [vmem:[#allocation2 + $0x9c] sm:$0xf]  ;;  %v4667_v44 = vsel %vm14903_vm9, %v4662_v36, %v4666_v3  ;;  %v16467_v13 = vrot.slane %v4726_v6, 5  ;;  %v4681_v35 = vsel %vm14903_vm9, %v4676_v8, %v16433_v18 }
 0x259   : > { %13399 = vmatprep.subr.bf16.mxu0 %v14524_v14  ;;  %v4744_v25 = vshll.u32 %v4461_v47, 16  ;;  %v4714_v20 = vrot.slane %v4712_v17, 5  ;;  %v4750_v62 = vshll.u32 %v16223_v61, 16  ;;  %v4691_v52 = vsel %vm14903_vm9, %v4686_v4, %v4690_v30  ;;  %v14529_v4 = vld [vmem:[%s18352_s1 + $0x238] sm:$0xff]  }
 0x25a   : > { %v4699_v24 = vor.u32 %v4698_v43, %v4695_v37  ;;  %v4765_v37 = vshrl.u32 %v4464_v21, 16  ;;  %v4768_v43 = vshll.u32 %v4464_v21, 16  ;;  %v4736_v18 = vshll.u32 %v16221_v32, 16  ;;  %v14528_v32 = vld [vmem:[%s18352_s1 + $0x230] sm:$0xff]  }
 0x25b   : > { %13368 = vmatmul.mubr.bf16.gmra.mrb[4].mxu0 %v12143_v16  ;;  %v4732_v16 = vrot.slane %v4730_v46, 4  ;;  %v4774_v15 = vshll.u32 %v16272_v23, 16  ;;  %v4723_v36 = vor.u32 %v4722_v53, %v4719_v39  ;;  %v4746_v50 = vrot.slane %v4744_v25, 5 }
 0x25c   : > { %13371 = vmatprep.mubr.bf16.mxu0 %v12144_v63  ;;  %13400 = vmatpush3.bf16.msra.mxu0 %v14524_v14  ;;  %v4657_v14 = vsel %vm14903_vm9, %v4652_v2, %v16421_v34  ;;  %v4741_v63 = vshrl.u32 %v4461_v47, 16  ;;  %v4700_v10 = vrot.slane %v4699_v24, 4  ;;  %v4710_v34 = vrot.slane %v4709_v42, 4  ;;  %v4467_v47 = vld [vmem:[#allocation2 + $0xb4] sm:$0xf] }
 0x25d   : > { %13401 = vmatprep.subr.bf16.mxu0 %v14525_v27  ;;  %v4778_v2 = vshrl.u32 %v16272_v23, 16  ;;  %v4733_v3 = vor.u32 %v4732_v16, %v16467_v13  ;;  %v16491_v23 = vrot.slane %v4750_v62, 5  ;;  %v4767_v46 = vrot.slane %v4765_v37, 4  ;;  %v4470_v16 = vld [vmem:[#allocation2 + $0xc0] sm:$0xf] }
 0x25e   : > { %v4743_v38 = vrot.slane %v4741_v63, 4  ;;  %v4705_v12 = vsel %vm14903_vm9, %v4700_v10, %v16449_v59  ;;  %v4715_v56 = vsel %vm14903_vm9, %v4710_v34, %v4714_v20  ;;  %v4770_v8 = vrot.slane %v4768_v43, 5 }
 0x25f   : > { %v12148_v24 = vcombine.low %v4681_v35, %v4691_v52  ;;  %v4738_v42 = vrot.slane %v4736_v18, 5  ;;  %v16493_v17 = vrot.slane %v4774_v15, 5  ;;  %v4724_v59 = vrot.slane %v4723_v36, 4 }
 0x260   : > { %13402 = vmatpush3.bf16.msra.mxu0 %v14525_v27  ;;  %v4754_v27 = vshrl.u32 %v16223_v61, 16  ;;  %v12147_v61 = vcombine.low %v4657_v14, %v4667_v44  ;;  %v4760_v14 = vshll.u32 %v16225_v26, 16  ;;  %v12149_v44 = vcombine.low %v4705_v12, %v4715_v56  ;;  %v4473_v56 = vld [vmem:[#allocation2 + $0xcc] sm:$0xf] }
 0x261   : > { %13403 = vmatprep.subr.bf16.mxu0 %v14526_v31  ;;  %v4771_v39 = vor.u32 %v4770_v8, %v4767_v46  ;;  %v4784_v53 = vshll.u32 %v16274_v58, 16  ;;  %v4789_v21 = vshrl.u32 %v4467_v47, 16  ;;  %v4792_v25 = vshll.u32 %v4467_v47, 16 }
 0x262   : > { %v4756_v6 = vrot.slane %v4754_v27, 4  ;;  %v4798_v26 = vshll.u32 %v16276_v57, 16  ;;  %v4802_v35 = vshrl.u32 %v16276_v57, 16  ;;  %v4729_v10 = vsel %vm14903_vm9, %v4724_v59, %v16467_v13 }
 0x263   : > { %13372 = vmatmul.mubr.bf16.gmra.mrb[8].mxu0 %v12145_v48  ;;  %v4734_v48 = vrot.slane %v4733_v3, 4  ;;  %v4762_v58 = vrot.slane %v4760_v14, 5  ;;  %v4816_v62 = vshll.u32 %v4470_v16, 16  ;;  %v4822_v27 = vshll.u32 %v16333_v28, 16 }
 0x264   : > { %13375 = vmatprep.mubr.bf16.mxu0 %v12146_v55  ;;  %13404 = vmatpush3.bf16.msra.mxu0 %v14526_v31  ;;  %v4780_v31 = vrot.slane %v4778_v2, 4  ;;  %v4747_v55 = vor.u32 %v4746_v50, %v4743_v38  ;;  %v4757_v30 = vor.u32 %v4756_v6, %v16491_v23  ;;  %v4826_v37 = vshrl.u32 %v16333_v28, 16 }
 0x265   : > { %13405 = vmatprep.subr.bf16.mxu0 %v14527_v60  ;;  %v4739_v34 = vsel %vm14903_vm9, %v4734_v48, %v4738_v42  ;;  %v4772_v57 = vrot.slane %v4771_v39, 4  ;;  %v4786_v52 = vrot.slane %v4784_v53, 5  ;;  %v4791_v18 = vrot.slane %v4789_v21, 4 }
 0x266   : > { %v4781_v63 = vor.u32 %v4780_v31, %v16493_v17  ;;  %v4748_v20 = vrot.slane %v4747_v55, 4  ;;  %v4758_v43 = vrot.slane %v4757_v30, 4  ;;  %v4794_v2 = vrot.slane %v4792_v25, 5 }
 0x267   : > { %v4800_v13 = vrot.slane %v4798_v26, 5  ;;  %v4804_v36 = vrot.slane %v4802_v35, 4  ;;  %v12150_v3 = vcombine.low %v4729_v10, %v4739_v34  ;;  %v4818_v50 = vrot.slane %v4816_v62, 5  ;;  %v5182_v62 = vld [vmem:[#allocation2 + $0x18] sm:$0xe] }
 0x268   : > { %13406 = vmatpush3.bf16.msra.mxu0 %v14527_v60  ;;  %v4813_v60 = vshrl.u32 %v4470_v16, 16  ;;  %v4782_v15 = vrot.slane %v4781_v63, 4  ;;  %v4828_v12 = vrot.slane %v4826_v37, 4  ;;  %v4753_v28 = vsel %vm14903_vm9, %v4748_v20, %v16491_v23 }
 0x269   : > { %13407 = vmatprep.subr.bf16.mxu0 %v14528_v32  ;;  %v4808_v6 = vshll.u32 %v16283_v41, 16  ;;  %v4777_v46 = vsel %vm14903_vm9, %v4772_v57, %v16493_v17  ;;  %v4805_v42 = vor.u32 %v4804_v36, %v4800_v13  ;;  %v4837_v31 = vshrl.u32 %v4473_v56, 16 }
 0x26a   : > { %v4815_v38 = vrot.slane %v4813_v60, 4  ;;  %v4787_v8 = vsel %vm14903_vm9, %v4782_v15, %v4786_v52  ;;  %v4840_v47 = vshll.u32 %v4473_v56, 16  ;;  %v4846_v23 = vshll.u32 %v16337_v40, 16 }
 0x26b   : > { %13376 = vmatmul.mubr.bf16.gmra.mrb[12].mxu0 %v12147_v61  ;;  %v4824_v61 = vrot.slane %v4822_v27, 5  ;;  %v4850_v59 = vshrl.u32 %v16337_v40, 16  ;;  %v4832_v41 = vshll.u32 %v16335_v1, 16  ;;  %v4806_v17 = vrot.slane %v4805_v42, 4 }
 0x26c   : > { %13379 = vmatprep.mubr.bf16.mxu0 %v12148_v24  ;;  %13408 = vmatpush3.bf16.msra.mxu0 %v14528_v32  ;;  %v4763_v32 = vsel %vm14903_vm9, %v4758_v43, %v4762_v58  ;;  %v4795_v24 = vor.u32 %v4794_v2, %v4791_v18  ;;  %v4819_v48 = vor.u32 %v4818_v50, %v4815_v38  ;;  %v4810_v30 = vrot.slane %v4808_v6, 5  ;;  %v5183_v38 = vld [vmem:[#allocation2 + $0x24] sm:$0xe] }
 0x26d   : > { %13409 = vmatprep.subr.bf16.mxu0 %v14529_v4  ;;  %v4829_v55 = vor.u32 %v4828_v12, %v4824_v61  ;;  %v12151_v14 = vcombine.low %v4753_v28, %v4763_v32  ;;  %v4839_v39 = vrot.slane %v4837_v31, 4  ;;  %v4842_v53 = vrot.slane %v4840_v47, 5  ;;  %v5185_v31 = vld [vmem:[#allocation2 + $0x3c] sm:$0xe]  ;;  %v18539_v47 = vld [vmem:[#allocation22_spill] sm:$0xff] }
 0x26e   : > { %v4848_v21 = vrot.slane %v4846_v23, 5  ;;  %v4852_v16 = vrot.slane %v4850_v59, 4  ;;  %v4820_v63 = vrot.slane %v4819_v48, 4  ;;  %v4834_v26 = vrot.slane %v4832_v41, 5 }
 0x26f   : > { %v4830_v25 = vrot.slane %v4829_v55, 4  ;;  %v4811_v1 = vsel %vm14903_vm9, %v4806_v17, %v4810_v30  ;;  %v4843_v35 = vor.u32 %v4842_v53, %v4839_v39  ;;  %v4856_v34 = vshll.u32 %v16344_v49, 16  ;;  %v18541_v30 = vld [vmem:[#allocation27_spill] sm:$0xff] }
 0x270   : > { %13410 = vmatpush3.bf16.msra.mxu0 %v14529_v4  ;;  %v4796_v4 = vrot.slane %v4795_v24, 4  ;;  %v4853_v10 = vor.u32 %v4852_v16, %v4848_v21  ;;  %v4825_v20 = vsel %vm14903_vm9, %v4820_v63, %v4824_v61  ;;  %v5248_v60 = vrot.slane %v16120_v51, 5  ;;  %v18542_v63 = vld [vmem:[#allocation28_spill] sm:$0xff] }
 0x271   : > { %v4835_v58 = vsel %vm14903_vm9, %v4830_v25, %v4834_v26  ;;  %v4844_v43 = vrot.slane %v4843_v35, 4  ;;  %v4858_v52 = vrot.slane %v4856_v34, 5  ;;  %v12164_v18 = vrot.slane %v5182_v62, 9  ;;  %v5188_v26 = vld [vmem:[#allocation2 + $0x60] sm:$0xe] }
 0x272   : > { %v4801_v40 = vsel %vm14903_vm9, %v4796_v4, %v4800_v13  ;;  %v12154_v37 = vcombine.low %v4825_v20, %v4835_v58  ;;  %v4854_v57 = vrot.slane %v4853_v10, 4  ;;  %v5250_v15 = vrot.slane %v5248_v60, 4  ;;  %v5190_v62 = vld [vmem:[#allocation2 + $0x78] sm:$0xe] }
 0x273   : > { %13380 = vmatmul.mubr.bf16.gmra.mrb[16].mxu0 %v12149_v44  ;;  %v12152_v44 = vcombine.low %v4777_v46, %v4787_v8  ;;  %v12153_v27 = vcombine.low %v4801_v40, %v4811_v1  ;;  %v5251_v2 = vrot.slane %v16152_v19, 5  ;;  %v4849_v49 = vsel %vm14903_vm9, %v4844_v43, %v4848_v21  ;;  %v5184_v19 = vld [vmem:[#allocation2 + $0x30] sm:$0xe] }
 0x274   : > { %13383 = vmatprep.mubr.bf16.mxu0 %v12150_v3  ;;  %v4859_v13 = vsel %vm14903_vm9, %v4854_v57, %v4858_v52  ;;  %v5255_v51 = vrot.slane %v16133_v7, 5  ;;  %v5249_v36 = vsel %vm15336_vm14, %v12164_v18, %v5248_v60  ;;  %v5262_v50 = vrot.slane %v16186_v9, 5  ;;  %v18543_v52 = vld [vmem:[#allocation11_spill] sm:$0xff]  ;;  %v18544_v18 = vld [vmem:[#allocation12_spill] sm:$0xff] }
 0x275   : > { %v5252_v3 = vsel %vm15336_vm14, %v5250_v15, %v5251_v2  ;;  %v12155_v61 = vcombine.low %v4849_v49, %v4859_v13  ;;  %v12165_v56 = vrot.slane %v5183_v38, 9  ;;  %v5258_v32 = vrot.slane %v16158_v22, 5  ;;  %v18546_v13 = vld [vmem:[#allocation13_spill] sm:$0xff]  ;;  %v18552_v38 = vld [vmem:[#allocation18_spill] sm:$0xff] }
 0x276   : > { %v12196_v12 = vcombine.low %v5249_v36, %v5252_v3  ;;  %v5257_v28 = vrot.slane %v5255_v51, 4  ;;  %v12166_v6 = vrot.slane %v5184_v19, 9  ;;  %v5264_v46 = vrot.slane %v5262_v50, 4  ;;  %v18549_v36 = vld [vmem:[#allocation15_spill] sm:$0xff]  ;;  %v18550_v3 = vld [vmem:[#allocation16_spill] sm:$0xff] }
 0x277   : > { %v5265_v7 = vrot.slane %v16217_v0, 5  ;;  %v5256_v8 = vsel %vm15336_vm14, %v12165_v56, %v5255_v51  ;;  %v5269_v9 = vrot.slane %v16213_v5, 5  ;;  %v5276_v23 = vrot.slane %v18539_v47, 5  ;;  %v5186_v0 = vld [vmem:[#allocation2 + $0x48] sm:$0xe] }
 0x278   : > { %v5259_v24 = vsel %vm15336_vm14, %v5257_v28, %v5258_v32  ;;  %v5263_v42 = vsel %vm15336_vm14, %v12166_v6, %v5262_v50  ;;  %v12167_v55 = vrot.slane %v5185_v31, 9  ;;  %v12168_v4 = vrot.slane %v5186_v0, 9  ;;  %v18553_v50 = vld [vmem:[#allocation19_spill] sm:$0xff]  ;;  %v18559_v32 = vld [vmem:[#allocation24_spill] sm:$0xff] }
 0x279   : > { %v5266_v22 = vsel %vm15336_vm14, %v5264_v46, %v5265_v7  ;;  %v12197_v59 = vcombine.low %v5256_v8, %v5259_v24  ;;  %v5271_v41 = vrot.slane %v5269_v9, 4  ;;  %v5278_v17 = vrot.slane %v5276_v23, 4  ;;  %v18558_v28 = vld [vmem:[#allocation23_spill] sm:$0xff]  ;;  %v18561_v46 = vld [vmem:[#allocation25_spill] sm:$0xff]  ;;  %v18562_v7 = vld [vmem:[#allocation26_spill] sm:$0xff] }
 0x27a   : > { %v12198_v48 = vcombine.low %v5263_v42, %v5266_v22  ;;  %v5279_v5 = vrot.slane %v18541_v30, 5  ;;  %v5270_v39 = vsel %vm15336_vm14, %v12167_v55, %v5269_v9  ;;  %v5277_v21 = vsel %vm15336_vm14, %v12168_v4, %v5276_v23  ;;  %v18564_v24 = vld [vmem:[#allocation29_spill] sm:$0xff]  ;;  %v18565_v9 = vld [vmem:[#allocation30_spill] sm:$0xff]  ;;  %v18567_v22 = vld [vmem:[#allocation31_spill] sm:$0xff] }
 0x27b   : > { %13384 = vmatmul.mubr.bf16.gmra.mrb[20].mxu0 %v12151_v14  ;;  %v18540_v14 = vld [vmem:[#allocation17_spill] sm:$0xff]  ;;  %v5290_v25 = vrot.slane %v18542_v63, 5  ;;  %v12170_v35 = vrot.slane %v5188_v26, 9  ;;  %v5293_v34 = vrot.slane %v16391_v11, 5  ;;  %v5304_v60 = vrot.slane %v16407_v45, 5  ;;  %v18547_v45 = vld [vmem:[#allocation14_spill] sm:$0xff] }
 0x27c   : > { %13387 = vmatprep.mubr.bf16.mxu0 %v12152_v44  ;;  %v5272_v44 = vrot.slane %v18540_v14, 5  ;;  %v5280_v16 = vsel %vm15336_vm14, %v5278_v17, %v5279_v5  ;;  %v5307_v57 = vrot.slane %v16444_v29, 5  ;;  %v18545_v15 = vcombine.low %v18543_v52, %v18544_v18  ;;  %v18568_v31 = vld [vmem:[#allocation32_spill] sm:$0xff]  ;;  %v14530_v23 = vld [vmem:[#allocation4 + $0x40] sm:$0xff]   ;;  %v5798_v55 = vld [vmem:[#allocation3 + $0xc] sm:$0x1] }
 0x27d   : > { %v12200_v1 = vcombine.low %v5277_v21, %v5280_v16  ;;  %v5292_v10 = vrot.slane %v5290_v25, 4  ;;  %v5291_v20 = vsel %vm15336_vm14, %v12170_v35, %v5290_v25  ;;  %v5306_v43 = vrot.slane %v5304_v60, 4  ;;  %v5801_v0 = vld [vmem:[#allocation3 + $0x18] sm:$0x1]  ;;  %13443 = vmatprep.subr.bf16.mxu1 %v14530_v23  ;;  %v5849_v14 = vld [vmem:[#allocation3 + $0x20] sm:$0x1] }
 0x27e   : > { %v5273_v53 = vsel %vm15336_vm14, %v5271_v41, %v5272_v44  ;;  %v18548_v51 = vcombine.low %v18546_v13, %v18547_v45  ;;  %v18551_v29 = vcombine.low %v18549_v36, %v18550_v3  ;;  %v18554_v19 = vcombine.low %v18552_v38, %v18553_v50  ;;  %13444 = vmatpush3.bf16.msra.mxu1 %v14530_v23  ;;  %v5846_v17 = vld [vmem:[#allocation3 + $0x14] sm:$0x1]  ;;  %v5807_v5 = vld [vmem:[#allocation3 + $0x30] sm:$0x1]  ;;  %v14531_v16 = vld [vmem:[#allocation4 + $0x48] sm:$0xff]  }
 0x27f   : > { %v12199_v40 = vcombine.low %v5270_v39, %v5273_v53  ;;  %v5294_v58 = vsel %vm15336_vm14, %v5292_v10, %v5293_v34  ;;  %v5308_v2 = vsel %vm15336_vm14, %v5306_v43, %v5307_v57  ;;  %v18560_v6 = vcombine.low %v18558_v28, %v18559_v32  ;;  %v5804_v53 = vld [vmem:[#allocation3 + $0x24] sm:$0x1]  ;;  %13445 = vmatprep.subr.bf16.mxu1 %v14531_v16  ;;  %v14532_v63 = vld [vmem:[#allocation4 + $0x50] sm:$0xff]   ;;  %v5855_v25 = vld [vmem:[#allocation3 + $0x38] sm:$0x1] }
 0x280   : > { %v18563_v8 = vcombine.low %v18561_v46, %v18562_v7  ;;  %v18566_v42 = vcombine.low %v18564_v24, %v18565_v9  ;;  %v18569_v47 = vcombine.low %v18567_v22, %v18568_v31  ;;  %v5799_v41 = vsel %vm14874_vm5, 0, %v5798_v55  ;;  %v14534_v10 = vld [vmem:[#allocation4 + $0x60] sm:$0xff]   ;;  %v5813_v34 = vld [vmem:[#allocation3 + $0x48] sm:$0x1]  ;;  %v14535_v57 = vld [vmem:[#allocation4 + $0x68] sm:$0xff]  }
 0x281   : > { %5800 = vst [vmem:[#allocation3 + $0xc] sm:$0x1] %v5799_v41  ;;  %v5850_v4 = vsel %vm14888_vm7, 0, %v5849_v14  ;;  %v5847_v30 = vsel %vm14888_vm7, 0, %v5846_v17  ;;  %v5808_v39 = vsel %vm14874_vm5, 0, %v5807_v5  ;;  %v5805_v21 = vsel %vm14874_vm5, 0, %v5804_v53 }
 0x282   : > { %5851 = vst [vmem:[#allocation3 + $0x20] sm:$0x1] %v5850_v4  ;;  %5848 = vst [vmem:[#allocation3 + $0x14] sm:$0x1] %v5847_v30  ;;  %13446 = vmatpush3.bf16.msra.mxu1 %v14531_v16  ;;  %v5856_v26 = vsel %vm14888_vm7, 0, %v5855_v25  ;;  %v16651_v30 = vld [vmem:[#allocation4] sm:$0xff]  }
 0x283   : > { %13388 = vmatmul.mubr.bf16.gmra.mrb[24].mxu0 %v12153_v27  ;;  %v12202_v27 = vcombine.low %v5291_v20, %v5294_v58  ;;  %5809 = vst [vmem:[#allocation3 + $0x30] sm:$0x1] %v5808_v39  ;;  %5806 = vst [vmem:[#allocation3 + $0x24] sm:$0x1] %v5805_v21  ;;  %13447 = vmatprep.subr.bf16.mxu1 %v14532_v63  ;;  %v5814_v20 = vsel %vm14874_vm5, 0, %v5813_v34 }
 0x284   : > { %13391 = vmatprep.mubr.bf16.mxu0 %v12154_v37  ;;  %v12172_v37 = vrot.slane %v5190_v62, 9  ;;  %5857 = vst [vmem:[#allocation3 + $0x38] sm:$0x1] %v5856_v26  ;;  %v5810_v58 = vld [vmem:[#allocation3 + $0x3c] sm:$0x1] }
 0x285   : > { %5815 = vst [vmem:[#allocation3 + $0x48] sm:$0x1] %v5814_v20  ;;  %v5861_v62 = vld [vmem:[#allocation3 + $0x50] sm:$0x1]  ;;  %v5819_v52 = vld [vmem:[#allocation3 + $0x60] sm:$0x1] }
 0x286   : > { %v5305_v11 = vsel %vm15336_vm14, %v12172_v37, %v5304_v60  ;;  %13448 = vmatpush3.bf16.msra.mxu1 %v14532_v63  ;;  %v5811_v60 = vsel %vm14874_vm5, 0, %v5810_v58  ;;  %v5858_v37 = vld [vmem:[#allocation3 + $0x44] sm:$0x1]  ;;  %v5820_v18 = vsel %vm14874_vm5, 0, %v5819_v52  ;;  %v5867_v36 = vld [vmem:[#allocation3 + $0x68] sm:$0x1] }
 0x287   : > { %v12204_v49 = vcombine.low %v5305_v11, %v5308_v2  ;;  %5812 = vst [vmem:[#allocation3 + $0x3c] sm:$0x1] %v5811_v60  ;;  %v5859_v43 = vsel %vm14888_vm7, 0, %v5858_v37  ;;  %v14536_v11 = vld [vmem:[#allocation4 + $0x70] sm:$0xff]   ;;  %5821 = vst [vmem:[#allocation3 + $0x60] sm:$0x1] %v5820_v18 }
 0x288   : > { %5860 = vst [vmem:[#allocation3 + $0x44] sm:$0x1] %v5859_v43  ;;  %v6423_v13 = vld [vmem:[#allocation3 + $0x4] sm:$0xf]  ;;  %v5868_v38 = vsel %vm14888_vm7, 0, %v5867_v36 }
 0x289   : > { %v6496_v3 = vshll.u32 %v6423_v13, 16  ;;  %v5864_v50 = vld [vmem:[#allocation3 + $0x5c] sm:$0x1]  ;;  %5869 = vst [vmem:[#allocation3 + $0x68] sm:$0x1] %v5868_v38 }
 0x28a   : > { %v5825_v9 = vld [vmem:[#allocation3 + $0x78] sm:$0x1]  ;;  %v5873_v55 = vld [vmem:[#allocation3 + $0x80] sm:$0x1]  ;;  %v5870_v4 = vld [vmem:[#allocation3 + $0x74] sm:$0x1] }
 0x28b   : > { %13392 = vmatmul.mubr.bf16.gmra.mrb[28].mxu0 %v12155_v61  ;;  %v18555_v61 = vld [vmem:[#allocation20_spill] sm:$0xff]  ;;  %v6498_v28 = vrot.slane %v6496_v3, 5  ;;  %v5826_v31 = vsel %vm14874_vm5, 0, %v5825_v9  ;;  %v5874_v14 = vsel %vm14888_vm7, 0, %v5873_v55  ;;  %v5871_v17 = vsel %vm14888_vm7, 0, %v5870_v4 }
 0x28c   : > { %13411 = vmatprep.mubr.bf16.mxu0 %v12196_v12  ;;  %v18556_v12 = vld [vmem:[#allocation21_spill] sm:$0xff]  ;;  %5827 = vst [vmem:[#allocation3 + $0x78] sm:$0x1] %v5826_v31  ;;  %5875 = vst [vmem:[#allocation3 + $0x80] sm:$0x1] %v5874_v14 }
 0x28d   : > { %v18557_v56 = vcombine.low %v18555_v61, %v18556_v12  ;;  %v5865_v12 = vsel %vm14888_vm7, 0, %v5864_v50  ;;  %5872 = vst [vmem:[#allocation3 + $0x74] sm:$0x1] %v5871_v17  ;;  %v5831_v5 = vld [vmem:[#allocation3 + $0x90] sm:$0x1] }
 0x28e   : > { %5866 = vst [vmem:[#allocation3 + $0x5c] sm:$0x1] %v5865_v12  ;;  %v5832_v39 = vsel %vm14874_vm5, 0, %v5831_v5  ;;  %v5828_v53 = vld [vmem:[#allocation3 + $0x84] sm:$0x1] }
 0x28f   : > { %5833 = vst [vmem:[#allocation3 + $0x90] sm:$0x1] %v5832_v39  ;;  %v5879_v21 = vld [vmem:[#allocation3 + $0x98] sm:$0x1]  ;;  %v5829_v16 = vsel %vm14874_vm5, 0, %v5828_v53 }
 0x290   : > { %v5880_v63 = vsel %vm14888_vm7, 0, %v5879_v21  ;;  %v5876_v25 = vld [vmem:[#allocation3 + $0x8c] sm:$0x1]  ;;  %5830 = vst [vmem:[#allocation3 + $0x84] sm:$0x1] %v5829_v16 }
 0x291   : > { %5881 = vst [vmem:[#allocation3 + $0x98] sm:$0x1] %v5880_v63  ;;  %v5877_v26 = vsel %vm14888_vm7, 0, %v5876_v25  ;;  %v5885_v34 = vld [vmem:[#allocation3 + $0xb0] sm:$0x1] }
 0x292   : > { %5878 = vst [vmem:[#allocation3 + $0x8c] sm:$0x1] %v5877_v26  ;;  %v5882_v20 = vld [vmem:[#allocation3 + $0xa4] sm:$0x1]  ;;  %v5886_v58 = vsel %vm14888_vm7, 0, %v5885_v34 }
 0x293   : > { %13412 = vmatmul.mubr.bf16.vlgmr.msra.gmra.mrb[0].mxu0 %v12197_v59  ;;  %v5883_v60 = vsel %vm14888_vm7, 0, %v5882_v20  ;;  %5887 = vst [vmem:[#allocation3 + $0xb0] sm:$0x1] %v5886_v58  ;;  %v5840_v37 = vld [vmem:[#allocation3 + $0xb4] sm:$0x1] }
 0x294   : > { %13415 = vmatprep.mubr.bf16.mxu0 %v12198_v48  ;;  %v5802_v48 = vsel %vm14874_vm5, 0, %v5801_v0  ;;  %5884 = vst [vmem:[#allocation3 + $0xa4] sm:$0x1] %v5883_v60  ;;  %v5891_v43 = vld [vmem:[#allocation3 + $0xc8] sm:$0x1] }
 0x295   : > { %5803 = vst [vmem:[#allocation3 + $0x18] sm:$0x1] %v5802_v48  ;;  %v5892_v52 = vsel %vm14888_vm7, 0, %v5891_v43  ;;  %v5888_v18 = vld [vmem:[#allocation3 + $0xbc] sm:$0x1] }
 0x296   : > { %5893 = vst [vmem:[#allocation3 + $0xc8] sm:$0x1] %v5892_v52  ;;  %v6310_v26 = vld [vmem:[#allocation3 + $0xc] sm:$0xf]  ;;  %v6321_v34 = vld [vmem:[#allocation3 + $0x20] sm:$0x1] }
 0x297   : > { %v6314_v43 = vld [vmem:[#allocation3 + $0x14] sm:$0x1] }
 0x29b   : > { %13416 = vmatmul.mubr.bf16.gmra.mrb[4].mxu0 %v12199_v40  ;;  %v5852_v40 = vld [vmem:[#allocation3 + $0x2c] sm:$0x1] }
 0x29c   : > { %13419 = vmatprep.mubr.bf16.mxu0 %v12200_v1  ;;  %v14533_v1 = vld [vmem:[#allocation4 + $0x58] sm:$0xff]   ;;  %v5853_v35 = vsel %vm14888_vm7, 0, %v5852_v40  ;;  %v5837_v40 = vld [vmem:[#allocation3 + $0xa8] sm:$0x1]  ;;  %v6317_v5 = vld [vmem:[#allocation3 + $0x18] sm:$0xf] }
 0x29d   : > { %5854 = vst [vmem:[#allocation3 + $0x2c] sm:$0x1] %v5853_v35  ;;  %13449 = vmatprep.subr.bf16.mxu1 %v14533_v1  ;;  %v5834_v35 = vld [vmem:[#allocation3 + $0x9c] sm:$0x1] }
 0x29e   : > { %13450 = vmatpush3.bf16.msra.mxu1 %v14533_v1  ;;  %v5838_v1 = vsel %vm14874_vm5, 0, %v5837_v40 }
 0x29f   : > { %13451 = vmatprep.subr.bf16.mxu1 %v14534_v10  ;;  %5839 = vst [vmem:[#allocation3 + $0xa8] sm:$0x1] %v5838_v1 }
 0x2a2   : > { %13452 = vmatpush3.bf16.msra.mxu1 %v14534_v10  ;;  %v5835_v10 = vsel %vm14874_vm5, 0, %v5834_v35 }
 0x2a3   : > { %13420 = vmatmul.mubr.bf16.gmra.mrb[8].mxu0 %v18545_v15  ;;  %13453 = vmatprep.subr.bf16.mxu1 %v14535_v57  ;;  %v5816_v15 = vld [vmem:[#allocation3 + $0x54] sm:$0x1]  ;;  %5836 = vst [vmem:[#allocation3 + $0x9c] sm:$0x1] %v5835_v10 }
 0x2a4   : > { %13423 = vmatprep.mubr.bf16.mxu0 %v12202_v27  ;;  %v5862_v27 = vsel %vm14888_vm7, 0, %v5861_v62  ;;  %v5817_v2 = vsel %vm14874_vm5, 0, %v5816_v15  ;;  %v5843_v62 = vld [vmem:[#allocation3 + $0xc0] sm:$0x1]  ;;  %v5889_v15 = vsel %vm14888_vm7, 0, %v5888_v18 }
 0x2a5   : > { %5863 = vst [vmem:[#allocation3 + $0x50] sm:$0x1] %v5862_v27  ;;  %5818 = vst [vmem:[#allocation3 + $0x54] sm:$0x1] %v5817_v2  ;;  %v5844_v27 = vsel %vm14874_vm5, 0, %v5843_v62 }
 0x2a6   : > { %13454 = vmatpush3.bf16.msra.mxu1 %v14535_v57  ;;  %5845 = vst [vmem:[#allocation3 + $0xc0] sm:$0x1] %v5844_v27  ;;  %v5841_v57 = vsel %vm14874_vm5, 0, %v5840_v37  ;;  %5890 = vst [vmem:[#allocation3 + $0xbc] sm:$0x1] %v5889_v15 }
 0x2a7   : > { %13455 = vmatprep.subr.bf16.mxu1 %v14536_v11  ;;  %5842 = vst [vmem:[#allocation3 + $0xb4] sm:$0x1] %v5841_v57 }
 0x2aa   : > { %13456 = vmatpush3.bf16.msra.mxu1 %v14536_v11  ;;  %v16681_v11 = vld [vmem:[%s18353_s2] ss:$0 sm:$0xff] }
 0x2ab   : > { %13424 = vmatmul.mubr.bf16.gmra.mrb[12].mxu0 %v18548_v51 }
 0x2ac   : > { %13427 = vmatprep.mubr.bf16.mxu0 %v12204_v49  ;;  %v6422_v49 = vld [vmem:[#allocation3] sm:$0xf] }
 0x2ad   : > { %v6487_v45 = vshrl.u32 %v6422_v49, 16  ;;  %v6490_v51 = vshll.u32 %v6422_v49, 16  ;;  %v16686_v49 = vld [vmem:[%s18354_s3] ss:$0 sm:$0xff] }
 0x2af   : > { %v6489_v61 = vrot.slane %v6487_v45, 4 }
 0x2b3   : > { %13428 = vmatmul.mubr.bf16.gmra.mrb[16].mxu0 %v18551_v29  ;;  %v6500_v29 = vshrl.u32 %v6423_v13, 16 }
 0x2b4   : > { %13431 = vmatprep.mubr.bf16.mxu0 %v18554_v19  ;;  %v6470_v19 = vld [vmem:[#allocation3 + $0x8] sm:$0x1] }
 0x2b5   : > { %v6502_v32 = vrot.slane %v6500_v29, 4  ;;  %v6506_v46 = vshll.u32 %v6470_v19, 16 }
 0x2b7   : > { %v6508_v24 = vrot.slane %v6506_v46, 5 }
 0x2bb   : > { %13432 = vmatmul.mubr.bf16.gmra.mrb[20].mxu0 %v18557_v56  ;;  %v6492_v56 = vrot.slane %v6490_v51, 5 }
 0x2bc   : > { %13435 = vmatprep.mubr.bf16.mxu0 %v18560_v6  ;;  %v14537_v6 = vld [vmem:[#allocation4 + $0x78] sm:$0xff]  }
 0x2bd   : > { %v6493_v7 = vor.u32 %v6492_v56, %v6489_v61  ;;  %13457 = vmatprep.subr.bf16.mxu1 %v14537_v6 }
 0x2be   : > { %13458 = vmatpush3.bf16.msra.mxu1 %v14537_v6 }
 0x2bf   : > { %13491 = vmatprep.subr.bf16.mxu1 %v16651_v30 }
 0x2c3   : > { %13436 = vmatmul.mubr.bf16.gmra.mrb[24].mxu0 %v18563_v8  ;;  %v6503_v8 = vor.u32 %v6502_v32, %v6498_v28 }
 0x2c4   : > { %13439 = vmatprep.mubr.bf16.mxu0 %v18566_v42  ;;  %v6494_v42 = vrot.slane %v6493_v7, 4 }
 0x2c5   : > { %v6504_v22 = vrot.slane %v6503_v8, 4 }
 0x2c6   : > { %v6499_v0 = vsel %vm14903_vm9, %v6494_v42, %v6498_v28 }
 0x2c7   : > { %v6509_v48 = vsel %vm14903_vm9, %v6504_v22, %v6508_v24 }
 0x2c8   : > { %v12254_v41 = vcombine.low %v6499_v0, %v6509_v48 }
 0x2ca   : > { %13459 = vmatprep.mubr.bf16.mxu1 %v12254_v41 }
 0x2cb   : > { %13440 = vmatmul.mubr.bf16.gmra.mrb[28].mxu0 %v18569_v47  ;;  %v5822_v47 = vld [vmem:[#allocation3 + $0x6c] sm:$0x1] }
 0x2cc   : > { %v5823_v23 = vsel %vm14874_vm5, 0, %v5822_v47 }
 0x2cd   : > { %5824 = vst [vmem:[#allocation3 + $0x6c] sm:$0x1] %v5823_v23 }
 0x366   : > { %v13413_v2 = vpop.f32.mrb[0].mxu0 }
 0x367   : > { %v5689_v13 = vmul.f32 %v13413_v2, %v16681_v11  ;;  %v5521_v45 = vpop.f32.mrb[1].mxu0 }
 0x368   : > { %v5687_v51 = vmul.f32 %v16681_v11, %v5521_v45  ;;  %v13414_v36 = vpop.f32.mrb[2].mxu0 }
 0x369   : > { %v5728_v44 = vadd.f32 %v16686_v49, %v5689_v13  ;;  %v5690_v3 = vmul.f32 %v13414_v36, %v16681_v11  ;;  %v5524_v29 = vpop.f32.mrb[3].mxu0 }
 0x36a   : > { %v5726_v38 = vadd.f32 %v16686_v49, %v5687_v51  ;;  %v5688_v50 = vmul.f32 %v16681_v11, %v5524_v29 }
 0x36b   : > { %v5760_v19 = vmax.f32 %v5728_v44, 0.0  ;;  %v5729_v61 = vadd.f32 %v16686_v49, %v5690_v3 }
 0x36c   : > { %v5758_v12 = vmax.f32 %v5726_v38, 0.0  ;;  %v5727_v56 = vadd.f32 %v16686_v49, %v5688_v50 }
 0x36d   : > { %v12526_v28 = vpack.c.bf16 %v5760_v19, %v5760_v19  ;;  %v5761_v32 = vmax.f32 %v5729_v61, 0.0 }
 0x36e   : > { %v12524_v6 = vpack.c.bf16 %v5758_v12, %v5758_v12  ;;  %v5759_v46 = vmax.f32 %v5727_v56, 0.0  ;;  %v13417_v7 = vpop.f32.mrb[4].mxu0 }
 0x36f   : > { %v6008_v8 = vshrl.u32 %v12526_v28, 16  ;;  %v6011_v24 = vshll.u32 %v12526_v28, 16  ;;  %v12527_v9 = vpack.c.bf16 %v5761_v32, %v5761_v32  ;;  %v5693_v42 = vmul.f32 %v13417_v7, %v16681_v11  ;;  %v5537_v22 = vpop.f32.mrb[5].mxu0  ;;  %v6331_v7 = vld [vmem:[#allocation3 + $0x30] sm:$0xf] }
 0x370   : > { %v5991_v31 = vshrl.u32 %v12524_v6, 16  ;;  %v5994_v47 = vshll.u32 %v12524_v6, 16  ;;  %v12525_v23 = vpack.c.bf16 %v5759_v46, %v5759_v46  ;;  %v5691_v0 = vmul.f32 %v16681_v11, %v5537_v22  ;;  %v13418_v48 = vpop.f32.mrb[6].mxu0 }
 0x371   : > { %v6010_v55 = vrot.slane %v6008_v8, 7  ;;  %v6016_v41 = vshrl.u32 %v12527_v9, 16  ;;  %v6019_v14 = vshll.u32 %v12527_v9, 16  ;;  %v5732_v4 = vadd.f32 %v16686_v49, %v5693_v42  ;;  %v5540_v17 = vpop.f32.mrb[7].mxu0 }
 0x372   : > { %v5993_v39 = vrot.slane %v5991_v31, 7  ;;  %v5999_v53 = vshrl.u32 %v12525_v23, 16  ;;  %v6002_v21 = vshll.u32 %v12525_v23, 16  ;;  %v5730_v16 = vadd.f32 %v16686_v49, %v5691_v0 }
 0x373   : > { %v6013_v63 = vor.u32 %v6011_v24, %v6010_v55  ;;  %v6014_v25 = vrot.slane %v6010_v55, 4  ;;  %v6018_v40 = vrot.slane %v6016_v41, 7  ;;  %v5764_v1 = vmax.f32 %v5732_v4, 0.0 }
 0x374   : > { %v5996_v35 = vor.u32 %v5994_v47, %v5993_v39  ;;  %v5997_v10 = vrot.slane %v5993_v39, 4  ;;  %v6001_v20 = vrot.slane %v5999_v53, 7  ;;  %v5762_v58 = vmax.f32 %v5730_v16, 0.0  ;;  %v6324_v47 = vld [vmem:[#allocation3 + $0x24] sm:$0xf] }
 0x375   : > { %v6318_v62 = vsel %vm14921_vm11, %v6013_v63, %v6317_v5  ;;  %v6021_v27 = vor.u32 %v6019_v14, %v6018_v40  ;;  %v6023_v37 = vrot.slane %v6018_v40, 4  ;;  %v12530_v57 = vpack.c.bf16 %v5764_v1, %v5764_v1 }
 0x376   : > { %6319 = vst [vmem:[#allocation3 + $0x18] sm:$0xf] %v6318_v62  ;;  %v6311_v52 = vsel %vm14921_vm11, %v5996_v35, %v6310_v26  ;;  %v6004_v18 = vor.u32 %v6002_v21, %v6001_v20  ;;  %v6006_v15 = vrot.slane %v6001_v20, 4  ;;  %v12528_v2 = vpack.c.bf16 %v5762_v58, %v5762_v58  ;;  %v13421_v13 = vpop.f32.mrb[8].mxu0 }
 0x377   : > { %6312 = vst [vmem:[#allocation3 + $0xc] sm:$0xf] %v6311_v52  ;;  %v6022_v51 = vsel %vm14909_vm10, %v6014_v25, %v6021_v27  ;;  %v6322_v36 = vsel %vm14874_vm5, %v6023_v37, %v6321_v34  ;;  %v6042_v44 = vshrl.u32 %v12530_v57, 16  ;;  %v6045_v3 = vshll.u32 %v12530_v57, 16  ;;  %v5553_v29 = vpop.f32.mrb[9].mxu0 }
 0x378   : > { %6320 = vst [vmem:[#allocation3 + $0x1c] sm:$0xf] %v6022_v51  ;;  %6323 = vst [vmem:[#allocation3 + $0x20] sm:$0x1] %v6322_v36  ;;  %v6005_v38 = vsel %vm14909_vm10, %v5997_v10, %v6004_v18  ;;  %v6315_v50 = vsel %vm14874_vm5, %v6006_v15, %v6314_v43  ;;  %v6025_v19 = vshrl.u32 %v12528_v2, 16  ;;  %v6028_v61 = vshll.u32 %v12528_v2, 16 }
 0x379   : > { %v13422_v12 = vpop.f32.mrb[10].mxu0  ;;  %6313 = vst [vmem:[#allocation3 + $0x10] sm:$0xf] %v6005_v38  ;;  %6316 = vst [vmem:[#allocation3 + $0x14] sm:$0x1] %v6315_v50  ;;  %v16712_v56 = vrot.slane %v6042_v44, 7  ;;  %v5694_v28 = vmul.f32 %v13418_v48, %v16681_v11  ;;  %v5692_v32 = vmul.f32 %v16681_v11, %v5540_v17  ;;  %v5697_v6 = vmul.f32 %v13421_v13, %v16681_v11 }
 0x37a   : > { %v5556_v46 = vpop.f32.mrb[11].mxu0  ;;  %v16717_v8 = vrot.slane %v6025_v19, 7  ;;  %v5695_v24 = vmul.f32 %v16681_v11, %v5553_v29  ;;  %v5698_v9 = vmul.f32 %v13422_v12, %v16681_v11  ;;  %v6335_v15 = vld [vmem:[#allocation3 + $0x38] sm:$0x1]  ;;  %v6328_v29 = vld [vmem:[#allocation3 + $0x2c] sm:$0x1] }
 0x37b   : > { %v5696_v42 = vmul.f32 %v16681_v11, %v5556_v46  ;;  %v6047_v22 = vor.u32 %v6045_v3, %v16712_v56  ;;  %v6048_v31 = vrot.slane %v16712_v56, 4  ;;  %v5733_v23 = vadd.f32 %v16686_v49, %v5694_v28 }
 0x37c   : > { %v5731_v0 = vadd.f32 %v16686_v49, %v5692_v32  ;;  %v6030_v48 = vor.u32 %v6028_v61, %v16717_v8  ;;  %v6031_v55 = vrot.slane %v16717_v8, 4  ;;  %v5736_v41 = vadd.f32 %v16686_v49, %v5697_v6  ;;  %v6338_v8 = vld [vmem:[#allocation3 + $0x3c] sm:$0xf] }
 0x37d   : > { %v5734_v14 = vadd.f32 %v16686_v49, %v5695_v24  ;;  %v6332_v4 = vsel %vm14921_vm11, %v6047_v22, %v6331_v7  ;;  %v5765_v17 = vmax.f32 %v5733_v23, 0.0  ;;  %v5737_v39 = vadd.f32 %v16686_v49, %v5698_v9  ;;  %v6345_v7 = vld [vmem:[#allocation3 + $0x48] sm:$0xf] }
 0x37e   : > { %v5763_v5 = vmax.f32 %v5731_v0, 0.0  ;;  %6333 = vst [vmem:[#allocation3 + $0x30] sm:$0xf] %v6332_v4  ;;  %v6325_v53 = vsel %vm14921_vm11, %v6030_v48, %v6324_v47  ;;  %v5768_v21 = vmax.f32 %v5736_v41, 0.0  ;;  %v5735_v63 = vadd.f32 %v16686_v49, %v5696_v42  ;;  %v13425_v25 = vpop.f32.mrb[12].mxu0 }
 0x37f   : > { %v5766_v16 = vmax.f32 %v5734_v14, 0.0  ;;  %6326 = vst [vmem:[#allocation3 + $0x24] sm:$0xf] %v6325_v53  ;;  %v12531_v26 = vpack.c.bf16 %v5765_v17, %v5765_v17  ;;  %v5769_v1 = vmax.f32 %v5737_v39, 0.0  ;;  %v5701_v35 = vmul.f32 %v13425_v25, %v16681_v11  ;;  %v5569_v10 = vpop.f32.mrb[13].mxu0 }
 0x380   : > { %v12529_v40 = vpack.c.bf16 %v5763_v5, %v5763_v5  ;;  %v12534_v34 = vpack.c.bf16 %v5768_v21, %v5768_v21  ;;  %v5767_v58 = vmax.f32 %v5735_v63, 0.0  ;;  %v5699_v62 = vmul.f32 %v16681_v11, %v5569_v10  ;;  %v13426_v27 = vpop.f32.mrb[14].mxu0 }
 0x381   : > { %v12532_v20 = vpack.c.bf16 %v5766_v16, %v5766_v16  ;;  %v6050_v37 = vshrl.u32 %v12531_v26, 16  ;;  %v6053_v43 = vshll.u32 %v12531_v26, 16  ;;  %v5572_v18 = vpop.f32.mrb[15].mxu0  ;;  %v12535_v38 = vpack.c.bf16 %v5769_v1, %v5769_v1 }
 0x382   : > { %v6033_v57 = vshrl.u32 %v12529_v40, 16  ;;  %v6036_v52 = vshll.u32 %v12529_v40, 16  ;;  %v6076_v2 = vshrl.u32 %v12534_v34, 16  ;;  %v6079_v13 = vshll.u32 %v12534_v34, 16 }
 0x383   : > { %v6059_v51 = vshrl.u32 %v12532_v20, 16  ;;  %v6062_v36 = vshll.u32 %v12532_v20, 16  ;;  %v6052_v44 = vrot.slane %v6050_v37, 7  ;;  %v12533_v50 = vpack.c.bf16 %v5767_v58, %v5767_v58 }
 0x384   : > { %v6035_v3 = vrot.slane %v6033_v57, 7  ;;  %v6078_v19 = vrot.slane %v6076_v2, 7  ;;  %v5740_v12 = vadd.f32 %v16686_v49, %v5701_v35  ;;  %v5738_v56 = vadd.f32 %v16686_v49, %v5699_v62  ;;  %v6349_v35 = vld [vmem:[#allocation3 + $0x50] sm:$0x1] }
 0x385   : > { %v6061_v61 = vrot.slane %v6059_v51, 7  ;;  %v6055_v28 = vor.u32 %v6053_v43, %v6052_v44  ;;  %v6057_v32 = vrot.slane %v6052_v44, 4  ;;  %v6084_v17 = vshrl.u32 %v12535_v38, 16  ;;  %v6342_v43 = vld [vmem:[#allocation3 + $0x44] sm:$0x1] }
 0x386   : > { %v6038_v6 = vor.u32 %v6036_v52, %v6035_v3  ;;  %v6040_v46 = vrot.slane %v6035_v3, 4  ;;  %v6081_v24 = vor.u32 %v6079_v13, %v6078_v19  ;;  %v6082_v9 = vrot.slane %v6078_v19, 4  ;;  %v13429_v47 = vpop.f32.mrb[16].mxu0 }
 0x387   : > { %v6064_v42 = vor.u32 %v6062_v36, %v6061_v61  ;;  %v6065_v22 = vrot.slane %v6061_v61, 4  ;;  %v6056_v23 = vsel %vm14909_vm10, %v6048_v31, %v6055_v28  ;;  %v6336_v0 = vsel %vm14874_vm5, %v6057_v32, %v6335_v15  ;;  %v5585_v14 = vpop.f32.mrb[17].mxu0 }
 0x388   : > { %v6039_v48 = vsel %vm14909_vm10, %v6031_v55, %v6038_v6  ;;  %v6329_v41 = vsel %vm14874_vm5, %v6040_v46, %v6328_v29  ;;  %6334 = vst [vmem:[#allocation3 + $0x34] sm:$0xf] %v6056_v23  ;;  %6337 = vst [vmem:[#allocation3 + $0x38] sm:$0x1] %v6336_v0  ;;  %v6346_v4 = vsel %vm14921_vm11, %v6081_v24, %v6345_v7  ;;  %v6087_v5 = vshll.u32 %v12535_v38, 16  ;;  %v13430_v39 = vpop.f32.mrb[18].mxu0 }
 0x389   : > { %6327 = vst [vmem:[#allocation3 + $0x28] sm:$0xf] %v6039_v48  ;;  %6330 = vst [vmem:[#allocation3 + $0x2c] sm:$0x1] %v6329_v41  ;;  %v6339_v31 = vsel %vm14921_vm11, %v6064_v42, %v6338_v8  ;;  %v6067_v55 = vshrl.u32 %v12533_v50, 16  ;;  %v6070_v53 = vshll.u32 %v12533_v50, 16  ;;  %v5702_v26 = vmul.f32 %v13426_v27, %v16681_v11 }
 0x38a   : > { %6347 = vst [vmem:[#allocation3 + $0x48] sm:$0xf] %v6346_v4  ;;  %6340 = vst [vmem:[#allocation3 + $0x3c] sm:$0xf] %v6339_v31  ;;  %v5772_v21 = vmax.f32 %v5740_v12, 0.0  ;;  %v5770_v16 = vmax.f32 %v5738_v56, 0.0  ;;  %v5700_v40 = vmul.f32 %v16681_v11, %v5572_v18  ;;  %v5705_v1 = vmul.f32 %v13429_v47, %v16681_v11 }
 0x38b   : > { %v16752_v63 = vpop.f32.mrb[19].mxu0  ;;  %v6086_v25 = vrot.slane %v6084_v17, 7  ;;  %v6069_v10 = vrot.slane %v6067_v55, 7  ;;  %v5703_v58 = vmul.f32 %v16681_v11, %v5585_v14  ;;  %v5741_v57 = vadd.f32 %v16686_v49, %v5702_v26  ;;  %v6359_v12 = vld [vmem:[#allocation3 + $0x60] sm:$0xf] }
 0x38c   : > { %v12538_v34 = vpack.c.bf16 %v5772_v21, %v5772_v21  ;;  %v12536_v20 = vpack.c.bf16 %v5770_v16, %v5770_v16  ;;  %v5739_v52 = vadd.f32 %v16686_v49, %v5700_v40  ;;  %v5744_v32 = vadd.f32 %v16686_v49, %v5705_v1  ;;  %v6352_v24 = vld [vmem:[#allocation3 + $0x54] sm:$0xf]  ;;  %v6424_v17 = vld [vmem:[#allocation3 + $0xc] sm:$0xf]  ;;  %v6363_v55 = vld [vmem:[#allocation3 + $0x68] sm:$0x1] }
 0x38d   : > { %v6089_v62 = vor.u32 %v6087_v5, %v6086_v25  ;;  %v6091_v37 = vrot.slane %v6086_v25, 4  ;;  %v6072_v15 = vor.u32 %v6070_v53, %v6069_v10  ;;  %v6074_v2 = vrot.slane %v6069_v10, 4 }
 0x38e   : > { %v6110_v27 = vshrl.u32 %v12538_v34, 16  ;;  %v6113_v13 = vshll.u32 %v12538_v34, 16  ;;  %v6093_v36 = vshrl.u32 %v12536_v20, 16  ;;  %v6096_v44 = vshll.u32 %v12536_v20, 16  ;;  %v16764_v3 = vpop.f32.mrb[20].mxu0 }
 0x38f   : > { %v6090_v18 = vsel %vm14909_vm10, %v6082_v9, %v6089_v62  ;;  %v6350_v51 = vsel %vm14874_vm5, %v6091_v37, %v6349_v35  ;;  %v6073_v29 = vsel %vm14909_vm10, %v6065_v22, %v6072_v15  ;;  %v6343_v38 = vsel %vm14874_vm5, %v6074_v2, %v6342_v43  ;;  %v16770_v61 = vpop.f32.mrb[21].mxu0  ;;  %v6356_v37 = vld [vmem:[#allocation3 + $0x5c] sm:$0x1] }
 0x390   : > { %6348 = vst [vmem:[#allocation3 + $0x4c] sm:$0xf] %v6090_v18  ;;  %6351 = vst [vmem:[#allocation3 + $0x50] sm:$0x1] %v6350_v51  ;;  %v6112_v50 = vrot.slane %v6110_v27, 7  ;;  %v5773_v19 = vmax.f32 %v5741_v57, 0.0  ;;  %v5742_v6 = vadd.f32 %v16686_v49, %v5703_v58  ;;  %v5706_v42 = vmul.f32 %v13430_v39, %v16681_v11 }
 0x391   : > { %6341 = vst [vmem:[#allocation3 + $0x40] sm:$0xf] %v6073_v29  ;;  %6344 = vst [vmem:[#allocation3 + $0x44] sm:$0x1] %v6343_v38  ;;  %v6095_v56 = vrot.slane %v6093_v36, 7  ;;  %v5771_v28 = vmax.f32 %v5739_v52, 0.0  ;;  %v5704_v40 = vmul.f32 %v16681_v11, %v16752_v63 }
 0x392   : > { %v16774_v46 = vpop.f32.mrb[22].mxu0  ;;  %v6115_v7 = vor.u32 %v6113_v13, %v6112_v50  ;;  %v6116_v8 = vrot.slane %v6112_v50, 4  ;;  %v12539_v9 = vpack.c.bf16 %v5773_v19, %v5773_v19  ;;  %v5776_v48 = vmax.f32 %v5744_v32, 0.0  ;;  %v6373_v36 = vld [vmem:[#allocation3 + $0x78] sm:$0xf] }
 0x393   : > { %v16777_v22 = vpop.f32.mrb[23].mxu0  ;;  %v6098_v47 = vor.u32 %v6096_v44, %v6095_v56  ;;  %v6099_v23 = vrot.slane %v6095_v56, 4  ;;  %v12537_v0 = vpack.c.bf16 %v5771_v28, %v5771_v28  ;;  %v5774_v31 = vmax.f32 %v5742_v6, 0.0  ;;  %v6425_v38 = vld [vmem:[#allocation3 + $0x10] sm:$0xf] }
 0x394   : > { %v6360_v41 = vsel %vm14921_vm11, %v6115_v7, %v6359_v12  ;;  %v6118_v14 = vshrl.u32 %v12539_v9, 16  ;;  %v6121_v4 = vshll.u32 %v12539_v9, 16  ;;  %v12542_v21 = vpack.c.bf16 %v5776_v48, %v5776_v48  ;;  %v6366_v28 = vld [vmem:[#allocation3 + $0x6c] sm:$0xf] }
 0x395   : > { %6361 = vst [vmem:[#allocation3 + $0x60] sm:$0xf] %v6360_v41  ;;  %v6353_v5 = vsel %vm14921_vm11, %v6098_v47, %v6352_v24  ;;  %v6101_v53 = vshrl.u32 %v12537_v0, 16  ;;  %v6104_v39 = vshll.u32 %v12537_v0, 16  ;;  %v12540_v25 = vpack.c.bf16 %v5774_v31, %v5774_v31  ;;  %v6471_v24 = vld [vmem:[#allocation3 + $0x14] sm:$0x1] }
 0x396   : > { %6354 = vst [vmem:[#allocation3 + $0x54] sm:$0xf] %v6353_v5  ;;  %v6120_v16 = vrot.slane %v6118_v14, 7  ;;  %v5745_v26 = vadd.f32 %v16686_v49, %v5706_v42  ;;  %v6144_v35 = vshrl.u32 %v12542_v21, 16  ;;  %v6147_v10 = vshll.u32 %v12542_v21, 16  ;;  %v16786_v20 = vpop.f32.mrb[24].mxu0 }
 0x397   : > { %v6103_v1 = vrot.slane %v6101_v53, 7  ;;  %v6511_v34 = vshrl.u32 %v6424_v17, 16  ;;  %v6127_v43 = vshrl.u32 %v12540_v25, 16  ;;  %v6130_v57 = vshll.u32 %v12540_v25, 16  ;;  %v16788_v52 = vpop.f32.mrb[25].mxu0 }
 0x398   : > { %v6123_v58 = vor.u32 %v6121_v4, %v6120_v16  ;;  %v6125_v62 = vrot.slane %v6120_v16, 4  ;;  %v16790_v27 = vrot.slane %v6144_v35, 7  ;;  %v5777_v13 = vmax.f32 %v5745_v26, 0.0  ;;  %v16792_v18 = vpop.f32.mrb[26].mxu0  ;;  %v6426_v0 = vld [vmem:[#allocation3 + $0x18] sm:$0xf] }
 0x399   : > { %v6106_v15 = vor.u32 %v6104_v39, %v6103_v1  ;;  %v6108_v2 = vrot.slane %v6103_v1, 4  ;;  %v16798_v44 = vrot.slane %v6127_v43, 7  ;;  %v5743_v29 = vadd.f32 %v16686_v49, %v5704_v40  ;;  %v16801_v50 = vpop.f32.mrb[27].mxu0  ;;  %v6427_v31 = vld [vmem:[#allocation3 + $0x1c] sm:$0xf] }
 0x39a   : > { %v6124_v63 = vsel %vm14909_vm10, %v6116_v8, %v6123_v58  ;;  %v6364_v51 = vsel %vm14874_vm5, %v6125_v62, %v6363_v55  ;;  %v6149_v56 = vor.u32 %v6147_v10, %v16790_v27  ;;  %v6150_v32 = vrot.slane %v16790_v27, 4  ;;  %v6377_v5 = vld [vmem:[#allocation3 + $0x80] sm:$0x1] }
 0x39b   : > { %6362 = vst [vmem:[#allocation3 + $0x64] sm:$0xf] %v6124_v63  ;;  %6365 = vst [vmem:[#allocation3 + $0x68] sm:$0x1] %v6364_v51  ;;  %v6107_v19 = vsel %vm14909_vm10, %v6099_v23, %v6106_v15  ;;  %v6357_v12 = vsel %vm14874_vm5, %v6108_v2, %v6356_v37  ;;  %v6132_v6 = vor.u32 %v6130_v57, %v16798_v44  ;;  %v5775_v8 = vmax.f32 %v5743_v29, 0.0 }
 0x39c   : > { %6355 = vst [vmem:[#allocation3 + $0x58] sm:$0xf] %v6107_v19  ;;  %6358 = vst [vmem:[#allocation3 + $0x5c] sm:$0x1] %v6357_v12  ;;  %v12543_v7 = vpack.c.bf16 %v5777_v13, %v5777_v13  ;;  %v6374_v9 = vsel %vm14921_vm11, %v6149_v56, %v6373_v36  ;;  %v6513_v42 = vrot.slane %v6511_v34, 4  ;;  %v6514_v47 = vshll.u32 %v6424_v17, 16 }
 0x39d   : > { %v6520_v23 = vshll.u32 %v6425_v38, 16  ;;  %6375 = vst [vmem:[#allocation3 + $0x78] sm:$0xf] %v6374_v9  ;;  %v6133_v48 = vrot.slane %v16798_v44, 4  ;;  %v6367_v41 = vsel %vm14921_vm11, %v6132_v6, %v6366_v28  ;;  %v12541_v4 = vpack.c.bf16 %v5775_v8, %v5775_v8  ;;  %v6370_v15 = vld [vmem:[#allocation3 + $0x74] sm:$0x1] }
 0x39e   : > { %v6152_v14 = vshrl.u32 %v12543_v7, 16  ;;  %6368 = vst [vmem:[#allocation3 + $0x6c] sm:$0xf] %v6367_v41  ;;  %v6516_v55 = vrot.slane %v6514_v47, 5  ;;  %v6524_v39 = vshrl.u32 %v6425_v38, 16  ;;  %v6530_v21 = vshll.u32 %v6471_v24, 16 }
 0x39f   : > { %v6522_v53 = vrot.slane %v6520_v23, 5  ;;  %v16815_v16 = vpop.f32.mrb[28].mxu0  ;;  %v6155_v25 = vshll.u32 %v12543_v7, 16  ;;  %v6135_v26 = vshrl.u32 %v12541_v4, 16  ;;  %v6138_v40 = vshll.u32 %v12541_v4, 16 }
 0x3a0   : > { %v6154_v17 = vrot.slane %v6152_v14, 7  ;;  %v16817_v1 = vpop.f32.mrb[29].mxu0  ;;  %v6517_v35 = vor.u32 %v6516_v55, %v6513_v42  ;;  %v6526_v10 = vrot.slane %v6524_v39, 4  ;;  %v6532_v34 = vrot.slane %v6530_v21, 5  ;;  %v6472_v51 = vld [vmem:[#allocation3 + $0x20] sm:$0x1] }
 0x3a1   : > { %v6535_v58 = vshrl.u32 %v6426_v0, 16  ;;  %v16819_v62 = vpop.f32.mrb[30].mxu0  ;;  %v6137_v57 = vrot.slane %v6135_v26, 7  ;;  %v6538_v2 = vshll.u32 %v6426_v0, 16  ;;  %v6544_v44 = vshll.u32 %v6427_v31, 16  ;;  %v14539_v14 = vld [vmem:[#allocation4 + $0x8] sm:$0xff]  }
 0x3a2   : > { %v6157_v37 = vor.u32 %v6155_v25, %v6154_v17  ;;  %v6159_v43 = vrot.slane %v6154_v17, 4  ;;  %v16821_v27 = vpop.f32.mrb[31].mxu0  ;;  %v6518_v13 = vrot.slane %v6517_v35, 4  ;;  %v6527_v63 = vor.u32 %v6526_v10, %v6522_v53  ;;  %v6428_v41 = vld [vmem:[#allocation3 + $0x24] sm:$0xf] }
 0x3a3   : > { %v6537_v36 = vrot.slane %v6535_v58, 4  ;;  %v6140_v19 = vor.u32 %v6138_v40, %v6137_v57  ;;  %v6142_v12 = vrot.slane %v6137_v57, 4  ;;  %v6540_v6 = vrot.slane %v6538_v2, 5  ;;  %v6429_v17 = vld [vmem:[#allocation3 + $0x28] sm:$0xf] }
 0x3a4   : > { %v6158_v29 = vsel %vm14909_vm10, %v6150_v32, %v6157_v37  ;;  %v6378_v38 = vsel %vm14874_vm5, %v6159_v43, %v6377_v5  ;;  %v6523_v56 = vsel %vm14903_vm9, %v6518_v13, %v6522_v53  ;;  %v6528_v28 = vrot.slane %v6527_v63, 4  ;;  %v14540_v43 = vld [vmem:[#allocation4 + $0x10] sm:$0xff]  }
 0x3a5   : > { %6376 = vst [vmem:[#allocation3 + $0x7c] sm:$0xf] %v6158_v29  ;;  %6379 = vst [vmem:[#allocation3 + $0x80] sm:$0x1] %v6378_v38  ;;  %v6546_v7 = vrot.slane %v6544_v44, 5  ;;  %v6141_v8 = vsel %vm14909_vm10, %v6133_v48, %v6140_v19  ;;  %v6371_v24 = vsel %vm14874_vm5, %v6142_v12, %v6370_v15  ;;  %v6548_v32 = vshrl.u32 %v6427_v31, 16 }
 0x3a6   : > { %v6554_v9 = vshll.u32 %v6472_v51, 16  ;;  %6369 = vst [vmem:[#allocation3 + $0x70] sm:$0xf] %v6141_v8  ;;  %6372 = vst [vmem:[#allocation3 + $0x74] sm:$0x1] %v6371_v24  ;;  %v6533_v42 = vsel %vm14903_vm9, %v6528_v28, %v6532_v34  ;;  %v6541_v47 = vor.u32 %v6540_v6, %v6537_v36  ;;  %v5709_v23 = vmul.f32 %v16764_v3, %v16681_v11  ;;  %v14541_v8 = vld [vmem:[#allocation4 + $0x18] sm:$0xff]  }
 0x3a7   : > { %v5707_v0 = vmul.f32 %v16681_v11, %v16770_v61  ;;  %v12255_v48 = vcombine.low %v6523_v56, %v6533_v42  ;;  %v6550_v4 = vrot.slane %v6548_v32, 4  ;;  %v5710_v31 = vmul.f32 %v16774_v46, %v16681_v11  ;;  %v6387_v12 = vld [vmem:[#allocation3 + $0x90] sm:$0xf] }
 0x3a8   : > { %v6556_v5 = vrot.slane %v6554_v9, 5  ;;  %v6542_v55 = vrot.slane %v6541_v47, 4  ;;  %v5748_v53 = vadd.f32 %v16686_v49, %v5709_v23  ;;  %v5708_v21 = vmul.f32 %v16681_v11, %v16777_v22  ;;  %v6380_v9 = vld [vmem:[#allocation3 + $0x84] sm:$0xf] }
 0x3a9   : > { %v5746_v39 = vadd.f32 %v16686_v49, %v5707_v0  ;;  %13460 = vmatmul.mubr.bf16.vlgmr.msra.gmra.mrb[0].mxu1 %v12255_v48  ;;  %v6551_v3 = vor.u32 %v6550_v4, %v6546_v7  ;;  %v5749_v61 = vadd.f32 %v16686_v49, %v5710_v31  ;;  %v6559_v25 = vshrl.u32 %v6428_v41, 16  ;;  %v6473_v48 = vld [vmem:[#allocation3 + $0x2c] sm:$0x1] }
 0x3aa   : > { %v6562_v26 = vshll.u32 %v6428_v41, 16  ;;  %v6547_v40 = vsel %vm14903_vm9, %v6542_v55, %v6546_v7  ;;  %13492 = vmatpush3.bf16.msra.mxu1 %v16651_v30  ;;  %v5780_v46 = vmax.f32 %v5748_v53, 0.0  ;;  %v5747_v10 = vadd.f32 %v16686_v49, %v5708_v21  ;;  %v6391_v53 = vld [vmem:[#allocation3 + $0x98] sm:$0x1] }
 0x3ab   : > { %v5778_v35 = vmax.f32 %v5746_v39, 0.0  ;;  %v6552_v34 = vrot.slane %v6551_v3, 4  ;;  %v5781_v58 = vmax.f32 %v5749_v61, 0.0  ;;  %v6561_v37 = vrot.slane %v6559_v25, 4  ;;  %13493 = vmatprep.subr.bf16.mxu1 %v14539_v14  ;;  %v14542_v25 = vld [vmem:[#allocation4 + $0x20] sm:$0xff]  }
 0x3ac   : > { %v6564_v22 = vrot.slane %v6562_v26, 5  ;;  %v12546_v57 = vpack.c.bf16 %v5780_v46, %v5780_v46  ;;  %v5779_v2 = vmax.f32 %v5747_v10, 0.0  ;;  %v6568_v13 = vshll.u32 %v6429_v17, 16  ;;  %v6384_v46 = vld [vmem:[#allocation3 + $0x8c] sm:$0x1] }
 0x3ad   : > { %v12544_v15 = vpack.c.bf16 %v5778_v35, %v5778_v35  ;;  %v6557_v63 = vsel %vm14903_vm9, %v6552_v34, %v6556_v5  ;;  %v12547_v51 = vpack.c.bf16 %v5781_v58, %v5781_v58  ;;  %v6572_v30 = vshrl.u32 %v6429_v17, 16  ;;  %v16854_v17 = vld [vmem:[#allocation3 + $0x30] sm:$0xf]  ;;  %v16860_v34 = vld [vmem:[#allocation3 + $0x34] sm:$0xf] }
 0x3ae   : > { %v6565_v36 = vor.u32 %v6564_v22, %v6561_v37  ;;  %v12256_v44 = vcombine.low %v6547_v40, %v6557_v63  ;;  %v6178_v29 = vshrl.u32 %v12546_v57, 16  ;;  %v6181_v38 = vshll.u32 %v12546_v57, 16  ;;  %13494 = vmatpush3.bf16.msra.mxu1 %v14539_v14  ;;  %v6474_v57 = vld [vmem:[#allocation3 + $0x38] sm:$0x1] }
 0x3af   : > { %v6161_v19 = vshrl.u32 %v12544_v15, 16  ;;  %v6164_v56 = vshll.u32 %v12544_v15, 16  ;;  %v6186_v28 = vshrl.u32 %v12547_v51, 16  ;;  %v6189_v6 = vshll.u32 %v12547_v51, 16  ;;  %13495 = vmatprep.subr.bf16.mxu1 %v14540_v43  ;;  %v14543_v51 = vld [vmem:[#allocation4 + $0x28] sm:$0xff]  }
 0x3b0   : > { %v12545_v7 = vpack.c.bf16 %v5779_v2, %v5779_v2  ;;  %13463 = vmatprep.mubr.bf16.mxu1 %v12256_v44  ;;  %v6180_v24 = vrot.slane %v6178_v29, 7  ;;  %v6566_v42 = vrot.slane %v6565_v36, 4  ;;  %v6570_v47 = vrot.slane %v6568_v13, 5 }
 0x3b1   : > { %v6163_v32 = vrot.slane %v6161_v19, 7  ;;  %v6188_v23 = vrot.slane %v6186_v28, 7  ;;  %v6574_v4 = vrot.slane %v6572_v30, 4  ;;  %v6578_v10 = vshll.u32 %v6473_v48, 16 }
 0x3b2   : > { %v6169_v0 = vshrl.u32 %v12545_v7, 16  ;;  %v6172_v41 = vshll.u32 %v12545_v7, 16  ;;  %v6183_v5 = vor.u32 %v6181_v38, %v6180_v24  ;;  %v6184_v14 = vrot.slane %v6180_v24, 4  ;;  %13496 = vmatpush3.bf16.msra.mxu1 %v14540_v43  ;;  %v16874_v38 = vld [vmem:[#allocation3 + $0x3c] sm:$0xf] }
 0x3b3   : > { %v6166_v31 = vor.u32 %v6164_v56, %v6163_v32  ;;  %v6167_v55 = vrot.slane %v6163_v32, 4  ;;  %v6191_v39 = vor.u32 %v6189_v6, %v6188_v23  ;;  %v6193_v21 = vrot.slane %v6188_v23, 4  ;;  %13497 = vmatprep.subr.bf16.mxu1 %v14541_v8 }
 0x3b4   : > { %v6171_v3 = vrot.slane %v6169_v0, 7  ;;  %v6571_v61 = vsel %vm14903_vm9, %v6566_v42, %v6570_v47  ;;  %v6388_v26 = vsel %vm14921_vm11, %v6183_v5, %v6387_v12  ;;  %v6575_v35 = vor.u32 %v6574_v4, %v6570_v47 }
 0x3b5   : > { %v6381_v40 = vsel %vm14921_vm11, %v6166_v31, %v6380_v9  ;;  %6389 = vst [vmem:[#allocation3 + $0x90] sm:$0xf] %v6388_v26  ;;  %v6192_v58 = vsel %vm14909_vm10, %v6184_v14, %v6191_v39  ;;  %v6392_v37 = vsel %vm14874_vm5, %v6193_v21, %v6391_v53  ;;  %v6580_v2 = vrot.slane %v6578_v10, 5  ;;  %v16890_v14 = vld [vmem:[#allocation3 + $0x40] sm:$0xf] }
 0x3b6   : > { %6382 = vst [vmem:[#allocation3 + $0x84] sm:$0xf] %v6381_v40  ;;  %v6174_v22 = vor.u32 %v6172_v41, %v6171_v3  ;;  %v6176_v43 = vrot.slane %v6171_v3, 4  ;;  %6390 = vst [vmem:[#allocation3 + $0x94] sm:$0xf] %v6192_v58  ;;  %v6576_v15 = vrot.slane %v6575_v35, 4  ;;  %13498 = vmatpush3.bf16.msra.mxu1 %v14541_v8  ;;  %v5713_v24 = vmul.f32 %v16786_v20, %v16681_v11 }
 0x3b7   : > { %6393 = vst [vmem:[#allocation3 + $0x98] sm:$0x1] %v6392_v37  ;;  %v6583_v13 = vshrl.u32 %v16854_v17, 16  ;;  %v6586_v63 = vshll.u32 %v16854_v17, 16  ;;  %v6592_v44 = vshll.u32 %v16860_v34, 16  ;;  %v6596_v29 = vshrl.u32 %v16860_v34, 16  ;;  %13499 = vmatprep.subr.bf16.mxu1 %v14542_v25 }
 0x3b8   : > { %v6175_v36 = vsel %vm14909_vm10, %v6167_v55, %v6174_v22  ;;  %v6385_v30 = vsel %vm14874_vm5, %v6176_v43, %v6384_v46  ;;  %v6581_v19 = vsel %vm14903_vm9, %v6576_v15, %v6580_v2  ;;  %v6602_v28 = vshll.u32 %v6474_v57, 16  ;;  %v14544_v20 = vld [vmem:[#allocation4 + $0x30] sm:$0xff]   ;;  %v14545_v46 = vld [vmem:[#allocation4 + $0x38] sm:$0xff]   ;;  %v6475_v58 = vld [vmem:[#allocation3 + $0x44] sm:$0x1] }
 0x3b9   : > { %6383 = vst [vmem:[#allocation3 + $0x88] sm:$0xf] %v6175_v36  ;;  %6386 = vst [vmem:[#allocation3 + $0x8c] sm:$0x1] %v6385_v30  ;;  %v6585_v12 = vrot.slane %v6583_v13, 4  ;;  %v6588_v56 = vrot.slane %v6586_v63, 5  ;;  %v12257_v6 = vcombine.low %v6571_v61, %v6581_v19  ;;  %v5711_v42 = vmul.f32 %v16681_v11, %v16788_v52 }
 0x3ba   : > { %v6594_v7 = vrot.slane %v6592_v44, 5  ;;  %v6598_v8 = vrot.slane %v6596_v29, 4  ;;  %v6604_v9 = vrot.slane %v6602_v28, 5  ;;  %v5714_v47 = vmul.f32 %v16792_v18, %v16681_v11  ;;  %13500 = vmatpush3.bf16.msra.mxu1 %v14542_v25  ;;  %v16901_v2 = vld [vmem:[#allocation4 + $0x80] sm:$0xff]  }
 0x3bb   : > { %v6589_v32 = vor.u32 %v6588_v56, %v6585_v12  ;;  %13464 = vmatmul.mubr.bf16.gmra.mrb[4].mxu1 %v12257_v6  ;;  %v5752_v0 = vadd.f32 %v16686_v49, %v5713_v24  ;;  %v5712_v41 = vmul.f32 %v16681_v11, %v16801_v50  ;;  %v6607_v48 = vshrl.u32 %v16874_v38, 16  ;;  %13501 = vmatprep.subr.bf16.mxu1 %v14543_v51  ;;  %v6401_v12 = vld [vmem:[#allocation3 + $0xa8] sm:$0xf] }
 0x3bc   : > { %v6599_v23 = vor.u32 %v6598_v8, %v6594_v7  ;;  %v5750_v5 = vadd.f32 %v16686_v49, %v5711_v42  ;;  %v5753_v52 = vadd.f32 %v16686_v49, %v5714_v47  ;;  %v6610_v18 = vshll.u32 %v16874_v38, 16 }
 0x3bd   : > { %v6590_v4 = vrot.slane %v6589_v32, 4  ;;  %v5784_v55 = vmax.f32 %v5752_v0, 0.0  ;;  %v5751_v53 = vadd.f32 %v16686_v49, %v5712_v41  ;;  %v6609_v39 = vrot.slane %v6607_v48, 4  ;;  %v6394_v32 = vld [vmem:[#allocation3 + $0x9c] sm:$0xf] }
 0x3be   : > { %v6600_v31 = vrot.slane %v6599_v23, 4  ;;  %v5782_v50 = vmax.f32 %v5750_v5, 0.0  ;;  %v5785_v21 = vmax.f32 %v5753_v52, 0.0  ;;  %v6612_v3 = vrot.slane %v6610_v18, 5  ;;  %13502 = vmatpush3.bf16.msra.mxu1 %v14543_v51 }
 0x3bf   : > { %v6595_v11 = vsel %vm14903_vm9, %v6590_v4, %v6594_v7  ;;  %v12550_v25 = vpack.c.bf16 %v5784_v55, %v5784_v55  ;;  %v5783_v26 = vmax.f32 %v5751_v53, 0.0  ;;  %v6616_v40 = vshll.u32 %v16890_v14, 16  ;;  %13503 = vmatprep.subr.bf16.mxu1 %v14544_v20  ;;  %v16907_v4 = vld [vmem:[#allocation3 + $0x48] sm:$0xf]  ;;  %v16911_v55 = vld [vmem:[#allocation3 + $0x4c] sm:$0xf] }
 0x3c0   : > { %v6605_v61 = vsel %vm14903_vm9, %v6600_v31, %v6604_v9  ;;  %v12548_v10 = vpack.c.bf16 %v5782_v50, %v5782_v50  ;;  %v12551_v49 = vpack.c.bf16 %v5785_v21, %v5785_v21  ;;  %v6613_v37 = vor.u32 %v6612_v3, %v6609_v39  ;;  %v6405_v9 = vld [vmem:[#allocation3 + $0xb0] sm:$0x1] }
 0x3c1   : > { %v12258_v35 = vcombine.low %v6595_v11, %v6605_v61  ;;  %v6212_v22 = vshrl.u32 %v12550_v25, 16  ;;  %v6215_v43 = vshll.u32 %v12550_v25, 16  ;;  %v12549_v57 = vpack.c.bf16 %v5783_v26, %v5783_v26  ;;  %v16913_v53 = vld [vmem:[#allocation3 + $0x50] sm:$0x1] }
 0x3c2   : > { %v16899_v15 = vrot.slane %v6616_v40, 5  ;;  %v6195_v13 = vshrl.u32 %v12548_v10, 16  ;;  %v6198_v63 = vshll.u32 %v12548_v10, 16  ;;  %v6220_v51 = vshrl.u32 %v12551_v49, 16  ;;  %13504 = vmatpush3.bf16.msra.mxu1 %v14544_v20  ;;  %v6398_v20 = vld [vmem:[#allocation3 + $0xa4] sm:$0x1] }
 0x3c3   : > { %13467 = vmatprep.mubr.bf16.mxu1 %v12258_v35  ;;  %v6223_v36 = vshll.u32 %v12551_v49, 16  ;;  %v6214_v30 = vrot.slane %v6212_v22, 7  ;;  %v6203_v44 = vshrl.u32 %v12549_v57, 16  ;;  %v6206_v29 = vshll.u32 %v12549_v57, 16  ;;  %13505 = vmatprep.subr.bf16.mxu1 %v14545_v46 }
 0x3c4   : > { %v6614_v19 = vrot.slane %v6613_v37, 4  ;;  %v6197_v56 = vrot.slane %v6195_v13, 7  ;;  %v6222_v28 = vrot.slane %v6220_v51, 7  ;;  %v6620_v6 = vshrl.u32 %v16890_v14, 16  ;;  %v14684_v37 = vld [vmem:[%s18353_s2] ss:$0 sm:$0xff] }
 0x3c5   : > { %v6626_v7 = vshll.u32 %v6475_v58, 16  ;;  %v6217_v8 = vor.u32 %v6215_v43, %v6214_v30  ;;  %v6218_v24 = vrot.slane %v6214_v30, 4  ;;  %v6205_v42 = vrot.slane %v6203_v44, 7  ;;  %v16937_v51 = vld [vmem:[#allocation3 + $0x54] sm:$0xf] }
 0x3c6   : > { %v6619_v47 = vsel %vm14903_vm9, %v6614_v19, %v16899_v15  ;;  %v6200_v23 = vor.u32 %v6198_v63, %v6197_v56  ;;  %v6201_v0 = vrot.slane %v6197_v56, 4  ;;  %v6225_v41 = vor.u32 %v6223_v36, %v6222_v28  ;;  %13506 = vmatpush3.bf16.msra.mxu1 %v14545_v46  ;;  %v14685_v30 = vld [vmem:[%s18354_s3] ss:$0 sm:$0xff] }
 0x3c7   : > { %v6227_v48 = vrot.slane %v6222_v28, 4  ;;  %v6402_v5 = vsel %vm14921_vm11, %v6217_v8, %v6401_v12  ;;  %v6208_v52 = vor.u32 %v6206_v29, %v6205_v42  ;;  %v6210_v18 = vrot.slane %v6205_v42, 4  ;;  %13539 = vmatprep.subr.bf16.mxu1 %v16901_v2 }
 0x3c8   : > { %v6622_v31 = vrot.slane %v6620_v6, 4  ;;  %6403 = vst [vmem:[#allocation3 + $0xa8] sm:$0xf] %v6402_v5  ;;  %v6395_v39 = vsel %vm14921_vm11, %v6200_v23, %v6394_v32  ;;  %v6226_v11 = vsel %vm14909_vm10, %v6218_v24, %v6225_v41  ;;  %v6628_v21 = vrot.slane %v6626_v7, 5 }
 0x3c9   : > { %v6406_v50 = vsel %vm14874_vm5, %v6227_v48, %v6405_v9  ;;  %6396 = vst [vmem:[#allocation3 + $0x9c] sm:$0xf] %v6395_v39  ;;  %6404 = vst [vmem:[#allocation3 + $0xac] sm:$0xf] %v6226_v11  ;;  %v6209_v3 = vsel %vm14909_vm10, %v6201_v0, %v6208_v52  ;;  %v6399_v61 = vsel %vm14874_vm5, %v6210_v18, %v6398_v20  ;;  %v6631_v26 = vshrl.u32 %v16907_v4, 16 }
 0x3ca   : > { %6407 = vst [vmem:[#allocation3 + $0xb0] sm:$0x1] %v6406_v50  ;;  %v6623_v25 = vor.u32 %v6622_v31, %v16899_v15  ;;  %6397 = vst [vmem:[#allocation3 + $0xa0] sm:$0xf] %v6209_v3  ;;  %v6634_v40 = vshll.u32 %v16907_v4, 16  ;;  %v6640_v46 = vshll.u32 %v16911_v55, 16  ;;  %v5717_v22 = vmul.f32 %v14684_v37, %v16815_v16 }
 0x3cb   : > { %6400 = vst [vmem:[#allocation3 + $0xa4] sm:$0x1] %v6399_v61  ;;  %v6644_v35 = vshrl.u32 %v16911_v55, 16  ;;  %v6650_v10 = vshll.u32 %v16913_v53, 16  ;;  %v6633_v58 = vrot.slane %v6631_v26, 4  ;;  %v5715_v43 = vmul.f32 %v14684_v37, %v16817_v1 }
 0x3cc   : > { %v6624_v49 = vrot.slane %v6623_v25, 4  ;;  %v6636_v57 = vrot.slane %v6634_v40, 5  ;;  %v6642_v15 = vrot.slane %v6640_v46, 5  ;;  %v5756_v44 = vadd.f32 %v14685_v30, %v5717_v22  ;;  %v16952_v20 = vld [vmem:[#allocation3 + $0x58] sm:$0xf] }
 0x3cd   : > { %v6646_v13 = vrot.slane %v6644_v35, 4  ;;  %v6652_v63 = vrot.slane %v6650_v10, 5  ;;  %v5754_v29 = vadd.f32 %v14685_v30, %v5715_v43  ;;  %v5718_v19 = vmul.f32 %v14684_v37, %v16819_v62  ;;  %v6415_v11 = vld [vmem:[#allocation3 + $0xc0] sm:$0xf]  ;;  %v16956_v22 = vld [vmem:[#allocation3 + $0x5c] sm:$0x1] }
 0x3ce   : > { %v6629_v36 = vsel %vm14903_vm9, %v6624_v49, %v6628_v21  ;;  %v6637_v12 = vor.u32 %v6636_v57, %v6633_v58  ;;  %v5716_v56 = vmul.f32 %v14684_v37, %v16821_v27  ;;  %v5788_v28 = vmax.f32 %v5756_v44, 0.0  ;;  %v6408_v21 = vld [vmem:[#allocation3 + $0xb4] sm:$0xf] }
 0x3cf   : > { %v12259_v16 = vcombine.low %v6619_v47, %v6629_v36  ;;  %v6647_v1 = vor.u32 %v6646_v13, %v6642_v15  ;;  %v5786_v6 = vmax.f32 %v5754_v29, 0.0  ;;  %v5757_v7 = vadd.f32 %v14685_v30, %v5718_v19  ;;  %v16958_v19 = vld [vmem:[#allocation3 + $0x60] sm:$0xf] }
 0x3d0   : > { %v6655_v8 = vshrl.u32 %v16937_v51, 16  ;;  %v6638_v24 = vrot.slane %v6637_v12, 4  ;;  %v5755_v9 = vadd.f32 %v14685_v30, %v5716_v56  ;;  %v6658_v42 = vshll.u32 %v16937_v51, 16 }
 0x3d1   : > { %13468 = vmatmul.mubr.bf16.gmra.mrb[8].mxu1 %v12259_v16  ;;  %v6648_v32 = vrot.slane %v6647_v1, 4  ;;  %v12554_v23 = vpack.c.bf16 %v5788_v28, %v5788_v28  ;;  %v12552_v0 = vpack.c.bf16 %v5786_v6, %v5786_v6  ;;  %v5789_v41 = vmax.f32 %v5757_v7, 0.0  ;;  %v6412_v1 = vld [vmem:[#allocation3 + $0xbc] sm:$0x1]  ;;  %v16965_v6 = vld [vmem:[#allocation3 + $0x64] sm:$0xf] }
 0x3d2   : > { %v6657_v62 = vrot.slane %v6655_v8, 4  ;;  %v6643_v47 = vsel %vm14903_vm9, %v6638_v24, %v6642_v15  ;;  %v5787_v48 = vmax.f32 %v5755_v9, 0.0  ;;  %v6660_v5 = vrot.slane %v6658_v42, 5  ;;  %v16967_v9 = vld [vmem:[#allocation3 + $0x68] sm:$0x1] }
 0x3d3   : > { %v6653_v27 = vsel %vm14903_vm9, %v6648_v32, %v6652_v63  ;;  %v6246_v18 = vshrl.u32 %v12554_v23, 16  ;;  %v6249_v31 = vshll.u32 %v12554_v23, 16  ;;  %v6229_v39 = vshrl.u32 %v12552_v0, 16  ;;  %v6419_v63 = vld [vmem:[#allocation3 + $0xc8] sm:$0x1] }
 0x3d4   : > { %v12260_v52 = vcombine.low %v6643_v47, %v6653_v27  ;;  %v6232_v50 = vshll.u32 %v12552_v0, 16  ;;  %v12555_v3 = vpack.c.bf16 %v5789_v41, %v5789_v41  ;;  %v12553_v61 = vpack.c.bf16 %v5787_v48, %v5787_v48  ;;  %v16969_v42 = vld [vmem:[#allocation3 + $0x6c] sm:$0xf] }
 0x3d5   : > { %v6661_v25 = vor.u32 %v6660_v5, %v6657_v62  ;;  %v6248_v26 = vrot.slane %v6246_v18, 7  ;;  %v6231_v40 = vrot.slane %v6229_v39, 7  ;;  %v6664_v46 = vshll.u32 %v16952_v20, 16  ;;  %v16974_v62 = vld [vmem:[#allocation3 + $0x70] sm:$0xf] }
 0x3d6   : > { %13471 = vmatprep.mubr.bf16.mxu1 %v12260_v52  ;;  %v6668_v35 = vshrl.u32 %v16952_v20, 16  ;;  %v6254_v10 = vshrl.u32 %v12555_v3, 16  ;;  %v6257_v49 = vshll.u32 %v12555_v3, 16  ;;  %v6237_v58 = vshrl.u32 %v12553_v61, 16  ;;  %v16992_v3 = vld [vmem:[#allocation3 + $0x7c] sm:$0xf] }
 0x3d7   : > { %v6240_v37 = vshll.u32 %v12553_v61, 16  ;;  %v6251_v43 = vor.u32 %v6249_v31, %v6248_v26  ;;  %v6252_v57 = vrot.slane %v6248_v26, 4  ;;  %v6234_v15 = vor.u32 %v6232_v50, %v6231_v40 }
 0x3d8   : > { %v6235_v13 = vrot.slane %v6231_v40, 4  ;;  %v6256_v36 = vrot.slane %v6254_v10, 7  ;;  %v6239_v30 = vrot.slane %v6237_v58, 7  ;;  %v6662_v44 = vrot.slane %v6661_v25, 4  ;;  %v16996_v40 = vld [vmem:[#allocation3 + $0x74] sm:$0x1] }
 0x3d9   : > { %v6666_v29 = vrot.slane %v6664_v46, 5  ;;  %v6416_v16 = vsel %vm14921_vm11, %v6251_v43, %v6415_v11  ;;  %v6409_v12 = vsel %vm14921_vm11, %v6234_v15, %v6408_v21  ;;  %v6670_v56 = vrot.slane %v6668_v35, 4  ;;  %v16986_v11 = vld [vmem:[#allocation3 + $0x78] sm:$0xf] }
 0x3da   : > { %v6674_v28 = vshll.u32 %v16956_v22, 16  ;;  %6417 = vst [vmem:[#allocation3 + $0xc0] sm:$0xf] %v6416_v16  ;;  %6410 = vst [vmem:[#allocation3 + $0xb4] sm:$0xf] %v6409_v12  ;;  %v6259_v7 = vor.u32 %v6257_v49, %v6256_v36  ;;  %v6261_v8 = vrot.slane %v6256_v36, 4  ;;  %v6242_v24 = vor.u32 %v6240_v37, %v6239_v30 }
 0x3db   : > { %v6244_v32 = vrot.slane %v6239_v30, 4  ;;  %v6667_v60 = vsel %vm14903_vm9, %v6662_v44, %v6666_v29  ;;  %v6671_v23 = vor.u32 %v6670_v56, %v6666_v29  ;;  %v6679_v41 = vshrl.u32 %v16958_v19, 16  ;;  %v17001_v36 = vld [vmem:[#allocation3 + $0x80] sm:$0x1] }
 0x3dc   : > { %v6676_v0 = vrot.slane %v6674_v28, 5  ;;  %v6260_v47 = vsel %vm14909_vm10, %v6252_v57, %v6259_v7  ;;  %v6420_v27 = vsel %vm14874_vm5, %v6261_v8, %v6419_v63  ;;  %v6243_v48 = vsel %vm14909_vm10, %v6235_v13, %v6242_v24  ;;  %v17006_v24 = vld [vmem:[#allocation3 + $0x84] sm:$0xf] }
 0x3dd   : > { %v6413_v5 = vsel %vm14874_vm5, %v6244_v32, %v6412_v1  ;;  %6418 = vst [vmem:[#allocation3 + $0xc4] sm:$0xf] %v6260_v47  ;;  %6421 = vst [vmem:[#allocation3 + $0xc8] sm:$0x1] %v6420_v27  ;;  %v6672_v52 = vrot.slane %v6671_v23, 4  ;;  %v6681_v18 = vrot.slane %v6679_v41, 4 }
 0x3de   : > { %6411 = vst [vmem:[#allocation3 + $0xb8] sm:$0xf] %v6243_v48  ;;  %6414 = vst [vmem:[#allocation3 + $0xbc] sm:$0x1] %v6413_v5  ;;  %v6682_v31 = vshll.u32 %v16958_v19, 16  ;;  %v6688_v39 = vshll.u32 %v16965_v6, 16 }
 0x3df   : > { %v6692_v50 = vshrl.u32 %v16965_v6, 16  ;;  %v6698_v45 = vshll.u32 %v16967_v9, 16  ;;  %v6703_v21 = vshrl.u32 %v16969_v42, 16  ;;  %v6706_v59 = vshll.u32 %v16969_v42, 16  ;;  %v17014_v5 = vld [vmem:[#allocation3 + $0x88] sm:$0xf] }
 0x3e0   : > { %v6677_v61 = vsel %vm14903_vm9, %v6672_v52, %v6676_v0  ;;  %v6684_v25 = vrot.slane %v6682_v31, 5  ;;  %v6690_v26 = vrot.slane %v6688_v39, 5  ;;  %v6712_v46 = vshll.u32 %v16974_v62, 16 }
 0x3e1   : > { %v12261_v35 = vcombine.low %v6667_v60, %v6677_v61  ;;  %v6694_v10 = vrot.slane %v6692_v50, 4  ;;  %v6700_v49 = vrot.slane %v6698_v45, 5  ;;  %v6705_v58 = vrot.slane %v6703_v21, 4  ;;  %v17019_v50 = vld [vmem:[#allocation3 + $0x90] sm:$0xf] }
 0x3e2   : > { %v6685_v37 = vor.u32 %v6684_v25, %v6681_v18  ;;  %v6708_v43 = vrot.slane %v6706_v59, 5  ;;  %v6714_v57 = vrot.slane %v6712_v46, 5  ;;  %v6716_v15 = vshrl.u32 %v16974_v62, 16  ;;  %v17021_v61 = vld [vmem:[#allocation3 + $0x8c] sm:$0x1] }
 0x3e3   : > { %13472 = vmatmul.mubr.bf16.gmra.mrb[12].mxu1 %v12261_v35  ;;  %v6695_v13 = vor.u32 %v6694_v10, %v6690_v26  ;;  %v6722_v63 = vshll.u32 %v16996_v40, 16  ;;  %v6727_v30 = vshrl.u32 %v16986_v11, 16  ;;  %v6730_v44 = vshll.u32 %v16986_v11, 16 }
 0x3e4   : > { %v6686_v29 = vrot.slane %v6685_v37, 4  ;;  %v6709_v16 = vor.u32 %v6708_v43, %v6705_v58  ;;  %v6718_v12 = vrot.slane %v6716_v15, 4  ;;  %v6736_v1 = vshll.u32 %v16992_v3, 16 }
 0x3e5   : > { %v6696_v56 = vrot.slane %v6695_v13, 4  ;;  %v6724_v28 = vrot.slane %v6722_v63, 5  ;;  %v6729_v7 = vrot.slane %v6727_v30, 4  ;;  %v6732_v8 = vrot.slane %v6730_v44, 5  ;;  %v17033_v30 = vld [vmem:[#allocation3 + $0x98] sm:$0x1] }
 0x3e6   : > { %v6691_v32 = vsel %vm14903_vm9, %v6686_v29, %v6690_v26  ;;  %v6710_v60 = vrot.slane %v6709_v16, 4  ;;  %v6719_v23 = vor.u32 %v6718_v12, %v6714_v57  ;;  %v6738_v0 = vrot.slane %v6736_v1, 5 }
 0x3e7   : > { %v6701_v41 = vsel %vm14903_vm9, %v6696_v56, %v6700_v49  ;;  %v6733_v47 = vor.u32 %v6732_v8, %v6729_v7  ;;  %v6740_v27 = vshrl.u32 %v16992_v3, 16  ;;  %v6746_v48 = vshll.u32 %v17001_v36, 16  ;;  %v17028_v49 = vld [vmem:[#allocation3 + $0x94] sm:$0xf]  ;;  %v17038_v56 = vld [vmem:[#allocation3 + $0x9c] sm:$0xf] }
 0x3e8   : > { %v12262_v52 = vcombine.low %v6691_v32, %v6701_v41  ;;  %v6715_v18 = vsel %vm14903_vm9, %v6710_v60, %v6714_v57  ;;  %v6720_v31 = vrot.slane %v6719_v23, 4  ;;  %v6751_v39 = vshrl.u32 %v17006_v24, 16  ;;  %v17041_v60 = vld [vmem:[#allocation3 + $0xa0] sm:$0xf] }
 0x3e9   : > { %v6734_v45 = vrot.slane %v6733_v47, 4  ;;  %v6742_v21 = vrot.slane %v6740_v27, 4  ;;  %v6748_v59 = vrot.slane %v6746_v48, 5  ;;  %v6754_v25 = vshll.u32 %v17006_v24, 16  ;;  %v17045_v27 = vld [vmem:[#allocation3 + $0xa4] sm:$0x1] }
 0x3ea   : > { %13475 = vmatprep.mubr.bf16.mxu1 %v12262_v52  ;;  %v6725_v26 = vsel %vm14903_vm9, %v6720_v31, %v6724_v28  ;;  %v6753_v46 = vrot.slane %v6751_v39, 4  ;;  %v6760_v35 = vshll.u32 %v17014_v5, 16  ;;  %v6764_v10 = vshrl.u32 %v17014_v5, 16  ;;  %v17048_v39 = vld [vmem:[#allocation3 + $0xa8] sm:$0xf] }
 0x3eb   : > { %v12263_v58 = vcombine.low %v6715_v18, %v6725_v26  ;;  %v6739_v37 = vsel %vm14903_vm9, %v6734_v45, %v6738_v0  ;;  %v6743_v43 = vor.u32 %v6742_v21, %v6738_v0  ;;  %v6756_v57 = vrot.slane %v6754_v25, 5 }
 0x3ec   : > { %v6762_v15 = vrot.slane %v6760_v35, 5  ;;  %v6766_v13 = vrot.slane %v6764_v10, 4  ;;  %v6770_v63 = vshll.u32 %v17021_v61, 16  ;;  %v6775_v44 = vshrl.u32 %v17019_v50, 16 }
 0x3ed   : > { %13476 = vmatmul.mubr.bf16.gmra.mrb[16].mxu1 %v12263_v58  ;;  %v6744_v29 = vrot.slane %v6743_v43, 4  ;;  %v6757_v16 = vor.u32 %v6756_v57, %v6753_v46  ;;  %v6778_v12 = vshll.u32 %v17019_v50, 16  ;;  %v6784_v1 = vshll.u32 %v17028_v49, 16  ;;  %v17057_v58 = vld [vmem:[#allocation3 + $0xac] sm:$0xf] }
 0x3ee   : > { %v6767_v28 = vor.u32 %v6766_v13, %v6762_v15  ;;  %v6772_v7 = vrot.slane %v6770_v63, 5  ;;  %v6777_v8 = vrot.slane %v6775_v44, 4  ;;  %v6788_v32 = vshrl.u32 %v17028_v49, 16 }
 0x3ef   : > { %v6749_v23 = vsel %vm14903_vm9, %v6744_v29, %v6748_v59  ;;  %v6758_v0 = vrot.slane %v6757_v16, 4  ;;  %v6780_v41 = vrot.slane %v6778_v12, 5  ;;  %v6786_v47 = vrot.slane %v6784_v1, 5  ;;  %v17063_v12 = vld [vmem:[#allocation3 + $0xb4] sm:$0xf] }
 0x3f0   : > { %v12264_v48 = vcombine.low %v6739_v37, %v6749_v23  ;;  %v6768_v52 = vrot.slane %v6767_v28, 4  ;;  %v6790_v18 = vrot.slane %v6788_v32, 4  ;;  %v6794_v31 = vshll.u32 %v17033_v30, 16  ;;  %v17069_v32 = vld [vmem:[#allocation3 + $0xb8] sm:$0xf] }
 0x3f1   : > { %v6763_v45 = vsel %vm14903_vm9, %v6758_v0, %v6762_v15  ;;  %v6781_v21 = vor.u32 %v6780_v41, %v6777_v8  ;;  %v6799_v25 = vshrl.u32 %v17038_v56, 16  ;;  %v6802_v59 = vshll.u32 %v17038_v56, 16  ;;  %v17059_v15 = vld [vmem:[#allocation3 + $0xb0] sm:$0x1] }
 0x3f2   : > { %13479 = vmatprep.mubr.bf16.mxu1 %v12264_v48  ;;  %v6773_v26 = vsel %vm14903_vm9, %v6768_v52, %v6772_v7  ;;  %v6791_v46 = vor.u32 %v6790_v18, %v6786_v47  ;;  %v6796_v35 = vrot.slane %v6794_v31, 5  ;;  %v6808_v10 = vshll.u32 %v17041_v60, 16 }
 0x3f3   : > { %v12265_v37 = vcombine.low %v6763_v45, %v6773_v26  ;;  %v6782_v43 = vrot.slane %v6781_v21, 4  ;;  %v6801_v57 = vrot.slane %v6799_v25, 4  ;;  %v6804_v13 = vrot.slane %v6802_v59, 5  ;;  %v17074_v21 = vld [vmem:[#allocation3 + $0xbc] sm:$0x1] }
 0x3f4   : > { %v6792_v63 = vrot.slane %v6791_v46, 4  ;;  %v6810_v44 = vrot.slane %v6808_v10, 5  ;;  %v6812_v29 = vshrl.u32 %v17041_v60, 16  ;;  %v6818_v16 = vshll.u32 %v17045_v27, 16 }
 0x3f5   : > { %13480 = vmatmul.mubr.bf16.gmra.mrb[20].mxu1 %v12265_v37  ;;  %v6787_v1 = vsel %vm14903_vm9, %v6782_v43, %v6786_v47  ;;  %v6805_v28 = vor.u32 %v6804_v13, %v6801_v57  ;;  %v6823_v7 = vshrl.u32 %v17048_v39, 16  ;;  %v6826_v8 = vshll.u32 %v17048_v39, 16 }
 0x3f6   : > { %v6797_v23 = vsel %vm14903_vm9, %v6792_v63, %v6796_v35  ;;  %v6814_v0 = vrot.slane %v6812_v29, 4  ;;  %v6820_v41 = vrot.slane %v6818_v16, 5  ;;  %v6832_v48 = vshll.u32 %v17057_v58, 16 }
 0x3f7   : > { %v12266_v52 = vcombine.low %v6787_v1, %v6797_v23  ;;  %v6806_v18 = vrot.slane %v6805_v28, 4  ;;  %v6825_v31 = vrot.slane %v6823_v7, 4  ;;  %v6828_v45 = vrot.slane %v6826_v8, 5 }
 0x3f8   : > { %v6815_v47 = vor.u32 %v6814_v0, %v6810_v44  ;;  %v6834_v25 = vrot.slane %v6832_v48, 5  ;;  %v6836_v59 = vshrl.u32 %v17057_v58, 16  ;;  %v6842_v26 = vshll.u32 %v17059_v15, 16 }
 0x3f9   : > { %13483 = vmatprep.mubr.bf16.mxu1 %v12266_v52  ;;  %v6829_v46 = vor.u32 %v6828_v45, %v6825_v31  ;;  %v6847_v35 = vshrl.u32 %v17063_v12, 16  ;;  %v6850_v10 = vshll.u32 %v17063_v12, 16  ;;  %v6811_v37 = vsel %vm14903_vm9, %v6806_v18, %v6810_v44 }
 0x3fa   : > { %v6816_v43 = vrot.slane %v6815_v47, 4  ;;  %v6838_v57 = vrot.slane %v6836_v59, 4  ;;  %v6856_v13 = vshll.u32 %v17069_v32, 16  ;;  %v6860_v1 = vshrl.u32 %v17069_v32, 16 }
 0x3fb   : > { %v6830_v63 = vrot.slane %v6829_v46, 4  ;;  %v6849_v29 = vrot.slane %v6847_v35, 4  ;;  %v6852_v16 = vrot.slane %v6850_v10, 5  ;;  %v6866_v23 = vshll.u32 %v17074_v21, 16 }
 0x3fc   : > { %v6821_v28 = vsel %vm14903_vm9, %v6816_v43, %v6820_v41  ;;  %v6839_v7 = vor.u32 %v6838_v57, %v6834_v25  ;;  %v6858_v8 = vrot.slane %v6856_v13, 5  ;;  %v6862_v52 = vrot.slane %v6860_v1, 4 }
 0x3fd   : > { %v12267_v0 = vcombine.low %v6811_v37, %v6821_v28  ;;  %v6853_v48 = vor.u32 %v6852_v16, %v6849_v29  ;;  %v6844_v18 = vrot.slane %v6842_v26, 5  ;;  %v6835_v47 = vsel %vm14903_vm9, %v6830_v63, %v6834_v25  ;;  %v14686_v28 = vld [vmem:[#allocation3] sm:$0xf]  ;;  %v7475_v16 = vld [vmem:[#allocation3 + $0x78] sm:$0xe] }
 0x3fe   : > { %v6840_v44 = vrot.slane %v6839_v7, 4  ;;  %v6863_v45 = vor.u32 %v6862_v52, %v6858_v8  ;;  %v6868_v46 = vrot.slane %v6866_v23, 5  ;;  %v12285_v37 = vcombine.low %v16937_v51, %v16952_v20  ;;  %v17111_v7 = vld [vmem:[#allocation3 + $0x4] sm:$0xf] }
 0x3ff   : > { %13484 = vmatmul.mubr.bf16.gmra.mrb[24].mxu1 %v12267_v0  ;;  %v6854_v31 = vrot.slane %v6853_v48, 4  ;;  %v12286_v26 = vcombine.low %v16958_v19, %v16965_v6  ;;  %v12287_v43 = vcombine.low %v16969_v42, %v16974_v62  ;;  %v12288_v25 = vcombine.low %v16986_v11, %v16992_v3  ;;  %v14688_v0 = vld [vmem:[#allocation3 + $0xc] sm:$0xf]  ;;  %v17116_v48 = vld [vmem:[#allocation3 + $0x10] sm:$0xf] }
 0x400   : > { %v6845_v59 = vsel %vm14903_vm9, %v6840_v44, %v6844_v18  ;;  %v6864_v10 = vrot.slane %v6863_v45, 4  ;;  %v12279_v52 = vcombine.low %v14688_v0, %v17116_v48  ;;  %v14551_v44 = vld [vmem:[#allocation4 + $0x88] sm:$0xff]   ;;  %v7472_v18 = vld [vmem:[#allocation3 + $0x54] sm:$0xe]  ;;  %v17119_v45 = vld [vmem:[#allocation3 + $0x1c] sm:$0xf]  ;;  %v18574_v51 = vcombine.low %v17006_v24, %v17014_v5 }
 0x401   : > { %v12268_v41 = vcombine.low %v6835_v47, %v6845_v59  ;;  %v6859_v35 = vsel %vm14903_vm9, %v6854_v31, %v6858_v8  ;;  %v12278_v8 = vcombine.low %v14686_v28, %v17111_v7  ;;  %v14690_v31 = vld [vmem:[#allocation3 + $0x18] sm:$0xf]  ;;  %v7473_v59 = vld [vmem:[#allocation3 + $0x60] sm:$0xe]  ;;  %v7574_v23 = vrot.slane %v16967_v9, 5 }
 0x402   : > { %v6869_v13 = vsel %vm14903_vm9, %v6864_v10, %v6868_v46  ;;  %v12280_v47 = vcombine.low %v14690_v31, %v17119_v45  ;;  %v7564_v46 = vrot.slane %v16952_v20, 5  ;;  %v7474_v10 = vld [vmem:[#allocation3 + $0x6c] sm:$0xe]  ;;  %v7567_v31 = vrot.slane %v16956_v22, 5 }
 0x403   : > { %13487 = vmatprep.mubr.bf16.mxu1 %v12268_v41  ;;  %v12269_v1 = vcombine.low %v6859_v35, %v6869_v13  ;;  %v12309_v41 = vrot.slane %v7472_v18, 9  ;;  %v7571_v35 = vrot.slane %v16965_v6, 5  ;;  %v14692_v13 = vld [vmem:[#allocation3 + $0x24] sm:$0xf]  ;;  %v12311_v22 = vrot.slane %v7474_v10, 9 }
 0x404   : > { %v7566_v0 = vrot.slane %v7564_v46, 4  ;;  %v18575_v20 = vcombine.low %v17019_v50, %v17028_v49  ;;  %v7515_v19 = vrot.slane %v17111_v7, 5  ;;  %v7465_v6 = vld [vmem:[#allocation3] sm:$0xe]  ;;  %v18577_v11 = vcombine.low %v17048_v39, %v17057_v58  ;;  %v14695_v39 = vld [vmem:[#allocation3 + $0x14] sm:$0x1] }
 0x405   : > { %v7573_v18 = vrot.slane %v7571_v35, 4  ;;  %v7529_v50 = vrot.slane %v17119_v45, 5  ;;  %v7467_v7 = vld [vmem:[#allocation3 + $0x18] sm:$0xe] }
 0x406   : > { %v7517_v42 = vrot.slane %v7515_v19, 4 }
 0x407   : > { %13488 = vmatmul.mubr.bf16.gmra.mrb[28].mxu1 %v12269_v1  ;;  %v17125_v1 = vld [vmem:[#allocation3 + $0x28] sm:$0xf]  ;;  %v17149_v9 = vsel %vm15336_vm14, %v7573_v18, %v7574_v23 }
 0x408   : > { %13507 = vmatprep.mubr.bf16.mxu1 %v12278_v8  ;;  %v12281_v28 = vcombine.low %v14692_v13, %v17125_v1  ;;  %v14554_v8 = vld [vmem:[#allocation4 + $0x90] sm:$0xff]   ;;  %v17138_v13 = vsel %vm15336_vm14, %v7566_v0, %v7567_v31  ;;  %v14557_v0 = vld [vmem:[#allocation4 + $0x98] sm:$0xff]   ;;  %v12312_v31 = vrot.slane %v7475_v16, 9  ;;  %v7599_v16 = vrot.slane %v17028_v49, 5 }
 0x409   : > { %v7536_v45 = vrot.slane %v17125_v1, 5  ;;  %v14698_v1 = vld [vmem:[#allocation3 + $0x2c] sm:$0x1] }
 0x40f   : > { %13508 = vmatmul.mubr.bf16.vlgmr.msra.gmra.mrb[0].mxu1 %v12279_v52  ;;  %v12310_v52 = vrot.slane %v7473_v59, 9  ;;  %v7578_v59 = vrot.slane %v16974_v62, 5  ;;  %v18576_v62 = vcombine.low %v17038_v56, %v17041_v60  ;;  %v18578_v56 = vcombine.low %v17063_v12, %v17069_v32  ;;  %v14697_v12 = vld [vmem:[#allocation3 + $0x34] sm:$0xf] }
 0x410   : > { %13511 = vmatprep.mubr.bf16.mxu1 %v12280_v47  ;;  %13540 = vmatpush3.bf16.msra.mxu1 %v16901_v2  ;;  %v12282_v47 = vcombine.low %v16854_v17, %v16860_v34  ;;  %v17133_v2 = vsel %vm15336_vm14, %v12309_v41, %v7564_v46  ;;  %v7476_v17 = vld [vmem:[#allocation3 + $0x84] sm:$0xe]  ;;  %v7581_v46 = vrot.slane %v16996_v40, 5  ;;  %v7585_v41 = vrot.slane %v16992_v3, 5 }
 0x411   : > { %13541 = vmatprep.subr.bf16.mxu1 %v14551_v44  ;;  %v17142_v29 = vsel %vm15336_vm14, %v12310_v52, %v7571_v35  ;;  %v7580_v10 = vrot.slane %v7578_v59, 4  ;;  %v7477_v52 = vld [vmem:[#allocation3 + $0x90] sm:$0xe]  ;;  %v17158_v34 = vsel %vm15336_vm14, %v12311_v22, %v7578_v59  ;;  %v12313_v18 = vrot.slane %v7476_v17, 9 }
 0x412   : > { %v7587_v23 = vrot.slane %v7585_v41, 4  ;;  %v7592_v40 = vrot.slane %v17014_v5, 5  ;;  %v17167_v35 = vsel %vm15336_vm14, %v12312_v31, %v7585_v41  ;;  %v12314_v17 = vrot.slane %v7477_v52, 9  ;;  %v7479_v31 = vld [vmem:[#allocation3 + $0xa8] sm:$0xe]  ;;  %v14563_v52 = vld [vmem:[#allocation4 + $0xa8] sm:$0xff]  }
 0x413   : > { %v17163_v63 = vsel %vm15336_vm14, %v7580_v10, %v7581_v46  ;;  %v7478_v46 = vld [vmem:[#allocation3 + $0x9c] sm:$0xe]  ;;  %v12283_v41 = vcombine.low %v16874_v38, %v16890_v14  ;;  %v7606_v14 = vrot.slane %v17041_v60, 5  ;;  %v7522_v5 = vrot.slane %v17116_v48, 5  ;;  %v7466_v60 = vld [vmem:[#allocation3 + $0xc] sm:$0xe] }
 0x414   : > { %13542 = vmatpush3.bf16.msra.mxu1 %v14551_v44  ;;  %v7588_v44 = vrot.slane %v17001_v36, 5  ;;  %v7595_v36 = vrot.slane %v17021_v61, 5  ;;  %v7594_v59 = vrot.slane %v7592_v40, 4  ;;  %v14560_v10 = vld [vmem:[#allocation4 + $0xa0] sm:$0xff]   ;;  %v17184_v22 = vsel %vm15336_vm14, %v12313_v18, %v7592_v40  ;;  %v7480_v40 = vld [vmem:[#allocation3 + $0xb4] sm:$0xe] }
 0x415   : > { %13543 = vmatprep.subr.bf16.mxu1 %v14554_v8  ;;  %v17192_v38 = vsel %vm15336_vm14, %v12314_v17, %v7599_v16  ;;  %v7613_v18 = vrot.slane %v17057_v58, 5  ;;  %v12316_v17 = vrot.slane %v7479_v31, 9  ;;  %v12284_v61 = vcombine.low %v16907_v4, %v16911_v55 }
 0x416   : > { %v12317_v4 = vrot.slane %v7480_v40, 9  ;;  %v7525_v58 = vrot.slane %v14695_v39, 5  ;;  %v7470_v39 = vld [vmem:[#allocation3 + $0x3c] sm:$0xe] }
 0x417   : > { %13512 = vmatmul.mubr.bf16.gmra.mrb[4].mxu1 %v12281_v28  ;;  %v17175_v28 = vsel %vm15336_vm14, %v7587_v23, %v7588_v44  ;;  %v17188_v44 = vsel %vm15336_vm14, %v7594_v59, %v7595_v36  ;;  %v12315_v23 = vrot.slane %v7478_v46, 9  ;;  %v7608_v59 = vrot.slane %v7606_v14, 4 }
 0x418   : > { %13515 = vmatprep.mubr.bf16.mxu1 %v12282_v47  ;;  %13544 = vmatpush3.bf16.msra.mxu1 %v14554_v8  ;;  %v7601_v47 = vrot.slane %v7599_v16, 4  ;;  %v7602_v8 = vrot.slane %v17033_v30, 5  ;;  %v7609_v16 = vrot.slane %v17045_v27, 5  ;;  %v7615_v57 = vrot.slane %v7613_v18, 4 }
 0x419   : > { %13545 = vmatprep.subr.bf16.mxu1 %v14557_v0  ;;  %v7620_v46 = vrot.slane %v17069_v32, 5  ;;  %v17219_v27 = vsel %vm15336_vm14, %v12316_v17, %v7613_v18  ;;  %v14566_v18 = vld [vmem:[#allocation4 + $0xb0] sm:$0xff]   ;;  %v7543_v32 = vrot.slane %v14697_v12, 5 }
 0x41a   : > { %v17199_v30 = vsel %vm15336_vm14, %v7601_v47, %v7602_v8  ;;  %v7616_v47 = vrot.slane %v17059_v15, 5  ;;  %v17215_v8 = vsel %vm15336_vm14, %v7608_v59, %v7609_v16  ;;  %v12303_v59 = vrot.slane %v7466_v60, 9 }
 0x41b   : > { %v7622_v36 = vrot.slane %v7620_v46, 4  ;;  %v12304_v16 = vrot.slane %v7467_v7, 9  ;;  %v14701_v7 = vld [vmem:[#allocation3 + $0x44] sm:$0x1] }
 0x41c   : > { %13546 = vmatpush3.bf16.msra.mxu1 %v14557_v0  ;;  %v17211_v0 = vsel %vm15336_vm14, %v12315_v23, %v7606_v14  ;;  %v17225_v15 = vsel %vm15336_vm14, %v7615_v57, %v7616_v47  ;;  %v7623_v14 = vrot.slane %v17074_v21, 5  ;;  %v14569_v21 = vld [vmem:[#allocation4 + $0xb8] sm:$0xff]   ;;  %v7523_v47 = vsel %vm15336_vm14, %v12303_v59, %v7522_v5  ;;  %v14574_v59 = vld [vmem:[#allocation4 + $0xe0] sm:$0xff]   ;;  %v8373_v23 = vld [vmem:[#allocation3 + $0xac] sm:$0xf] }
 0x41d   : > { %13547 = vmatprep.subr.bf16.mxu1 %v14560_v10 }
 0x41e   : > { %v17236_v40 = vsel %vm15336_vm14, %v7622_v36, %v7623_v14  ;;  %v14571_v14 = vld [vmem:[#allocation4 + $0xc8] sm:$0xff]  }
 0x41f   : > { %13516 = vmatmul.mubr.bf16.gmra.mrb[8].mxu1 %v12283_v41  ;;  %v17232_v41 = vsel %vm15336_vm14, %v12317_v4, %v7620_v46  ;;  %v7530_v4 = vsel %vm15336_vm14, %v12304_v16, %v7529_v50 }
 0x420   : > { %13519 = vmatprep.mubr.bf16.mxu1 %v12284_v61  ;;  %13548 = vmatpush3.bf16.msra.mxu1 %v14560_v10  ;;  %v14570_v10 = vld [vmem:[#allocation4 + $0xc0] sm:$0xff]   ;;  %v12302_v61 = vrot.slane %v7465_v6, 9  ;;  %v7469_v6 = vld [vmem:[#allocation3 + $0x30] sm:$0xe] }
 0x421   : > { %13549 = vmatprep.subr.bf16.mxu1 %v14563_v52 }
 0x422   : > { %v7516_v3 = vsel %vm15336_vm14, %v12302_v61, %v7515_v19  ;;  %v7539_v19 = vrot.slane %v14698_v1, 5  ;;  %v14572_v61 = vld [vmem:[#allocation4 + $0xd0] sm:$0xff]   ;;  %v17307_v1 = vld [vmem:[#allocation3 + $0x38] sm:$0x1] }
 0x424   : > { %13550 = vmatpush3.bf16.msra.mxu1 %v14563_v52  ;;  %v14696_v52 = vld [vmem:[#allocation3 + $0x20] sm:$0x1] }
 0x425   : > { %13551 = vmatprep.subr.bf16.mxu1 %v14566_v18  ;;  %v7532_v36 = vrot.slane %v14696_v52, 5  ;;  %v7553_v52 = vrot.slane %v14701_v7, 5 }
 0x427   : > { %13520 = vmatmul.mubr.bf16.gmra.mrb[12].mxu1 %v12285_v37  ;;  %v14694_v37 = vld [vmem:[#allocation3 + $0x8] sm:$0x1] }
 0x428   : > { %13523 = vmatprep.mubr.bf16.mxu1 %v12286_v26  ;;  %13552 = vmatpush3.bf16.msra.mxu1 %v14566_v18  ;;  %v7518_v26 = vrot.slane %v14694_v37, 5  ;;  %v14699_v37 = vld [vmem:[#allocation3 + $0x38] sm:$0x1] }
 0x429   : > { %13553 = vmatprep.subr.bf16.mxu1 %v14569_v21 }
 0x42a   : > { %v7519_v24 = vsel %vm15336_vm14, %v7517_v42, %v7518_v26  ;;  %v7546_v26 = vrot.slane %v14699_v37, 5  ;;  %v17312_v37 = vld [vmem:[#allocation3 + $0x44] sm:$0x1] }
 0x42b   : > { %v12318_v49 = vcombine.low %v7516_v3, %v7519_v24  ;;  %v12306_v24 = vrot.slane %v7469_v6, 9 }
 0x42c   : > { %13554 = vmatpush3.bf16.msra.mxu1 %v14569_v21  ;;  %v7538_v21 = vrot.slane %v7536_v45, 4 }
 0x42d   : > { %13587 = vmatprep.subr.bf16.mxu1 %v14570_v10 }
 0x42f   : > { %13524 = vmatmul.mubr.bf16.gmra.mrb[16].mxu1 %v12287_v43  ;;  %v7524_v43 = vrot.slane %v7522_v5, 4 }
 0x430   : > { %13527 = vmatprep.mubr.bf16.mxu1 %v12288_v25  ;;  %v7531_v25 = vrot.slane %v7529_v50, 4  ;;  %v7557_v50 = vrot.slane %v16911_v55, 5  ;;  %v7560_v55 = vrot.slane %v16913_v53, 5  ;;  %v14575_v53 = vld [vmem:[#allocation4 + $0xe8] sm:$0xff]  }
 0x431   : > { %v7526_v48 = vsel %vm15336_vm14, %v7524_v43, %v7525_v58  ;;  %v7544_v43 = vsel %vm15336_vm14, %v12306_v24, %v7543_v32 }
 0x432   : > { %v7533_v17 = vsel %vm15336_vm14, %v7531_v25, %v7532_v36  ;;  %v12319_v46 = vcombine.low %v7523_v47, %v7526_v48  ;;  %v7559_v58 = vrot.slane %v7557_v50, 4  ;;  %v7471_v36 = vld [vmem:[#allocation3 + $0x48] sm:$0xe]  ;;  %v12307_v48 = vrot.slane %v7470_v39, 9 }
 0x433   : > { %v12320_v18 = vcombine.low %v7530_v4, %v7533_v17  ;;  %v12308_v16 = vrot.slane %v7471_v36, 9  ;;  %v14576_v4 = vld [vmem:[#allocation4 + $0xf0] sm:$0xff]   ;;  %v17344_v36 = vld [vmem:[#allocation3 + $0x64] sm:$0xf] }
 0x434   : > { %v7561_v17 = vsel %vm15336_vm14, %v7559_v58, %v7560_v55 }
 0x435   : > { %v7558_v47 = vsel %vm15336_vm14, %v12308_v16, %v7557_v50  ;;  %v18580_v50 = vcombine.low %v17142_v29, %v17149_v9  ;;  %v9177_v9 = vrot.slane %v17307_v1, 5 }
 0x437   : > { %13528 = vmatmul.mubr.bf16.gmra.mrb[20].mxu1 %v18574_v51  ;;  %v7468_v51 = vld [vmem:[#allocation3 + $0x24] sm:$0xe] }
 0x438   : > { %13531 = vmatprep.mubr.bf16.mxu1 %v18575_v20  ;;  %v7545_v20 = vrot.slane %v7543_v32, 4  ;;  %v12305_v42 = vrot.slane %v7468_v51, 9  ;;  %v9089_v51 = vld [vmem:[#allocation3 + $0x24] sm:$0xe] }
 0x43a   : > { %v7547_v5 = vsel %vm15336_vm14, %v7545_v20, %v7546_v26  ;;  %v14577_v20 = vld [vmem:[#allocation4 + $0xf8] sm:$0xff]   ;;  %v17314_v26 = vld [vmem:[#allocation3 + $0x4c] sm:$0xf] }
 0x43b   : > { %v12322_v60 = vcombine.low %v7544_v43, %v7547_v5  ;;  %v9091_v5 = vld [vmem:[#allocation3 + $0x3c] sm:$0xe]  ;;  %v9092_v43 = vld [vmem:[#allocation3 + $0x48] sm:$0xe] }
 0x43c   : > { %v12394_v58 = vrot.slane %v9091_v5, 9  ;;  %v18583_v5 = vcombine.low %v17158_v34, %v17163_v63  ;;  %v17395_v63 = vld [vmem:[#allocation3 + $0x80] sm:$0x1] }
 0x43f   : > { %13532 = vmatmul.mubr.bf16.gmra.mrb[24].mxu1 %v18576_v62  ;;  %v7540_v62 = vsel %vm15336_vm14, %v7538_v21, %v7539_v19  ;;  %v17305_v21 = vld [vmem:[#allocation3 + $0x34] sm:$0xf]  ;;  %v17309_v19 = vld [vmem:[#allocation3 + $0x40] sm:$0xf] }
 0x440   : > { %13535 = vmatprep.mubr.bf16.mxu1 %v18577_v11  ;;  %v14700_v11 = vld [vmem:[#allocation3 + $0x40] sm:$0xf]  ;;  %v9181_v7 = vrot.slane %v17309_v19, 5 }
 0x441   : > { %v7550_v3 = vrot.slane %v14700_v11, 5  ;;  %v12392_v11 = vrot.slane %v9089_v51, 9 }
 0x443   : > { %v7552_v25 = vrot.slane %v7550_v3, 4  ;;  %v7551_v12 = vsel %vm15336_vm14, %v12307_v48, %v7550_v3  ;;  %v12395_v48 = vrot.slane %v9092_v43, 9 }
 0x447   : > { %13536 = vmatmul.mubr.bf16.gmra.mrb[28].mxu1 %v18578_v56  ;;  %v14573_v56 = vld [vmem:[#allocation4 + $0xd8] sm:$0xff]  }
 0x448   : > { %13555 = vmatprep.mubr.bf16.mxu1 %v12318_v49 }
 0x44f   : > { %13556 = vmatmul.mubr.bf16.vlgmr.msra.gmra.mrb[0].mxu1 %v12319_v46  ;;  %v12324_v46 = vcombine.low %v7558_v47, %v7561_v17  ;;  %v17358_v17 = vsel %vm15336_vm14, %v12394_v58, %v9181_v7  ;;  %v9094_v47 = vld [vmem:[#allocation3 + $0x60] sm:$0xe]  ;;  %v18585_v58 = vcombine.low %v17167_v35, %v17175_v28 }
 0x450   : > { %13559 = vmatprep.mubr.bf16.mxu1 %v12320_v18  ;;  %13588 = vmatpush3.bf16.msra.mxu1 %v14570_v10  ;;  %v7537_v10 = vsel %vm15336_vm14, %v12305_v42, %v7536_v45  ;;  %v7554_v45 = vsel %vm15336_vm14, %v7552_v25, %v7553_v52  ;;  %v17303_v18 = vld [vmem:[#allocation3 + $0x2c] sm:$0x1]  ;;  %v18579_v42 = vcombine.low %v17133_v2, %v17138_v13  ;;  %v17328_v2 = vld [vmem:[#allocation4 + $0x100] sm:$0xff]   ;;  %v9093_v52 = vld [vmem:[#allocation3 + $0x54] sm:$0xe] }
 0x451   : > { %13589 = vmatprep.subr.bf16.mxu1 %v14571_v14  ;;  %v12321_v49 = vcombine.low %v7537_v10, %v7540_v62  ;;  %v12323_v32 = vcombine.low %v7551_v12, %v7554_v45  ;;  %v17319_v62 = vld [vmem:[#allocation3 + $0x50] sm:$0x1]  ;;  %v9170_v24 = vrot.slane %v17303_v18, 5  ;;  %v17325_v10 = vld [vmem:[#allocation3 + $0x58] sm:$0xf]  ;;  %v9188_v45 = vrot.slane %v17314_v26, 5 }
 0x452   : > { %v17330_v13 = vld [vmem:[#allocation3 + $0x5c] sm:$0x1]  ;;  %v9183_v12 = vrot.slane %v9181_v7, 4  ;;  %v12396_v51 = vrot.slane %v9093_v52, 9  ;;  %v17393_v7 = vld [vmem:[#allocation3 + $0x74] sm:$0x1] }
 0x453   : > { %v9212_v34 = vrot.slane %v17393_v7, 5 }
 0x454   : > { %13590 = vmatpush3.bf16.msra.mxu1 %v14571_v14  ;;  %v17301_v14 = vld [vmem:[#allocation3 + $0x28] sm:$0xf] }
 0x455   : > { %13591 = vmatprep.subr.bf16.mxu1 %v14572_v61  ;;  %v9167_v6 = vrot.slane %v17301_v14, 5 }
 0x457   : > { %13560 = vmatmul.mubr.bf16.gmra.mrb[4].mxu1 %v12321_v49  ;;  %v9169_v3 = vrot.slane %v9167_v6, 4  ;;  %v9174_v49 = vrot.slane %v17305_v21, 5 }
 0x458   : > { %13563 = vmatprep.mubr.bf16.mxu1 %v12322_v60  ;;  %13592 = vmatpush3.bf16.msra.mxu1 %v14572_v61  ;;  %v9090_v61 = vld [vmem:[#allocation3 + $0x30] sm:$0xe] }
 0x459   : > { %13593 = vmatprep.subr.bf16.mxu1 %v14573_v56  ;;  %v17338_v60 = vsel %vm15336_vm14, %v9169_v3, %v9170_v24  ;;  %v12393_v29 = vrot.slane %v9090_v61, 9  ;;  %v9176_v39 = vrot.slane %v9174_v49, 4  ;;  %v9202_v3 = vrot.slane %v17344_v36, 5  ;;  %v9095_v24 = vld [vmem:[#allocation3 + $0x6c] sm:$0xe] }
 0x45b   : > { %v17348_v55 = vsel %vm15336_vm14, %v12393_v29, %v9174_v49  ;;  %v17354_v16 = vsel %vm15336_vm14, %v9176_v39, %v9177_v9  ;;  %v12397_v9 = vrot.slane %v9094_v47, 9  ;;  %v9096_v39 = vld [vmem:[#allocation3 + $0x78] sm:$0xe]  ;;  %v17433_v49 = vld [vmem:[#allocation3 + $0xa0] sm:$0xf] }
 0x45c   : > { %13594 = vmatpush3.bf16.msra.mxu1 %v14573_v56  ;;  %v17334_v56 = vsel %vm15336_vm14, %v12392_v11, %v9167_v6  ;;  %v17367_v6 = vld [vmem:[#allocation3 + $0x70] sm:$0xf]  ;;  %v9198_v11 = vrot.slane %v17330_v13, 5 }
 0x45d   : > { %13595 = vmatprep.subr.bf16.mxu1 %v14574_v59  ;;  %v17414_v28 = vsel %vm15336_vm14, %v12397_v9, %v9202_v3  ;;  %v9209_v47 = vrot.slane %v17367_v6, 5 }
 0x45e   : > { %18588 = vst [vmem:[#allocation12_spill] sm:$0xff] %v17414_v28  ;;  %v9099_v28 = vld [vmem:[#allocation3 + $0x9c] sm:$0xe] }
 0x45f   : > { %13564 = vmatmul.mubr.bf16.gmra.mrb[8].mxu1 %v12323_v32  ;;  %v9191_v32 = vrot.slane %v17319_v62, 5  ;;  %v9211_v9 = vrot.slane %v9209_v47, 4 }
 0x460   : > { %13567 = vmatprep.mubr.bf16.mxu1 %v12324_v46  ;;  %13596 = vmatpush3.bf16.msra.mxu1 %v14574_v59  ;;  %v9184_v59 = vrot.slane %v17312_v37, 5 }
 0x461   : > { %13597 = vmatprep.subr.bf16.mxu1 %v14575_v53 }
 0x462   : > { %v17371_v61 = vsel %vm15336_vm14, %v9183_v12, %v9184_v59  ;;  %v9204_v59 = vrot.slane %v9202_v3, 4  ;;  %v17406_v12 = vld [vmem:[#allocation3 + $0x94] sm:$0xf]  ;;  %v8371_v3 = vld [vmem:[#allocation3 + $0xa4] sm:$0x1] }
 0x463   : > { %18581 = vst [vmem:[#allocation22_spill] sm:$0xff] %v17371_v61  ;;  %v9230_v57 = vrot.slane %v17406_v12, 5  ;;  %v9995_v61 = vld [vmem:[#allocation3 + $0x74] sm:$0x1] }
 0x464   : > { %13598 = vmatpush3.bf16.msra.mxu1 %v14575_v53  ;;  %v17362_v53 = vld [vmem:[#allocation3 + $0x68] sm:$0x1] }
 0x465   : > { %13599 = vmatprep.subr.bf16.mxu1 %v14576_v4 }
 0x467   : > { %13568 = vmatmul.mubr.bf16.gmra.mrb[12].mxu1 %v18579_v42  ;;  %v17375_v42 = vsel %vm15336_vm14, %v12395_v48, %v9188_v45  ;;  %v9205_v48 = vrot.slane %v17362_v53, 5 }
 0x468   : > { %13571 = vmatprep.mubr.bf16.mxu1 %v18580_v50  ;;  %13600 = vmatpush3.bf16.msra.mxu1 %v14576_v4  ;;  %v9190_v4 = vrot.slane %v9188_v45, 4  ;;  %18582 = vst [vmem:[#allocation17_spill] sm:$0xff] %v17375_v42  ;;  %v17382_v50 = vld [vmem:[#allocation3 + $0x7c] sm:$0xf]  ;;  %v17404_v45 = vld [vmem:[#allocation3 + $0x88] sm:$0xf] }
 0x469   : > { %13601 = vmatprep.subr.bf16.mxu1 %v14577_v20  ;;  %v9223_v46 = vrot.slane %v17404_v45, 5  ;;  %v10733_v42 = vld [vmem:[#allocation3 + $0x6c] sm:$0xe] }
 0x46a   : > { %v17388_v43 = vsel %vm15336_vm14, %v9190_v4, %v9191_v32  ;;  %v12398_v32 = vrot.slane %v9095_v24, 9  ;;  %v17417_v4 = vld [vmem:[#allocation3 + $0x8c] sm:$0x1] }
 0x46b   : > { %18584 = vst [vmem:[#allocation27_spill] sm:$0xff] %v17388_v43  ;;  %v9226_v25 = vrot.slane %v17417_v4, 5  ;;  %v9225_v31 = vrot.slane %v9223_v46, 4  ;;  %v9100_v43 = vld [vmem:[#allocation3 + $0xa8] sm:$0xe] }
 0x46c   : > { %13602 = vmatpush3.bf16.msra.mxu1 %v14577_v20  ;;  %v9195_v20 = vrot.slane %v17325_v10, 5  ;;  %v17430_v24 = vsel %vm15336_vm14, %v12398_v32, %v9209_v47  ;;  %v17443_v32 = vsel %vm15336_vm14, %v9211_v9, %v9212_v34  ;;  %v18594_v34 = vcombine.low %v17184_v22, %v17188_v44  ;;  %v8380_v9 = vld [vmem:[#allocation3 + $0xc8] sm:$0x1] }
 0x46d   : > { %13635 = vmatprep.subr.bf16.mxu1 %v17328_v2  ;;  %18590 = vst [vmem:[#allocation14_spill] sm:$0xff] %v17430_v24  ;;  %18592 = vst [vmem:[#allocation16_spill] sm:$0xff] %v17443_v32  ;;  %v17469_v22 = vsel %vm15336_vm14, %v9225_v31, %v9226_v25  ;;  %v14585_v31 = vld [vmem:[#allocation3 + $0x48] sm:$0xff]   ;;  %v14591_v32 = vld [vmem:[#allocation3 + $0x78] sm:$0xff]  }
 0x46e   : > { %v9197_v29 = vrot.slane %v9195_v20, 4  ;;  %v17401_v52 = vsel %vm15336_vm14, %v12396_v51, %v9195_v20  ;;  %v17423_v20 = vsel %vm15336_vm14, %v9204_v59, %v9205_v48  ;;  %v9098_v51 = vld [vmem:[#allocation3 + $0x90] sm:$0xe]  ;;  %v9219_v48 = vrot.slane %v17395_v63, 5  ;;  %18597 = vst [vmem:[#allocation20_spill] sm:$0xff] %v17469_v22 }
 0x46f   : > { %13572 = vmatmul.mubr.bf16.gmra.mrb[16].mxu1 %v18583_v5  ;;  %18586 = vst [vmem:[#allocation28_spill] sm:$0xff] %v17401_v52  ;;  %18589 = vst [vmem:[#allocation13_spill] sm:$0xff] %v17423_v20  ;;  %v12399_v5 = vrot.slane %v9096_v39, 9  ;;  %v12401_v20 = vrot.slane %v9098_v51, 9  ;;  %v17725_v24 = vld [vmem:[#allocation3 + $0x64] sm:$0xf] }
 0x470   : > { %13575 = vmatprep.mubr.bf16.mxu1 %v18585_v58  ;;  %v17410_v35 = vsel %vm15336_vm14, %v9197_v29, %v9198_v11  ;;  %v9216_v11 = vrot.slane %v17382_v50, 5  ;;  %v9097_v29 = vld [vmem:[#allocation3 + $0x84] sm:$0xe]  ;;  %v8368_v58 = vld [vmem:[#allocation3 + $0x98] sm:$0x1]  ;;  %18627 = vst [vmem:[#allocation46_spill] sm:$0xff] %v17725_v24 }
 0x471   : > { %18587 = vst [vmem:[#allocation11_spill] sm:$0xff] %v17410_v35  ;;  %v12400_v47 = vrot.slane %v9097_v29, 9  ;;  %v8374_v29 = vld [vmem:[#allocation3 + $0xb0] sm:$0x1]  ;;  %v9232_v35 = vrot.slane %v9230_v57, 4  ;;  %v9233_v52 = vrot.slane %v8368_v58, 5  ;;  %v17473_v44 = vsel %vm15336_vm14, %v12401_v20, %v9230_v57 }
 0x472   : > { %v17437_v39 = vsel %vm15336_vm14, %v12399_v5, %v9216_v11  ;;  %v9218_v59 = vrot.slane %v9216_v11, 4  ;;  %v18595_v5 = vcombine.low %v17192_v38, %v17199_v30  ;;  %18598 = vst [vmem:[#allocation21_spill] sm:$0xff] %v17473_v44  ;;  %v9237_v58 = vrot.slane %v17433_v49, 5 }
 0x473   : > { %18591 = vst [vmem:[#allocation15_spill] sm:$0xff] %v17437_v39  ;;  %v17465_v51 = vsel %vm15336_vm14, %v12400_v47, %v9223_v46  ;;  %v17480_v30 = vsel %vm15336_vm14, %v9232_v35, %v9233_v52  ;;  %v12402_v46 = vrot.slane %v9099_v28, 9  ;;  %v9244_v47 = vrot.slane %v8373_v23, 5  ;;  %v9102_v52 = vld [vmem:[#allocation3 + $0xc0] sm:$0xe] }
 0x474   : > { %v17451_v11 = vsel %vm15336_vm14, %v9218_v59, %v9219_v48  ;;  %v17461_v59 = vld [vmem:[#allocation3 + $0xb8] sm:$0xf]  ;;  %v8377_v48 = vld [vmem:[#allocation3 + $0xbc] sm:$0x1]  ;;  %18596 = vst [vmem:[#allocation19_spill] sm:$0xff] %v17465_v51  ;;  %18599 = vst [vmem:[#allocation23_spill] sm:$0xff] %v17480_v30 }
 0x475   : > { %18593 = vst [vmem:[#allocation18_spill] sm:$0xff] %v17451_v11  ;;  %v9239_v25 = vrot.slane %v9237_v58, 4  ;;  %v9240_v57 = vrot.slane %v8371_v3, 5  ;;  %v12403_v20 = vrot.slane %v9100_v43, 9  ;;  %v17486_v11 = vsel %vm15336_vm14, %v12402_v46, %v9237_v58  ;;  %v17537_v43 = vld [vmem:[#allocation3 + $0x14] sm:$0x1] }
 0x476   : > { %18600 = vst [vmem:[#allocation24_spill] sm:$0xff] %v17486_v11  ;;  %v9246_v39 = vrot.slane %v9244_v47, 4  ;;  %v9247_v38 = vrot.slane %v8374_v29, 5  ;;  %v9251_v22 = vrot.slane %v17461_v59, 5  ;;  %v9254_v46 = vrot.slane %v8377_v48, 5 }
 0x477   : > { %13576 = vmatmul.mubr.bf16.gmra.mrb[20].mxu1 %v18594_v34  ;;  %v8379_v34 = vld [vmem:[#allocation3 + $0xc4] sm:$0xf]  ;;  %v17491_v23 = vsel %vm15336_vm14, %v9239_v25, %v9240_v57  ;;  %v17495_v35 = vsel %vm15336_vm14, %v12403_v20, %v9244_v47  ;;  %v12405_v25 = vrot.slane %v9102_v52, 9  ;;  %v9261_v30 = vrot.slane %v8380_v9, 5  ;;  %v14586_v52 = vld [vmem:[#allocation4 + $0x110] sm:$0xff]  }
 0x478   : > { %13579 = vmatprep.mubr.bf16.mxu1 %v18595_v5  ;;  %v9101_v5 = vld [vmem:[#allocation3 + $0xb4] sm:$0xe]  ;;  %18601 = vst [vmem:[#allocation25_spill] sm:$0xff] %v17491_v23  ;;  %18602 = vst [vmem:[#allocation26_spill] sm:$0xff] %v17495_v35  ;;  %v9258_v3 = vrot.slane %v8379_v34, 5  ;;  %v17501_v58 = vsel %vm15336_vm14, %v9246_v39, %v9247_v38  ;;  %v9253_v29 = vrot.slane %v9251_v22, 4  ;;  %v18604_v47 = vcombine.low %v17211_v0, %v17215_v8 }
 0x479   : > { %v12404_v28 = vrot.slane %v9101_v5, 9  ;;  %18603 = vst [vmem:[#allocation29_spill] sm:$0xff] %v17501_v58  ;;  %v18607_v48 = vcombine.low %v17219_v27, %v17225_v15  ;;  %v18610_v5 = vcombine.low %v17232_v41, %v17236_v40  ;;  %v14579_v27 = vld [vmem:[#allocation3 + $0x18] sm:$0xff]   ;;  %v14583_v15 = vld [vmem:[#allocation4 + $0x108] sm:$0xff]   ;;  %v14589_v41 = vld [vmem:[#allocation4 + $0x118] sm:$0xff]   ;;  %v8467_v44 = vshrl.u32 %v17305_v21, 16 }
 0x47a   : > { %v9260_v57 = vrot.slane %v9258_v3, 4  ;;  %v17514_v39 = vsel %vm15336_vm14, %v9253_v29, %v9254_v46  ;;  %v17523_v9 = vsel %vm15336_vm14, %v12405_v25, %v9258_v3  ;;  %v14581_v20 = vld [vmem:[#allocation3 + $0x24] sm:$0xff]   ;;  %v14582_v46 = vld [vmem:[#allocation3 + $0x30] sm:$0xff]   ;;  %v14584_v25 = vld [vmem:[#allocation3 + $0x3c] sm:$0xff]  }
 0x47b   : > { %v17510_v34 = vsel %vm15336_vm14, %v12404_v28, %v9251_v22  ;;  %18606 = vst [vmem:[#allocation31_spill] sm:$0xff] %v17514_v39  ;;  %18608 = vst [vmem:[#allocation32_spill] sm:$0xff] %v17523_v9  ;;  %v14578_v22 = vld [vmem:[#allocation3 + $0xc] sm:$0xff]   ;;  %v8339_v9 = vld [vmem:[#allocation3 + $0x24] sm:$0xf] }
 0x47c   : > { %18605 = vst [vmem:[#allocation30_spill] sm:$0xff] %v17510_v34  ;;  %v17527_v0 = vsel %vm15336_vm14, %v9260_v57, %v9261_v30  ;;  %v8333_v30 = vld [vmem:[#allocation3 + $0xc] sm:$0xf]  ;;  %v8334_v28 = vld [vmem:[#allocation3 + $0x10] sm:$0xf]  ;;  %v8430_v39 = vshrl.u32 %v8339_v9, 16 }
 0x47d   : > { %18609 = vst [vmem:[#allocation7_spill] sm:$0xff] %v17527_v0  ;;  %v8382_v3 = vshrl.u32 %v8333_v30, 16  ;;  %v8385_v29 = vshll.u32 %v8333_v30, 16  ;;  %v8391_v40 = vshll.u32 %v8334_v28, 16  ;;  %v8395_v57 = vshrl.u32 %v8334_v28, 16  ;;  %v14587_v0 = vld [vmem:[#allocation3 + $0x54] sm:$0xff]  }
 0x47e   : > { %v8345_v35 = vld [vmem:[#allocation3 + $0x3c] sm:$0xf] }
 0x47f   : > { %13580 = vmatmul.mubr.bf16.gmra.mrb[24].mxu1 %v18604_v47  ;;  %v8336_v47 = vld [vmem:[#allocation3 + $0x18] sm:$0xf]  ;;  %v17535_v8 = vrot.slane %v8391_v40, 5  ;;  %v8397_v30 = vrot.slane %v8395_v57, 4  ;;  %v8439_v57 = vshll.u32 %v17301_v14, 16 }
 0x480   : > { %13583 = vmatprep.mubr.bf16.mxu1 %v18607_v48  ;;  %v8337_v48 = vld [vmem:[#allocation3 + $0x1c] sm:$0xf] }
 0x481   : > { %v8419_v38 = vshrl.u32 %v8337_v48, 16  ;;  %v17549_v58 = vrot.slane %v8439_v57, 5 }
 0x483   : > { %v8421_v40 = vrot.slane %v8419_v38, 4 }
 0x487   : > { %13584 = vmatmul.mubr.bf16.gmra.mrb[28].mxu1 %v18610_v5  ;;  %v14592_v5 = vld [vmem:[#allocation4 + $0x120] sm:$0xff]  }
 0x488   : > { %13603 = vmatprep.mubr.bf16.mxu1 %v14578_v22  ;;  %v8384_v22 = vrot.slane %v8382_v3, 4 }
 0x48f   : > { %13604 = vmatmul.mubr.bf16.vlgmr.msra.gmra.mrb[0].mxu1 %v14579_v27  ;;  %v8406_v27 = vshrl.u32 %v8336_v47, 16 }
 0x490   : > { %13607 = vmatprep.mubr.bf16.mxu1 %v14581_v20  ;;  %13636 = vmatpush3.bf16.msra.mxu1 %v17328_v2  ;;  %v8387_v2 = vrot.slane %v8385_v29, 5  ;;  %v8409_v20 = vshll.u32 %v8336_v47, 16  ;;  %v8398_v47 = vor.u32 %v8397_v30, %v17535_v8  ;;  %v8433_v30 = vshll.u32 %v8339_v9, 16 }
 0x491   : > { %13637 = vmatprep.subr.bf16.mxu1 %v14583_v15 }
 0x492   : > { %v8388_v28 = vor.u32 %v8387_v2, %v8384_v22  ;;  %v8411_v3 = vrot.slane %v8409_v20, 5  ;;  %v8401_v22 = vshll.u32 %v17537_v43, 16  ;;  %v8342_v2 = vld [vmem:[#allocation3 + $0x30] sm:$0xf]  ;;  %v8399_v38 = vrot.slane %v8398_v47, 4 }
 0x493   : > { %v8432_v47 = vrot.slane %v8430_v39, 4  ;;  %v8435_v11 = vrot.slane %v8433_v30, 5  ;;  %v8478_v39 = vshrl.u32 %v8345_v35, 16  ;;  %v8491_v30 = vshrl.u32 %v17309_v19, 16 }
 0x494   : > { %13638 = vmatpush3.bf16.msra.mxu1 %v14583_v15  ;;  %v8415_v15 = vshll.u32 %v8337_v48, 16  ;;  %v8389_v48 = vrot.slane %v8388_v28, 4  ;;  %v8403_v28 = vrot.slane %v8401_v22, 5 }
 0x495   : > { %13639 = vmatprep.subr.bf16.mxu1 %v14586_v52 }
 0x496   : > { %v17541_v29 = vrot.slane %v8415_v15, 5  ;;  %v8404_v57 = vsel %vm14903_vm9, %v8399_v38, %v8403_v28  ;;  %v8436_v28 = vor.u32 %v8435_v11, %v8432_v47  ;;  %v8480_v11 = vrot.slane %v8478_v39, 4 }
 0x497   : > { %13608 = vmatmul.mubr.bf16.gmra.mrb[4].mxu1 %v14582_v46  ;;  %v14595_v46 = vld [vmem:[#allocation4 + $0x128] sm:$0xff]   ;;  %v8473_v39 = vshll.u32 %v17307_v1, 16 }
 0x498   : > { %13611 = vmatprep.mubr.bf16.mxu1 %v14584_v25  ;;  %13640 = vmatpush3.bf16.msra.mxu1 %v14586_v52  ;;  %v17539_v25 = vld [vmem:[#allocation3 + $0x20] sm:$0x1]  ;;  %v8408_v52 = vrot.slane %v8406_v27, 4  ;;  %v14598_v27 = vld [vmem:[#allocation4 + $0x130] sm:$0xff]   ;;  %v8422_v34 = vor.u32 %v8421_v40, %v17541_v29 }
 0x499   : > { %13641 = vmatprep.subr.bf16.mxu1 %v14589_v41  ;;  %v8425_v15 = vshll.u32 %v17539_v25, 16  ;;  %v14590_v40 = vld [vmem:[#allocation3 + $0x6c] sm:$0xff]  }
 0x49a   : > { %v8412_v20 = vor.u32 %v8411_v3, %v8408_v52  ;;  %v14588_v52 = vld [vmem:[#allocation3 + $0x60] sm:$0xff]   ;;  %v14601_v3 = vld [vmem:[#allocation4 + $0x138] sm:$0xff]  }
 0x49b   : > { %v8427_v9 = vrot.slane %v8425_v15, 5  ;;  %v8487_v15 = vshll.u32 %v17309_v19, 16 }
 0x49c   : > { %13642 = vmatpush3.bf16.msra.mxu1 %v14589_v41  ;;  %v8443_v41 = vshrl.u32 %v17301_v14, 16  ;;  %v8413_v23 = vrot.slane %v8412_v20, 4  ;;  %v8481_v20 = vshll.u32 %v8345_v35, 16 }
 0x49d   : > { %13643 = vmatprep.subr.bf16.mxu1 %v14592_v5  ;;  %v17575_v51 = vrot.slane %v8487_v15, 5 }
 0x49e   : > { %v8445_v14 = vrot.slane %v8443_v41, 4  ;;  %v8423_v41 = vrot.slane %v8422_v34, 4  ;;  %v8348_v34 = vld [vmem:[#allocation3 + $0x48] sm:$0xf]  ;;  %v8483_v47 = vrot.slane %v8481_v20, 5 }
 0x49f   : > { %13612 = vmatmul.mubr.bf16.gmra.mrb[8].mxu1 %v14585_v31  ;;  %v8454_v31 = vshrl.u32 %v8342_v2, 16 }
 0x4a0   : > { %13615 = vmatprep.mubr.bf16.mxu1 %v14587_v0  ;;  %13644 = vmatpush3.bf16.msra.mxu1 %v14592_v5  ;;  %v8457_v0 = vshll.u32 %v8342_v2, 16  ;;  %v8394_v5 = vsel %vm14903_vm9, %v8389_v48, %v17535_v8  ;;  %v8463_v2 = vshll.u32 %v17305_v21, 16  ;;  %v8449_v8 = vshll.u32 %v17303_v18, 16 }
 0x4a1   : > { %13645 = vmatprep.subr.bf16.mxu1 %v14595_v46  ;;  %v8456_v48 = vrot.slane %v8454_v31, 4  ;;  %v17562_v38 = vcombine.low %v8394_v5, %v8404_v57  ;;  %v8511_v18 = vshll.u32 %v17314_v26, 16  ;;  %v8515_v31 = vshrl.u32 %v17314_v26, 16 }
 0x4a2   : > { %v8459_v22 = vrot.slane %v8457_v0, 5  ;;  %v8418_v21 = vsel %vm14903_vm9, %v8413_v23, %v17541_v29  ;;  %v8428_v35 = vsel %vm14903_vm9, %v8423_v41, %v8427_v9  ;;  %v17573_v19 = vrot.slane %v8463_v2, 5  ;;  %v8351_v0 = vld [vmem:[#allocation3 + $0x54] sm:$0xf] }
 0x4a3   : > { %v8505_v57 = vshll.u32 %v8348_v34, 16  ;;  %v8493_v26 = vrot.slane %v8491_v30, 4  ;;  %v17578_v23 = vrot.slane %v8511_v18, 5  ;;  %v8517_v29 = vrot.slane %v8515_v31, 4 }
 0x4a4   : > { %13646 = vmatpush3.bf16.msra.mxu1 %v14595_v46  ;;  %v8446_v46 = vor.u32 %v8445_v14, %v17549_v58  ;;  %v17564_v14 = vld [vmem:[#allocation4 + $0x140] sm:$0xff]   ;;  %v8460_v5 = vor.u32 %v8459_v22, %v8456_v48  ;;  %v8526_v9 = vshrl.u32 %v8351_v0, 16  ;;  %v8529_v41 = vshll.u32 %v8351_v0, 16 }
 0x4a5   : > { %13647 = vmatprep.subr.bf16.mxu1 %v14598_v27  ;;  %v8437_v2 = vrot.slane %v8436_v28, 4  ;;  %v8451_v48 = vrot.slane %v8449_v8, 5  ;;  %v8507_v15 = vrot.slane %v8505_v57, 5  ;;  %v17584_v30 = vcombine.low %v8418_v21, %v8428_v35  ;;  %v8354_v35 = vld [vmem:[#allocation3 + $0x60] sm:$0xf] }
 0x4a6   : > { %v8484_v18 = vor.u32 %v8483_v47, %v8480_v11  ;;  %v8494_v31 = vor.u32 %v8493_v26, %v17575_v51  ;;  %v8518_v28 = vor.u32 %v8517_v29, %v17578_v23  ;;  %v8497_v0 = vshll.u32 %v17312_v37, 16 }
 0x4a7   : > { %13616 = vmatmul.mubr.bf16.gmra.mrb[12].mxu1 %v14588_v52  ;;  %v8469_v52 = vrot.slane %v8467_v44, 4  ;;  %v8535_v44 = vshll.u32 %v17325_v10, 16  ;;  %v8442_v1 = vsel %vm14903_vm9, %v8437_v2, %v17549_v58  ;;  %v8521_v11 = vshll.u32 %v17319_v62, 16  ;;  %v14594_v58 = vld [vmem:[#allocation3 + $0x90] sm:$0xff]   ;;  %v8357_v2 = vld [vmem:[#allocation3 + $0x6c] sm:$0xf] }
 0x4a8   : > { %13619 = vmatprep.mubr.bf16.mxu1 %v14590_v40  ;;  %13648 = vmatpush3.bf16.msra.mxu1 %v14598_v27  ;;  %v8447_v27 = vrot.slane %v8446_v46, 4  ;;  %v8502_v40 = vshrl.u32 %v8348_v34, 16  ;;  %v14593_v46 = vld [vmem:[#allocation3 + $0x84] sm:$0xff]   ;;  %v8461_v34 = vrot.slane %v8460_v5, 4  ;;  %v8485_v26 = vrot.slane %v8484_v18, 4 }
 0x4a9   : > { %13649 = vmatprep.subr.bf16.mxu1 %v14601_v3  ;;  %v8470_v22 = vor.u32 %v8469_v52, %v17573_v19  ;;  %v17594_v52 = vrot.slane %v8535_v44, 5  ;;  %v8495_v29 = vrot.slane %v8494_v31, 4  ;;  %v8499_v44 = vrot.slane %v8497_v0, 5 }
 0x4aa   : > { %v8504_v20 = vrot.slane %v8502_v40, 4  ;;  %v8452_v8 = vsel %vm14903_vm9, %v8447_v27, %v8451_v48  ;;  %v8475_v40 = vrot.slane %v8473_v39, 5  ;;  %v8466_v47 = vsel %vm14903_vm9, %v8461_v34, %v17573_v19  ;;  %v14596_v48 = vld [vmem:[#allocation3 + $0x9c] sm:$0xff]  }
 0x4ab   : > { %v8471_v5 = vrot.slane %v8470_v22, 4  ;;  %v17597_v27 = vcombine.low %v8442_v1, %v8452_v8  ;;  %v8559_v62 = vshll.u32 %v17344_v36, 16  ;;  %v8563_v22 = vshrl.u32 %v17344_v36, 16 }
 0x4ac   : > { %13650 = vmatpush3.bf16.msra.mxu1 %v14601_v3  ;;  %v8539_v3 = vshrl.u32 %v17325_v10, 16  ;;  %v8528_v10 = vrot.slane %v8526_v9, 4  ;;  %v8508_v57 = vor.u32 %v8507_v15, %v8504_v20  ;;  %v8519_v9 = vrot.slane %v8518_v28, 4 }
 0x4ad   : > { %13683 = vmatprep.subr.bf16.mxu1 %v17564_v14  ;;  %v8476_v19 = vsel %vm14903_vm9, %v8471_v5, %v8475_v40  ;;  %v8523_v20 = vrot.slane %v8521_v11, 5  ;;  %v8545_v15 = vshll.u32 %v17330_v13, 16  ;;  %v8490_v34 = vsel %vm14903_vm9, %v8485_v26, %v17575_v51  ;;  %v17621_v13 = vld [vmem:[#allocation3 + $0x78] sm:$0xf]  ;;  %v17641_v26 = vld [vmem:[#allocation3 + $0x20] sm:$0x1] }
 0x4ae   : > { %v8541_v21 = vrot.slane %v8539_v3, 4  ;;  %v8509_v39 = vrot.slane %v8508_v57, 4  ;;  %v8500_v18 = vsel %vm14903_vm9, %v8495_v29, %v8499_v44  ;;  %v8574_v31 = vshrl.u32 %v8357_v2, 16  ;;  %18612 = vst [vmem:[#allocation10_spill] sm:$0xff] %v17641_v26  ;;  %v10726_v29 = vld [vmem:[#allocation3 + $0x18] sm:$0xe] }
 0x4af   : > { %13620 = vmatmul.mubr.bf16.gmra.mrb[16].mxu1 %v14591_v32  ;;  %v8531_v32 = vrot.slane %v8529_v41, 5  ;;  %v8550_v41 = vshrl.u32 %v8354_v35, 16  ;;  %v8577_v8 = vshll.u32 %v8357_v2, 16  ;;  %v8524_v36 = vsel %vm14903_vm9, %v8519_v9, %v8523_v20  ;;  %v14599_v2 = vld [vmem:[#allocation3 + $0xb4] sm:$0xff]   ;;  %v17669_v20 = vld [vmem:[#allocation3 + $0x2c] sm:$0x1] }
 0x4b0   : > { %13623 = vmatprep.mubr.bf16.mxu1 %v14593_v46  ;;  %v8553_v46 = vshll.u32 %v8354_v35, 16  ;;  %v8542_v3 = vor.u32 %v8541_v21, %v17594_v52  ;;  %v17625_v0 = vrot.slane %v8559_v62, 5  ;;  %v17627_v51 = vrot.slane %v8563_v22, 4  ;;  %v17630_v35 = vld [vmem:[#allocation3 + $0x1c] sm:$0xf]  ;;  %18614 = vst [vmem:[#allocation33_spill] sm:$0xff] %v17669_v20 }
 0x4b1   : > { %v8532_v37 = vor.u32 %v8531_v32, %v8528_v10  ;;  %v17617_v10 = vrot.slane %v8550_v41, 4  ;;  %v8583_v21 = vshll.u32 %v17367_v6, 16  ;;  %18611 = vst [vmem:[#allocation8_spill] sm:$0xff] %v17630_v35  ;;  %v17632_v5 = vcombine.low %v8466_v47, %v8476_v19  ;;  %v17650_v41 = vld [vmem:[#allocation3 + $0x28] sm:$0xf] }
 0x4b2   : > { %v17619_v32 = vrot.slane %v8553_v46, 5  ;;  %v17623_v1 = vrot.slane %v8542_v3, 4  ;;  %v17634_v40 = vcombine.low %v8490_v34, %v8500_v18  ;;  %v8514_v57 = vsel %vm14903_vm9, %v8509_v39, %v17578_v23  ;;  %18613 = vst [vmem:[#allocation9_spill] sm:$0xff] %v17650_v41  ;;  %v14597_v46 = vld [vmem:[#allocation3 + $0xa8] sm:$0xff]   ;;  %v10727_v62 = vld [vmem:[#allocation3 + $0x24] sm:$0xe] }
 0x4b3   : > { %v17615_v28 = vrot.slane %v8532_v37, 4  ;;  %v17639_v11 = vrot.slane %v8545_v15, 5  ;;  %v17645_v9 = vrot.slane %v8574_v31, 4  ;;  %v17647_v37 = vrot.slane %v8577_v8, 5  ;;  %v17671_v15 = vld [vmem:[#allocation3 + $0x34] sm:$0xf] }
 0x4b4   : > { %v8587_v47 = vshrl.u32 %v17367_v6, 16  ;;  %v10792_v3 = vrot.slane %v17630_v35, 5  ;;  %v17666_v19 = vrot.slane %v8583_v21, 5  ;;  %18615 = vst [vmem:[#allocation34_spill] sm:$0xff] %v17671_v15  ;;  %v17673_v34 = vld [vmem:[#allocation3 + $0x38] sm:$0x1] }
 0x4b5   : > { %18616 = vst [vmem:[#allocation35_spill] sm:$0xff] %v17673_v34  ;;  %v17675_v18 = vld [vmem:[#allocation3 + $0x40] sm:$0xf]  ;;  %v12478_v31 = vrot.slane %v10726_v29, 9  ;;  %v12479_v6 = vrot.slane %v10727_v62, 9 }
 0x4b6   : > { %18617 = vst [vmem:[#allocation36_spill] sm:$0xff] %v17675_v18  ;;  %v10794_v8 = vrot.slane %v10792_v3, 4  ;;  %v17681_v44 = vrot.slane %v8587_v47, 4  ;;  %v17684_v22 = vld [vmem:[#allocation3 + $0x4c] sm:$0xf]  ;;  %v10813_v47 = vrot.slane %v17675_v18, 5 }
 0x4b7   : > { %13624 = vmatmul.mubr.bf16.gmra.mrb[20].mxu1 %v14594_v58  ;;  %v17643_v58 = vcombine.low %v8514_v57, %v8524_v36  ;;  %v10795_v36 = vrot.slane %v17641_v26, 5  ;;  %v10799_v57 = vrot.slane %v17650_v41, 5  ;;  %18618 = vst [vmem:[#allocation37_spill] sm:$0xff] %v17684_v22  ;;  %v17688_v29 = vsel %vm15336_vm14, %v12478_v31, %v10792_v3  ;;  %v10729_v21 = vld [vmem:[#allocation3 + $0x3c] sm:$0xe]  ;;  %v14600_v41 = vld [vmem:[#allocation3 + $0xc0] sm:$0xff]  }
 0x4b8   : > { %13627 = vmatprep.mubr.bf16.mxu1 %v14596_v48  ;;  %18619 = vst [vmem:[#allocation38_spill] sm:$0xff] %v17688_v29  ;;  %v10802_v48 = vrot.slane %v17669_v20, 5  ;;  %v17697_v62 = vld [vmem:[#allocation3 + $0x44] sm:$0x1]  ;;  %v10806_v3 = vrot.slane %v17671_v15, 5  ;;  %v10809_v29 = vrot.slane %v17673_v34, 5 }
 0x4b9   : > { %v17692_v39 = vsel %vm15336_vm14, %v10794_v8, %v10795_v36  ;;  %18621 = vst [vmem:[#allocation40_spill] sm:$0xff] %v17697_v62  ;;  %v9986_v31 = vld [vmem:[#allocation3 + $0x50] sm:$0x1]  ;;  %v17704_v8 = vsel %vm15336_vm14, %v12479_v6, %v10799_v57  ;;  %v10730_v23 = vld [vmem:[#allocation3 + $0x48] sm:$0xe]  ;;  %v12481_v15 = vrot.slane %v10729_v21, 9 }
 0x4ba   : > { %18620 = vst [vmem:[#allocation39_spill] sm:$0xff] %v17692_v39  ;;  %18622 = vst [vmem:[#allocation41_spill] sm:$0xff] %v17704_v8  ;;  %v17711_v35 = vld [vmem:[#allocation3 + $0x58] sm:$0xf]  ;;  %v10808_v39 = vrot.slane %v10806_v3, 4  ;;  %v12482_v6 = vrot.slane %v10730_v23, 9 }
 0x4bb   : > { %18624 = vst [vmem:[#allocation43_spill] sm:$0xff] %v17711_v35  ;;  %v10731_v18 = vld [vmem:[#allocation3 + $0x54] sm:$0xe]  ;;  %v17733_v21 = vsel %vm15336_vm14, %v12481_v15, %v10813_v47  ;;  %v10732_v8 = vld [vmem:[#allocation3 + $0x60] sm:$0xe] }
 0x4bc   : > { %v17729_v26 = vsel %vm15336_vm14, %v10808_v39, %v10809_v29  ;;  %18629 = vst [vmem:[#allocation48_spill] sm:$0xff] %v17733_v21  ;;  %v10823_v39 = vrot.slane %v9986_v31, 5  ;;  %v10827_v29 = vrot.slane %v17711_v35, 5  ;;  %v9997_v23 = vld [vmem:[#allocation3 + $0x7c] sm:$0xf]  ;;  %v12484_v31 = vrot.slane %v10732_v8, 9 }
 0x4bd   : > { %18628 = vst [vmem:[#allocation47_spill] sm:$0xff] %v17729_v26  ;;  %v9998_v26 = vld [vmem:[#allocation3 + $0x80] sm:$0x1]  ;;  %v10734_v21 = vld [vmem:[#allocation3 + $0x78] sm:$0xe] }
 0x4be   : > { %v14603_v35 = vld [vmem:[#allocation4 + $0x148] sm:$0xff]  }
 0x4bf   : > { %13628 = vmatmul.mubr.bf16.gmra.mrb[24].mxu1 %v14597_v46  ;;  %v10728_v46 = vld [vmem:[#allocation3 + $0x30] sm:$0xe] }
 0x4c0   : > { %13631 = vmatprep.mubr.bf16.mxu1 %v14599_v2  ;;  %v10801_v2 = vrot.slane %v10799_v57, 4  ;;  %v12480_v20 = vrot.slane %v10728_v46, 9  ;;  %v17718_v57 = vld [vmem:[#allocation3 + $0x5c] sm:$0x1]  ;;  %v10815_v46 = vrot.slane %v10813_v47, 4  ;;  %v12483_v47 = vrot.slane %v10731_v18, 9 }
 0x4c1   : > { %18625 = vst [vmem:[#allocation44_spill] sm:$0xff] %v17718_v57 }
 0x4c2   : > { %v17708_v36 = vsel %vm15336_vm14, %v10801_v2, %v10802_v48  ;;  %v17722_v48 = vsel %vm15336_vm14, %v12480_v20, %v10806_v3  ;;  %v10816_v2 = vrot.slane %v17697_v62, 5  ;;  %v9992_v20 = vld [vmem:[#allocation3 + $0x68] sm:$0x1]  ;;  %v17736_v3 = vld [vmem:[#allocation3 + $0x70] sm:$0xf]  ;;  %v17760_v18 = vsel %vm15336_vm14, %v12483_v47, %v10827_v29 }
 0x4c3   : > { %18623 = vst [vmem:[#allocation42_spill] sm:$0xff] %v17708_v36  ;;  %18626 = vst [vmem:[#allocation45_spill] sm:$0xff] %v17722_v48  ;;  %v10820_v36 = vrot.slane %v17684_v22, 5  ;;  %v10830_v22 = vrot.slane %v17718_v57, 5  ;;  %v10837_v15 = vrot.slane %v9992_v20, 5 }
 0x4c4   : > { %18630 = vst [vmem:[#allocation49_spill] sm:$0xff] %v17736_v3  ;;  %v17742_v34 = vsel %vm15336_vm14, %v10815_v46, %v10816_v2  ;;  %v10829_v46 = vrot.slane %v10827_v29, 4  ;;  %v10834_v2 = vrot.slane %v17725_v24, 5  ;;  %18633 = vst [vmem:[#allocation52_spill] sm:$0xff] %v17760_v18  ;;  %v10000_v48 = vld [vmem:[#allocation3 + $0x88] sm:$0xf] }
 0x4c5   : > { %18631 = vst [vmem:[#allocation50_spill] sm:$0xff] %v17742_v34  ;;  %v17751_v62 = vsel %vm15336_vm14, %v12482_v6, %v10820_v36  ;;  %v10841_v34 = vrot.slane %v17736_v3, 5  ;;  %v10844_v3 = vrot.slane %v9995_v61, 5  ;;  %v10735_v24 = vld [vmem:[#allocation3 + $0x84] sm:$0xe]  ;;  %v10855_v18 = vrot.slane %v10000_v48, 5 }
 0x4c6   : > { %v17767_v6 = vsel %vm15336_vm14, %v10829_v46, %v10830_v22  ;;  %v10836_v57 = vrot.slane %v10834_v2, 4  ;;  %v17773_v20 = vsel %vm15336_vm14, %v12484_v31, %v10834_v2  ;;  %v10848_v46 = vrot.slane %v9997_v23, 5  ;;  %v10004_v29 = vld [vmem:[#allocation3 + $0x98] sm:$0x1]  ;;  %v10007_v31 = vld [vmem:[#allocation3 + $0xa4] sm:$0x1] }
 0x4c7   : > { %13632 = vmatmul.mubr.bf16.gmra.mrb[28].mxu1 %v14600_v41  ;;  %v10822_v41 = vrot.slane %v10820_v36, 4  ;;  %v10003_v36 = vld [vmem:[#allocation3 + $0x94] sm:$0xf]  ;;  %18634 = vst [vmem:[#allocation53_spill] sm:$0xff] %v17767_v6  ;;  %v10843_v47 = vrot.slane %v10841_v34, 4  ;;  %v10851_v2 = vrot.slane %v9998_v26, 5 }
 0x4c8   : > { %13651 = vmatprep.mubr.bf16.mxu1 %v17562_v38  ;;  %v17777_v8 = vsel %vm15336_vm14, %v10836_v57, %v10837_v15  ;;  %v10006_v6 = vld [vmem:[#allocation3 + $0xa0] sm:$0xf]  ;;  %v10009_v57 = vld [vmem:[#allocation3 + $0xac] sm:$0xf]  ;;  %v12487_v23 = vrot.slane %v10735_v24, 9  ;;  %v10857_v26 = vrot.slane %v10855_v18, 4 }
 0x4c9   : > { %v17756_v38 = vsel %vm15336_vm14, %v10822_v41, %v10823_v39  ;;  %v12485_v39 = vrot.slane %v10733_v42, 9  ;;  %v10001_v41 = vld [vmem:[#allocation3 + $0x8c] sm:$0x1]  ;;  %18635 = vst [vmem:[#allocation54_spill] sm:$0xff] %v17777_v8  ;;  %v12486_v42 = vrot.slane %v10734_v21, 9  ;;  %v17787_v61 = vsel %vm15336_vm14, %v10843_v47, %v10844_v3 }
 0x4ca   : > { %18632 = vst [vmem:[#allocation51_spill] sm:$0xff] %v17756_v38  ;;  %v10736_v38 = vld [vmem:[#allocation3 + $0x90] sm:$0xe]  ;;  %18637 = vst [vmem:[#allocation56_spill] sm:$0xff] %v17787_v61  ;;  %v10850_v21 = vrot.slane %v10848_v46, 4  ;;  %v10858_v15 = vrot.slane %v10001_v41, 5 }
 0x4cb   : > { %v17781_v22 = vsel %vm15336_vm14, %v12485_v39, %v10841_v34  ;;  %v10737_v39 = vld [vmem:[#allocation3 + $0x9c] sm:$0xe]  ;;  %v17796_v3 = vsel %vm15336_vm14, %v12486_v42, %v10848_v46  ;;  %v12488_v48 = vrot.slane %v10736_v38, 9  ;;  %v14604_v47 = vld [vmem:[#allocation4 + $0x150] sm:$0xff]   ;;  %v10010_v8 = vld [vmem:[#allocation3 + $0xb0] sm:$0x1] }
 0x4cc   : > { %18636 = vst [vmem:[#allocation55_spill] sm:$0xff] %v17781_v22  ;;  %v17800_v24 = vsel %vm15336_vm14, %v10850_v21, %v10851_v2  ;;  %v10869_v41 = vrot.slane %v10006_v6, 5  ;;  %v10012_v34 = vld [vmem:[#allocation3 + $0xb8] sm:$0xf]  ;;  %v17810_v38 = vsel %vm15336_vm14, %v10857_v26, %v10858_v15  ;;  %v12489_v46 = vrot.slane %v10737_v39, 9 }
 0x4cd   : > { %18638 = vst [vmem:[#allocation57_spill] sm:$0xff] %v17800_v24  ;;  %18640 = vst [vmem:[#allocation59_spill] sm:$0xff] %v17810_v38  ;;  %v10738_v61 = vld [vmem:[#allocation3 + $0xa8] sm:$0xe]  ;;  %v18641_v2 = vshll.u32 %v17382_v50, 16  ;;  %v10872_v6 = vrot.slane %v10007_v31, 5 }
 0x4ce   : > { %v10013_v22 = vld [vmem:[#allocation3 + $0xbc] sm:$0x1]  ;;  %v10015_v42 = vld [vmem:[#allocation3 + $0xc4] sm:$0xf]  ;;  %v17828_v26 = vsel %vm15336_vm14, %v12489_v46, %v10869_v41  ;;  %v10740_v38 = vld [vmem:[#allocation3 + $0xc0] sm:$0xe] }
 0x4cf   : > { %13652 = vmatmul.mubr.bf16.vlgmr.msra.gmra.mrb[0].mxu1 %v17584_v30  ;;  %v10862_v30 = vrot.slane %v10003_v36, 5  ;;  %v17814_v21 = vrot.slane %v18641_v2, 5  ;;  %v10876_v2 = vrot.slane %v10009_v57, 5  ;;  %v18644_v57 = vshrl.u32 %v17382_v50, 16 }
 0x4d0   : > { %13655 = vmatprep.mubr.bf16.mxu1 %v17597_v27  ;;  %13684 = vmatpush3.bf16.msra.mxu1 %v17564_v14  ;;  %v17804_v27 = vsel %vm15336_vm14, %v12487_v23, %v10855_v18  ;;  %v10865_v14 = vrot.slane %v10004_v29, 5  ;;  %v10871_v29 = vrot.slane %v10869_v41, 4  ;;  %v10739_v23 = vld [vmem:[#allocation3 + $0xb4] sm:$0xe]  ;;  %v10879_v41 = vrot.slane %v10010_v8, 5  ;;  %v14606_v8 = vld [vmem:[#allocation4 + $0x160] sm:$0xff]  }
 0x4d1   : > { %13685 = vmatprep.subr.bf16.mxu1 %v14603_v35  ;;  %18639 = vst [vmem:[#allocation58_spill] sm:$0xff] %v17804_v27  ;;  %v10864_v36 = vrot.slane %v10862_v30, 4  ;;  %v17820_v15 = vsel %vm15336_vm14, %v12488_v48, %v10862_v30  ;;  %v14605_v18 = vld [vmem:[#allocation4 + $0x158] sm:$0xff]   ;;  %v12490_v48 = vrot.slane %v10738_v61, 9  ;;  %v10883_v30 = vrot.slane %v10012_v34, 5  ;;  %v18716_v33 = vld [vmem:[#allocation51_spill] sm:$0xff] }
 0x4d2   : > { %18642 = vst [vmem:[#allocation60_spill] sm:$0xff] %v17820_v15  ;;  %v17834_v31 = vsel %vm15336_vm14, %v10871_v29, %v10872_v6  ;;  %v10016_v27 = vld [vmem:[#allocation3 + $0xc8] sm:$0x1]  ;;  %v12491_v46 = vrot.slane %v10739_v23, 9  ;;  %v8613_v24 = vrot.slane %v18644_v57, 4  ;;  %v10890_v15 = vrot.slane %v10015_v42, 5 }
 0x4d3   : > { %v17824_v39 = vsel %vm15336_vm14, %v10864_v36, %v10865_v14  ;;  %v12505_v14 = vcombine.low %v17828_v26, %v17834_v31  ;;  %v10878_v36 = vrot.slane %v10876_v2, 4  ;;  %v17844_v61 = vsel %vm15336_vm14, %v12490_v48, %v10876_v2  ;;  %v18233_v31 = vld [vmem:[%s18356_s5] ss:$0 sm:$0xff] }
 0x4d4   : > { %13686 = vmatpush3.bf16.msra.mxu1 %v14603_v35  ;;  %18643 = vst [vmem:[#allocation61_spill] sm:$0xff] %v17824_v39  ;;  %v10885_v35 = vrot.slane %v10883_v30, 4  ;;  %v10886_v39 = vrot.slane %v10013_v22, 5  ;;  %v12492_v50 = vrot.slane %v10740_v38, 9  ;;  %v8363_v22 = vld [vmem:[#allocation3 + $0x84] sm:$0xf]  ;;  %v18645_v6 = vor.u32 %v17619_v32, %v17617_v10 }
 0x4d5   : > { %13687 = vmatprep.subr.bf16.mxu1 %v14604_v47  ;;  %v17848_v34 = vsel %vm15336_vm14, %v10878_v36, %v10879_v41  ;;  %v10892_v42 = vrot.slane %v10890_v15, 4  ;;  %v10893_v29 = vrot.slane %v10016_v27, 5  ;;  %v8593_v2 = vshll.u32 %v17393_v7, 16 }
 0x4d6   : > { %v8557_v23 = vrot.slane %v18645_v6, 4  ;;  %v18646_v38 = vshrl.u32 %v17621_v13, 16  ;;  %v8631_v36 = vshll.u32 %v17404_v45, 16  ;;  %v8635_v41 = vshrl.u32 %v17404_v45, 16 }
 0x4d7   : > { %13656 = vmatmul.mubr.bf16.gmra.mrb[4].mxu1 %v17632_v5  ;;  %v17852_v5 = vsel %vm15336_vm14, %v12491_v46, %v10883_v30  ;;  %v17876_v10 = vsel %vm15336_vm14, %v10892_v42, %v10893_v29  ;;  %v18647_v7 = vshll.u32 %v17621_v13, 16  ;;  %v8622_v27 = vshrl.u32 %v8363_v22, 16  ;;  %v14607_v29 = vld [vmem:[#allocation4 + $0x168] sm:$0xff]  }
 0x4d8   : > { %13659 = vmatprep.mubr.bf16.mxu1 %v17634_v40  ;;  %13688 = vmatpush3.bf16.msra.mxu1 %v14604_v47  ;;  %v12506_v40 = vcombine.low %v17844_v61, %v17848_v34  ;;  %v17858_v47 = vsel %vm15336_vm14, %v10885_v35, %v10886_v39  ;;  %v8600_v48 = vrot.slane %v18646_v38, 4  ;;  %v17872_v39 = vsel %vm15336_vm14, %v12492_v50, %v10890_v15 }
 0x4d9   : > { %13689 = vmatprep.subr.bf16.mxu1 %v14605_v18  ;;  %v12507_v30 = vcombine.low %v17852_v5, %v17858_v47  ;;  %v8603_v32 = vrot.slane %v18647_v7, 5  ;;  %v8625_v35 = vshll.u32 %v8363_v22, 16  ;;  %v12508_v46 = vcombine.low %v17872_v39, %v17876_v10  ;;  %v18238_v5 = vld [vmem:[%s18357_s6] ss:$0 sm:$0xff] }
 0x4da   : > { %v18648_v45 = vor.u32 %v17627_v51, %v17625_v0  ;;  %v18649_v15 = vor.u32 %v17647_v37, %v17645_v9  ;;  %v18650_v42 = vor.u32 %v17681_v44, %v17666_v19  ;;  %v8614_v13 = vor.u32 %v8613_v24, %v17814_v21 }
 0x4db   : > { %v18651_v22 = vsel %vm14903_vm9, %v17623_v1, %v17639_v11  ;;  %v18652_v51 = vsel %vm14903_vm9, %v17615_v28, %v17594_v52  ;;  %v18653_v37 = vshll.u32 %v17362_v53, 16  ;;  %v8595_v44 = vrot.slane %v8593_v2, 5 }
 0x4dc   : > { %13690 = vmatpush3.bf16.msra.mxu1 %v14605_v18  ;;  %v8567_v57 = vrot.slane %v18648_v45, 4  ;;  %v8581_v50 = vrot.slane %v18649_v15, 4  ;;  %v8591_v18 = vrot.slane %v18650_v42, 4  ;;  %v12372_v9 = vcombine.low %v18652_v51, %v18651_v22  ;;  %v8366_v45 = vld [vmem:[#allocation3 + $0x90] sm:$0xf] }
 0x4dd   : > { %13691 = vmatprep.subr.bf16.mxu1 %v14606_v8  ;;  %v8571_v6 = vrot.slane %v18653_v37, 5  ;;  %v8617_v24 = vshll.u32 %v17395_v63, 16  ;;  %v17906_v38 = vrot.slane %v8631_v36, 5  ;;  %v8637_v7 = vrot.slane %v8635_v41, 4  ;;  %v14608_v36 = vld [vmem:[#allocation4 + $0x170] sm:$0xff]   ;;  %v14609_v51 = vld [vmem:[#allocation4 + $0x178] sm:$0xff]  }
 0x4de   : > { %v8562_v1 = vsel %vm14903_vm9, %v8557_v23, %v17625_v0  ;;  %v8604_v11 = vor.u32 %v8603_v32, %v8600_v48  ;;  %v8624_v52 = vrot.slane %v8622_v27, 4  ;;  %v8627_v28 = vrot.slane %v8625_v35, 5 }
 0x4df   : > { %13660 = vmatmul.mubr.bf16.gmra.mrb[8].mxu1 %v17643_v58  ;;  %v8572_v53 = vsel %vm14903_vm9, %v8567_v57, %v8571_v6  ;;  %v8586_v63 = vsel %vm14903_vm9, %v8581_v50, %v17666_v19  ;;  %v8596_v58 = vsel %vm14903_vm9, %v8591_v18, %v8595_v44  ;;  %v8615_v2 = vrot.slane %v8614_v13, 4 }
 0x4e0   : > { %13663 = vmatprep.mubr.bf16.mxu1 %v12372_v9  ;;  %13692 = vmatpush3.bf16.msra.mxu1 %v14606_v8  ;;  %v8646_v41 = vshrl.u32 %v8366_v45, 16  ;;  %v8649_v15 = vshll.u32 %v8366_v45, 16  ;;  %v8655_v0 = vshll.u32 %v17406_v12, 16  ;;  %v8659_v23 = vshrl.u32 %v17406_v12, 16  ;;  %v8369_v8 = vld [vmem:[#allocation3 + $0x9c] sm:$0xf] }
 0x4e1   : > { %13693 = vmatprep.subr.bf16.mxu1 %v14607_v29  ;;  %v8619_v48 = vrot.slane %v8617_v24, 5  ;;  %v8638_v32 = vor.u32 %v8637_v7, %v17906_v38  ;;  %v8679_v27 = vshll.u32 %v17433_v49, 16  ;;  %v8683_v19 = vshrl.u32 %v17433_v49, 16 }
 0x4e2   : > { %v12373_v35 = vcombine.low %v8562_v1, %v8572_v53  ;;  %v12374_v57 = vcombine.low %v8586_v63, %v8596_v58  ;;  %v8605_v50 = vrot.slane %v8604_v11, 4  ;;  %v8628_v42 = vor.u32 %v8627_v28, %v8624_v52  ;;  %v8372_v28 = vld [vmem:[#allocation3 + $0xa8] sm:$0xf]  ;;  %v17933_v53 = vld [vmem:[#allocation4 + $0x180] sm:$0xff]  }
 0x4e3   : > { %v8620_v18 = vsel %vm14903_vm9, %v8615_v2, %v8619_v48  ;;  %v8641_v13 = vshll.u32 %v17417_v4, 16  ;;  %v8670_v22 = vshrl.u32 %v8369_v8, 16  ;;  %v8673_v12 = vshll.u32 %v8369_v8, 16  ;;  %v14702_v2 = vld [vmem:[#allocation3 + $0xac] sm:$0xf] }
 0x4e4   : > { %13694 = vmatpush3.bf16.msra.mxu1 %v14607_v29  ;;  %v8648_v9 = vrot.slane %v8646_v41, 4  ;;  %v8651_v37 = vrot.slane %v8649_v15, 5  ;;  %v17926_v6 = vrot.slane %v8655_v0, 5  ;;  %v8661_v44 = vrot.slane %v8659_v23, 4  ;;  %v8375_v0 = vld [vmem:[#allocation3 + $0xb4] sm:$0xf] }
 0x4e5   : > { %13695 = vmatprep.subr.bf16.mxu1 %v14608_v36  ;;  %v8639_v49 = vrot.slane %v8638_v32, 4  ;;  %v17928_v24 = vrot.slane %v8679_v27, 5  ;;  %v8685_v7 = vrot.slane %v8683_v19, 4  ;;  %v8610_v29 = vsel %vm14903_vm9, %v8605_v50, %v17814_v21  ;;  %v14703_v32 = vld [vmem:[#allocation3 + $0x98] sm:$0x1] }
 0x4e6   : > { %v8629_v4 = vrot.slane %v8628_v42, 4  ;;  %v12375_v45 = vcombine.low %v8610_v29, %v8620_v18  ;;  %v8643_v1 = vrot.slane %v8641_v13, 5  ;;  %v8672_v11 = vrot.slane %v8670_v22, 4  ;;  %v14704_v50 = vld [vmem:[#allocation3 + $0xa4] sm:$0x1] }
 0x4e7   : > { %13664 = vmatmul.mubr.bf16.gmra.mrb[12].mxu1 %v12373_v35  ;;  %v8675_v52 = vrot.slane %v8673_v12, 5  ;;  %v8652_v63 = vor.u32 %v8651_v37, %v8648_v9  ;;  %v8662_v58 = vor.u32 %v8661_v44, %v17926_v6  ;;  %v8703_v41 = vshll.u32 %v14702_v2, 16 }
 0x4e8   : > { %13667 = vmatprep.mubr.bf16.mxu1 %v12374_v57  ;;  %13696 = vmatpush3.bf16.msra.mxu1 %v14608_v36  ;;  %v8707_v15 = vshrl.u32 %v14702_v2, 16  ;;  %v8644_v21 = vsel %vm14903_vm9, %v8639_v49, %v8643_v1  ;;  %v8686_v36 = vor.u32 %v8685_v7, %v17928_v24  ;;  %v8727_v23 = vshll.u32 %v17461_v59, 16 }
 0x4e9   : > { %13697 = vmatprep.subr.bf16.mxu1 %v14609_v51  ;;  %v8731_v8 = vshrl.u32 %v17461_v59, 16  ;;  %v8634_v48 = vsel %vm14903_vm9, %v8629_v4, %v17906_v38  ;;  %v8665_v27 = vshll.u32 %v14703_v32, 16  ;;  %v8694_v19 = vshrl.u32 %v8372_v28, 16 }
 0x4ea   : > { %v8697_v35 = vshll.u32 %v8372_v28, 16  ;;  %v8676_v57 = vor.u32 %v8675_v52, %v8672_v11  ;;  %v8689_v42 = vshll.u32 %v14704_v50, 16  ;;  %v8718_v18 = vshrl.u32 %v8375_v0, 16  ;;  %v8378_v28 = vld [vmem:[#allocation3 + $0xc0] sm:$0xf] }
 0x4eb   : > { %v8721_v13 = vshll.u32 %v8375_v0, 16  ;;  %v12376_v22 = vcombine.low %v8634_v48, %v8644_v21  ;;  %v8663_v12 = vrot.slane %v8662_v58, 4  ;;  %v8705_v9 = vrot.slane %v8703_v41, 5  ;;  %v14705_v41 = vld [vmem:[#allocation3 + $0xc4] sm:$0xf] }
 0x4ec   : > { %13698 = vmatpush3.bf16.msra.mxu1 %v14609_v51  ;;  %v8709_v59 = vrot.slane %v8707_v15, 4  ;;  %v8653_v37 = vrot.slane %v8652_v63, 4  ;;  %v8687_v44 = vrot.slane %v8686_v36, 4  ;;  %v8729_v38 = vrot.slane %v8727_v23, 5  ;;  %v14706_v23 = vld [vmem:[#allocation3 + $0xb0] sm:$0x1] }
 0x4ed   : > { %13731 = vmatprep.subr.bf16.mxu1 %v17933_v53  ;;  %v8733_v49 = vrot.slane %v8731_v8, 4  ;;  %v8667_v7 = vrot.slane %v8665_v27, 5  ;;  %v8696_v29 = vrot.slane %v8694_v19, 4  ;;  %v8699_v51 = vrot.slane %v8697_v35, 5 }
 0x4ee   : > { %v8677_v4 = vrot.slane %v8676_v57, 4  ;;  %v8691_v1 = vrot.slane %v8689_v42, 5  ;;  %v8720_v11 = vrot.slane %v8718_v18, 4  ;;  %v8723_v52 = vrot.slane %v8721_v13, 5  ;;  %v14707_v57 = vld [vmem:[#allocation3 + $0xbc] sm:$0x1] }
 0x4ef   : > { %13668 = vmatmul.mubr.bf16.gmra.mrb[16].mxu1 %v12375_v45  ;;  %v8668_v2 = vsel %vm14903_vm9, %v8663_v12, %v8667_v7  ;;  %v8710_v58 = vor.u32 %v8709_v59, %v8705_v9  ;;  %v8751_v15 = vshll.u32 %v14705_v41, 16  ;;  %v8755_v45 = vshrl.u32 %v14705_v41, 16 }
 0x4f0   : > { %13671 = vmatprep.mubr.bf16.mxu1 %v12376_v22  ;;  %v8658_v63 = vsel %vm14903_vm9, %v8653_v37, %v17926_v6  ;;  %v8692_v0 = vsel %vm14903_vm9, %v8687_v44, %v8691_v1  ;;  %v8734_v21 = vor.u32 %v8733_v49, %v8729_v38  ;;  %v8700_v36 = vor.u32 %v8699_v51, %v8696_v29 }
 0x4f1   : > { %v8713_v8 = vshll.u32 %v14706_v23, 16  ;;  %v8742_v48 = vshrl.u32 %v8378_v28, 16  ;;  %v8745_v32 = vshll.u32 %v8378_v28, 16  ;;  %v12377_v27 = vcombine.low %v8658_v63, %v8668_v2  ;;  %v14709_v28 = vld [vmem:[#allocation3 + $0xc8] sm:$0x1] }
 0x4f2   : > { %v8682_v19 = vsel %vm14903_vm9, %v8677_v4, %v17928_v24  ;;  %v8724_v35 = vor.u32 %v8723_v52, %v8720_v11  ;;  %v8737_v50 = vshll.u32 %v14707_v57, 16  ;;  %v8711_v18 = vrot.slane %v8710_v58, 4  ;;  %v14708_v4 = vld [vmem:[#allocation3 + $0x10] sm:$0xf] }
 0x4f3   : > { %v12378_v42 = vcombine.low %v8682_v19, %v8692_v0  ;;  %v8753_v6 = vrot.slane %v8751_v15, 5  ;;  %v8757_v13 = vrot.slane %v8755_v45, 4  ;;  %v8735_v22 = vrot.slane %v8734_v21, 4 }
 0x4f4   : > { %v8701_v12 = vrot.slane %v8700_v36, 4  ;;  %v8715_v59 = vrot.slane %v8713_v8, 5  ;;  %v8744_v37 = vrot.slane %v8742_v48, 4  ;;  %v8747_v44 = vrot.slane %v8745_v32, 5  ;;  %v9087_v36 = vld [vmem:[#allocation3 + $0xc] sm:$0xe] }
 0x4f5   : > { %v8725_v49 = vrot.slane %v8724_v35, 4  ;;  %v8739_v7 = vrot.slane %v8737_v50, 5  ;;  %v8758_v24 = vor.u32 %v8757_v13, %v8753_v6  ;;  %v9153_v1 = vrot.slane %v14708_v4, 5  ;;  %v14710_v8 = vld [vmem:[#allocation3 + $0x1c] sm:$0xf] }
 0x4f6   : > { %v8716_v29 = vsel %vm14903_vm9, %v8711_v18, %v8715_v59  ;;  %v8706_v11 = vsel %vm14903_vm9, %v8701_v12, %v8705_v9  ;;  %v8748_v52 = vor.u32 %v8747_v44, %v8744_v37  ;;  %v8761_v2 = vshll.u32 %v14709_v28, 16  ;;  %v14612_v37 = vld [vmem:[#allocation4 + $0x190] sm:$0xff]   ;;  %v18662_v4 = vld [vmem:[#allocation11_spill] sm:$0xff]  ;;  %v18667_v28 = vld [vmem:[#allocation14_spill] sm:$0xff] }
 0x4f7   : > { %13672 = vmatmul.mubr.bf16.gmra.mrb[20].mxu1 %v12377_v27  ;;  %v8740_v51 = vsel %vm14903_vm9, %v8735_v22, %v8739_v7  ;;  %v12379_v58 = vcombine.low %v8706_v11, %v8716_v29  ;;  %v8730_v41 = vsel %vm14903_vm9, %v8725_v49, %v8729_v38  ;;  %v8759_v45 = vrot.slane %v8758_v24, 4  ;;  %v18656_v49 = vld [vmem:[#allocation22_spill] sm:$0xff]  ;;  %v14614_v29 = vld [vmem:[#allocation4 + $0x1a0] sm:$0xff]   ;;  %v18665_v11 = vld [vmem:[#allocation13_spill] sm:$0xff] }
 0x4f8   : > { %13675 = vmatprep.mubr.bf16.mxu1 %v12378_v42  ;;  %v12380_v15 = vcombine.low %v8730_v41, %v8740_v51  ;;  %v9155_v63 = vrot.slane %v9153_v1, 4  ;;  %v8749_v0 = vrot.slane %v8748_v52, 4  ;;  %v8763_v21 = vrot.slane %v8761_v2, 5  ;;  %v18661_v51 = vld [vmem:[#allocation28_spill] sm:$0xff]  ;;  %v14620_v41 = vld [vmem:[#allocation4 + $0x1c0] sm:$0xff]  }
 0x4f9   : > { %v9156_v23 = vrot.slane %v17537_v43, 5  ;;  %v9160_v48 = vrot.slane %v14710_v8, 5  ;;  %v12390_v32 = vrot.slane %v9087_v36, 9  ;;  %v9088_v43 = vld [vmem:[#allocation3 + $0x18] sm:$0xe]  ;;  %v9163_v42 = vrot.slane %v17539_v25, 5 }
 0x4fa   : > { %v8764_v9 = vsel %vm14903_vm9, %v8759_v45, %v8763_v21  ;;  %v8754_v38 = vsel %vm14903_vm9, %v8749_v0, %v8753_v6  ;;  %v12391_v18 = vrot.slane %v9088_v43, 9  ;;  %v14611_v6 = vld [vmem:[#allocation4 + $0x188] sm:$0xff]   ;;  %v18654_v59 = vcombine.low %v17334_v56, %v17338_v60  ;;  %v14613_v25 = vld [vmem:[#allocation4 + $0x198] sm:$0xff]   ;;  %v18658_v60 = vld [vmem:[#allocation17_spill] sm:$0xff] }
 0x4fb   : > { %v9157_v27 = vsel %vm15336_vm14, %v9155_v63, %v9156_v23  ;;  %v12381_v19 = vcombine.low %v8754_v38, %v8764_v9  ;;  %v9154_v35 = vsel %vm15336_vm14, %v12390_v32, %v9153_v1  ;;  %v9162_v50 = vrot.slane %v9160_v48, 4  ;;  %v14615_v56 = vld [vmem:[#allocation4 + $0x1a8] sm:$0xff]   ;;  %v18671_v45 = vld [vmem:[#allocation18_spill] sm:$0xff]  ;;  %v18673_v0 = vld [vmem:[#allocation19_spill] sm:$0xff] }
 0x4fc   : > { %v12406_v57 = vcombine.low %v9154_v35, %v9157_v27  ;;  %v9161_v22 = vsel %vm15336_vm14, %v12391_v18, %v9160_v48  ;;  %v18655_v44 = vcombine.low %v17348_v55, %v17354_v16  ;;  %v18657_v7 = vcombine.low %v17358_v17, %v18656_v49  ;;  %v14616_v55 = vld [vmem:[#allocation4 + $0x1b0] sm:$0xff]   ;;  %v14617_v16 = vld [vmem:[#allocation4 + $0x1b8] sm:$0xff]   ;;  %v18664_v17 = vld [vmem:[#allocation12_spill] sm:$0xff] }
 0x4fd   : > { %v9164_v13 = vsel %vm15336_vm14, %v9162_v50, %v9163_v42  ;;  %v18663_v1 = vcombine.low %v18661_v51, %v18662_v4  ;;  %v18666_v52 = vcombine.low %v18664_v17, %v18665_v11  ;;  %v18668_v2 = vld [vmem:[#allocation16_spill] sm:$0xff]  ;;  %v18676_v23 = vld [vmem:[#allocation21_spill] sm:$0xff]  ;;  %v18677_v9 = vld [vmem:[#allocation23_spill] sm:$0xff]  ;;  %v11337_v26 = vlaneseq }
 0x4fe   : > { %v12407_v12 = vcombine.low %v9161_v22, %v9164_v13  ;;  %v18674_v21 = vld [vmem:[#allocation20_spill] sm:$0xff]  ;;  %v18678_v8 = vcombine.low %v18676_v23, %v18677_v9  ;;  %v18680_v32 = vld [vmem:[#allocation25_spill] sm:$0xff]  ;;  %v18682_v38 = vld [vmem:[#allocation26_spill] sm:$0xff] }
 0x4ff   : > { %13676 = vmatmul.mubr.bf16.gmra.mrb[24].mxu1 %v12379_v58  ;;  %v18669_v58 = vcombine.low %v18667_v28, %v18668_v2  ;;  %v18675_v36 = vcombine.low %v18673_v0, %v18674_v21  ;;  %v18679_v48 = vld [vmem:[#allocation24_spill] sm:$0xff]  ;;  %v18686_v50 = vld [vmem:[#allocation31_spill] sm:$0xff]  ;;  %v14624_v49 = vld [vmem:[#allocation3 + $0x48] sm:$0xff]   ;;  %v11338_v61 = vshrl.u32 %v11337_v26, 7 }
 0x500   : > { %13679 = vmatprep.mubr.bf16.mxu1 %v12380_v15  ;;  %v18670_v15 = vld [vmem:[#allocation15_spill] sm:$0xff]  ;;  %v18681_v27 = vcombine.low %v18679_v48, %v18680_v32  ;;  %v18688_v18 = vld [vmem:[#allocation32_spill] sm:$0xff]  ;;  %v14641_v51 = vld [vmem:[#allocation4 + $0x1f8] sm:$0xff]  }
 0x501   : > { %v18672_v63 = vcombine.low %v18670_v15, %v18671_v45  ;;  %v14618_v42 = vld [vmem:[#allocation3 + $0x18] sm:$0xff]   ;;  %v14631_v28 = vld [vmem:[#allocation3 + $0x84] sm:$0xff]  }
 0x502   : > { %v18689_v13 = vld [vmem:[#allocation7_spill] sm:$0xff]  ;;  %v18692_v23 = vld [vmem:[#allocation9_spill] sm:$0xff] }
 0x503   : > { %v18690_v22 = vcombine.low %v18688_v18, %v18689_v13  ;;  %v14630_v4 = vld [vmem:[#allocation3 + $0x78] sm:$0xff]   ;;  %v10054_v9 = vshll.u32 %v18692_v23, 16 }
 0x507   : > { %13680 = vmatmul.mubr.bf16.gmra.mrb[28].mxu1 %v12381_v19  ;;  %v18683_v19 = vld [vmem:[#allocation29_spill] sm:$0xff] }
 0x508   : > { %13699 = vmatprep.mubr.bf16.mxu1 %v12406_v57  ;;  %v18684_v35 = vcombine.low %v18682_v38, %v18683_v19  ;;  %v18685_v57 = vld [vmem:[#allocation30_spill] sm:$0xff]  ;;  %v14634_v19 = vld [vmem:[#allocation3 + $0x9c] sm:$0xff]  }
 0x509   : > { %v18687_v43 = vcombine.low %v18685_v57, %v18686_v50  ;;  %v9978_v38 = vld [vmem:[#allocation3 + $0x30] sm:$0xf] }
 0x50a   : > { %v18693_v57 = vld [vmem:[#allocation10_spill] sm:$0xff]  ;;  %v10069_v18 = vshrl.u32 %v9978_v38, 16 }
 0x50b   : > { %v10040_v50 = vshll.u32 %v18693_v57, 16  ;;  %v10741_v57 = vld [vmem:[#allocation3 + $0xcc] sm:$0xe] }
 0x50f   : > { %13700 = vmatmul.mubr.bf16.vlgmr.msra.gmra.mrb[0].mxu1 %v12407_v12  ;;  %v14619_v12 = vld [vmem:[#allocation3 + $0x24] sm:$0xff]  }
 0x510   : > { %13703 = vmatprep.mubr.bf16.mxu1 %v18654_v59  ;;  %13732 = vmatpush3.bf16.msra.mxu1 %v17933_v53  ;;  %v18659_v53 = vld [vmem:[#allocation27_spill] sm:$0xff]  ;;  %v14621_v59 = vld [vmem:[#allocation3 + $0x30] sm:$0xff]  }
 0x511   : > { %13733 = vmatprep.subr.bf16.mxu1 %v14611_v6  ;;  %v18660_v24 = vcombine.low %v18658_v60, %v18659_v53  ;;  %v14627_v60 = vld [vmem:[#allocation3 + $0x60] sm:$0xff]   ;;  %v14638_v53 = vld [vmem:[#allocation4 + $0x1f0] sm:$0xff]  }
 0x514   : > { %13734 = vmatpush3.bf16.msra.mxu1 %v14611_v6  ;;  %v14623_v6 = vld [vmem:[#allocation4 + $0x1c8] sm:$0xff]  }
 0x515   : > { %13735 = vmatprep.subr.bf16.mxu1 %v14612_v37 }
 0x517   : > { %13704 = vmatmul.mubr.bf16.gmra.mrb[4].mxu1 %v18655_v44  ;;  %v14629_v44 = vld [vmem:[#allocation4 + $0x1d8] sm:$0xff]  }
 0x518   : > { %13707 = vmatprep.mubr.bf16.mxu1 %v18657_v7  ;;  %13736 = vmatpush3.bf16.msra.mxu1 %v14612_v37  ;;  %v14626_v37 = vld [vmem:[#allocation4 + $0x1d0] sm:$0xff]   ;;  %v14632_v7 = vld [vmem:[#allocation4 + $0x1e0] sm:$0xff]  }
 0x519   : > { %13737 = vmatprep.subr.bf16.mxu1 %v14613_v25 }
 0x51c   : > { %13738 = vmatpush3.bf16.msra.mxu1 %v14613_v25  ;;  %v14622_v25 = vld [vmem:[#allocation3 + $0x3c] sm:$0xff]  }
 0x51d   : > { %13739 = vmatprep.subr.bf16.mxu1 %v14614_v29 }
 0x51f   : > { %13708 = vmatmul.mubr.bf16.gmra.mrb[8].mxu1 %v18660_v24  ;;  %v14628_v24 = vld [vmem:[#allocation3 + $0x6c] sm:$0xff]  }
 0x520   : > { %13711 = vmatprep.mubr.bf16.mxu1 %v18663_v1  ;;  %13740 = vmatpush3.bf16.msra.mxu1 %v14614_v29  ;;  %v14625_v29 = vld [vmem:[#allocation3 + $0x54] sm:$0xff]  }
 0x521   : > { %13741 = vmatprep.subr.bf16.mxu1 %v14615_v56  ;;  %v18020_v1 = vld [vmem:[#allocation4 + $0x200] sm:$0xff]  }
 0x524   : > { %13742 = vmatpush3.bf16.msra.mxu1 %v14615_v56  ;;  %v14635_v56 = vld [vmem:[#allocation4 + $0x1e8] sm:$0xff]  }
 0x525   : > { %13743 = vmatprep.subr.bf16.mxu1 %v14616_v55 }
 0x527   : > { %13712 = vmatmul.mubr.bf16.gmra.mrb[12].mxu1 %v18666_v52  ;;  %v9975_v52 = vld [vmem:[#allocation3 + $0x24] sm:$0xf] }
 0x528   : > { %13715 = vmatprep.mubr.bf16.mxu1 %v18669_v58  ;;  %13744 = vmatpush3.bf16.msra.mxu1 %v14616_v55  ;;  %v9972_v55 = vld [vmem:[#allocation3 + $0x18] sm:$0xf]  ;;  %v10048_v0 = vshll.u32 %v9975_v52, 16 }
 0x529   : > { %13745 = vmatprep.subr.bf16.mxu1 %v14617_v16  ;;  %v10021_v2 = vshrl.u32 %v9972_v55, 16  ;;  %v10024_v58 = vshll.u32 %v9972_v55, 16 }
 0x52a   : > { %v10050_v32 = vrot.slane %v10048_v0, 5  ;;  %v18697_v0 = vld [vmem:[#allocation36_spill] sm:$0xff] }
 0x52b   : > { %v10023_v21 = vrot.slane %v10021_v2, 4 }
 0x52c   : > { %13746 = vmatpush3.bf16.msra.mxu1 %v14617_v16  ;;  %v18691_v16 = vld [vmem:[#allocation8_spill] sm:$0xff] }
 0x52d   : > { %13779 = vmatprep.subr.bf16.mxu1 %v14620_v41  ;;  %v10030_v17 = vshll.u32 %v18691_v16, 16  ;;  %v10034_v11 = vshrl.u32 %v18691_v16, 16 }
 0x52f   : > { %13716 = vmatmul.mubr.bf16.gmra.mrb[16].mxu1 %v18672_v63  ;;  %v10032_v15 = vrot.slane %v10030_v17, 5  ;;  %v10036_v45 = vrot.slane %v10034_v11, 4  ;;  %v10045_v63 = vshrl.u32 %v9975_v52, 16  ;;  %v14637_v17 = vld [vmem:[#allocation3 + $0xb4] sm:$0xff]  }
 0x530   : > { %13719 = vmatprep.mubr.bf16.mxu1 %v18675_v36  ;;  %v10026_v36 = vrot.slane %v10024_v58, 5 }
 0x531   : > { %v10047_v48 = vrot.slane %v10045_v63, 4 }
 0x537   : > { %13720 = vmatmul.mubr.bf16.gmra.mrb[20].mxu1 %v18678_v8  ;;  %v10037_v8 = vor.u32 %v10036_v45, %v10032_v15 }
 0x538   : > { %13723 = vmatprep.mubr.bf16.mxu1 %v18681_v27  ;;  %v10058_v27 = vshrl.u32 %v18692_v23, 16  ;;  %v9984_v23 = vld [vmem:[#allocation3 + $0x48] sm:$0xf] }
 0x539   : > { %v10038_v13 = vrot.slane %v10037_v8, 4 }
 0x53f   : > { %13724 = vmatmul.mubr.bf16.gmra.mrb[24].mxu1 %v18684_v35  ;;  %v10027_v35 = vor.u32 %v10026_v36, %v10023_v21  ;;  %v10102_v21 = vshll.u32 %v18697_v0, 16  ;;  %v10106_v36 = vshrl.u32 %v18697_v0, 16 }
 0x540   : > { %13727 = vmatprep.mubr.bf16.mxu1 %v18687_v43  ;;  %v14636_v43 = vld [vmem:[#allocation3 + $0xa8] sm:$0xff]  }
 0x547   : > { %13728 = vmatmul.mubr.bf16.gmra.mrb[28].mxu1 %v18690_v22  ;;  %v10051_v22 = vor.u32 %v10050_v32, %v10047_v48  ;;  %v18698_v48 = vld [vmem:[#allocation37_spill] sm:$0xff] }
 0x548   : > { %13747 = vmatprep.mubr.bf16.mxu1 %v14618_v42  ;;  %v18028_v42 = vrot.slane %v10054_v9, 5  ;;  %v10126_v32 = vshll.u32 %v18698_v48, 16 }
 0x54f   : > { %13748 = vmatmul.mubr.bf16.vlgmr.msra.gmra.mrb[0].mxu1 %v14619_v12  ;;  %v10060_v12 = vrot.slane %v10058_v27, 4  ;;  %v18052_v27 = vld [vmem:[#allocation3 + $0xd0] sm:$0xf] }
 0x550   : > { %13751 = vmatprep.mubr.bf16.mxu1 %v14621_v59  ;;  %13780 = vmatpush3.bf16.msra.mxu1 %v14620_v41  ;;  %v14633_v41 = vld [vmem:[#allocation3 + $0x90] sm:$0xff]  }
 0x551   : > { %13781 = vmatprep.subr.bf16.mxu1 %v14623_v6  ;;  %v18694_v59 = vld [vmem:[#allocation34_spill] sm:$0xff] }
 0x554   : > { %13782 = vmatpush3.bf16.msra.mxu1 %v14623_v6  ;;  %v10072_v6 = vshll.u32 %v9978_v38, 16  ;;  %v18054_v38 = vld [vmem:[#allocation3 + $0xd4] sm:$0x1] }
 0x555   : > { %13783 = vmatprep.subr.bf16.mxu1 %v14626_v37 }
 0x557   : > { %13752 = vmatmul.mubr.bf16.gmra.mrb[4].mxu1 %v14622_v25  ;;  %v10082_v25 = vshrl.u32 %v18694_v59, 16 }
 0x558   : > { %13755 = vmatprep.mubr.bf16.mxu1 %v14624_v49  ;;  %13784 = vmatpush3.bf16.msra.mxu1 %v14626_v37  ;;  %v10078_v37 = vshll.u32 %v18694_v59, 16  ;;  %v10042_v49 = vrot.slane %v10040_v50, 5  ;;  %v10897_v50 = vrot.slane %v18052_v27, 5 }
 0x559   : > { %13785 = vmatprep.subr.bf16.mxu1 %v14629_v44  ;;  %v10084_v16 = vrot.slane %v10082_v25, 4  ;;  %v10108_v25 = vrot.slane %v10106_v36, 4 }
 0x55a   : > { %v18038_v55 = vrot.slane %v10078_v37, 5  ;;  %v18062_v37 = vrot.slane %v10102_v21, 5  ;;  %v18700_v21 = vld [vmem:[#allocation40_spill] sm:$0xff] }
 0x55b   : > { %v10112_v36 = vshll.u32 %v18700_v21, 16 }
 0x55c   : > { %13786 = vmatpush3.bf16.msra.mxu1 %v14629_v44  ;;  %v10028_v44 = vrot.slane %v10027_v35, 4  ;;  %v10130_v35 = vshrl.u32 %v18698_v48, 16 }
 0x55d   : > { %13787 = vmatprep.subr.bf16.mxu1 %v14632_v7 }
 0x55e   : > { %v10033_v11 = vsel %vm14903_vm9, %v10028_v44, %v10032_v15  ;;  %v10899_v44 = vrot.slane %v10897_v50, 4 }
 0x55f   : > { %13756 = vmatmul.mubr.bf16.gmra.mrb[8].mxu1 %v14625_v29 }
 0x560   : > { %13759 = vmatprep.mubr.bf16.mxu1 %v14627_v60  ;;  %13788 = vmatpush3.bf16.msra.mxu1 %v14632_v7  ;;  %v18695_v7 = vld [vmem:[#allocation33_spill] sm:$0xff]  ;;  %v9981_v60 = vld [vmem:[#allocation3 + $0x3c] sm:$0xf] }
 0x561   : > { %13789 = vmatprep.subr.bf16.mxu1 %v14635_v56  ;;  %v10064_v29 = vshll.u32 %v18695_v7, 16  ;;  %v10093_v58 = vshrl.u32 %v9981_v60, 16  ;;  %v10096_v63 = vshll.u32 %v9981_v60, 16  ;;  %v10117_v7 = vshrl.u32 %v9984_v23, 16 }
 0x563   : > { %v18042_v52 = vrot.slane %v10064_v29, 5  ;;  %v10098_v59 = vrot.slane %v10096_v63, 5  ;;  %v10120_v29 = vshll.u32 %v9984_v23, 16  ;;  %v10109_v23 = vor.u32 %v10108_v25, %v18062_v37  ;;  %v18702_v25 = vld [vmem:[#allocation44_spill] sm:$0xff] }
 0x564   : > { %13790 = vmatpush3.bf16.msra.mxu1 %v14635_v56  ;;  %v10071_v56 = vrot.slane %v10069_v18, 4  ;;  %v10095_v18 = vrot.slane %v10093_v58, 4 }
 0x565   : > { %13791 = vmatprep.subr.bf16.mxu1 %v14638_v53  ;;  %v10122_v48 = vrot.slane %v10120_v29, 5 }
 0x566   : > { %v10099_v54 = vor.u32 %v10098_v59, %v10095_v18  ;;  %v10114_v59 = vrot.slane %v10112_v36, 5 }
 0x567   : > { %13760 = vmatmul.mubr.bf16.gmra.mrb[12].mxu1 %v14628_v24  ;;  %v18035_v24 = vrot.slane %v10051_v22, 4 }
 0x568   : > { %13763 = vmatprep.mubr.bf16.mxu1 %v14630_v4  ;;  %13792 = vmatpush3.bf16.msra.mxu1 %v14638_v53  ;;  %v10043_v53 = vsel %vm14903_vm9, %v10038_v13, %v10042_v49  ;;  %v10074_v4 = vrot.slane %v10072_v6, 5  ;;  %v18699_v13 = vld [vmem:[#allocation43_spill] sm:$0xff]  ;;  %v12493_v6 = vrot.slane %v10741_v57, 9  ;;  %v14640_v49 = vld [vmem:[#allocation3 + $0xcc] sm:$0xff]  }
 0x569   : > { %13793 = vmatprep.subr.bf16.mxu1 %v14641_v51  ;;  %v12454_v45 = vcombine.low %v10033_v11, %v10043_v53  ;;  %v10057_v9 = vsel %vm14903_vm9, %v18035_v24, %v18028_v42  ;;  %v10150_v22 = vshll.u32 %v18699_v13, 16  ;;  %v10132_v53 = vrot.slane %v10130_v35, 4 }
 0x56a   : > { %v10075_v8 = vor.u32 %v10074_v4, %v10071_v56  ;;  %v18064_v56 = vrot.slane %v10126_v32, 5  ;;  %v18068_v60 = vsel %vm15336_vm14, %v12493_v6, %v10897_v50  ;;  %v10110_v6 = vrot.slane %v10109_v23, 4 }
 0x56c   : > { %13794 = vmatpush3.bf16.msra.mxu1 %v14641_v51  ;;  %v10061_v51 = vor.u32 %v10060_v12, %v18028_v42  ;;  %v9987_v42 = vld [vmem:[#allocation3 + $0x54] sm:$0xf]  ;;  %v10154_v12 = vshrl.u32 %v18699_v13, 16  ;;  %v10076_v63 = vrot.slane %v10075_v8, 4  ;;  %v10133_v32 = vor.u32 %v10132_v53, %v18064_v56  ;;  %v14711_v13 = vld [vmem:[#allocation3 + $0x50] sm:$0x1] }
 0x56d   : > { %13827 = vmatprep.subr.bf16.mxu1 %v18020_v1  ;;  %v10141_v24 = vshrl.u32 %v9987_v42, 16 }
 0x56e   : > { %v10062_v15 = vrot.slane %v10061_v51, 4  ;;  %v10144_v51 = vshll.u32 %v9987_v42, 16  ;;  %v10156_v11 = vrot.slane %v10154_v12, 4  ;;  %v10081_v18 = vsel %vm14903_vm9, %v10076_v63, %v18038_v55  ;;  %v18703_v63 = vld [vmem:[#allocation49_spill] sm:$0xff] }
 0x56f   : > { %13764 = vmatmul.mubr.bf16.gmra.mrb[16].mxu1 %v14631_v28  ;;  %v18696_v28 = vld [vmem:[#allocation35_spill] sm:$0xff]  ;;  %v10143_v35 = vrot.slane %v10141_v24, 4  ;;  %v10100_v12 = vrot.slane %v10099_v54, 4  ;;  %v9993_v24 = vld [vmem:[#allocation3 + $0x6c] sm:$0xf]  ;;  %v10202_v21 = vshrl.u32 %v18703_v63, 16 }
 0x570   : > { %13767 = vmatprep.mubr.bf16.mxu1 %v14633_v41  ;;  %v10088_v2 = vshll.u32 %v18696_v28, 16  ;;  %v14639_v41 = vld [vmem:[#allocation3 + $0xc0] sm:$0xff]   ;;  %v10146_v57 = vrot.slane %v10144_v51, 5  ;;  %v10189_v23 = vshrl.u32 %v9993_v24, 16 }
 0x571   : > { %v9990_v28 = vld [vmem:[#allocation3 + $0x60] sm:$0xf]  ;;  %v10105_v36 = vsel %vm14903_vm9, %v10100_v12, %v18062_v37  ;;  %v14644_v37 = vld [vmem:[#allocation4 + $0x210] sm:$0xff]   ;;  %v14713_v12 = vld [vmem:[#allocation3 + $0x7c] sm:$0xf] }
 0x572   : > { %v10165_v50 = vshrl.u32 %v9990_v28, 16  ;;  %v10168_v42 = vshll.u32 %v9990_v28, 16  ;;  %v10147_v29 = vor.u32 %v10146_v57, %v10143_v35 }
 0x574   : > { %v10167_v53 = vrot.slane %v10165_v50, 4  ;;  %v10148_v50 = vrot.slane %v10147_v29, 4 }
 0x577   : > { %13768 = vmatmul.mubr.bf16.gmra.mrb[20].mxu1 %v14634_v19  ;;  %v10085_v19 = vor.u32 %v10084_v16, %v18038_v55  ;;  %v10090_v16 = vrot.slane %v10088_v2, 5  ;;  %v10119_v2 = vrot.slane %v10117_v7, 4  ;;  %v10134_v7 = vrot.slane %v10133_v32, 4 }
 0x578   : > { %13771 = vmatprep.mubr.bf16.mxu1 %v14636_v43  ;;  %v10900_v43 = vrot.slane %v18054_v38, 5  ;;  %v10115_v32 = vsel %vm14903_vm9, %v10110_v6, %v10114_v59  ;;  %v10222_v6 = vshll.u32 %v14713_v12, 16  ;;  %v10226_v59 = vshrl.u32 %v14713_v12, 16 }
 0x579   : > { %v10086_v0 = vrot.slane %v10085_v19, 4 }
 0x57a   : > { %v18072_v4 = vsel %vm15336_vm14, %v10899_v44, %v10900_v43  ;;  %v10160_v44 = vshll.u32 %v18702_v25, 16  ;;  %v12457_v25 = vcombine.low %v10105_v36, %v10115_v32  ;;  %v18117_v36 = vrot.slane %v10222_v6, 5 }
 0x57b   : > { %v12509_v58 = vcombine.low %v18068_v60, %v18072_v4 }
 0x57c   : > { %v10162_v54 = vrot.slane %v10160_v44, 5 }
 0x57f   : > { %13772 = vmatmul.mubr.bf16.gmra.mrb[24].mxu1 %v14637_v17  ;;  %v18074_v17 = vrot.slane %v10150_v22, 5  ;;  %v10136_v22 = vshll.u32 %v14711_v13, 16  ;;  %v10191_v13 = vrot.slane %v10189_v23, 4 }
 0x580   : > { %13775 = vmatprep.mubr.bf16.mxu1 %v14639_v41  ;;  %v10067_v41 = vsel %vm14903_vm9, %v10062_v15, %v18042_v52  ;;  %v18701_v52 = vld [vmem:[#allocation46_spill] sm:$0xff] }
 0x581   : > { %v10157_v43 = vor.u32 %v10156_v11, %v18074_v17  ;;  %v10174_v15 = vshll.u32 %v18701_v52, 16  ;;  %v10178_v8 = vshrl.u32 %v18701_v52, 16  ;;  %v12455_v19 = vcombine.low %v10057_v9, %v10067_v41  ;;  %v14643_v9 = vld [vmem:[#allocation4 + $0x208] sm:$0xff]  }
 0x582   : > { %v10170_v11 = vrot.slane %v10168_v42, 5 }
 0x583   : > { %v10158_v51 = vrot.slane %v10157_v43, 4  ;;  %v18093_v28 = vrot.slane %v10174_v15, 5  ;;  %v10180_v55 = vrot.slane %v10178_v8, 4  ;;  %v14712_v15 = vld [vmem:[#allocation3 + $0x68] sm:$0x1] }
 0x584   : > { %v10171_v42 = vor.u32 %v10170_v11, %v10167_v53  ;;  %v10184_v8 = vshll.u32 %v14712_v15, 16  ;;  %v9999_v11 = vld [vmem:[#allocation3 + $0x84] sm:$0xf] }
 0x585   : > { %v10163_v43 = vsel %vm14903_vm9, %v10158_v51, %v10162_v54  ;;  %v10181_v52 = vor.u32 %v10180_v55, %v18093_v28  ;;  %v14645_v51 = vld [vmem:[#allocation4 + $0x218] sm:$0xff]   ;;  %v10237_v54 = vshrl.u32 %v9999_v11, 16  ;;  %v10240_v23 = vshll.u32 %v9999_v11, 16  ;;  %v14647_v11 = vld [vmem:[#allocation4 + $0x228] sm:$0xff]  }
 0x586   : > { %v10172_v53 = vrot.slane %v10171_v42, 4 }
 0x587   : > { %13776 = vmatmul.mubr.bf16.gmra.mrb[28].mxu1 %v14640_v49  ;;  %v10123_v49 = vor.u32 %v10122_v48, %v10119_v2  ;;  %v10192_v2 = vshll.u32 %v9993_v24, 16  ;;  %v9996_v48 = vld [vmem:[#allocation3 + $0x78] sm:$0xf]  ;;  %v10186_v24 = vrot.slane %v10184_v8, 5  ;;  %v10182_v55 = vrot.slane %v10181_v52, 4 }
 0x588   : > { %13795 = vmatprep.mubr.bf16.mxu1 %v12454_v45  ;;  %v10091_v45 = vsel %vm14903_vm9, %v10086_v0, %v10090_v16  ;;  %v10138_v16 = vrot.slane %v10136_v22, 5  ;;  %v10198_v0 = vshll.u32 %v18703_v63, 16  ;;  %v10177_v15 = vsel %vm14903_vm9, %v10172_v53, %v18093_v28 }
 0x589   : > { %v12456_v41 = vcombine.low %v10081_v18, %v10091_v45  ;;  %v10124_v35 = vrot.slane %v10123_v49, 4  ;;  %v10213_v18 = vshrl.u32 %v9996_v48, 16  ;;  %v10216_v45 = vshll.u32 %v9996_v48, 16 }
 0x58a   : > { %v10139_v57 = vsel %vm14903_vm9, %v10134_v7, %v10138_v16  ;;  %v10194_v22 = vrot.slane %v10192_v2, 5  ;;  %v10153_v49 = vsel %vm14903_vm9, %v10148_v50, %v18074_v17  ;;  %v10228_v17 = vrot.slane %v10226_v59, 4  ;;  %v14715_v2 = vld [vmem:[#allocation3 + $0x88] sm:$0xf] }
 0x58b   : > { %v10129_v44 = vsel %vm14903_vm9, %v10124_v35, %v18064_v56  ;;  %v12459_v29 = vcombine.low %v10153_v49, %v10163_v43  ;;  %v10215_v16 = vrot.slane %v10213_v18, 4  ;;  %v10218_v63 = vrot.slane %v10216_v45, 5  ;;  %v14646_v35 = vld [vmem:[#allocation4 + $0x220] sm:$0xff]   ;;  %v14716_v43 = vld [vmem:[#allocation3 + $0x94] sm:$0xf] }
 0x58c   : > { %v12458_v7 = vcombine.low %v10129_v44, %v10139_v57  ;;  %v10195_v56 = vor.u32 %v10194_v22, %v10191_v13  ;;  %v10246_v48 = vshll.u32 %v14715_v2, 16  ;;  %v10250_v32 = vshrl.u32 %v14715_v2, 16  ;;  %v14717_v22 = vld [vmem:[#allocation3 + $0x80] sm:$0x1]  ;;  %v10005_v49 = vld [vmem:[#allocation3 + $0x9c] sm:$0xf] }
 0x58d   : > { %v10270_v42 = vshll.u32 %v14716_v43, 16  ;;  %v10274_v52 = vshrl.u32 %v14716_v43, 16  ;;  %v10187_v8 = vsel %vm14903_vm9, %v10182_v55, %v10186_v24  ;;  %v10229_v13 = vor.u32 %v10228_v17, %v18117_v36 }
 0x58e   : > { %v10196_v18 = vrot.slane %v10195_v56, 4  ;;  %v10232_v12 = vshll.u32 %v14717_v22, 16  ;;  %v10239_v6 = vrot.slane %v10237_v54, 4  ;;  %v10242_v59 = vrot.slane %v10240_v23, 5 }
 0x58f   : > { %13796 = vmatmul.mubr.bf16.vlgmr.msra.gmra.mrb[0].mxu1 %v12455_v19  ;;  %v18108_v19 = vrot.slane %v10198_v0, 5  ;;  %v10002_v0 = vld [vmem:[#allocation3 + $0x90] sm:$0xf]  ;;  %v10252_v44 = vrot.slane %v10250_v32, 4  ;;  %v18127_v53 = vrot.slane %v10270_v42, 5  ;;  %v10276_v24 = vrot.slane %v10274_v52, 4 }
 0x590   : > { %13799 = vmatprep.mubr.bf16.mxu1 %v12456_v41  ;;  %13828 = vmatpush3.bf16.msra.mxu1 %v18020_v1  ;;  %v10204_v1 = vrot.slane %v10202_v21, 4  ;;  %v10261_v57 = vshrl.u32 %v10002_v0, 16  ;;  %v10264_v50 = vshll.u32 %v10002_v0, 16  ;;  %v12460_v55 = vcombine.low %v10177_v15, %v10187_v8  ;;  %v10008_v42 = vld [vmem:[#allocation3 + $0xa8] sm:$0xf] }
 0x591   : > { %13829 = vmatprep.subr.bf16.mxu1 %v14643_v9  ;;  %v10243_v0 = vor.u32 %v10242_v59, %v10239_v6  ;;  %v10234_v54 = vrot.slane %v10232_v12, 5  ;;  %v10277_v2 = vor.u32 %v10276_v24, %v18127_v53  ;;  %v14720_v52 = vld [vmem:[#allocation3 + $0x98] sm:$0x1]  ;;  %v14721_v8 = vld [vmem:[#allocation3 + $0xac] sm:$0xf]  ;;  %v10309_v6 = vshrl.u32 %v10008_v42, 16 }
 0x592   : > { %v10205_v41 = vor.u32 %v10204_v1, %v18108_v19  ;;  %v10219_v1 = vor.u32 %v10218_v63, %v10215_v16  ;;  %v10263_v28 = vrot.slane %v10261_v57, 4  ;;  %v10230_v63 = vrot.slane %v10229_v13, 4  ;;  %v14719_v57 = vld [vmem:[#allocation3 + $0xa0] sm:$0xf] }
 0x593   : > { %v10298_v43 = vshrl.u32 %v14719_v57, 16  ;;  %v10280_v15 = vshll.u32 %v14720_v52, 16  ;;  %v10278_v12 = vrot.slane %v10277_v2, 4  ;;  %v10312_v59 = vshll.u32 %v10008_v42, 16 }
 0x594   : > { %13830 = vmatpush3.bf16.msra.mxu1 %v14643_v9  ;;  %v14714_v9 = vld [vmem:[#allocation3 + $0x74] sm:$0x1]  ;;  %v10220_v16 = vrot.slane %v10219_v1, 4  ;;  %v10322_v1 = vshrl.u32 %v14721_v8, 16 }
 0x595   : > { %13831 = vmatprep.subr.bf16.mxu1 %v14644_v37  ;;  %v10208_v21 = vshll.u32 %v14714_v9, 16  ;;  %v10285_v9 = vshrl.u32 %v10005_v49, 16  ;;  %v10300_v24 = vrot.slane %v10298_v43, 4  ;;  %v14724_v43 = vld [vmem:[#allocation3 + $0xc4] sm:$0xf] }
 0x596   : > { %v10366_v42 = vshll.u32 %v14724_v43, 16 }
 0x597   : > { %13800 = vmatmul.mubr.bf16.gmra.mrb[4].mxu1 %v12457_v25  ;;  %v10210_v45 = vrot.slane %v10208_v21, 5  ;;  %v18125_v25 = vrot.slane %v10246_v48, 5  ;;  %v10288_v21 = vshll.u32 %v10005_v49, 16  ;;  %v14648_v48 = vld [vmem:[#allocation4 + $0x230] sm:$0xff]   ;;  %v10287_v13 = vrot.slane %v10285_v9, 4 }
 0x598   : > { %13803 = vmatprep.mubr.bf16.mxu1 %v12458_v7  ;;  %13832 = vmatpush3.bf16.msra.mxu1 %v14644_v37  ;;  %v10206_v37 = vrot.slane %v10205_v41, 4  ;;  %v10266_v7 = vrot.slane %v10264_v50, 5  ;;  %v10294_v50 = vshll.u32 %v14719_v57, 16  ;;  %v10014_v57 = vld [vmem:[#allocation3 + $0xc0] sm:$0xf] }
 0x599   : > { %13833 = vmatprep.subr.bf16.mxu1 %v14645_v51  ;;  %v10253_v56 = vor.u32 %v10252_v44, %v18125_v25  ;;  %v10290_v22 = vrot.slane %v10288_v21, 5  ;;  %v14649_v44 = vld [vmem:[#allocation4 + $0x238] sm:$0xff]  }
 0x59a   : > { %v10211_v41 = vsel %vm14903_vm9, %v10206_v37, %v10210_v45  ;;  %v10267_v23 = vor.u32 %v10266_v7, %v10263_v28  ;;  %v10318_v37 = vshll.u32 %v14721_v8, 16  ;;  %v18141_v7 = vrot.slane %v10294_v50, 5 }
 0x59b   : > { %v10254_v45 = vrot.slane %v10253_v56, 4  ;;  %v14722_v56 = vld [vmem:[#allocation3 + $0xa4] sm:$0x1] }
 0x59c   : > { %13834 = vmatpush3.bf16.msra.mxu1 %v14645_v51  ;;  %v10201_v51 = vsel %vm14903_vm9, %v10196_v18, %v18108_v19  ;;  %v14718_v19 = vld [vmem:[#allocation3 + $0x8c] sm:$0x1]  ;;  %v10244_v18 = vrot.slane %v10243_v0, 4  ;;  %v10291_v0 = vor.u32 %v10290_v22, %v10287_v13  ;;  %v10304_v9 = vshll.u32 %v14722_v56, 16 }
 0x59d   : > { %13835 = vmatprep.subr.bf16.mxu1 %v14646_v35  ;;  %v12461_v17 = vcombine.low %v10201_v51, %v10211_v41  ;;  %v10256_v32 = vshll.u32 %v14718_v19, 16  ;;  %v18143_v41 = vrot.slane %v10318_v37, 5  ;;  %v10011_v51 = vld [vmem:[#allocation3 + $0xb4] sm:$0xf]  ;;  %v10301_v2 = vor.u32 %v10300_v24, %v18141_v7  ;;  %v10017_v22 = vld [vmem:[#allocation3 + $0xcc] sm:$0xf] }
 0x59e   : > { %v10306_v8 = vrot.slane %v10304_v9, 5  ;;  %v10360_v13 = vshll.u32 %v10014_v57, 16  ;;  %v10368_v24 = vrot.slane %v10366_v42, 5  ;;  %v14727_v42 = vld [vmem:[#allocation3 + $0xc8] sm:$0x1] }
 0x59f   : > { %13804 = vmatmul.mubr.bf16.gmra.mrb[8].mxu1 %v12459_v29  ;;  %v10225_v29 = vsel %vm14903_vm9, %v10220_v16, %v18117_v36  ;;  %v10268_v36 = vrot.slane %v10267_v23, 4  ;;  %v10258_v28 = vrot.slane %v10256_v32, 5  ;;  %v10324_v16 = vrot.slane %v10322_v1, 4  ;;  %v14725_v1 = vld [vmem:[#allocation3 + $0xb0] sm:$0x1] }
 0x5a0   : > { %13807 = vmatprep.mubr.bf16.mxu1 %v12460_v55  ;;  %13836 = vmatpush3.bf16.msra.mxu1 %v14646_v35  ;;  %v10235_v35 = vsel %vm14903_vm9, %v10230_v63, %v10234_v54  ;;  %v10282_v55 = vrot.slane %v10280_v15, 5  ;;  %v10311_v54 = vrot.slane %v10309_v6, 4  ;;  %v10314_v23 = vrot.slane %v10312_v59, 5 }
 0x5a1   : > { %13837 = vmatprep.subr.bf16.mxu1 %v14647_v11  ;;  %v12462_v49 = vcombine.low %v10225_v29, %v10235_v35  ;;  %v10259_v63 = vsel %vm14903_vm9, %v10254_v45, %v10258_v28  ;;  %v10273_v21 = vsel %vm14903_vm9, %v10268_v36, %v18127_v53  ;;  %v14723_v29 = vld [vmem:[#allocation3 + $0xb8] sm:$0xf]  ;;  %v10325_v50 = vor.u32 %v10324_v16, %v18143_v41 }
 0x5a2   : > { %v10342_v19 = vshll.u32 %v14723_v29, 16  ;;  %v10346_v32 = vshrl.u32 %v14723_v29, 16  ;;  %v10370_v35 = vshrl.u32 %v14724_v43, 16  ;;  %v10292_v15 = vrot.slane %v10291_v0, 4 }
 0x5a3   : > { %v10315_v37 = vor.u32 %v10314_v23, %v10311_v54  ;;  %v10357_v45 = vshrl.u32 %v10014_v57, 16  ;;  %v10302_v36 = vrot.slane %v10301_v2, 4  ;;  %v10381_v16 = vshrl.u32 %v10017_v22, 16 }
 0x5a4   : > { %13838 = vmatpush3.bf16.msra.mxu1 %v14647_v11  ;;  %v10249_v11 = vsel %vm14903_vm9, %v10244_v18, %v18125_v25  ;;  %v10333_v25 = vshrl.u32 %v10011_v51, 16  ;;  %v10328_v18 = vshll.u32 %v14725_v1, 16  ;;  %v10344_v6 = vrot.slane %v10342_v19, 5 }
 0x5a5   : > { %13839 = vmatprep.subr.bf16.mxu1 %v14648_v48  ;;  %v12463_v53 = vcombine.low %v10249_v11, %v10259_v63  ;;  %v10348_v59 = vrot.slane %v10346_v32, 4  ;;  %v10394_v11 = vshrl.u32 %v18052_v27, 16  ;;  %v10316_v63 = vrot.slane %v10315_v37, 4 }
 0x5a6   : > { %v10330_v0 = vrot.slane %v10328_v18, 5  ;;  %v10359_v56 = vrot.slane %v10357_v45, 4  ;;  %v10362_v9 = vrot.slane %v10360_v13, 5  ;;  %v10400_v45 = vshll.u32 %v18054_v38, 16 }
 0x5a7   : > { %13808 = vmatmul.mubr.bf16.gmra.mrb[12].mxu1 %v12461_v17  ;;  %v10283_v17 = vsel %vm14903_vm9, %v10278_v12, %v10282_v55  ;;  %v10335_v12 = vrot.slane %v10333_v25, 4  ;;  %v10372_v55 = vrot.slane %v10370_v35, 4  ;;  %v10349_v54 = vor.u32 %v10348_v59, %v10344_v6  ;;  %v14726_v25 = vld [vmem:[#allocation3 + $0xbc] sm:$0x1] }
 0x5a8   : > { %13811 = vmatprep.mubr.bf16.mxu1 %v12462_v49  ;;  %13840 = vmatpush3.bf16.msra.mxu1 %v14648_v48  ;;  %v10336_v48 = vshll.u32 %v10011_v51, 16  ;;  %v12464_v52 = vcombine.low %v10273_v21, %v10283_v17  ;;  %v10326_v49 = vrot.slane %v10325_v50, 4  ;;  %v10384_v51 = vshll.u32 %v10017_v22, 16 }
 0x5a9   : > { %13841 = vmatprep.subr.bf16.mxu1 %v14649_v44  ;;  %v10297_v21 = vsel %vm14903_vm9, %v10292_v15, %v18141_v7  ;;  %v10307_v17 = vsel %vm14903_vm9, %v10302_v36, %v10306_v8  ;;  %v10352_v29 = vshll.u32 %v14726_v25, 16  ;;  %v10373_v19 = vor.u32 %v10372_v55, %v10368_v24 }
 0x5aa   : > { %v10338_v28 = vrot.slane %v10336_v48, 5  ;;  %v10331_v23 = vsel %vm14903_vm9, %v10326_v49, %v10330_v0  ;;  %v10386_v32 = vrot.slane %v10384_v51, 5  ;;  %v10396_v50 = vrot.slane %v10394_v11, 4 }
 0x5ab   : > { %v12465_v48 = vcombine.low %v10297_v21, %v10307_v17  ;;  %v10321_v7 = vsel %vm14903_vm9, %v10316_v63, %v18143_v41  ;;  %v10363_v43 = vor.u32 %v10362_v9, %v10359_v56  ;;  %v10376_v35 = vshll.u32 %v14727_v42, 16  ;;  %v18704_v63 = vld [vmem:[#allocation38_spill] sm:$0xff]  ;;  %v18707_v56 = vld [vmem:[#allocation41_spill] sm:$0xff]  ;;  %v18711_v17 = vld [vmem:[#allocation47_spill] sm:$0xff] }
 0x5ac   : > { %13842 = vmatpush3.bf16.msra.mxu1 %v14649_v44  ;;  %v10390_v44 = vshll.u32 %v18052_v27, 16  ;;  %v10339_v2 = vor.u32 %v10338_v28, %v10335_v12  ;;  %v10383_v27 = vrot.slane %v10381_v16, 4  ;;  %v10354_v15 = vrot.slane %v10352_v29, 5  ;;  %v18708_v9 = vld [vmem:[#allocation42_spill] sm:$0xff]  ;;  %v18726_v42 = vld [vmem:[#allocation57_spill] sm:$0xff] }
 0x5ad   : > { %v10374_v8 = vrot.slane %v10373_v19, 4  ;;  %v10364_v13 = vrot.slane %v10363_v43, 4  ;;  %v10378_v22 = vrot.slane %v10376_v35, 5  ;;  %v10402_v28 = vrot.slane %v10400_v45, 5  ;;  %v18718_v19 = vld [vmem:[#allocation52_spill] sm:$0xff] }
 0x5ae   : > { %v10392_v57 = vrot.slane %v10390_v44, 5  ;;  %v10340_v37 = vrot.slane %v10339_v2, 4  ;;  %v10387_v1 = vor.u32 %v10386_v32, %v10383_v27  ;;  %v18709_v21 = vcombine.low %v18707_v56, %v18708_v9  ;;  %v18714_v2 = vld [vmem:[#allocation50_spill] sm:$0xff]  ;;  %v18719_v27 = vld [vmem:[#allocation53_spill] sm:$0xff] }
 0x5af   : > { %13812 = vmatmul.mubr.bf16.gmra.mrb[16].mxu1 %v12463_v53  ;;  %v12466_v53 = vcombine.low %v10321_v7, %v10331_v23  ;;  %v10379_v41 = vsel %vm14903_vm9, %v10374_v8, %v10378_v22  ;;  %v10369_v16 = vsel %vm14903_vm9, %v10364_v13, %v10368_v24  ;;  %v18710_v24 = vld [vmem:[#allocation45_spill] sm:$0xff]  ;;  %v18713_v23 = vld [vmem:[#allocation48_spill] sm:$0xff]  ;;  %v18717_v29 = vcombine.low %v17751_v62, %v18716_v33 }
 0x5b0   : > { %13815 = vmatprep.mubr.bf16.mxu1 %v12464_v52  ;;  %v10350_v52 = vrot.slane %v10349_v54, 4  ;;  %v10397_v18 = vor.u32 %v10396_v50, %v10392_v57  ;;  %v10345_v12 = vsel %vm14903_vm9, %v10340_v37, %v10344_v6  ;;  %v10388_v59 = vrot.slane %v10387_v1, 4  ;;  %v18705_v6 = vld [vmem:[#allocation39_spill] sm:$0xff]  ;;  %v18724_v7 = vld [vmem:[#allocation56_spill] sm:$0xff]  ;;  %v18732_v8 = vld [vmem:[#allocation61_spill] sm:$0xff] }
 0x5b1   : > { %v12468_v51 = vcombine.low %v10369_v16, %v10379_v41  ;;  %v18706_v0 = vcombine.low %v18704_v63, %v18705_v6  ;;  %v18712_v54 = vcombine.low %v18710_v24, %v18711_v17  ;;  %v18715_v25 = vcombine.low %v18713_v23, %v18714_v2 }
 0x5b2   : > { %v10355_v36 = vsel %vm14903_vm9, %v10350_v52, %v10354_v15  ;;  %v10398_v49 = vrot.slane %v10397_v18, 4  ;;  %v10393_v38 = vsel %vm14903_vm9, %v10388_v59, %v10392_v57  ;;  %v18720_v32 = vcombine.low %v18718_v19, %v18719_v27  ;;  %v18721_v57 = vld [vmem:[#allocation54_spill] sm:$0xff]  ;;  %v18729_v52 = vld [vmem:[#allocation59_spill] sm:$0xff]  ;;  %v18731_v15 = vld [vmem:[#allocation60_spill] sm:$0xff] }
 0x5b3   : > { %v12467_v55 = vcombine.low %v10345_v12, %v10355_v36  ;;  %v18722_v50 = vcombine.low %v17773_v20, %v18721_v57  ;;  %v18727_v35 = vcombine.low %v17796_v3, %v18726_v42  ;;  %v18733_v37 = vcombine.low %v18731_v15, %v18732_v8 }
 0x5b4   : > { %v10403_v44 = vsel %vm14903_vm9, %v10398_v49, %v10402_v28  ;;  %v14772_v20 = vmov 1966171168  }
 0x5b5   : > { %v12469_v11 = vcombine.low %v10393_v38, %v10403_v44  ;;  %v11335_v3 = vunpack.c.l.s4 %v14772_v20 }
 0x5b7   : > { %13816 = vmatmul.mubr.bf16.gmra.mrb[20].mxu1 %v12465_v48  ;;  %v18723_v48 = vld [vmem:[#allocation55_spill] sm:$0xff] }
 0x5b8   : > { %13819 = vmatprep.mubr.bf16.mxu1 %v12466_v53  ;;  %v18725_v43 = vcombine.low %v18723_v48, %v18724_v7  ;;  %v18728_v53 = vld [vmem:[#allocation58_spill] sm:$0xff] }
 0x5b9   : > { %v18730_v62 = vcombine.low %v18728_v53, %v18729_v52 }
 0x5bf   : > { %13820 = vmatmul.mubr.bf16.gmra.mrb[24].mxu1 %v12467_v55 }
 0x5c0   : > { %13823 = vmatprep.mubr.bf16.mxu1 %v12468_v51 }
 0x5c7   : > { %13824 = vmatmul.mubr.bf16.gmra.mrb[28].mxu1 %v12469_v11 }
 0x5c8   : > { %13843 = vmatprep.mubr.bf16.mxu1 %v18706_v0 }
 0x5cf   : > { %13844 = vmatmul.mubr.bf16.vlgmr.msra.gmra.mrb[0].mxu1 %v18709_v21 }
 0x5d0   : > { %13847 = vmatprep.mubr.bf16.mxu1 %v18712_v54 }
 0x5d7   : > { %13848 = vmatmul.mubr.bf16.gmra.mrb[4].mxu1 %v18715_v25 }
 0x5d8   : > { %13851 = vmatprep.mubr.bf16.mxu1 %v18717_v29 }
 0x5df   : > { %13852 = vmatmul.mubr.bf16.gmra.mrb[8].mxu1 %v18720_v32 }
 0x5e0   : > { %13855 = vmatprep.mubr.bf16.mxu1 %v18722_v50 }
 0x5e7   : > { %13856 = vmatmul.mubr.bf16.gmra.mrb[12].mxu1 %v18725_v43 }
 0x5e8   : > { %13859 = vmatprep.mubr.bf16.mxu1 %v18727_v35 }
 0x5ef   : > { %13860 = vmatmul.mubr.bf16.gmra.mrb[16].mxu1 %v18730_v62 }
 0x5f0   : > { %13863 = vmatprep.mubr.bf16.mxu1 %v18733_v37 }
 0x5f7   : > { %13864 = vmatmul.mubr.bf16.gmra.mrb[20].mxu1 %v12505_v14  ;;  %v11336_v14 = vunpack.c.0.s8 %v11335_v3 }
 0x5f8   : > { %13867 = vmatprep.mubr.bf16.mxu1 %v12506_v40 }
 0x5ff   : > { %13868 = vmatmul.mubr.bf16.gmra.mrb[24].mxu1 %v12507_v30 }
 0x600   : > { %13871 = vmatprep.mubr.bf16.mxu1 %v12508_v46  ;;  %v18243_v46 = vsub.s32 %v11336_v14, %v11338_v61 }
 0x607   : > { %13872 = vmatmul.mubr.bf16.gmra.mrb[28].mxu1 %v12509_v58 }
 0x6a2   : > { %v13845_v34 = vpop.f32.mrb[0].mxu1 }
 0x6a3   : > { %v11233_v40 = vmul.f32 %v13845_v34, %v18233_v31  ;;  %v11065_v47 = vpop.f32.mrb[1].mxu1 }
 0x6a4   : > { %v11231_v30 = vmul.f32 %v18233_v31, %v11065_v47  ;;  %v13846_v39 = vpop.f32.mrb[2].mxu1 }
 0x6a5   : > { %v11272_v10 = vadd.f32 %v18238_v5, %v11233_v40  ;;  %v11234_v60 = vmul.f32 %v13846_v39, %v18233_v31  ;;  %v11068_v4 = vpop.f32.mrb[3].mxu1 }
 0x6a6   : > { %v11270_v58 = vadd.f32 %v18238_v5, %v11231_v30  ;;  %v11232_v1 = vmul.f32 %v18233_v31, %v11068_v4 }
 0x6a7   : > { %v11304_v18 = vmax.f32 %v11272_v10, 0.0  ;;  %v11273_v45 = vadd.f32 %v18238_v5, %v11234_v60 }
 0x6a8   : > { %v11302_v13 = vmax.f32 %v11270_v58, 0.0  ;;  %v11271_v22 = vadd.f32 %v18238_v5, %v11232_v1 }
 0x6a9   : > { %v11354_v36 = vrot.slane %v11304_v18, %v18243_v46  ;;  %v11305_v41 = vmax.f32 %v11273_v45, 0.0 }
 0x6aa   : > { %v11340_v12 = vrot.slane %v11302_v13, %v18243_v46  ;;  %v11303_v59 = vmax.f32 %v11271_v22, 0.0  ;;  %v13849_v49 = vpop.f32.mrb[4].mxu1 }
 0x6ab   : > { %v11592_v28 = vrot.slane %v11354_v36, 4  ;;  %v11361_v55 = vrot.slane %v11305_v41, %v18243_v46  ;;  %v11237_v16 = vmul.f32 %v13849_v49, %v18233_v31  ;;  %v11081_v51 = vpop.f32.mrb[5].mxu1 }
 0x6ac   : > { %v11590_v38 = vrot.slane %v11340_v12, 4  ;;  %v11347_v44 = vrot.slane %v11303_v59, %v18243_v46  ;;  %v11235_v11 = vmul.f32 %v18233_v31, %v11081_v51  ;;  %v13850_v63 = vpop.f32.mrb[6].mxu1 }
 0x6ad   : > { %v11656_v6 = vmax.f32 %v11354_v36, %v11592_v28  ;;  %v11593_v0 = vrot.slane %v11361_v55, 4  ;;  %v11276_v56 = vadd.f32 %v18238_v5, %v11237_v16  ;;  %v11238_v9 = vmul.f32 %v13850_v63, %v18233_v31  ;;  %v11084_v21 = vpop.f32.mrb[7].mxu1 }
 0x6ae   : > { %v11654_v24 = vmax.f32 %v11340_v12, %v11590_v38  ;;  %v11591_v17 = vrot.slane %v11347_v44, 4  ;;  %v11274_v54 = vadd.f32 %v18238_v5, %v11235_v11  ;;  %v11236_v23 = vmul.f32 %v18233_v31, %v11084_v21 }
 0x6af   : > { %v11657_v2 = vmax.f32 %v11361_v55, %v11593_v0  ;;  %v11308_v25 = vmax.f32 %v11276_v56, 0.0  ;;  %v11277_v33 = vadd.f32 %v18238_v5, %v11238_v9 }
 0x6b0   : > { %v11686_v29 = vmax.f32 %v11654_v24, %v11656_v6  ;;  %v11655_v19 = vmax.f32 %v11347_v44, %v11591_v17  ;;  %v11306_v27 = vmax.f32 %v11274_v54, 0.0  ;;  %v11275_v32 = vadd.f32 %v18238_v5, %v11236_v23 }
 0x6b1   : > { %v11382_v57 = vrot.slane %v11308_v25, %v18243_v46  ;;  %v11309_v50 = vmax.f32 %v11277_v33, 0.0 }
 0x6b2   : > { %v11687_v48 = vmax.f32 %v11655_v19, %v11657_v2  ;;  %v11368_v7 = vrot.slane %v11306_v27, %v18243_v46  ;;  %v11307_v43 = vmax.f32 %v11275_v32, 0.0  ;;  %v13853_v42 = vpop.f32.mrb[8].mxu1 }
 0x6b3   : > { %v11596_v35 = vrot.slane %v11382_v57, 4  ;;  %v11389_v53 = vrot.slane %v11309_v50, %v18243_v46  ;;  %v11241_v52 = vmul.f32 %v13853_v42, %v18233_v31  ;;  %v11097_v62 = vpop.f32.mrb[9].mxu1 }
 0x6b4   : > { %v11718_v15 = vcombine.low %v11686_v29, %v11687_v48  ;;  %v11594_v8 = vrot.slane %v11368_v7, 4  ;;  %v11375_v37 = vrot.slane %v11307_v43, %v18243_v46  ;;  %v11239_v20 = vmul.f32 %v18233_v31, %v11097_v62  ;;  %v13854_v3 = vpop.f32.mrb[10].mxu1 }
 0x6b5   : > { %v11660_v26 = vmax.f32 %v11382_v57, %v11596_v35  ;;  %v11597_v14 = vrot.slane %v11389_v53, 4  ;;  %v11280_v61 = vadd.f32 %v18238_v5, %v11241_v52  ;;  %v11242_v34 = vmul.f32 %v13854_v3, %v18233_v31  ;;  %v11100_v40 = vpop.f32.mrb[11].mxu1 }
 0x6b6   : > { %v11658_v47 = vmax.f32 %v11368_v7, %v11594_v8  ;;  %v11595_v30 = vrot.slane %v11375_v37, 4  ;;  %v11278_v39 = vadd.f32 %v18238_v5, %v11239_v20  ;;  %v11240_v10 = vmul.f32 %v18233_v31, %v11100_v40 }
 0x6b7   : > { %v11661_v60 = vmax.f32 %v11389_v53, %v11597_v14  ;;  %v11312_v4 = vmax.f32 %v11280_v61, 0.0  ;;  %v11281_v58 = vadd.f32 %v18238_v5, %v11242_v34 }
 0x6b8   : > { %v11688_v1 = vmax.f32 %v11658_v47, %v11660_v26  ;;  %v11659_v18 = vmax.f32 %v11375_v37, %v11595_v30  ;;  %v11310_v45 = vmax.f32 %v11278_v39, 0.0  ;;  %v11279_v13 = vadd.f32 %v18238_v5, %v11240_v10 }
 0x6b9   : > { %v11410_v22 = vrot.slane %v11312_v4, %v18243_v46  ;;  %v11313_v36 = vmax.f32 %v11281_v58, 0.0 }
 0x6ba   : > { %v11689_v41 = vmax.f32 %v11659_v18, %v11661_v60  ;;  %v11396_v12 = vrot.slane %v11310_v45, %v18243_v46  ;;  %v11311_v59 = vmax.f32 %v11279_v13, 0.0  ;;  %v13857_v49 = vpop.f32.mrb[12].mxu1 }
 0x6bb   : > { %v11600_v28 = vrot.slane %v11410_v22, 4  ;;  %v11417_v55 = vrot.slane %v11313_v36, %v18243_v46  ;;  %v11245_v16 = vmul.f32 %v13857_v49, %v18233_v31  ;;  %v11113_v51 = vpop.f32.mrb[13].mxu1 }
 0x6bc   : > { %v11719_v38 = vcombine.low %v11688_v1, %v11689_v41  ;;  %v11598_v44 = vrot.slane %v11396_v12, 4  ;;  %v11403_v11 = vrot.slane %v11311_v59, %v18243_v46  ;;  %v11243_v63 = vmul.f32 %v18233_v31, %v11113_v51  ;;  %v13858_v6 = vpop.f32.mrb[14].mxu1 }
 0x6bd   : > { %v11664_v0 = vmax.f32 %v11410_v22, %v11600_v28  ;;  %v11601_v56 = vrot.slane %v11417_v55, 4  ;;  %v11284_v9 = vadd.f32 %v18238_v5, %v11245_v16  ;;  %v11246_v21 = vmul.f32 %v13858_v6, %v18233_v31  ;;  %v11116_v24 = vpop.f32.mrb[15].mxu1 }
 0x6be   : > { %v12559_v17 = vpack.c.bf16 %v11719_v38, %v11718_v15  ;;  %v11662_v54 = vmax.f32 %v11396_v12, %v11598_v44  ;;  %v11599_v23 = vrot.slane %v11403_v11, 4  ;;  %v11282_v2 = vadd.f32 %v18238_v5, %v11243_v63 }
 0x6bf   : > { %v11665_v25 = vmax.f32 %v11417_v55, %v11601_v56  ;;  %v11316_v33 = vmax.f32 %v11284_v9, 0.0  ;;  %v11285_v29 = vadd.f32 %v18238_v5, %v11246_v21  ;;  %v11244_v19 = vmul.f32 %v18233_v31, %v11116_v24 }
 0x6c0   : > { %12560 = vst [vmem:[%s18284_s14] sm:$0xff] %v12559_v17   ;;  %v11690_v27 = vmax.f32 %v11662_v54, %v11664_v0  ;;  %v11663_v32 = vmax.f32 %v11403_v11, %v11599_v23  ;;  %v11314_v57 = vmax.f32 %v11282_v2, 0.0 }
 0x6c1   : > { %v11438_v50 = vrot.slane %v11316_v33, %v18243_v46  ;;  %v11317_v48 = vmax.f32 %v11285_v29, 0.0  ;;  %v11283_v7 = vadd.f32 %v18238_v5, %v11244_v19 }
 0x6c2   : > { %v11691_v43 = vmax.f32 %v11663_v32, %v11665_v25  ;;  %v11424_v42 = vrot.slane %v11314_v57, %v18243_v46  ;;  %v13861_v35 = vpop.f32.mrb[16].mxu1 }
 0x6c3   : > { %v11604_v53 = vrot.slane %v11438_v50, 4  ;;  %v11445_v52 = vrot.slane %v11317_v48, %v18243_v46  ;;  %v11315_v62 = vmax.f32 %v11283_v7, 0.0  ;;  %v11249_v15 = vmul.f32 %v13861_v35, %v18233_v31  ;;  %v11129_v8 = vpop.f32.mrb[17].mxu1 }
 0x6c4   : > { %v11720_v37 = vcombine.low %v11690_v27, %v11691_v43  ;;  %v11602_v20 = vrot.slane %v11424_v42, 4  ;;  %v11247_v3 = vmul.f32 %v18233_v31, %v11129_v8  ;;  %v13862_v26 = vpop.f32.mrb[18].mxu1 }
 0x6c5   : > { %v11668_v14 = vmax.f32 %v11438_v50, %v11604_v53  ;;  %v11605_v61 = vrot.slane %v11445_v52, 4  ;;  %v11431_v34 = vrot.slane %v11315_v62, %v18243_v46  ;;  %v11288_v40 = vadd.f32 %v18238_v5, %v11249_v15  ;;  %v11132_v47 = vpop.f32.mrb[19].mxu1 }
 0x6c6   : > { %v11666_v30 = vmax.f32 %v11424_v42, %v11602_v20  ;;  %v11286_v39 = vadd.f32 %v18238_v5, %v11247_v3  ;;  %v11250_v10 = vmul.f32 %v13862_v26, %v18233_v31  ;;  %v11248_v60 = vmul.f32 %v18233_v31, %v11132_v47 }
 0x6c7   : > { %v11669_v4 = vmax.f32 %v11445_v52, %v11605_v61  ;;  %v11603_v58 = vrot.slane %v11431_v34, 4  ;;  %v11320_v1 = vmax.f32 %v11288_v40, 0.0 }
 0x6c8   : > { %v11692_v18 = vmax.f32 %v11666_v30, %v11668_v14  ;;  %v11318_v45 = vmax.f32 %v11286_v39, 0.0  ;;  %v11289_v13 = vadd.f32 %v18238_v5, %v11250_v10  ;;  %v11287_v22 = vadd.f32 %v18238_v5, %v11248_v60 }
 0x6c9   : > { %v11667_v36 = vmax.f32 %v11431_v34, %v11603_v58  ;;  %v11466_v41 = vrot.slane %v11320_v1, %v18243_v46 }
 0x6ca   : > { %v11452_v12 = vrot.slane %v11318_v45, %v18243_v46  ;;  %v11321_v59 = vmax.f32 %v11289_v13, 0.0  ;;  %v11319_v49 = vmax.f32 %v11287_v22, 0.0  ;;  %v13865_v28 = vpop.f32.mrb[20].mxu1 }
 0x6cb   : > { %v11693_v55 = vmax.f32 %v11667_v36, %v11669_v4  ;;  %v11608_v16 = vrot.slane %v11466_v41, 4  ;;  %v11253_v51 = vmul.f32 %v13865_v28, %v18233_v31  ;;  %v11145_v38 = vpop.f32.mrb[21].mxu1 }
 0x6cc   : > { %v11606_v44 = vrot.slane %v11452_v12, 4  ;;  %v11473_v11 = vrot.slane %v11321_v59, %v18243_v46  ;;  %v11459_v63 = vrot.slane %v11319_v49, %v18243_v46  ;;  %v11251_v6 = vmul.f32 %v18233_v31, %v11145_v38  ;;  %v13866_v0 = vpop.f32.mrb[22].mxu1 }
 0x6cd   : > { %v11721_v56 = vcombine.low %v11692_v18, %v11693_v55  ;;  %v11672_v9 = vmax.f32 %v11466_v41, %v11608_v16  ;;  %v11292_v21 = vadd.f32 %v18238_v5, %v11253_v51  ;;  %v11254_v24 = vmul.f32 %v13866_v0, %v18233_v31  ;;  %v11148_v17 = vpop.f32.mrb[23].mxu1 }
 0x6ce   : > { %v11670_v54 = vmax.f32 %v11452_v12, %v11606_v44  ;;  %v11609_v23 = vrot.slane %v11473_v11, 4  ;;  %v11607_v2 = vrot.slane %v11459_v63, 4  ;;  %v11290_v25 = vadd.f32 %v18238_v5, %v11251_v6 }
 0x6cf   : > { %v12564_v33 = vpack.c.bf16 %v11721_v56, %v11720_v37  ;;  %v11324_v29 = vmax.f32 %v11292_v21, 0.0  ;;  %v11293_v19 = vadd.f32 %v18238_v5, %v11254_v24  ;;  %v11252_v27 = vmul.f32 %v18233_v31, %v11148_v17 }
 0x6d0   : > { %v11694_v32 = vmax.f32 %v11670_v54, %v11672_v9  ;;  %v11673_v57 = vmax.f32 %v11473_v11, %v11609_v23  ;;  %v11671_v50 = vmax.f32 %v11459_v63, %v11607_v2  ;;  %v11322_v48 = vmax.f32 %v11290_v25, 0.0 }
 0x6d1   : > { %12576 = vst [vmem:[%s18284_s14 + $0x8] sm:$0xff] %v12564_v33   ;;  %v11494_v7 = vrot.slane %v11324_v29, %v18243_v46  ;;  %v11325_v43 = vmax.f32 %v11293_v19, 0.0  ;;  %v11291_v42 = vadd.f32 %v18238_v5, %v11252_v27 }
 0x6d2   : > { %v11695_v35 = vmax.f32 %v11671_v50, %v11673_v57  ;;  %v11480_v53 = vrot.slane %v11322_v48, %v18243_v46  ;;  %v13869_v52 = vpop.f32.mrb[24].mxu1 }
 0x6d3   : > { %v11612_v62 = vrot.slane %v11494_v7, 4  ;;  %v11501_v15 = vrot.slane %v11325_v43, %v18243_v46  ;;  %v11323_v8 = vmax.f32 %v11291_v42, 0.0  ;;  %v11257_v37 = vmul.f32 %v13869_v52, %v18233_v31  ;;  %v11161_v20 = vpop.f32.mrb[25].mxu1 }
 0x6d4   : > { %v11722_v3 = vcombine.low %v11694_v32, %v11695_v35  ;;  %v11610_v26 = vrot.slane %v11480_v53, 4  ;;  %v11255_v14 = vmul.f32 %v18233_v31, %v11161_v20  ;;  %v13870_v61 = vpop.f32.mrb[26].mxu1 }
 0x6d5   : > { %v11676_v34 = vmax.f32 %v11494_v7, %v11612_v62  ;;  %v11613_v40 = vrot.slane %v11501_v15, 4  ;;  %v11487_v47 = vrot.slane %v11323_v8, %v18243_v46  ;;  %v11296_v30 = vadd.f32 %v18238_v5, %v11257_v37  ;;  %v11164_v39 = vpop.f32.mrb[27].mxu1 }
 0x6d6   : > { %v11674_v10 = vmax.f32 %v11480_v53, %v11610_v26  ;;  %v11294_v60 = vadd.f32 %v18238_v5, %v11255_v14  ;;  %v11258_v4 = vmul.f32 %v13870_v61, %v18233_v31  ;;  %v11256_v58 = vmul.f32 %v18233_v31, %v11164_v39 }
 0x6d7   : > { %v11677_v1 = vmax.f32 %v11501_v15, %v11613_v40  ;;  %v11611_v18 = vrot.slane %v11487_v47, 4  ;;  %v11328_v45 = vmax.f32 %v11296_v30, 0.0 }
 0x6d8   : > { %v11696_v13 = vmax.f32 %v11674_v10, %v11676_v34  ;;  %v11326_v22 = vmax.f32 %v11294_v60, 0.0  ;;  %v11297_v36 = vadd.f32 %v18238_v5, %v11258_v4  ;;  %v11295_v41 = vadd.f32 %v18238_v5, %v11256_v58 }
 0x6d9   : > { %v11675_v12 = vmax.f32 %v11487_v47, %v11611_v18  ;;  %v11522_v59 = vrot.slane %v11328_v45, %v18243_v46 }
 0x6da   : > { %v11508_v49 = vrot.slane %v11326_v22, %v18243_v46  ;;  %v11329_v28 = vmax.f32 %v11297_v36, 0.0  ;;  %v11327_v55 = vmax.f32 %v11295_v41, 0.0  ;;  %v13873_v16 = vpop.f32.mrb[28].mxu1 }
 0x6db   : > { %v11697_v51 = vmax.f32 %v11675_v12, %v11677_v1  ;;  %v11616_v38 = vrot.slane %v11522_v59, 4  ;;  %v11261_v44 = vmul.f32 %v13873_v16, %v18233_v31  ;;  %v11177_v11 = vpop.f32.mrb[29].mxu1 }
 0x6dc   : > { %v11614_v63 = vrot.slane %v11508_v49, 4  ;;  %v11529_v6 = vrot.slane %v11329_v28, %v18243_v46  ;;  %v11515_v0 = vrot.slane %v11327_v55, %v18243_v46  ;;  %v11259_v56 = vmul.f32 %v18233_v31, %v11177_v11  ;;  %v13874_v9 = vpop.f32.mrb[30].mxu1 }
 0x6dd   : > { %v11723_v21 = vcombine.low %v11696_v13, %v11697_v51  ;;  %v11680_v24 = vmax.f32 %v11522_v59, %v11616_v38  ;;  %v11300_v17 = vadd.f32 %v18238_v5, %v11261_v44  ;;  %v11262_v54 = vmul.f32 %v13874_v9, %v18233_v31  ;;  %v11180_v23 = vpop.f32.mrb[31].mxu1 }
 0x6de   : > { %v11678_v2 = vmax.f32 %v11508_v49, %v11614_v63  ;;  %v11617_v25 = vrot.slane %v11529_v6, 4  ;;  %v11615_v33 = vrot.slane %v11515_v0, 4  ;;  %v11298_v29 = vadd.f32 %v18238_v5, %v11259_v56 }
 0x6df   : > { %v12569_v19 = vpack.c.bf16 %v11723_v21, %v11722_v3  ;;  %v11332_v27 = vmax.f32 %v11300_v17, 0.0  ;;  %v11301_v32 = vadd.f32 %v18238_v5, %v11262_v54  ;;  %v11260_v57 = vmul.f32 %v18233_v31, %v11180_v23 }
 0x6e0   : > { %v11698_v50 = vmax.f32 %v11678_v2, %v11680_v24  ;;  %v11681_v48 = vmax.f32 %v11529_v6, %v11617_v25  ;;  %v11679_v7 = vmax.f32 %v11515_v0, %v11615_v33  ;;  %v11330_v43 = vmax.f32 %v11298_v29, 0.0 }
 0x6e1   : > { %12577 = vst [vmem:[%s18284_s14 + $0x10] sm:$0xff] %v12569_v19   ;;  %v11550_v42 = vrot.slane %v11332_v27, %v18243_v46  ;;  %v11333_v35 = vmax.f32 %v11301_v32, 0.0  ;;  %v11299_v53 = vadd.f32 %v18238_v5, %v11260_v57 }
 0x6e2   : > { %v11699_v52 = vmax.f32 %v11679_v7, %v11681_v48  ;;  %v11536_v62 = vrot.slane %v11330_v43, %v18243_v46 }
 0x6e3   : > { %v11620_v15 = vrot.slane %v11550_v42, 4  ;;  %v11557_v8 = vrot.slane %v11333_v35, %v18243_v46  ;;  %v11331_v37 = vmax.f32 %v11299_v53, 0.0 }
 0x6e4   : > { %v11724_v20 = vcombine.low %v11698_v50, %v11699_v52  ;;  %v11618_v31 = vrot.slane %v11536_v62, 4 }
 0x6e5   : > { %v11684_v3 = vmax.f32 %v11550_v42, %v11620_v15  ;;  %v11621_v26 = vrot.slane %v11557_v8, 4  ;;  %v11543_v14 = vrot.slane %v11331_v37, %v18243_v46 }
 0x6e6   : > { %v11682_v61 = vmax.f32 %v11536_v62, %v11618_v31 }
 0x6e7   : > { %v11685_v34 = vmax.f32 %v11557_v8, %v11621_v26  ;;  %v11619_v40 = vrot.slane %v11543_v14, 4 }
 0x6e8   : > { %v11700_v47 = vmax.f32 %v11682_v61, %v11684_v3 }
 0x6e9   : > { %v11683_v30 = vmax.f32 %v11543_v14, %v11619_v40 }
 0x6eb   : > { %v11701_v5 = vmax.f32 %v11683_v30, %v11685_v34 }
 0x6ed   : > { %v11725_v39 = vcombine.low %v11700_v47, %v11701_v5 }
 0x6ef   : > { %v12574_v10 = vpack.c.bf16 %v11725_v39, %v11724_v20 }
 0x6f1   : > { %12578 = vst [vmem:[%s18284_s14 + $0x18] sm:$0xff] %v12574_v10  }
 0x6f2 PF: > { %s18_s24 = sadd.s32 1, %s14766_s24  }
 0x6f3   : > { %p15_p3 = scmp.ge.s32.totalorder %s18_s24, 4  }
 0x6f5   :  { %17 = sbr.rel (!%p15_p3) target bundleno = 1 (0x1), region = 105 }
 0x6fc   :  { %11771 = vsyncpa [#allocation5], 1 }
 0x6fd   :  { %11773 = vsyncpa [#allocation5 + $0x1], 1 }

</bundles_post_ra>
